<compile_context>
chip_gen: v5e
topology: v5e:2x2
jax: 0.10.0
libtpu: 0.0.40
codegen_flags: <defaults>
</compile_context>

<pallas_src>
import functools

import jax
import jax.numpy as jnp
from jax import lax
from jax.experimental import pallas as pl
from jax.experimental.pallas import tpu as pltpu

_BN_EPS = 1e-5
_P = 1                    # 'same' halo for 3x3x3 convolutions


@functools.lru_cache()
def _vmem_limit_bytes():
    cap = 128 * 1024 * 1024
    try:
        cap = int(getattr(pltpu.get_tpu_info(), "vmem_capacity_bytes", cap))
    except Exception:
        pass
    # Leave headroom below the physical capacity (v7x: 64 MiB -> 48 MiB,
    # v5e/v6e: 128 MiB -> 100 MiB).
    return int(min(cap * 3 // 4, 100 * 1024 * 1024))


def _compiler_params():
    return pltpu.CompilerParams(
        dimension_semantics=("parallel",),
        vmem_limit_bytes=_vmem_limit_bytes(),
    )


def _choose_h_tile(H, W, cmax):
    """M-tile the per-depth-row f32 accumulator to ~512 KiB."""
    budget_rows = (1 << 19) // max(1, 4 * cmax)
    return max(1, min(H, max(1, budget_rows // W)))


# ---------------------------------------------------------------------------
# Fused DoubleConv kernel (rolling 3-slice depth pipeline)
# ---------------------------------------------------------------------------
def _double_conv_kernel(*refs, n_in, chans, up, dims, cm, c2, fuse_head, h_tile):
    """concat(+fused 2x up) -> BN1 -> conv1+b1 -> ReLU -> BN2 -> conv2+b2 -> ReLU
    [-> 1x1x1 head conv + argmax], streamed one output depth row at a time."""
    D, H, W = dims
    C1 = sum(chans)

    x_refs = refs[:n_in]
    i = n_in
    (s1_ref, t1_ref, w1_ref, b1_ref,
     s2_ref, t2_ref, w2_ref, b2_ref) = refs[i:i + 8]
    i += 8
    if fuse_head:
        hw_ref, hb_ref, logits_ref, cls_ref = refs[i:i + 4]
        i += 4
        o_ref = None
    else:
        o_ref = refs[i]
        i += 1
    ring1_ref, ring2_ref = refs[i:i + 2]

    s1 = s1_ref[...]
    t1 = t1_ref[...]
    b1 = b1_ref[...]
    s2 = s2_ref[...]
    t2 = t2_ref[...]
    b2 = b2_ref[...]
    if fuse_head:
        hw = hw_ref[...]
        hb = hb_ref[...]
        ncls = hw.shape[-1]

    def kw_pack(row):
        """(1, hs, W, c) -> (1, hs, W, 3c) with [x(w-1) | x(w) | x(w+1)] per lane group."""
        c = row.shape[-1]
        z = jnp.zeros((1, row.shape[1], 1, c), row.dtype)
        left = jnp.concatenate([z, row[:, :, :W - 1, :]], axis=2)
        right = jnp.concatenate([row[:, :, 1:, :], z], axis=2)
        return jnp.concatenate([left, row, right], axis=-1)

    def fill1(r):
        """BN1(concat(inputs)) for depth row r -> kw-packed slab -> ring1 slot r%3."""
        pieces = []
        for xr, c, u in zip(x_refs, chans, up):
            if u:
                # fused nearest-2x upsample: D via index r//2, H via replication
                # of non-layout dims (W was pre-replicated cheaply at XLA level).
                h2 = H // 2
                rs = xr[:, pl.ds(r // 2, 1)].reshape(1, h2, W, c)
                rs = jnp.broadcast_to(rs[:, :, None, :, :], (1, h2, 2, W, c))
                rs = rs.reshape(1, H, W, c)
            else:
                rs = xr[:, pl.ds(r, 1)].reshape(1, H, W, c)
            pieces.append(rs)
        row = pieces[0] if n_in == 1 else jnp.concatenate(pieces, axis=-1)
        row = row.astype(jnp.float32) * s1 + t1          # BN1 before zero padding
        row = row.astype(ring1_ref.dtype)
        ring1_ref[pl.ds(r % 3, 1), _P:_P + H, :, :] = kw_pack(row)

    def conv_tiles(ring_ref, w_ref, r, cpack, cout):
        """9-tap conv for output depth row r, yielding M-tiled f32 accumulators."""
        slots = [(r + kd + 2) % 3 for kd in range(3)]    # rows r-1, r, r+1
        for h0 in range(0, H, h_tile):
            hs = min(h_tile, H - h0)
            acc = jnp.zeros((hs * W, cout), jnp.float32)
            for kd in range(3):
                for kh in range(3):
                    lhs = ring_ref[pl.ds(slots[kd], 1), h0 + kh:h0 + kh + hs, :, :]
                    lhs = lhs.reshape(hs * W, cpack)
                    acc = acc + jnp.dot(lhs, w_ref[kd, kh],
                                        preferred_element_type=jnp.float32)
            yield h0, hs, acc

    def do_conv1(r):
        for h0, hs, acc in conv_tiles(ring1_ref, w1_ref, r, 3 * C1, cm):
            y = jnp.maximum(acc + b1, 0.0)
            y = y * s2 + t2                              # BN2 before ring2's zero halo
            y = y.reshape(1, hs, W, cm).astype(ring2_ref.dtype)
            ring2_ref[pl.ds(r % 3, 1), _P + h0:_P + h0 + hs, :, :] = kw_pack(y)

    def do_conv2(r):
        for h0, hs, acc in conv_tiles(ring2_ref, w2_ref, r, 3 * cm, c2):
            y = jnp.maximum(acc + b2, 0.0)
            if fuse_head:
                lg = jnp.dot(y.astype(hw.dtype), hw,
                             preferred_element_type=jnp.float32) + hb
                logits_ref[:, pl.ds(r, 1), h0 * W:(h0 + hs) * W, :] = (
                    lg.reshape(1, 1, hs * W, ncls))
                mx = jnp.max(lg, axis=-1, keepdims=True)
                ids = lax.broadcasted_iota(jnp.int32, lg.shape, 1)
                cls = jnp.min(jnp.where(lg >= mx, ids, ncls), axis=-1)
                cls_ref[:, pl.ds(r, 1), h0 * W:(h0 + hs) * W] = (
                    cls.reshape(1, 1, hs * W))
            else:
                o_ref[:, pl.ds(r, 1), h0:h0 + hs, :, :] = (
                    y.reshape(1, 1, hs, W, c2).astype(o_ref.dtype))

    # Zero the two 3-slice rings once (provides H halos and the d<0 zero
    # slices); interiors are fully rewritten as the pipeline advances.
    ring1_ref[...] = jnp.zeros(ring1_ref.shape, ring1_ref.dtype)
    ring2_ref[...] = jnp.zeros(ring2_ref.shape, ring2_ref.dtype)
    fill1(0)

    def step(s, carry):
        # Stage A: fill input slice s+1, run conv1 on slice s.
        @pl.when(s < D)
        def _():
            @pl.when(s + 1 < D)
            def _():
                fill1(s + 1)

            @pl.when(s + 1 == D)
            def _():
                ring1_ref[pl.ds((s + 1) % 3, 1), :, :, :] = jnp.zeros(
                    (1,) + ring1_ref.shape[1:], ring1_ref.dtype)

            do_conv1(s)

        @pl.when(s == D)
        def _():
            ring2_ref[pl.ds(s % 3, 1), :, :, :] = jnp.zeros(
                (1,) + ring2_ref.shape[1:], ring2_ref.dtype)

        # Stage B: conv2 on slice s-1 (one step behind conv1).
        @pl.when(s >= 1)
        def _():
            do_conv2(s - 1)

        return carry

    lax.fori_loop(0, D + 1, step, 0)


def _bn_affine(p):
    s = p["gamma"] / jnp.sqrt(p["var"] + _BN_EPS)
    t = p["beta"] - p["mean"] * s
    return (s.reshape(1, -1).astype(jnp.float32),
            t.reshape(1, -1).astype(jnp.float32))


def fused_double_conv(inputs, up, p1, p2, head=None):
    """inputs: list of NDHWC bf16 arrays.  Inputs flagged up[i]=True are at half
    D/H resolution (their W must already be 2x nearest-upsampled by the caller);
    D/H replication happens inside the kernel.  If `head` is given the 1x1x1
    head conv + argmax are fused and (logits, class) are returned instead of the
    conv features."""
    n_in = len(inputs)
    chans = tuple(int(a.shape[-1]) for a in inputs)
    C1 = sum(chans)

    def tgt_dims(a, u):
        n, d, h, w = (int(v) for v in a.shape[:4])
        return (n, 2 * d, 2 * h, w) if u else (n, d, h, w)

    N, D, H, W = tgt_dims(inputs[0], up[0])
    for a, u in zip(inputs, up):
        assert tgt_dims(a, u) == (N, D, H, W), "inconsistent input volumes"

    K = int(p1["w"].shape[0])
    assert K == 3, "kernel assumes 3x3x3 convolutions"
    Cm = int(p1["w"].shape[-1])
    C2 = int(p2["w"].shape[-1])
    assert int(p1["w"].shape[3]) == C1 and int(p2["w"].shape[3]) == Cm

    s1, t1 = _bn_affine(p1)
    s2, t2 = _bn_affine(p2)
    w1 = p1["w"].reshape(K, K, K * C1, Cm).astype(jnp.bfloat16)   # kw packed into K
    w2 = p2["w"].reshape(K, K, K * Cm, C2).astype(jnp.bfloat16)
    b1 = p1["b"].reshape(1, Cm).astype(jnp.float32)
    b2 = p2["b"].reshape(1, C2).astype(jnp.float32)

    fuse_head = head is not None
    h_tile = _choose_h_tile(H, W, max(Cm, C2))

    args = list(inputs) + [s1, t1, w1, b1, s2, t2, w2, b2]

    def _full(x):
        return pl.BlockSpec(x.shape, lambda n: (0,) * x.ndim)

    in_specs = [pl.BlockSpec((1,) + a.shape[1:], lambda n: (n, 0, 0, 0, 0))
                for a in inputs]
    in_specs += [_full(s1), _full(t1), _full(w1), _full(b1),
                 _full(s2), _full(t2), _full(w2), _full(b2)]

    if fuse_head:
        hw, hb = head
        ncls = int(hw.shape[-1])
        hw = hw.astype(jnp.bfloat16)
        hb = hb.reshape(1, ncls).astype(jnp.float32)
        args += [hw, hb]
        in_specs += [_full(hw), _full(hb)]
        out_shape = (jax.ShapeDtypeStruct((N, D, H * W, ncls), jnp.float32),
                     jax.ShapeDtypeStruct((N, D, H * W), jnp.int32))
        out_specs = (pl.BlockSpec((1, D, H * W, ncls), lambda n: (n, 0, 0, 0)),
                     pl.BlockSpec((1, D, H * W), lambda n: (n, 0, 0)))
    else:
        out_shape = jax.ShapeDtypeStruct((N, D, H, W, C2), jnp.bfloat16)
        out_specs = pl.BlockSpec((1, D, H, W, C2), lambda n: (n, 0, 0, 0, 0))

    kern = functools.partial(
        _double_conv_kernel, n_in=n_in, chans=chans,
        up=tuple(bool(u) for u in up), dims=(D, H, W), cm=Cm, c2=C2,
        fuse_head=fuse_head, h_tile=h_tile)

    return pl.pallas_call(
        kern,
        out_shape=out_shape,
        grid=(N,),
        in_specs=in_specs,
        out_specs=out_specs,
        scratch_shapes=[
            # rolling rings of 3 kw-packed depth slabs (BN'd, zero-haloed)
            pltpu.VMEM((3, H + 2 * _P, W, 3 * C1), jnp.bfloat16),
            pltpu.VMEM((3, H + 2 * _P, W, 3 * Cm), jnp.bfloat16),
        ],
        compiler_params=_compiler_params(),
    )(*args)


# ---------------------------------------------------------------------------
# Cheap memory-bound glue kept at the XLA level
# ---------------------------------------------------------------------------
def maxpool3d_2x(x):  # NDHWC
    n, d, h, w, c = x.shape
    return x.reshape(n, d // 2, 2, h // 2, 2, w // 2, 2, c).max(axis=(2, 4, 6))


def upsample_w2(x):   # NDHWC: nearest 2x along W only (D/H replication is fused in-kernel)
    return jnp.repeat(x, 2, axis=3)


def upsample2_nearest(x):  # full nearest 2x (reference check only)
    n, d, h, w, c = x.shape
    y = jnp.broadcast_to(x[:, :, None, :, None, :, None, :],
                         (n, d, 2, h, 2, w, 2, c))
    return y.reshape(n, 2 * d, 2 * h, 2 * w, c)


# ---------------------------------------------------------------------------
# Parameters
# ---------------------------------------------------------------------------
def conv_block_params(key, cin, cout, k=3):
    kw_, kb, kg, kbt, km, kv = jax.random.split(key, 6)
    fan_in = cin * k * k * k
    return dict(
        w=jax.random.normal(kw_, (k, k, k, cin, cout), jnp.float32) / jnp.sqrt(fan_in),
        b=0.01 * jax.random.normal(kb, (cout,), jnp.float32),
        gamma=1.0 + 0.1 * jax.random.normal(kg, (cin,), jnp.float32),
        beta=0.1 * jax.random.normal(kbt, (cin,), jnp.float32),
        mean=0.1 * jax.random.normal(km, (cin,), jnp.float32),
        var=1.0 + 0.1 * jax.random.uniform(kv, (cin,), jnp.float32),
    )


def build_encoder_params(key, in_ch, fmaps):
    params, ch = [], in_ch
    for f in fmaps:
        key, k1, k2 = jax.random.split(key, 3)
        params.append((conv_block_params(k1, ch, f), conv_block_params(k2, f, f)))
        ch = f
    return params


def build_decoder_params(key, fmaps):
    L = len(fmaps)
    params, prev = [], 3 * fmaps[-1]
    for i in range(L - 1):
        tgt = fmaps[L - 2 - i]
        skip = 0 if i == 0 else 3 * fmaps[L - 2 - i]
        key, k1, k2 = jax.random.split(key, 3)
        params.append((conv_block_params(k1, skip + prev, tgt),
                       conv_block_params(k2, tgt, tgt)))
        prev = tgt
    return params


def build_params(key, in_ch, n_classes, fmaps):
    k1, k2, k3, k4, k5, k6 = jax.random.split(key, 6)
    return dict(
        x_enc=build_encoder_params(k1, in_ch, fmaps),
        y_enc=build_encoder_params(k2, in_ch, fmaps),
        z_enc=build_encoder_params(k3, in_ch, fmaps),
        dec=build_decoder_params(k4, fmaps),
        head_w=jax.random.normal(k5, (fmaps[0], n_classes), jnp.float32)
        / jnp.sqrt(fmaps[0]),
        head_b=0.01 * jax.random.normal(k6, (n_classes,), jnp.float32),
    )


# ---------------------------------------------------------------------------
# Forward pass
# ---------------------------------------------------------------------------
def run_encoder(x, enc_params):
    feats = []
    for lvl, (p1, p2) in enumerate(enc_params):
        if lvl > 0:
            x = maxpool3d_2x(x)   # TODO(synk): fuse into the producer's conv2 epilogue
        x = fused_double_conv([x], [False], p1, p2)
        feats.insert(0, x)        # deepest first (mirrors PyTorch)
    return feats


def run_decoders(xf, yf, zf, dec_params, head_w, head_b):
    out, logits, cls = None, None, None
    n_dec = len(dec_params)
    for i, (p1, p2) in enumerate(dec_params):
        if i == 0:                # encoder_features=None in the reference forward
            ins = [upsample_w2(xf[0]), upsample_w2(yf[0]), upsample_w2(zf[0])]
            up = [True, True, True]
        else:
            ins = [xf[i + 1], yf[i + 1], zf[i + 1], upsample_w2(out)]
            up = [False, False, False, True]
        if i == n_dec - 1:        # fuse 1x1x1 head + argmax into the last decoder
            logits, cls = fused_double_conv(ins, up, p1, p2, head=(head_w, head_b))
        else:
            out = fused_double_conv(ins, up, p1, p2)
    return logits, cls


def unet3d_me_forward(params, x, y, z):
    """x, y, z: (N, D, H, W, Cin) bf16.  Returns (logits NCDHW f32, argmax NDHW i32)."""
    xf = run_encoder(x, params["x_enc"])
    yf = run_encoder(y, params["y_enc"])
    zf = run_encoder(z, params["z_enc"])
    logits, cls = run_decoders(xf, yf, zf, params["dec"],
                               params["head_w"], params["head_b"])
    N, Dd, _, ncls = logits.shape
    H, W = x.shape[2], x.shape[3]
    logits = logits.reshape(N, Dd, H, W, ncls)
    cls = cls.reshape(N, Dd, H, W)
    logits_ncdhw = jnp.transpose(logits, (0, 4, 1, 2, 3))     # back to NCDHW
    # TODO(synk): inference-mode result_tensor scatter-accumulation (stateful
    # buffer indexed by _offsets) is not implemented; module default inference=False.
    return logits_ncdhw, cls


# ---------------------------------------------------------------------------
if __name__ == "__main__":
    key = jax.random.PRNGKey(0)
    N, Cin, D, H, W = 2, 1, 16, 16, 16
    n_classes = 3
    fmaps = (8, 16, 32, 64)      # scaled-down stand-in for (64, 128, 256, 512)

    kp, kx, ky, kz, kc = jax.random.split(key, 5)
    params = build_params(kp, Cin, n_classes, fmaps)

    to_ndhwc = lambda t: jnp.transpose(t, (0, 2, 3, 4, 1))
    x_ncdhw = jax.random.normal(kx, (N, Cin, D, H, W), jnp.float32)
    y_ncdhw = jax.random.normal(ky, (N, Cin, D, H, W), jnp.float32)
    z_ncdhw = jax.random.normal(kz, (N, Cin, D, H, W), jnp.float32)

    def ref_single(v, p):
        s = p["gamma"] / jnp.sqrt(p["var"] + _BN_EPS)
        t = p["beta"] - p["mean"] * s
        v = v * s + t                                   # BN (eval) before padding
        v = lax.conv_general_dilated(
            v, p["w"], (1, 1, 1), "SAME",
            dimension_numbers=("NDHWC", "DHWIO", "NDHWC")) + p["b"]
        return jnp.maximum(v, 0.0)

    def rel_err(a, b):
        return float(jnp.linalg.norm(a - b) / (jnp.linalg.norm(b) + 1e-6))

    # ---- check 1: encoder-style fused DoubleConv vs XLA reference ----
    xt = to_ndhwc(x_ncdhw)
    p1, p2 = params["x_enc"][0]
    got = fused_double_conv([xt.astype(jnp.bfloat16)], [False], p1, p2)
    ref = ref_single(ref_single(xt, p1), p2)
    r1 = rel_err(got.astype(jnp.float32), ref)
    assert r1 < 5e-2, f"encoder double-conv mismatch: rel L2 {r1:.3e}"

    # ---- check 2: decoder-style (skip concat + fused 2x upsample) vs XLA ref ----
    kk1, kk2, ks, kprev = jax.random.split(kc, 4)
    skip = jax.random.normal(ks, (N, D, H, W, fmaps[0]), jnp.float32)
    prev = jax.random.normal(kprev, (N, D // 2, H // 2, W // 2, 2 * fmaps[0]),
                             jnp.float32)
    q1 = conv_block_params(kk1, fmaps[0] + 2 * fmaps[0], 12)
    q2 = conv_block_params(kk2, 12, 12)
    got = fused_double_conv(
        [skip.astype(jnp.bfloat16), upsample_w2(prev.astype(jnp.bfloat16))],
        [False, True], q1, q2)
    ref_in = jnp.concatenate([skip, upsample2_nearest(prev)], axis=-1)
    ref = ref_single(ref_single(ref_in, q1), q2)
    r2 = rel_err(got.astype(jnp.float32), ref)
    assert r2 < 5e-2, f"decoder double-conv mismatch: rel L2 {r2:.3e}"

    # ---- full forward ----
    fwd = jax.jit(unet3d_me_forward)
    logits, cls = fwd(params,
                      to_ndhwc(x_ncdhw).astype(jnp.bfloat16),
                      to_ndhwc(y_ncdhw).astype(jnp.bfloat16),
                      to_ndhwc(z_ncdhw).astype(jnp.bfloat16))
    jax.block_until_ready((logits, cls))
    assert logits.shape == (N, n_classes, D, H, W)
    assert cls.shape == (N, D, H, W)
    assert bool(jnp.all(jnp.isfinite(logits)))
    print("KERNEL_OK")
</pallas_src>

<mosaic_0001>
module attributes {stable_mosaic.version = 11 : i64} {
  func.func @_double_conv_kernel(%arg0: i32, %arg1: memref<1x16x16x16x1xbf16, #tpu.memory_space<vmem>>, %arg2: memref<1x1xf32, #tpu.memory_space<vmem>>, %arg3: memref<1x1xf32, #tpu.memory_space<vmem>>, %arg4: memref<3x3x3x8xbf16, #tpu.memory_space<vmem>>, %arg5: memref<1x8xf32, #tpu.memory_space<vmem>>, %arg6: memref<1x8xf32, #tpu.memory_space<vmem>>, %arg7: memref<1x8xf32, #tpu.memory_space<vmem>>, %arg8: memref<3x3x24x8xbf16, #tpu.memory_space<vmem>>, %arg9: memref<1x8xf32, #tpu.memory_space<vmem>>, %arg10: memref<1x16x16x16x8xbf16, #tpu.memory_space<vmem>>, %arg11: memref<3x18x16x3xbf16, #tpu.memory_space<vmem>>, %arg12: memref<3x18x16x24xbf16, #tpu.memory_space<vmem>>) attributes {dimension_semantics = [#tpu.dimension_semantics<parallel>], iteration_bounds = array<i64: 2>, scalar_prefetch = 0 : i64, scratch_operands = 2 : i64, tpu.core_type = #tpu.core_type<tc>, window_params = [{transform_indices = @transform_0, window_bounds = array<i64: 1, 16, 16, 16, 1>}, {pipeline_mode = #tpu.pipeline_mode<synchronous>, transform_indices = @transform_1, window_bounds = array<i64: 1, 1>}, {pipeline_mode = #tpu.pipeline_mode<synchronous>, transform_indices = @transform_2, window_bounds = array<i64: 1, 1>}, {pipeline_mode = #tpu.pipeline_mode<synchronous>, transform_indices = @transform_3, window_bounds = array<i64: 3, 3, 3, 8>}, {pipeline_mode = #tpu.pipeline_mode<synchronous>, transform_indices = @transform_4, window_bounds = array<i64: 1, 8>}, {pipeline_mode = #tpu.pipeline_mode<synchronous>, transform_indices = @transform_5, window_bounds = array<i64: 1, 8>}, {pipeline_mode = #tpu.pipeline_mode<synchronous>, transform_indices = @transform_6, window_bounds = array<i64: 1, 8>}, {pipeline_mode = #tpu.pipeline_mode<synchronous>, transform_indices = @transform_7, window_bounds = array<i64: 3, 3, 24, 8>}, {pipeline_mode = #tpu.pipeline_mode<synchronous>, transform_indices = @transform_8, window_bounds = array<i64: 1, 8>}, {transform_indices = @transform_9, window_bounds = array<i64: 1, 16, 16, 16, 8>}]} {
    %c0 = arith.constant 0 : index
    %c0_0 = arith.constant 0 : index
    %0 = vector.load %arg2[%c0, %c0_0] : memref<1x1xf32, #tpu.memory_space<vmem>>, vector<1x1xf32>
    %c0_1 = arith.constant 0 : index
    %c0_2 = arith.constant 0 : index
    %1 = vector.load %arg3[%c0_1, %c0_2] : memref<1x1xf32, #tpu.memory_space<vmem>>, vector<1x1xf32>
    %c0_3 = arith.constant 0 : index
    %c0_4 = arith.constant 0 : index
    %2 = vector.load %arg5[%c0_3, %c0_4] : memref<1x8xf32, #tpu.memory_space<vmem>>, vector<1x8xf32>
    %c0_5 = arith.constant 0 : index
    %c0_6 = arith.constant 0 : index
    %3 = vector.load %arg6[%c0_5, %c0_6] : memref<1x8xf32, #tpu.memory_space<vmem>>, vector<1x8xf32>
    %c0_7 = arith.constant 0 : index
    %c0_8 = arith.constant 0 : index
    %4 = vector.load %arg7[%c0_7, %c0_8] : memref<1x8xf32, #tpu.memory_space<vmem>>, vector<1x8xf32>
    %c0_9 = arith.constant 0 : index
    %c0_10 = arith.constant 0 : index
    %5 = vector.load %arg9[%c0_9, %c0_10] : memref<1x8xf32, #tpu.memory_space<vmem>>, vector<1x8xf32>
    %cst = arith.constant 0.000000e+00 : bf16
    %6 = vector.broadcast %cst : bf16 to vector<3x18x16x3xbf16>
    %c0_11 = arith.constant 0 : index
    %c0_12 = arith.constant 0 : index
    %c0_13 = arith.constant 0 : index
    %c0_14 = arith.constant 0 : index
    %7 = vector.load %arg11[%c0_11, %c0_12, %c0_13, %c0_14] : memref<3x18x16x3xbf16, #tpu.memory_space<vmem>>, vector<3x18x16x3xbf16>
    tpu.vector_store %arg11[%c0_11, %c0_12, %c0_13, %c0_14], %6 {strides = array<i32>} : memref<3x18x16x3xbf16, #tpu.memory_space<vmem>>, vector<3x18x16x3xbf16>,
    %cst_15 = arith.constant 0.000000e+00 : bf16
    %8 = vector.broadcast %cst_15 : bf16 to vector<3x18x16x24xbf16>
    %c0_16 = arith.constant 0 : index
    %c0_17 = arith.constant 0 : index
    %c0_18 = arith.constant 0 : index
    %c0_19 = arith.constant 0 : index
    %9 = vector.load %arg12[%c0_16, %c0_17, %c0_18, %c0_19] : memref<3x18x16x24xbf16, #tpu.memory_space<vmem>>, vector<3x18x16x24xbf16>
    tpu.vector_store %arg12[%c0_16, %c0_17, %c0_18, %c0_19], %8 {strides = array<i32>} : memref<3x18x16x24xbf16, #tpu.memory_space<vmem>>, vector<3x18x16x24xbf16>,
    %c0_20 = arith.constant 0 : index
    %c0_21 = arith.constant 0 : index
    %c0_22 = arith.constant 0 : index
    %c0_23 = arith.constant 0 : index
    %c0_24 = arith.constant 0 : index
    %10 = vector.load %arg1[%c0_20, %c0_21, %c0_22, %c0_23, %c0_24] : memref<1x16x16x16x1xbf16, #tpu.memory_space<vmem>>, vector<1x1x16x16x1xbf16>
    %11 = vector.shape_cast %10 : vector<1x1x16x16x1xbf16> to vector<1x16x16x1xbf16>
    %12 = arith.extf %11 : vector<1x16x16x1xbf16> to vector<1x16x16x1xf32>
    %13 = vector.shape_cast %0 : vector<1x1xf32> to vector<1x1x1x1xf32>
    %14 = vector.broadcast %13 : vector<1x1x1x1xf32> to vector<1x16x16x1xf32>
    %15 = arith.mulf %12, %14 : vector<1x16x16x1xf32>
    %16 = vector.shape_cast %1 : vector<1x1xf32> to vector<1x1x1x1xf32>
    %17 = vector.broadcast %16 : vector<1x1x1x1xf32> to vector<1x16x16x1xf32>
    %18 = arith.addf %15, %17 : vector<1x16x16x1xf32>
    %19 = arith.truncf %18 : vector<1x16x16x1xf32> to vector<1x16x16x1xbf16>
    %cst_25 = arith.constant 0.000000e+00 : bf16
    %20 = vector.broadcast %cst_25 : bf16 to vector<1x16x1x1xbf16>
    %21 = vector.extract_strided_slice %19 {offsets = [0, 0, 0, 0], sizes = [1, 16, 15, 1], strides = [1, 1, 1, 1]} : vector<1x16x16x1xbf16> to vector<1x16x15x1xbf16>
    %22 = tpu.concatenate %20, %21 in 2 : vector<1x16x1x1xbf16>, vector<1x16x15x1xbf16> -> vector<1x16x16x1xbf16>
    %23 = vector.extract_strided_slice %19 {offsets = [0, 0, 1, 0], sizes = [1, 16, 15, 1], strides = [1, 1, 1, 1]} : vector<1x16x16x1xbf16> to vector<1x16x15x1xbf16>
    %24 = tpu.concatenate %23, %20 in 2 : vector<1x16x15x1xbf16>, vector<1x16x1x1xbf16> -> vector<1x16x16x1xbf16>
    %25 = tpu.concatenate %22, %19, %24 in 3 : vector<1x16x16x1xbf16>, vector<1x16x16x1xbf16>, vector<1x16x16x1xbf16> -> vector<1x16x16x3xbf16>
    %c0_26 = arith.constant 0 : index
    %c1 = arith.constant 1 : index
    %c0_27 = arith.constant 0 : index
    %c0_28 = arith.constant 0 : index
    %26 = vector.load %arg11[%c0_26, %c1, %c0_27, %c0_28] : memref<3x18x16x3xbf16, #tpu.memory_space<vmem>>, vector<1x16x16x3xbf16>
    tpu.vector_store %arg11[%c0_26, %c1, %c0_27, %c0_28], %25 {strides = array<i32>} : memref<3x18x16x3xbf16, #tpu.memory_space<vmem>>, vector<1x16x16x3xbf16>,
    %c0_i32 = arith.constant 0 : i32
    %c17_i32 = arith.constant 17 : i32
    %27 = arith.addi %c0_i32, %c17_i32 : i32
    %c1_i32 = arith.constant 1 : i32
    scf.for %arg13 = %c0_i32 to %27 step %c1_i32  : i32 {
      %c16_i32 = arith.constant 16 : i32
      %28 = arith.cmpi slt, %arg13, %c16_i32 : i32
      %29 = arith.extui %28 : i1 to i32
      %c0_i32_30 = arith.constant 0 : i32
      %30 = arith.cmpi ne, %29, %c0_i32_30 : i32
      scf.if %30 {
        %c1_i32_35 = arith.constant 1 : i32
        %37 = arith.addi %arg13, %c1_i32_35 : i32
        %c16_i32_36 = arith.constant 16 : i32
        %38 = arith.cmpi slt, %37, %c16_i32_36 : i32
        %39 = arith.extui %38 : i1 to i32
        %c0_i32_37 = arith.constant 0 : i32
        %40 = arith.cmpi ne, %39, %c0_i32_37 : i32
        scf.if %40 {
          %c1_i32_146 = arith.constant 1 : i32
          %173 = arith.addi %arg13, %c1_i32_146 : i32
          %c0_147 = arith.constant 0 : index
          %174 = arith.index_cast %173 : i32 to index
          %c0_148 = arith.constant 0 : index
          %c0_149 = arith.constant 0 : index
          %c0_150 = arith.constant 0 : index
          %175 = vector.load %arg1[%c0_147, %174, %c0_148, %c0_149, %c0_150] : memref<1x16x16x16x1xbf16, #tpu.memory_space<vmem>>, vector<1x1x16x16x1xbf16>
          %176 = vector.shape_cast %175 : vector<1x1x16x16x1xbf16> to vector<1x16x16x1xbf16>
          %177 = arith.extf %176 : vector<1x16x16x1xbf16> to vector<1x16x16x1xf32>
          %178 = vector.shape_cast %0 : vector<1x1xf32> to vector<1x1x1x1xf32>
          %179 = vector.broadcast %178 : vector<1x1x1x1xf32> to vector<1x16x16x1xf32>
          %180 = arith.mulf %177, %179 : vector<1x16x16x1xf32>
          %181 = vector.shape_cast %1 : vector<1x1xf32> to vector<1x1x1x1xf32>
          %182 = vector.broadcast %181 : vector<1x1x1x1xf32> to vector<1x16x16x1xf32>
          %183 = arith.addf %180, %182 : vector<1x16x16x1xf32>
          %184 = arith.truncf %183 : vector<1x16x16x1xf32> to vector<1x16x16x1xbf16>
          %cst_151 = arith.constant 0.000000e+00 : bf16
          %185 = vector.broadcast %cst_151 : bf16 to vector<1x16x1x1xbf16>
          %186 = vector.extract_strided_slice %184 {offsets = [0, 0, 0, 0], sizes = [1, 16, 15, 1], strides = [1, 1, 1, 1]} : vector<1x16x16x1xbf16> to vector<1x16x15x1xbf16>
          %187 = tpu.concatenate %185, %186 in 2 : vector<1x16x1x1xbf16>, vector<1x16x15x1xbf16> -> vector<1x16x16x1xbf16>
          %188 = vector.extract_strided_slice %184 {offsets = [0, 0, 1, 0], sizes = [1, 16, 15, 1], strides = [1, 1, 1, 1]} : vector<1x16x16x1xbf16> to vector<1x16x15x1xbf16>
          %189 = tpu.concatenate %188, %185 in 2 : vector<1x16x15x1xbf16>, vector<1x16x1x1xbf16> -> vector<1x16x16x1xbf16>
          %190 = tpu.concatenate %187, %184, %189 in 3 : vector<1x16x16x1xbf16>, vector<1x16x16x1xbf16>, vector<1x16x16x1xbf16> -> vector<1x16x16x3xbf16>
          %c3_i32_152 = arith.constant 3 : i32
          %c0_i32_153 = arith.constant 0 : i32
          %191 = arith.cmpi eq, %c3_i32_152, %c0_i32_153 : i32
          %c1_i32_154 = arith.constant 1 : i32
          %192 = arith.select %191, %c1_i32_154, %c3_i32_152 : i32
          %193 = arith.remsi %173, %192 : i32
          %c0_i32_155 = arith.constant 0 : i32
          %194 = arith.cmpi ne, %193, %c0_i32_155 : i32
          %c0_i32_156 = arith.constant 0 : i32
          %195 = arith.cmpi slt, %193, %c0_i32_156 : i32
          %c0_i32_157 = arith.constant 0 : i32
          %196 = arith.cmpi slt, %192, %c0_i32_157 : i32
          %197 = arith.xori %195, %196 : i1
          %198 = arith.andi %197, %194 : i1
          %199 = arith.addi %193, %192 : i32
          %200 = arith.select %198, %199, %193 : i32
          %201 = arith.index_cast %200 : i32 to index
          %c1_158 = arith.constant 1 : index
          %c0_159 = arith.constant 0 : index
          %c0_160 = arith.constant 0 : index
          %202 = vector.load %arg11[%201, %c1_158, %c0_159, %c0_160] : memref<3x18x16x3xbf16, #tpu.memory_space<vmem>>, vector<1x16x16x3xbf16>
          tpu.vector_store %arg11[%201, %c1_158, %c0_159, %c0_160], %190 {strides = array<i32>} : memref<3x18x16x3xbf16, #tpu.memory_space<vmem>>, vector<1x16x16x3xbf16>,
        } else {
        }
        %c1_i32_38 = arith.constant 1 : i32
        %41 = arith.addi %arg13, %c1_i32_38 : i32
        %c16_i32_39 = arith.constant 16 : i32
        %42 = arith.cmpi eq, %41, %c16_i32_39 : i32
        %43 = arith.extui %42 : i1 to i32
        %c0_i32_40 = arith.constant 0 : i32
        %44 = arith.cmpi ne, %43, %c0_i32_40 : i32
        scf.if %44 {
          %cst_146 = arith.constant 0.000000e+00 : bf16
          %173 = vector.broadcast %cst_146 : bf16 to vector<1x18x16x3xbf16>
          %c1_i32_147 = arith.constant 1 : i32
          %174 = arith.addi %arg13, %c1_i32_147 : i32
          %c3_i32_148 = arith.constant 3 : i32
          %c0_i32_149 = arith.constant 0 : i32
          %175 = arith.cmpi eq, %c3_i32_148, %c0_i32_149 : i32
          %c1_i32_150 = arith.constant 1 : i32
          %176 = arith.select %175, %c1_i32_150, %c3_i32_148 : i32
          %177 = arith.remsi %174, %176 : i32
          %c0_i32_151 = arith.constant 0 : i32
          %178 = arith.cmpi ne, %177, %c0_i32_151 : i32
          %c0_i32_152 = arith.constant 0 : i32
          %179 = arith.cmpi slt, %177, %c0_i32_152 : i32
          %c0_i32_153 = arith.constant 0 : i32
          %180 = arith.cmpi slt, %176, %c0_i32_153 : i32
          %181 = arith.xori %179, %180 : i1
          %182 = arith.andi %181, %178 : i1
          %183 = arith.addi %177, %176 : i32
          %184 = arith.select %182, %183, %177 : i32
          %185 = arith.index_cast %184 : i32 to index
          %c0_154 = arith.constant 0 : index
          %c0_155 = arith.constant 0 : index
          %c0_156 = arith.constant 0 : index
          %186 = vector.load %arg11[%185, %c0_154, %c0_155, %c0_156] : memref<3x18x16x3xbf16, #tpu.memory_space<vmem>>, vector<1x18x16x3xbf16>
          tpu.vector_store %arg11[%185, %c0_154, %c0_155, %c0_156], %173 {strides = array<i32>} : memref<3x18x16x3xbf16, #tpu.memory_space<vmem>>, vector<1x18x16x3xbf16>,
        } else {
        }
        %c0_i32_41 = arith.constant 0 : i32
        %45 = arith.addi %arg13, %c0_i32_41 : i32
        %c2_i32 = arith.constant 2 : i32
        %46 = arith.addi %45, %c2_i32 : i32
        %c3_i32 = arith.constant 3 : i32
        %c0_i32_42 = arith.constant 0 : i32
        %47 = arith.cmpi eq, %c3_i32, %c0_i32_42 : i32
        %c1_i32_43 = arith.constant 1 : i32
        %48 = arith.select %47, %c1_i32_43, %c3_i32 : i32
        %49 = arith.remsi %46, %48 : i32
        %c0_i32_44 = arith.constant 0 : i32
        %50 = arith.cmpi ne, %49, %c0_i32_44 : i32
        %c0_i32_45 = arith.constant 0 : i32
        %51 = arith.cmpi slt, %49, %c0_i32_45 : i32
        %c0_i32_46 = arith.constant 0 : i32
        %52 = arith.cmpi slt, %48, %c0_i32_46 : i32
        %53 = arith.xori %51, %52 : i1
        %54 = arith.andi %53, %50 : i1
        %55 = arith.addi %49, %48 : i32
        %56 = arith.select %54, %55, %49 : i32
        %c1_i32_47 = arith.constant 1 : i32
        %57 = arith.addi %arg13, %c1_i32_47 : i32
        %c2_i32_48 = arith.constant 2 : i32
        %58 = arith.addi %57, %c2_i32_48 : i32
        %c3_i32_49 = arith.constant 3 : i32
        %c0_i32_50 = arith.constant 0 : i32
        %59 = arith.cmpi eq, %c3_i32_49, %c0_i32_50 : i32
        %c1_i32_51 = arith.constant 1 : i32
        %60 = arith.select %59, %c1_i32_51, %c3_i32_49 : i32
        %61 = arith.remsi %58, %60 : i32
        %c0_i32_52 = arith.constant 0 : i32
        %62 = arith.cmpi ne, %61, %c0_i32_52 : i32
        %c0_i32_53 = arith.constant 0 : i32
        %63 = arith.cmpi slt, %61, %c0_i32_53 : i32
        %c0_i32_54 = arith.constant 0 : i32
        %64 = arith.cmpi slt, %60, %c0_i32_54 : i32
        %65 = arith.xori %63, %64 : i1
        %66 = arith.andi %65, %62 : i1
        %67 = arith.addi %61, %60 : i32
        %68 = arith.select %66, %67, %61 : i32
        %c2_i32_55 = arith.constant 2 : i32
        %69 = arith.addi %arg13, %c2_i32_55 : i32
        %c2_i32_56 = arith.constant 2 : i32
        %70 = arith.addi %69, %c2_i32_56 : i32
        %c3_i32_57 = arith.constant 3 : i32
        %c0_i32_58 = arith.constant 0 : i32
        %71 = arith.cmpi eq, %c3_i32_57, %c0_i32_58 : i32
        %c1_i32_59 = arith.constant 1 : i32
        %72 = arith.select %71, %c1_i32_59, %c3_i32_57 : i32
        %73 = arith.remsi %70, %72 : i32
        %c0_i32_60 = arith.constant 0 : i32
        %74 = arith.cmpi ne, %73, %c0_i32_60 : i32
        %c0_i32_61 = arith.constant 0 : i32
        %75 = arith.cmpi slt, %73, %c0_i32_61 : i32
        %c0_i32_62 = arith.constant 0 : i32
        %76 = arith.cmpi slt, %72, %c0_i32_62 : i32
        %77 = arith.xori %75, %76 : i1
        %78 = arith.andi %77, %74 : i1
        %79 = arith.addi %73, %72 : i32
        %80 = arith.select %78, %79, %73 : i32
        %cst_63 = arith.constant 0.000000e+00 : f32
        %81 = vector.broadcast %cst_63 : f32 to vector<256x8xf32>
        %82 = arith.index_cast %56 : i32 to index
        %c0_64 = arith.constant 0 : index
        %c0_65 = arith.constant 0 : index
        %c0_66 = arith.constant 0 : index
        %83 = vector.load %arg11[%82, %c0_64, %c0_65, %c0_66] : memref<3x18x16x3xbf16, #tpu.memory_space<vmem>>, vector<1x16x16x3xbf16>
        %84 = vector.shape_cast %83 : vector<1x16x16x3xbf16> to vector<256x3xbf16>
        %c0_67 = arith.constant 0 : index
        %c0_68 = arith.constant 0 : index
        %c0_69 = arith.constant 0 : index
        %c0_70 = arith.constant 0 : index
        %85 = vector.load %arg4[%c0_67, %c0_68, %c0_69, %c0_70] : memref<3x3x3x8xbf16, #tpu.memory_space<vmem>>, vector<1x1x3x8xbf16>
        %86 = vector.shape_cast %85 : vector<1x1x3x8xbf16> to vector<3x8xbf16>
        %cst_71 = arith.constant dense<0.000000e+00> : vector<256x8xf32>
        %87 = tpu.matmul %84, %86, %cst_71 {dimension_numbers = #tpu.dot_dimension_numbers<[1], [0], [0], [1], [0, 0, 1, 1], [], []>} : vector<256x3xbf16>, vector<3x8xbf16>, vector<256x8xf32> -> vector<256x8xf32>
        %88 = arith.addf %81, %87 : vector<256x8xf32>
        %89 = arith.index_cast %56 : i32 to index
        %c1_72 = arith.constant 1 : index
        %c0_73 = arith.constant 0 : index
        %c0_74 = arith.constant 0 : index
        %90 = vector.load %arg11[%89, %c1_72, %c0_73, %c0_74] : memref<3x18x16x3xbf16, #tpu.memory_space<vmem>>, vector<1x16x16x3xbf16>
        %91 = vector.shape_cast %90 : vector<1x16x16x3xbf16> to vector<256x3xbf16>
        %c0_75 = arith.constant 0 : index
        %c1_76 = arith.constant 1 : index
        %c0_77 = arith.constant 0 : index
        %c0_78 = arith.constant 0 : index
        %92 = vector.load %arg4[%c0_75, %c1_76, %c0_77, %c0_78] : memref<3x3x3x8xbf16, #tpu.memory_space<vmem>>, vector<1x1x3x8xbf16>
        %93 = vector.shape_cast %92 : vector<1x1x3x8xbf16> to vector<3x8xbf16>
        %cst_79 = arith.constant dense<0.000000e+00> : vector<256x8xf32>
        %94 = tpu.matmul %91, %93, %cst_79 {dimension_numbers = #tpu.dot_dimension_numbers<[1], [0], [0], [1], [0, 0, 1, 1], [], []>} : vector<256x3xbf16>, vector<3x8xbf16>, vector<256x8xf32> -> vector<256x8xf32>
        %95 = arith.addf %88, %94 : vector<256x8xf32>
        %96 = arith.index_cast %56 : i32 to index
        %c2 = arith.constant 2 : index
        %c0_80 = arith.constant 0 : index
        %c0_81 = arith.constant 0 : index
        %97 = vector.load %arg11[%96, %c2, %c0_80, %c0_81] : memref<3x18x16x3xbf16, #tpu.memory_space<vmem>>, vector<1x16x16x3xbf16>
        %98 = vector.shape_cast %97 : vector<1x16x16x3xbf16> to vector<256x3xbf16>
        %c0_82 = arith.constant 0 : index
        %c2_83 = arith.constant 2 : index
        %c0_84 = arith.constant 0 : index
        %c0_85 = arith.constant 0 : index
        %99 = vector.load %arg4[%c0_82, %c2_83, %c0_84, %c0_85] : memref<3x3x3x8xbf16, #tpu.memory_space<vmem>>, vector<1x1x3x8xbf16>
        %100 = vector.shape_cast %99 : vector<1x1x3x8xbf16> to vector<3x8xbf16>
        %cst_86 = arith.constant dense<0.000000e+00> : vector<256x8xf32>
        %101 = tpu.matmul %98, %100, %cst_86 {dimension_numbers = #tpu.dot_dimension_numbers<[1], [0], [0], [1], [0, 0, 1, 1], [], []>} : vector<256x3xbf16>, vector<3x8xbf16>, vector<256x8xf32> -> vector<256x8xf32>
        %102 = arith.addf %95, %101 : vector<256x8xf32>
        %103 = arith.index_cast %68 : i32 to index
        %c0_87 = arith.constant 0 : index
        %c0_88 = arith.constant 0 : index
        %c0_89 = arith.constant 0 : index
        %104 = vector.load %arg11[%103, %c0_87, %c0_88, %c0_89] : memref<3x18x16x3xbf16, #tpu.memory_space<vmem>>, vector<1x16x16x3xbf16>
        %105 = vector.shape_cast %104 : vector<1x16x16x3xbf16> to vector<256x3xbf16>
        %c1_90 = arith.constant 1 : index
        %c0_91 = arith.constant 0 : index
        %c0_92 = arith.constant 0 : index
        %c0_93 = arith.constant 0 : index
        %106 = vector.load %arg4[%c1_90, %c0_91, %c0_92, %c0_93] : memref<3x3x3x8xbf16, #tpu.memory_space<vmem>>, vector<1x1x3x8xbf16>
        %107 = vector.shape_cast %106 : vector<1x1x3x8xbf16> to vector<3x8xbf16>
        %cst_94 = arith.constant dense<0.000000e+00> : vector<256x8xf32>
        %108 = tpu.matmul %105, %107, %cst_94 {dimension_numbers = #tpu.dot_dimension_numbers<[1], [0], [0], [1], [0, 0, 1, 1], [], []>} : vector<256x3xbf16>, vector<3x8xbf16>, vector<256x8xf32> -> vector<256x8xf32>
        %109 = arith.addf %102, %108 : vector<256x8xf32>
        %110 = arith.index_cast %68 : i32 to index
        %c1_95 = arith.constant 1 : index
        %c0_96 = arith.constant 0 : index
        %c0_97 = arith.constant 0 : index
        %111 = vector.load %arg11[%110, %c1_95, %c0_96, %c0_97] : memref<3x18x16x3xbf16, #tpu.memory_space<vmem>>, vector<1x16x16x3xbf16>
        %112 = vector.shape_cast %111 : vector<1x16x16x3xbf16> to vector<256x3xbf16>
        %c1_98 = arith.constant 1 : index
        %c1_99 = arith.constant 1 : index
        %c0_100 = arith.constant 0 : index
        %c0_101 = arith.constant 0 : index
        %113 = vector.load %arg4[%c1_98, %c1_99, %c0_100, %c0_101] : memref<3x3x3x8xbf16, #tpu.memory_space<vmem>>, vector<1x1x3x8xbf16>
        %114 = vector.shape_cast %113 : vector<1x1x3x8xbf16> to vector<3x8xbf16>
        %cst_102 = arith.constant dense<0.000000e+00> : vector<256x8xf32>
        %115 = tpu.matmul %112, %114, %cst_102 {dimension_numbers = #tpu.dot_dimension_numbers<[1], [0], [0], [1], [0, 0, 1, 1], [], []>} : vector<256x3xbf16>, vector<3x8xbf16>, vector<256x8xf32> -> vector<256x8xf32>
        %116 = arith.addf %109, %115 : vector<256x8xf32>
        %117 = arith.index_cast %68 : i32 to index
        %c2_103 = arith.constant 2 : index
        %c0_104 = arith.constant 0 : index
        %c0_105 = arith.constant 0 : index
        %118 = vector.load %arg11[%117, %c2_103, %c0_104, %c0_105] : memref<3x18x16x3xbf16, #tpu.memory_space<vmem>>, vector<1x16x16x3xbf16>
        %119 = vector.shape_cast %118 : vector<1x16x16x3xbf16> to vector<256x3xbf16>
        %c1_106 = arith.constant 1 : index
        %c2_107 = arith.constant 2 : index
        %c0_108 = arith.constant 0 : index
        %c0_109 = arith.constant 0 : index
        %120 = vector.load %arg4[%c1_106, %c2_107, %c0_108, %c0_109] : memref<3x3x3x8xbf16, #tpu.memory_space<vmem>>, vector<1x1x3x8xbf16>
        %121 = vector.shape_cast %120 : vector<1x1x3x8xbf16> to vector<3x8xbf16>
        %cst_110 = arith.constant dense<0.000000e+00> : vector<256x8xf32>
        %122 = tpu.matmul %119, %121, %cst_110 {dimension_numbers = #tpu.dot_dimension_numbers<[1], [0], [0], [1], [0, 0, 1, 1], [], []>} : vector<256x3xbf16>, vector<3x8xbf16>, vector<256x8xf32> -> vector<256x8xf32>
        %123 = arith.addf %116, %122 : vector<256x8xf32>
        %124 = arith.index_cast %80 : i32 to index
        %c0_111 = arith.constant 0 : index
        %c0_112 = arith.constant 0 : index
        %c0_113 = arith.constant 0 : index
        %125 = vector.load %arg11[%124, %c0_111, %c0_112, %c0_113] : memref<3x18x16x3xbf16, #tpu.memory_space<vmem>>, vector<1x16x16x3xbf16>
        %126 = vector.shape_cast %125 : vector<1x16x16x3xbf16> to vector<256x3xbf16>
        %c2_114 = arith.constant 2 : index
        %c0_115 = arith.constant 0 : index
        %c0_116 = arith.constant 0 : index
        %c0_117 = arith.constant 0 : index
        %127 = vector.load %arg4[%c2_114, %c0_115, %c0_116, %c0_117] : memref<3x3x3x8xbf16, #tpu.memory_space<vmem>>, vector<1x1x3x8xbf16>
        %128 = vector.shape_cast %127 : vector<1x1x3x8xbf16> to vector<3x8xbf16>
        %cst_118 = arith.constant dense<0.000000e+00> : vector<256x8xf32>
        %129 = tpu.matmul %126, %128, %cst_118 {dimension_numbers = #tpu.dot_dimension_numbers<[1], [0], [0], [1], [0, 0, 1, 1], [], []>} : vector<256x3xbf16>, vector<3x8xbf16>, vector<256x8xf32> -> vector<256x8xf32>
        %130 = arith.addf %123, %129 : vector<256x8xf32>
        %131 = arith.index_cast %80 : i32 to index
        %c1_119 = arith.constant 1 : index
        %c0_120 = arith.constant 0 : index
        %c0_121 = arith.constant 0 : index
        %132 = vector.load %arg11[%131, %c1_119, %c0_120, %c0_121] : memref<3x18x16x3xbf16, #tpu.memory_space<vmem>>, vector<1x16x16x3xbf16>
        %133 = vector.shape_cast %132 : vector<1x16x16x3xbf16> to vector<256x3xbf16>
        %c2_122 = arith.constant 2 : index
        %c1_123 = arith.constant 1 : index
        %c0_124 = arith.constant 0 : index
        %c0_125 = arith.constant 0 : index
        %134 = vector.load %arg4[%c2_122, %c1_123, %c0_124, %c0_125] : memref<3x3x3x8xbf16, #tpu.memory_space<vmem>>, vector<1x1x3x8xbf16>
        %135 = vector.shape_cast %134 : vector<1x1x3x8xbf16> to vector<3x8xbf16>
        %cst_126 = arith.constant dense<0.000000e+00> : vector<256x8xf32>
        %136 = tpu.matmul %133, %135, %cst_126 {dimension_numbers = #tpu.dot_dimension_numbers<[1], [0], [0], [1], [0, 0, 1, 1], [], []>} : vector<256x3xbf16>, vector<3x8xbf16>, vector<256x8xf32> -> vector<256x8xf32>
        %137 = arith.addf %130, %136 : vector<256x8xf32>
        %138 = arith.index_cast %80 : i32 to index
        %c2_127 = arith.constant 2 : index
        %c0_128 = arith.constant 0 : index
        %c0_129 = arith.constant 0 : index
        %139 = vector.load %arg11[%138, %c2_127, %c0_128, %c0_129] : memref<3x18x16x3xbf16, #tpu.memory_space<vmem>>, vector<1x16x16x3xbf16>
        %140 = vector.shape_cast %139 : vector<1x16x16x3xbf16> to vector<256x3xbf16>
        %c2_130 = arith.constant 2 : index
        %c2_131 = arith.constant 2 : index
        %c0_132 = arith.constant 0 : index
        %c0_133 = arith.constant 0 : index
        %141 = vector.load %arg4[%c2_130, %c2_131, %c0_132, %c0_133] : memref<3x3x3x8xbf16, #tpu.memory_space<vmem>>, vector<1x1x3x8xbf16>
        %142 = vector.shape_cast %141 : vector<1x1x3x8xbf16> to vector<3x8xbf16>
        %cst_134 = arith.constant dense<0.000000e+00> : vector<256x8xf32>
        %143 = tpu.matmul %140, %142, %cst_134 {dimension_numbers = #tpu.dot_dimension_numbers<[1], [0], [0], [1], [0, 0, 1, 1], [], []>} : vector<256x3xbf16>, vector<3x8xbf16>, vector<256x8xf32> -> vector<256x8xf32>
        %144 = arith.addf %137, %143 : vector<256x8xf32>
        %145 = vector.broadcast %2 : vector<1x8xf32> to vector<256x8xf32>
        %146 = arith.addf %144, %145 : vector<256x8xf32>
        %cst_135 = arith.constant 0.000000e+00 : f32
        %147 = vector.broadcast %cst_135 : f32 to vector<256x8xf32>
        %148 = arith.maximumf %146, %147 : vector<256x8xf32>
        %149 = vector.broadcast %3 : vector<1x8xf32> to vector<256x8xf32>
        %150 = arith.mulf %148, %149 : vector<256x8xf32>
        %151 = vector.broadcast %4 : vector<1x8xf32> to vector<256x8xf32>
        %152 = arith.addf %150, %151 : vector<256x8xf32>
        %153 = vector.shape_cast %152 : vector<256x8xf32> to vector<1x16x16x8xf32>
        %154 = arith.truncf %153 : vector<1x16x16x8xf32> to vector<1x16x16x8xbf16>
        %cst_136 = arith.constant 0.000000e+00 : bf16
        %155 = vector.broadcast %cst_136 : bf16 to vector<1x16x1x8xbf16>
        %156 = vector.extract_strided_slice %154 {offsets = [0, 0, 0, 0], sizes = [1, 16, 15, 8], strides = [1, 1, 1, 1]} : vector<1x16x16x8xbf16> to vector<1x16x15x8xbf16>
        %157 = tpu.concatenate %155, %156 in 2 : vector<1x16x1x8xbf16>, vector<1x16x15x8xbf16> -> vector<1x16x16x8xbf16>
        %158 = vector.extract_strided_slice %154 {offsets = [0, 0, 1, 0], sizes = [1, 16, 15, 8], strides = [1, 1, 1, 1]} : vector<1x16x16x8xbf16> to vector<1x16x15x8xbf16>
        %159 = tpu.concatenate %158, %155 in 2 : vector<1x16x15x8xbf16>, vector<1x16x1x8xbf16> -> vector<1x16x16x8xbf16>
        %160 = tpu.concatenate %157, %154, %159 in 3 : vector<1x16x16x8xbf16>, vector<1x16x16x8xbf16>, vector<1x16x16x8xbf16> -> vector<1x16x16x24xbf16>
        %c3_i32_137 = arith.constant 3 : i32
        %c0_i32_138 = arith.constant 0 : i32
        %161 = arith.cmpi eq, %c3_i32_137, %c0_i32_138 : i32
        %c1_i32_139 = arith.constant 1 : i32
        %162 = arith.select %161, %c1_i32_139, %c3_i32_137 : i32
        %163 = arith.remsi %arg13, %162 : i32
        %c0_i32_140 = arith.constant 0 : i32
        %164 = arith.cmpi ne, %163, %c0_i32_140 : i32
        %c0_i32_141 = arith.constant 0 : i32
        %165 = arith.cmpi slt, %163, %c0_i32_141 : i32
        %c0_i32_142 = arith.constant 0 : i32
        %166 = arith.cmpi slt, %162, %c0_i32_142 : i32
        %167 = arith.xori %165, %166 : i1
        %168 = arith.andi %167, %164 : i1
        %169 = arith.addi %163, %162 : i32
        %170 = arith.select %168, %169, %163 : i32
        %171 = arith.index_cast %170 : i32 to index
        %c1_143 = arith.constant 1 : index
        %c0_144 = arith.constant 0 : index
        %c0_145 = arith.constant 0 : index
        %172 = vector.load %arg12[%171, %c1_143, %c0_144, %c0_145] : memref<3x18x16x24xbf16, #tpu.memory_space<vmem>>, vector<1x16x16x24xbf16>
        tpu.vector_store %arg12[%171, %c1_143, %c0_144, %c0_145], %160 {strides = array<i32>} : memref<3x18x16x24xbf16, #tpu.memory_space<vmem>>, vector<1x16x16x24xbf16>,
      } else {
      }
      %c16_i32_31 = arith.constant 16 : i32
      %31 = arith.cmpi eq, %arg13, %c16_i32_31 : i32
      %32 = arith.extui %31 : i1 to i32
      %c0_i32_32 = arith.constant 0 : i32
      %33 = arith.cmpi ne, %32, %c0_i32_32 : i32
      scf.if %33 {
        %cst_35 = arith.constant 0.000000e+00 : bf16
        %37 = vector.broadcast %cst_35 : bf16 to vector<1x18x16x24xbf16>
        %c3_i32 = arith.constant 3 : i32
        %c0_i32_36 = arith.constant 0 : i32
        %38 = arith.cmpi eq, %c3_i32, %c0_i32_36 : i32
        %c1_i32_37 = arith.constant 1 : i32
        %39 = arith.select %38, %c1_i32_37, %c3_i32 : i32
        %40 = arith.remsi %arg13, %39 : i32
        %c0_i32_38 = arith.constant 0 : i32
        %41 = arith.cmpi ne, %40, %c0_i32_38 : i32
        %c0_i32_39 = arith.constant 0 : i32
        %42 = arith.cmpi slt, %40, %c0_i32_39 : i32
        %c0_i32_40 = arith.constant 0 : i32
        %43 = arith.cmpi slt, %39, %c0_i32_40 : i32
        %44 = arith.xori %42, %43 : i1
        %45 = arith.andi %44, %41 : i1
        %46 = arith.addi %40, %39 : i32
        %47 = arith.select %45, %46, %40 : i32
        %48 = arith.index_cast %47 : i32 to index
        %c0_41 = arith.constant 0 : index
        %c0_42 = arith.constant 0 : index
        %c0_43 = arith.constant 0 : index
        %49 = vector.load %arg12[%48, %c0_41, %c0_42, %c0_43] : memref<3x18x16x24xbf16, #tpu.memory_space<vmem>>, vector<1x18x16x24xbf16>
        tpu.vector_store %arg12[%48, %c0_41, %c0_42, %c0_43], %37 {strides = array<i32>} : memref<3x18x16x24xbf16, #tpu.memory_space<vmem>>, vector<1x18x16x24xbf16>,
      } else {
      }
      %c1_i32_33 = arith.constant 1 : i32
      %34 = arith.cmpi sge, %arg13, %c1_i32_33 : i32
      %35 = arith.extui %34 : i1 to i32
      %c0_i32_34 = arith.constant 0 : i32
      %36 = arith.cmpi ne, %35, %c0_i32_34 : i32
      scf.if %36 {
        %c1_i32_35 = arith.constant 1 : i32
        %37 = arith.subi %arg13, %c1_i32_35 : i32
        %c0_i32_36 = arith.constant 0 : i32
        %38 = arith.addi %37, %c0_i32_36 : i32
        %c2_i32 = arith.constant 2 : i32
        %39 = arith.addi %38, %c2_i32 : i32
        %c3_i32 = arith.constant 3 : i32
        %c0_i32_37 = arith.constant 0 : i32
        %40 = arith.cmpi eq, %c3_i32, %c0_i32_37 : i32
        %c1_i32_38 = arith.constant 1 : i32
        %41 = arith.select %40, %c1_i32_38, %c3_i32 : i32
        %42 = arith.remsi %39, %41 : i32
        %c0_i32_39 = arith.constant 0 : i32
        %43 = arith.cmpi ne, %42, %c0_i32_39 : i32
        %c0_i32_40 = arith.constant 0 : i32
        %44 = arith.cmpi slt, %42, %c0_i32_40 : i32
        %c0_i32_41 = arith.constant 0 : i32
        %45 = arith.cmpi slt, %41, %c0_i32_41 : i32
        %46 = arith.xori %44, %45 : i1
        %47 = arith.andi %46, %43 : i1
        %48 = arith.addi %42, %41 : i32
        %49 = arith.select %47, %48, %42 : i32
        %c1_i32_42 = arith.constant 1 : i32
        %50 = arith.addi %37, %c1_i32_42 : i32
        %c2_i32_43 = arith.constant 2 : i32
        %51 = arith.addi %50, %c2_i32_43 : i32
        %c3_i32_44 = arith.constant 3 : i32
        %c0_i32_45 = arith.constant 0 : i32
        %52 = arith.cmpi eq, %c3_i32_44, %c0_i32_45 : i32
        %c1_i32_46 = arith.constant 1 : i32
        %53 = arith.select %52, %c1_i32_46, %c3_i32_44 : i32
        %54 = arith.remsi %51, %53 : i32
        %c0_i32_47 = arith.constant 0 : i32
        %55 = arith.cmpi ne, %54, %c0_i32_47 : i32
        %c0_i32_48 = arith.constant 0 : i32
        %56 = arith.cmpi slt, %54, %c0_i32_48 : i32
        %c0_i32_49 = arith.constant 0 : i32
        %57 = arith.cmpi slt, %53, %c0_i32_49 : i32
        %58 = arith.xori %56, %57 : i1
        %59 = arith.andi %58, %55 : i1
        %60 = arith.addi %54, %53 : i32
        %61 = arith.select %59, %60, %54 : i32
        %c2_i32_50 = arith.constant 2 : i32
        %62 = arith.addi %37, %c2_i32_50 : i32
        %c2_i32_51 = arith.constant 2 : i32
        %63 = arith.addi %62, %c2_i32_51 : i32
        %c3_i32_52 = arith.constant 3 : i32
        %c0_i32_53 = arith.constant 0 : i32
        %64 = arith.cmpi eq, %c3_i32_52, %c0_i32_53 : i32
        %c1_i32_54 = arith.constant 1 : i32
        %65 = arith.select %64, %c1_i32_54, %c3_i32_52 : i32
        %66 = arith.remsi %63, %65 : i32
        %c0_i32_55 = arith.constant 0 : i32
        %67 = arith.cmpi ne, %66, %c0_i32_55 : i32
        %c0_i32_56 = arith.constant 0 : i32
        %68 = arith.cmpi slt, %66, %c0_i32_56 : i32
        %c0_i32_57 = arith.constant 0 : i32
        %69 = arith.cmpi slt, %65, %c0_i32_57 : i32
        %70 = arith.xori %68, %69 : i1
        %71 = arith.andi %70, %67 : i1
        %72 = arith.addi %66, %65 : i32
        %73 = arith.select %71, %72, %66 : i32
        %cst_58 = arith.constant 0.000000e+00 : f32
        %74 = vector.broadcast %cst_58 : f32 to vector<256x8xf32>
        %75 = arith.index_cast %49 : i32 to index
        %c0_59 = arith.constant 0 : index
        %c0_60 = arith.constant 0 : index
        %c0_61 = arith.constant 0 : index
        %76 = vector.load %arg12[%75, %c0_59, %c0_60, %c0_61] : memref<3x18x16x24xbf16, #tpu.memory_space<vmem>>, vector<1x16x16x24xbf16>
        %77 = vector.shape_cast %76 : vector<1x16x16x24xbf16> to vector<256x24xbf16>
        %c0_62 = arith.constant 0 : index
        %c0_63 = arith.constant 0 : index
        %c0_64 = arith.constant 0 : index
        %c0_65 = arith.constant 0 : index
        %78 = vector.load %arg8[%c0_62, %c0_63, %c0_64, %c0_65] : memref<3x3x24x8xbf16, #tpu.memory_space<vmem>>, vector<1x1x24x8xbf16>
        %79 = vector.shape_cast %78 : vector<1x1x24x8xbf16> to vector<24x8xbf16>
        %cst_66 = arith.constant dense<0.000000e+00> : vector<256x8xf32>
        %80 = tpu.matmul %77, %79, %cst_66 {dimension_numbers = #tpu.dot_dimension_numbers<[1], [0], [0], [1], [0, 0, 1, 1], [], []>} : vector<256x24xbf16>, vector<24x8xbf16>, vector<256x8xf32> -> vector<256x8xf32>
        %81 = arith.addf %74, %80 : vector<256x8xf32>
        %82 = arith.index_cast %49 : i32 to index
        %c1_67 = arith.constant 1 : index
        %c0_68 = arith.constant 0 : index
        %c0_69 = arith.constant 0 : index
        %83 = vector.load %arg12[%82, %c1_67, %c0_68, %c0_69] : memref<3x18x16x24xbf16, #tpu.memory_space<vmem>>, vector<1x16x16x24xbf16>
        %84 = vector.shape_cast %83 : vector<1x16x16x24xbf16> to vector<256x24xbf16>
        %c0_70 = arith.constant 0 : index
        %c1_71 = arith.constant 1 : index
        %c0_72 = arith.constant 0 : index
        %c0_73 = arith.constant 0 : index
        %85 = vector.load %arg8[%c0_70, %c1_71, %c0_72, %c0_73] : memref<3x3x24x8xbf16, #tpu.memory_space<vmem>>, vector<1x1x24x8xbf16>
        %86 = vector.shape_cast %85 : vector<1x1x24x8xbf16> to vector<24x8xbf16>
        %cst_74 = arith.constant dense<0.000000e+00> : vector<256x8xf32>
        %87 = tpu.matmul %84, %86, %cst_74 {dimension_numbers = #tpu.dot_dimension_numbers<[1], [0], [0], [1], [0, 0, 1, 1], [], []>} : vector<256x24xbf16>, vector<24x8xbf16>, vector<256x8xf32> -> vector<256x8xf32>
        %88 = arith.addf %81, %87 : vector<256x8xf32>
        %89 = arith.index_cast %49 : i32 to index
        %c2 = arith.constant 2 : index
        %c0_75 = arith.constant 0 : index
        %c0_76 = arith.constant 0 : index
        %90 = vector.load %arg12[%89, %c2, %c0_75, %c0_76] : memref<3x18x16x24xbf16, #tpu.memory_space<vmem>>, vector<1x16x16x24xbf16>
        %91 = vector.shape_cast %90 : vector<1x16x16x24xbf16> to vector<256x24xbf16>
        %c0_77 = arith.constant 0 : index
        %c2_78 = arith.constant 2 : index
        %c0_79 = arith.constant 0 : index
        %c0_80 = arith.constant 0 : index
        %92 = vector.load %arg8[%c0_77, %c2_78, %c0_79, %c0_80] : memref<3x3x24x8xbf16, #tpu.memory_space<vmem>>, vector<1x1x24x8xbf16>
        %93 = vector.shape_cast %92 : vector<1x1x24x8xbf16> to vector<24x8xbf16>
        %cst_81 = arith.constant dense<0.000000e+00> : vector<256x8xf32>
        %94 = tpu.matmul %91, %93, %cst_81 {dimension_numbers = #tpu.dot_dimension_numbers<[1], [0], [0], [1], [0, 0, 1, 1], [], []>} : vector<256x24xbf16>, vector<24x8xbf16>, vector<256x8xf32> -> vector<256x8xf32>
        %95 = arith.addf %88, %94 : vector<256x8xf32>
        %96 = arith.index_cast %61 : i32 to index
        %c0_82 = arith.constant 0 : index
        %c0_83 = arith.constant 0 : index
        %c0_84 = arith.constant 0 : index
        %97 = vector.load %arg12[%96, %c0_82, %c0_83, %c0_84] : memref<3x18x16x24xbf16, #tpu.memory_space<vmem>>, vector<1x16x16x24xbf16>
        %98 = vector.shape_cast %97 : vector<1x16x16x24xbf16> to vector<256x24xbf16>
        %c1_85 = arith.constant 1 : index
        %c0_86 = arith.constant 0 : index
        %c0_87 = arith.constant 0 : index
        %c0_88 = arith.constant 0 : index
        %99 = vector.load %arg8[%c1_85, %c0_86, %c0_87, %c0_88] : memref<3x3x24x8xbf16, #tpu.memory_space<vmem>>, vector<1x1x24x8xbf16>
        %100 = vector.shape_cast %99 : vector<1x1x24x8xbf16> to vector<24x8xbf16>
        %cst_89 = arith.constant dense<0.000000e+00> : vector<256x8xf32>
        %101 = tpu.matmul %98, %100, %cst_89 {dimension_numbers = #tpu.dot_dimension_numbers<[1], [0], [0], [1], [0, 0, 1, 1], [], []>} : vector<256x24xbf16>, vector<24x8xbf16>, vector<256x8xf32> -> vector<256x8xf32>
        %102 = arith.addf %95, %101 : vector<256x8xf32>
        %103 = arith.index_cast %61 : i32 to index
        %c1_90 = arith.constant 1 : index
        %c0_91 = arith.constant 0 : index
        %c0_92 = arith.constant 0 : index
        %104 = vector.load %arg12[%103, %c1_90, %c0_91, %c0_92] : memref<3x18x16x24xbf16, #tpu.memory_space<vmem>>, vector<1x16x16x24xbf16>
        %105 = vector.shape_cast %104 : vector<1x16x16x24xbf16> to vector<256x24xbf16>
        %c1_93 = arith.constant 1 : index
        %c1_94 = arith.constant 1 : index
        %c0_95 = arith.constant 0 : index
        %c0_96 = arith.constant 0 : index
        %106 = vector.load %arg8[%c1_93, %c1_94, %c0_95, %c0_96] : memref<3x3x24x8xbf16, #tpu.memory_space<vmem>>, vector<1x1x24x8xbf16>
        %107 = vector.shape_cast %106 : vector<1x1x24x8xbf16> to vector<24x8xbf16>
        %cst_97 = arith.constant dense<0.000000e+00> : vector<256x8xf32>
        %108 = tpu.matmul %105, %107, %cst_97 {dimension_numbers = #tpu.dot_dimension_numbers<[1], [0], [0], [1], [0, 0, 1, 1], [], []>} : vector<256x24xbf16>, vector<24x8xbf16>, vector<256x8xf32> -> vector<256x8xf32>
        %109 = arith.addf %102, %108 : vector<256x8xf32>
        %110 = arith.index_cast %61 : i32 to index
        %c2_98 = arith.constant 2 : index
        %c0_99 = arith.constant 0 : index
        %c0_100 = arith.constant 0 : index
        %111 = vector.load %arg12[%110, %c2_98, %c0_99, %c0_100] : memref<3x18x16x24xbf16, #tpu.memory_space<vmem>>, vector<1x16x16x24xbf16>
        %112 = vector.shape_cast %111 : vector<1x16x16x24xbf16> to vector<256x24xbf16>
        %c1_101 = arith.constant 1 : index
        %c2_102 = arith.constant 2 : index
        %c0_103 = arith.constant 0 : index
        %c0_104 = arith.constant 0 : index
        %113 = vector.load %arg8[%c1_101, %c2_102, %c0_103, %c0_104] : memref<3x3x24x8xbf16, #tpu.memory_space<vmem>>, vector<1x1x24x8xbf16>
        %114 = vector.shape_cast %113 : vector<1x1x24x8xbf16> to vector<24x8xbf16>
        %cst_105 = arith.constant dense<0.000000e+00> : vector<256x8xf32>
        %115 = tpu.matmul %112, %114, %cst_105 {dimension_numbers = #tpu.dot_dimension_numbers<[1], [0], [0], [1], [0, 0, 1, 1], [], []>} : vector<256x24xbf16>, vector<24x8xbf16>, vector<256x8xf32> -> vector<256x8xf32>
        %116 = arith.addf %109, %115 : vector<256x8xf32>
        %117 = arith.index_cast %73 : i32 to index
        %c0_106 = arith.constant 0 : index
        %c0_107 = arith.constant 0 : index
        %c0_108 = arith.constant 0 : index
        %118 = vector.load %arg12[%117, %c0_106, %c0_107, %c0_108] : memref<3x18x16x24xbf16, #tpu.memory_space<vmem>>, vector<1x16x16x24xbf16>
        %119 = vector.shape_cast %118 : vector<1x16x16x24xbf16> to vector<256x24xbf16>
        %c2_109 = arith.constant 2 : index
        %c0_110 = arith.constant 0 : index
        %c0_111 = arith.constant 0 : index
        %c0_112 = arith.constant 0 : index
        %120 = vector.load %arg8[%c2_109, %c0_110, %c0_111, %c0_112] : memref<3x3x24x8xbf16, #tpu.memory_space<vmem>>, vector<1x1x24x8xbf16>
        %121 = vector.shape_cast %120 : vector<1x1x24x8xbf16> to vector<24x8xbf16>
        %cst_113 = arith.constant dense<0.000000e+00> : vector<256x8xf32>
        %122 = tpu.matmul %119, %121, %cst_113 {dimension_numbers = #tpu.dot_dimension_numbers<[1], [0], [0], [1], [0, 0, 1, 1], [], []>} : vector<256x24xbf16>, vector<24x8xbf16>, vector<256x8xf32> -> vector<256x8xf32>
        %123 = arith.addf %116, %122 : vector<256x8xf32>
        %124 = arith.index_cast %73 : i32 to index
        %c1_114 = arith.constant 1 : index
        %c0_115 = arith.constant 0 : index
        %c0_116 = arith.constant 0 : index
        %125 = vector.load %arg12[%124, %c1_114, %c0_115, %c0_116] : memref<3x18x16x24xbf16, #tpu.memory_space<vmem>>, vector<1x16x16x24xbf16>
        %126 = vector.shape_cast %125 : vector<1x16x16x24xbf16> to vector<256x24xbf16>
        %c2_117 = arith.constant 2 : index
        %c1_118 = arith.constant 1 : index
        %c0_119 = arith.constant 0 : index
        %c0_120 = arith.constant 0 : index
        %127 = vector.load %arg8[%c2_117, %c1_118, %c0_119, %c0_120] : memref<3x3x24x8xbf16, #tpu.memory_space<vmem>>, vector<1x1x24x8xbf16>
        %128 = vector.shape_cast %127 : vector<1x1x24x8xbf16> to vector<24x8xbf16>
        %cst_121 = arith.constant dense<0.000000e+00> : vector<256x8xf32>
        %129 = tpu.matmul %126, %128, %cst_121 {dimension_numbers = #tpu.dot_dimension_numbers<[1], [0], [0], [1], [0, 0, 1, 1], [], []>} : vector<256x24xbf16>, vector<24x8xbf16>, vector<256x8xf32> -> vector<256x8xf32>
        %130 = arith.addf %123, %129 : vector<256x8xf32>
        %131 = arith.index_cast %73 : i32 to index
        %c2_122 = arith.constant 2 : index
        %c0_123 = arith.constant 0 : index
        %c0_124 = arith.constant 0 : index
        %132 = vector.load %arg12[%131, %c2_122, %c0_123, %c0_124] : memref<3x18x16x24xbf16, #tpu.memory_space<vmem>>, vector<1x16x16x24xbf16>
        %133 = vector.shape_cast %132 : vector<1x16x16x24xbf16> to vector<256x24xbf16>
        %c2_125 = arith.constant 2 : index
        %c2_126 = arith.constant 2 : index
        %c0_127 = arith.constant 0 : index
        %c0_128 = arith.constant 0 : index
        %134 = vector.load %arg8[%c2_125, %c2_126, %c0_127, %c0_128] : memref<3x3x24x8xbf16, #tpu.memory_space<vmem>>, vector<1x1x24x8xbf16>
        %135 = vector.shape_cast %134 : vector<1x1x24x8xbf16> to vector<24x8xbf16>
        %cst_129 = arith.constant dense<0.000000e+00> : vector<256x8xf32>
        %136 = tpu.matmul %133, %135, %cst_129 {dimension_numbers = #tpu.dot_dimension_numbers<[1], [0], [0], [1], [0, 0, 1, 1], [], []>} : vector<256x24xbf16>, vector<24x8xbf16>, vector<256x8xf32> -> vector<256x8xf32>
        %137 = arith.addf %130, %136 : vector<256x8xf32>
        %138 = vector.broadcast %5 : vector<1x8xf32> to vector<256x8xf32>
        %139 = arith.addf %137, %138 : vector<256x8xf32>
        %cst_130 = arith.constant 0.000000e+00 : f32
        %140 = vector.broadcast %cst_130 : f32 to vector<256x8xf32>
        %141 = arith.maximumf %139, %140 : vector<256x8xf32>
        %142 = vector.shape_cast %141 : vector<256x8xf32> to vector<1x1x16x16x8xf32>
        %143 = arith.truncf %142 : vector<1x1x16x16x8xf32> to vector<1x1x16x16x8xbf16>
        %c0_131 = arith.constant 0 : index
        %144 = arith.index_cast %37 : i32 to index
        %c0_132 = arith.constant 0 : index
        %c0_133 = arith.constant 0 : index
        %c0_134 = arith.constant 0 : index
        %145 = vector.load %arg10[%c0_131, %144, %c0_132, %c0_133, %c0_134] : memref<1x16x16x16x8xbf16, #tpu.memory_space<vmem>>, vector<1x1x16x16x8xbf16>
        tpu.vector_store %arg10[%c0_131, %144, %c0_132, %c0_133, %c0_134], %143 {strides = array<i32>} : memref<1x16x16x16x8xbf16, #tpu.memory_space<vmem>>, vector<1x1x16x16x8xbf16>,
      } else {
      }
    }
    %c17_i32_29 = arith.constant 17 : i32
    return
  }
  func.func @transform_0(%arg0: i32) -> (i32, i32, i32, i32, i32) {
    %c0_i32 = arith.constant 0 : i32
    %c0_i32_0 = arith.constant 0 : i32
    %c0_i32_1 = arith.constant 0 : i32
    %c0_i32_2 = arith.constant 0 : i32
    %c0_i32_3 = arith.constant 0 : i32
    return %arg0, %c0_i32, %c0_i32_0, %c0_i32_1, %c0_i32_2 : i32, i32, i32, i32, i32
  }
  func.func @transform_1(%arg0: i32) -> (i32, i32) {
    %c0_i32 = arith.constant 0 : i32
    %c0_i32_0 = arith.constant 0 : i32
    %c0_i32_1 = arith.constant 0 : i32
    return %c0_i32, %c0_i32_0 : i32, i32
  }
  func.func @transform_2(%arg0: i32) -> (i32, i32) {
    %c0_i32 = arith.constant 0 : i32
    %c0_i32_0 = arith.constant 0 : i32
    %c0_i32_1 = arith.constant 0 : i32
    return %c0_i32, %c0_i32_0 : i32, i32
  }
  func.func @transform_3(%arg0: i32) -> (i32, i32, i32, i32) {
    %c0_i32 = arith.constant 0 : i32
    %c0_i32_0 = arith.constant 0 : i32
    %c0_i32_1 = arith.constant 0 : i32
    %c0_i32_2 = arith.constant 0 : i32
    %c0_i32_3 = arith.constant 0 : i32
    return %c0_i32, %c0_i32_0, %c0_i32_1, %c0_i32_2 : i32, i32, i32, i32
  }
  func.func @transform_4(%arg0: i32) -> (i32, i32) {
    %c0_i32 = arith.constant 0 : i32
    %c0_i32_0 = arith.constant 0 : i32
    %c0_i32_1 = arith.constant 0 : i32
    return %c0_i32, %c0_i32_0 : i32, i32
  }
  func.func @transform_5(%arg0: i32) -> (i32, i32) {
    %c0_i32 = arith.constant 0 : i32
    %c0_i32_0 = arith.constant 0 : i32
    %c0_i32_1 = arith.constant 0 : i32
    return %c0_i32, %c0_i32_0 : i32, i32
  }
  func.func @transform_6(%arg0: i32) -> (i32, i32) {
    %c0_i32 = arith.constant 0 : i32
    %c0_i32_0 = arith.constant 0 : i32
    %c0_i32_1 = arith.constant 0 : i32
    return %c0_i32, %c0_i32_0 : i32, i32
  }
  func.func @transform_7(%arg0: i32) -> (i32, i32, i32, i32) {
    %c0_i32 = arith.constant 0 : i32
    %c0_i32_0 = arith.constant 0 : i32
    %c0_i32_1 = arith.constant 0 : i32
    %c0_i32_2 = arith.constant 0 : i32
    %c0_i32_3 = arith.constant 0 : i32
    return %c0_i32, %c0_i32_0, %c0_i32_1, %c0_i32_2 : i32, i32, i32, i32
  }
  func.func @transform_8(%arg0: i32) -> (i32, i32) {
    %c0_i32 = arith.constant 0 : i32
    %c0_i32_0 = arith.constant 0 : i32
    %c0_i32_1 = arith.constant 0 : i32
    return %c0_i32, %c0_i32_0 : i32, i32
  }
  func.func @transform_9(%arg0: i32) -> (i32, i32, i32, i32, i32) {
    %c0_i32 = arith.constant 0 : i32
    %c0_i32_0 = arith.constant 0 : i32
    %c0_i32_1 = arith.constant 0 : i32
    %c0_i32_2 = arith.constant 0 : i32
    %c0_i32_3 = arith.constant 0 : i32
    return %arg0, %c0_i32, %c0_i32_0, %c0_i32_1, %c0_i32_2 : i32, i32, i32, i32, i32
  }
}

</mosaic_0001>

<bundles_post_ra>
// kernel: tpu_custom_call.1
= control target key start
LH: loop header
LB: loop body
LE: loop exit
PB: predicated region body
PF: predicated region fallthrough
CT: control target
= control target key end

     0   :  { %s11228_s13 = smov 0   ;;  %s14421_s0 = inlined_call_operand.vmem [shape: bf16[2,16,16,16,1], index: 0, kind: input, shape index: {}]   ;;  %s14422_s1 = inlined_call_operand.<no memory space> [shape: f32[1,1], index: 1, kind: input, shape index: {}]   ;;  %s14423_s3 = inlined_call_operand.vmem [shape: bf16[3,3,3,8], index: 3, kind: input, shape index: {}]   ;;  %s14424_s4 = inlined_call_operand.vmem [shape: f32[1,8], index: 4, kind: input, shape index: {}]   ;;  %s14425_s5 = inlined_call_operand.vmem [shape: f32[1,8], index: 5, kind: input, shape index: {}]   ;;  %s14426_s6 = inlined_call_operand.vmem [shape: f32[1,8], index: 6, kind: input, shape index: {}]   ;;  %s14427_s7 = inlined_call_operand.vmem [shape: bf16[3,3,24,8], index: 7, kind: input, shape index: {}]   ;;  %s14428_s8 = inlined_call_operand.vmem [shape: f32[1,8], index: 8, kind: input, shape index: {}]   ;;  %s14429_s9 = inlined_call_operand.vmem [shape: bf16[2,16,16,16,8], index: 9, kind: output, shape index: {}]   ;;  %s14430_s2 = inlined_call_operand.<no memory space> [shape: f32[1,1], index: 2, kind: input, shape index: {}]  }
   0x1   :  { %v14_v0 = vstv %s14422_s1  ;;  %v16_v1 = vstv %s14430_s2 }
   0x2   :  { %15 = vst [vmem:[#allocation4] sm:$0x1] %v14_v0 }
   0x3   :  { %17 = vst [vmem:[#allocation5] sm:$0x1] %v16_v1 }
   0x4 LB: > { %s8547_s14 = sadd.s32 4294967295, %s11156_s13   ;;  %p8551_p0 = scmp.ge.s32.totalorder %s11156_s13, 1  ;;  %s11156_s13 = sphi %s11228_s13, %s23_s13  }
   0x5   : > { %p291_p1 = scmp.lt.s32.totalorder %s11156_s13, 3 }
   0x7   : > { %p292_p2 = pnand %p8551_p0, %p291_p1 }
   0x8   : > { %p327_p3 = scmp.lt.s32.totalorder (!%p292_p2), %s8547_s14, 1  ;;  %s11162_s20 = smov (!%p292_p2), 1  }
   0x9   : > { %295 = sbr.rel (%p292_p2) target bundleno = 2299 (0x8fb), region = 56  ;;  %s11163_s21 = smov (!%p292_p2), 2  }
   0xa   : > { %s12174_s30 = smov (!%p292_p2), 0  }
   0xe   : > { %s14436_s14 = smov (!%p327_p3, %s8547_s14), 1  ;;  %v11246_v2 = vld [vmem:[#allocation4] ss:$0 sm:$0xff]  ;;  %v11251_v8 = vld [vmem:[#allocation5] ss:$0 sm:$0xff]  ;;  %vm1003_vm0 = vcmask 1047552  }
   0xf   : > { %s10607_s1 = sshll.u32 %s14436_s14, 11  ;;  %vm1004_vm1 = vsmask.f32 7424  ;;  %vm936_vm3 = vcmask 1040384   ;;  %vm937_vm4 = vsmask.f32 256 }
  0x10   : > { %s11239_s16 = scalar_lea.vmem %s14421_s0, %s10607_s1  ;;  %s11244_s19 = scalar_lea.vmem %s14429_s9, %s10607_s1  ;;  %vm11396_vm2 = vmand %vm1003_vm0, %vm1004_vm1  ;;  %vm1102_vm6 = vcmask 7168   ;;  %vm344_vm7 = vcmask 19456   ;;  %vm1151_vm8 = vcmask 15360   ;;  %vm453_vm9 = vcmask 191488  }
  0x11   : > { %v11046_v3 = vld [vmem:[%s11239_s16 + $0x20] sm:$0xff]   ;;  %v11044_v4 = vld [vmem:[%s11239_s16 + $0x10] sm:$0xff]   ;;  %v11047_v11 = vld [vmem:[%s11239_s16 + $0x28] sm:$0xff]  }
  0x12   : > { %v10916_v5 = vld [vmem:[%s11239_s16] sm:$0xff]   ;;  %v10933_v6 = vunpack.c.l.bf16 %v11046_v3  ;;  %v10934_v7 = vunpack.c.h.bf16 %v11046_v3  ;;  %v10925_v9 = vunpack.c.l.bf16 %v11044_v4  ;;  %v10926_v10 = vunpack.c.h.bf16 %v11044_v4  ;;  %v11045_v40 = vld [vmem:[%s11239_s16 + $0x18] sm:$0xff]   ;;  %v11043_v45 = vld [vmem:[%s11239_s16 + $0x8] sm:$0xff]  }
  0x13   : > { %v10917_v12 = vunpack.c.l.bf16 %v10916_v5  ;;  %v10918_v13 = vunpack.c.h.bf16 %v10916_v5  ;;  %v10937_v14 = vunpack.c.l.bf16 %v11047_v11  ;;  %v10938_v15 = vunpack.c.h.bf16 %v11047_v11  ;;  %v11050_v50 = vld [vmem:[%s11239_s16 + $0x40] sm:$0xff]   ;;  %v11049_v55 = vld [vmem:[%s11239_s16 + $0x38] sm:$0xff]   ;;  %vm11539_vm5 = vmand %vm936_vm3, %vm937_vm4 }
  0x14   : > { %v637_v16 = vmul.f32 %v11246_v2, %v10933_v6  ;;  %v638_v17 = vmul.f32 %v11246_v2, %v10934_v7  ;;  %v633_v18 = vmul.f32 %v11246_v2, %v10925_v9  ;;  %v634_v19 = vmul.f32 %v11246_v2, %v10926_v10 }
  0x15   : > { %v629_v20 = vmul.f32 %v11246_v2, %v10917_v12  ;;  %v630_v21 = vmul.f32 %v11246_v2, %v10918_v13  ;;  %v639_v22 = vmul.f32 %v11246_v2, %v10937_v14  ;;  %v640_v23 = vmul.f32 %v11246_v2, %v10938_v15 }
  0x16   : > { %v672_v24 = vadd.f32 %v11251_v8, %v637_v16  ;;  %v673_v25 = vadd.f32 %v11251_v8, %v638_v17  ;;  %v668_v26 = vadd.f32 %v11251_v8, %v633_v18  ;;  %v669_v27 = vadd.f32 %v11251_v8, %v634_v19 }
  0x17   : > { %v664_v28 = vadd.f32 %v11251_v8, %v629_v20  ;;  %v665_v29 = vadd.f32 %v11251_v8, %v630_v21  ;;  %v674_v30 = vadd.f32 %v11251_v8, %v639_v22  ;;  %v675_v31 = vadd.f32 %v11251_v8, %v640_v23  ;;  %v11048_v22 = vld [vmem:[%s11239_s16 + $0x30] sm:$0xff]  }
  0x18   : > { %v704_v32 = vpack.c.bf16 %v672_v24, %v672_v24  ;;  %v705_v33 = vpack.c.bf16 %v673_v25, %v673_v25  ;;  %v700_v34 = vpack.c.bf16 %v668_v26, %v668_v26  ;;  %v701_v35 = vpack.c.bf16 %v669_v27, %v669_v27 }
  0x19   : > { %v696_v36 = vpack.c.bf16 %v664_v28, %v664_v28  ;;  %v697_v37 = vpack.c.bf16 %v665_v29, %v665_v29  ;;  %v706_v38 = vpack.c.bf16 %v674_v30, %v674_v30  ;;  %v707_v39 = vpack.c.bf16 %v675_v31, %v675_v31  ;;  %v11053_v31 = vld [vmem:[%s11239_s16 + $0x58] sm:$0xff]  }
  0x1a   : > { %v768_v41 = vunpack.c.l.b16 %v704_v32  ;;  %v769_v42 = vunpack.c.l.b16 %v705_v33  ;;  %v764_v43 = vunpack.c.l.b16 %v700_v34  ;;  %v765_v44 = vunpack.c.l.b16 %v701_v35 }
  0x1b   : > { %v760_v46 = vunpack.c.l.b16 %v696_v36  ;;  %v761_v47 = vunpack.c.l.b16 %v697_v37  ;;  %v770_v48 = vunpack.c.l.b16 %v706_v38  ;;  %v771_v49 = vunpack.c.l.b16 %v707_v39  ;;  %v11052_v36 = vld [vmem:[%s11239_s16 + $0x50] sm:$0xff]  }
  0x1c   : > { %v11273_v51 = vpack.c.b16 %v769_v42, %v768_v41  ;;  %v11275_v52 = vpack.c.b16 %v765_v44, %v764_v43  ;;  %v10929_v53 = vunpack.c.l.bf16 %v11045_v40  ;;  %v10930_v54 = vunpack.c.h.bf16 %v11045_v40  ;;  %v11051_v41 = vld [vmem:[%s11239_s16 + $0x48] sm:$0xff]  }
  0x1d   : > { %v11278_v56 = vpack.c.b16 %v761_v47, %v760_v46  ;;  %v11280_v57 = vpack.c.b16 %v771_v49, %v770_v48  ;;  %v10921_v58 = vunpack.c.l.bf16 %v11043_v45  ;;  %v10922_v59 = vunpack.c.h.bf16 %v11043_v45 }
  0x1e   : > { %1030 = vrot.lane.b32.xlu2 %v11273_v51, %s11162_s20  ;;  %1026 = vrot.lane.b32.xlu1 %v11275_v52, %s11162_s20  ;;  %v635_v60 = vmul.f32 %v11246_v2, %v10929_v53  ;;  %v636_v61 = vmul.f32 %v11246_v2, %v10930_v54  ;;  %v10949_v62 = vunpack.c.l.bf16 %v11050_v50  ;;  %v10950_v63 = vunpack.c.h.bf16 %v11050_v50 }
  0x1f   : > { %1022 = vrot.lane.b32.xlu0 %v11278_v56, %s11162_s20  ;;  %v631_v0 = vmul.f32 %v11246_v2, %v10921_v58  ;;  %v632_v1 = vmul.f32 %v11246_v2, %v10922_v59  ;;  %v10945_v3 = vunpack.c.l.bf16 %v11049_v55  ;;  %v10946_v4 = vunpack.c.h.bf16 %v11049_v55 }
  0x20   : > { %v670_v5 = vadd.f32 %v11251_v8, %v635_v60  ;;  %v671_v6 = vadd.f32 %v11251_v8, %v636_v61  ;;  %v645_v7 = vmul.f32 %v11246_v2, %v10949_v62  ;;  %v646_v9 = vmul.f32 %v11246_v2, %v10950_v63 }
  0x21   : > { %v666_v10 = vadd.f32 %v11251_v8, %v631_v0  ;;  %v667_v11 = vadd.f32 %v11251_v8, %v632_v1  ;;  %v643_v12 = vmul.f32 %v11246_v2, %v10945_v3  ;;  %v644_v13 = vmul.f32 %v11246_v2, %v10946_v4 }
  0x22   : > { %v702_v14 = vpack.c.bf16 %v670_v5, %v670_v5  ;;  %v703_v15 = vpack.c.bf16 %v671_v6, %v671_v6  ;;  %v680_v16 = vadd.f32 %v11251_v8, %v645_v7  ;;  %v681_v17 = vadd.f32 %v11251_v8, %v646_v9  ;;  %v11056_v7 = vld [vmem:[%s11239_s16 + $0x70] sm:$0xff]  }
  0x23   : > { %v698_v18 = vpack.c.bf16 %v666_v10, %v666_v10  ;;  %v699_v19 = vpack.c.bf16 %v667_v11, %v667_v11  ;;  %v678_v20 = vadd.f32 %v11251_v8, %v643_v12  ;;  %v679_v21 = vadd.f32 %v11251_v8, %v644_v13 }
  0x24   : > { %v766_v23 = vunpack.c.l.b16 %v702_v14  ;;  %v767_v24 = vunpack.c.l.b16 %v703_v15  ;;  %v712_v25 = vpack.c.bf16 %v680_v16, %v680_v16  ;;  %v713_v26 = vpack.c.bf16 %v681_v17, %v681_v17 }
  0x25   : > { %v762_v27 = vunpack.c.l.b16 %v698_v18  ;;  %v763_v28 = vunpack.c.l.b16 %v699_v19  ;;  %v710_v29 = vpack.c.bf16 %v678_v20, %v678_v20  ;;  %v711_v30 = vpack.c.bf16 %v679_v21, %v679_v21  ;;  %v11055_v21 = vld [vmem:[%s11239_s16 + $0x68] sm:$0xff]  }
  0x26   : > { %1032 = vrot.lane.b32.xlu2 %v11280_v57, %s11162_s20  ;;  %v11308_v32 = vpack.c.b16 %v767_v24, %v766_v23  ;;  %v776_v33 = vunpack.c.l.b16 %v712_v25  ;;  %v777_v34 = vunpack.c.l.b16 %v713_v26  ;;  %v10941_v35 = vunpack.c.l.bf16 %v11048_v22  ;;  %v11054_v26 = vld [vmem:[%s11239_s16 + $0x60] sm:$0xff]  }
  0x27   : > { %v11311_v37 = vpack.c.b16 %v763_v28, %v762_v27  ;;  %v774_v38 = vunpack.c.l.b16 %v710_v29  ;;  %v775_v39 = vunpack.c.l.b16 %v711_v30  ;;  %v10942_v40 = vunpack.c.h.bf16 %v11048_v22 }
  0x28   : > { %1028 = vrot.lane.b32.xlu1 %v11308_v32, %s11162_s20  ;;  %v11316_v42 = vpack.c.b16 %v777_v34, %v776_v33  ;;  %v641_v43 = vmul.f32 %v11246_v2, %v10941_v35  ;;  %v10961_v44 = vunpack.c.l.bf16 %v11053_v31  ;;  %v10962_v45 = vunpack.c.h.bf16 %v11053_v31 }
  0x29   : > { %1024 = vrot.lane.b32.xlu0 %v11311_v37, %s11162_s20  ;;  %v11321_v46 = vpack.c.b16 %v775_v39, %v774_v38  ;;  %v642_v47 = vmul.f32 %v11246_v2, %v10942_v40  ;;  %v10957_v48 = vunpack.c.l.bf16 %v11052_v36  ;;  %v10958_v49 = vunpack.c.h.bf16 %v11052_v36 }
  0x2a   : > { %v676_v50 = vadd.f32 %v11251_v8, %v641_v43  ;;  %v651_v53 = vmul.f32 %v11246_v2, %v10961_v44  ;;  %v652_v54 = vmul.f32 %v11246_v2, %v10962_v45  ;;  %v10953_v55 = vunpack.c.l.bf16 %v11051_v41 }
  0x2b   : > { %v677_v58 = vadd.f32 %v11251_v8, %v642_v47  ;;  %v649_v59 = vmul.f32 %v11246_v2, %v10957_v48  ;;  %v650_v60 = vmul.f32 %v11246_v2, %v10958_v49  ;;  %v10954_v61 = vunpack.c.h.bf16 %v11051_v41 }
  0x2c   : > { %v708_v62 = vpack.c.bf16 %v676_v50, %v676_v50  ;;  %v686_v63 = vadd.f32 %v11251_v8, %v651_v53  ;;  %v687_v0 = vadd.f32 %v11251_v8, %v652_v54  ;;  %v647_v1 = vmul.f32 %v11246_v2, %v10953_v55 }
  0x2d   : > { %v709_v3 = vpack.c.bf16 %v677_v58, %v677_v58  ;;  %v684_v4 = vadd.f32 %v11251_v8, %v649_v59  ;;  %v685_v5 = vadd.f32 %v11251_v8, %v650_v60  ;;  %v648_v6 = vmul.f32 %v11246_v2, %v10954_v61  ;;  %v11057_v61 = vld [vmem:[%s11239_s16 + $0x78] sm:$0xff]  }
  0x2e   : > { %1038 = vrot.lane.b32.xlu2 %v11316_v42, %s11162_s20  ;;  %v772_v9 = vunpack.c.l.b16 %v708_v62  ;;  %v718_v10 = vpack.c.bf16 %v686_v63, %v686_v63  ;;  %v719_v11 = vpack.c.bf16 %v687_v0, %v687_v0  ;;  %v682_v12 = vadd.f32 %v11251_v8, %v647_v1 }
  0x2f   : > { %v773_v13 = vunpack.c.l.b16 %v709_v3  ;;  %v716_v14 = vpack.c.bf16 %v684_v4, %v684_v4  ;;  %v717_v15 = vpack.c.bf16 %v685_v5, %v685_v5  ;;  %v683_v16 = vadd.f32 %v11251_v8, %v648_v6 }
  0x30   : > { %1036 = vrot.lane.b32.xlu1 %v11321_v46, %s11162_s20  ;;  %v782_v17 = vunpack.c.l.b16 %v718_v10  ;;  %v783_v18 = vunpack.c.l.b16 %v719_v11  ;;  %v714_v19 = vpack.c.bf16 %v682_v12, %v682_v12  ;;  %v10973_v20 = vunpack.c.l.bf16 %v11056_v7 }
  0x31   : > { %v11344_v22 = vpack.c.b16 %v773_v13, %v772_v9  ;;  %v780_v23 = vunpack.c.l.b16 %v716_v14  ;;  %v781_v24 = vunpack.c.l.b16 %v717_v15  ;;  %v715_v25 = vpack.c.bf16 %v683_v16, %v683_v16 }
  0x32   : > { %v11347_v27 = vpack.c.b16 %v783_v18, %v782_v17  ;;  %v778_v28 = vunpack.c.l.b16 %v714_v19  ;;  %v10974_v29 = vunpack.c.h.bf16 %v11056_v7  ;;  %v657_v30 = vmul.f32 %v11246_v2, %v10973_v20 }
  0x33   : > { %1034 = vrot.lane.b32.xlu0 %v11344_v22, %s11162_s20  ;;  %v11352_v31 = vpack.c.b16 %v781_v24, %v780_v23  ;;  %v779_v33 = vunpack.c.l.b16 %v715_v25  ;;  %v10969_v34 = vunpack.c.l.bf16 %v11055_v21  ;;  %v10970_v35 = vunpack.c.h.bf16 %v11055_v21 }
  0x34   : > { %v658_v36 = vmul.f32 %v11246_v2, %v10974_v29  ;;  %v692_v38 = vadd.f32 %v11251_v8, %v657_v30  ;;  %v10965_v39 = vunpack.c.l.bf16 %v11054_v26  ;;  %v10966_v40 = vunpack.c.h.bf16 %v11054_v26 }
  0x35   : > { %v655_v41 = vmul.f32 %v11246_v2, %v10969_v34  ;;  %v656_v43 = vmul.f32 %v11246_v2, %v10970_v35  ;;  %v11363_v49 = vpack.c.b16 %v779_v33, %v778_v28  ;;  %v819_v54 = vshll.u32 %v11311_v37, 16 }
  0x36   : > { %1044 = vrot.lane.b32.xlu2 %v11347_v27, %s11162_s20  ;;  %v693_v44 = vadd.f32 %v11251_v8, %v658_v36  ;;  %v724_v45 = vpack.c.bf16 %v692_v38, %v692_v38  ;;  %v653_v47 = vmul.f32 %v11246_v2, %v10965_v39  ;;  %v654_v48 = vmul.f32 %v11246_v2, %v10966_v40 }
  0x37   : > { %v690_v50 = vadd.f32 %v11251_v8, %v655_v41  ;;  %v691_v53 = vadd.f32 %v11251_v8, %v656_v43  ;;  %v816_v4 = vshrl.u32 %v11311_v37, 16  ;;  %v957_v7 = vrot.slane %v819_v54, 1 }
  0x38   : > { %1042 = vrot.lane.b32.xlu1 %v11352_v31, %s11162_s20  ;;  %v725_v55 = vpack.c.bf16 %v693_v44, %v693_v44  ;;  %v788_v58 = vunpack.c.l.b16 %v724_v45  ;;  %v688_v59 = vadd.f32 %v11251_v8, %v653_v47  ;;  %v689_v60 = vadd.f32 %v11251_v8, %v654_v48 }
  0x39   : > { %v722_v62 = vpack.c.bf16 %v690_v50, %v690_v50  ;;  %v723_v63 = vpack.c.bf16 %v691_v53, %v691_v53  ;;  %v10977_v9 = vunpack.c.l.bf16 %v11057_v61  ;;  %v10978_v13 = vunpack.c.h.bf16 %v11057_v61 }
  0x3a   : > { %v789_v0 = vunpack.c.l.b16 %v725_v55  ;;  %v720_v1 = vpack.c.bf16 %v688_v59, %v688_v59  ;;  %v721_v3 = vpack.c.bf16 %v689_v60, %v689_v60  ;;  %v809_v17 = vshrl.u32 %v11278_v56, 16 }
  0x3b   : > { %1040 = vrot.lane.b32.xlu0 %v11363_v49, %s11162_s20  ;;  %v786_v5 = vunpack.c.l.b16 %v722_v62  ;;  %v787_v6 = vunpack.c.l.b16 %v723_v63  ;;  %v659_v15 = vmul.f32 %v11246_v2, %v10977_v9  ;;  %v660_v16 = vmul.f32 %v11246_v2, %v10978_v13 }
  0x3c   : > { %v11378_v10 = vpack.c.b16 %v789_v0, %v788_v58  ;;  %v784_v11 = vunpack.c.l.b16 %v720_v1  ;;  %v785_v12 = vunpack.c.l.b16 %v721_v3  ;;  %v812_v18 = vshll.u32 %v11278_v56, 16 }
  0x3d   : > { %v11380_v14 = vpack.c.b16 %v787_v6, %v786_v5  ;;  %v958_v20 = vor.u32 %v957_v7, %v816_v4  ;;  %v694_v21 = vadd.f32 %v11251_v8, %v659_v15  ;;  %v840_v23 = vshll.u32 %v11273_v51, 16 }
  0x3e   : > { %1050 = vrot.lane.b32.xlu2 %v11378_v10, %s11162_s20  ;;  %v11388_v19 = vpack.c.b16 %v785_v12, %v784_v11  ;;  %v695_v25 = vadd.f32 %v11251_v8, %v660_v16  ;;  %v955_v26 = vrot.slane %v812_v18, 1  ;;  %v833_v33 = vshll.u32 %v11308_v32, 16 }
  0x3f   : > { %v726_v28 = vpack.c.bf16 %v694_v21, %v694_v21  ;;  %v1007_v34 = vsel %vm11396_vm2, %v958_v20, 0  ;;  %v837_v36 = vshrl.u32 %v11273_v51, 16  ;;  %v963_v38 = vrot.slane %v840_v23, 1 }
  0x40   : > { %1048 = vrot.lane.b32.xlu1 %v11380_v14, %s11162_s20  ;;  %v727_v29 = vpack.c.bf16 %v695_v25, %v695_v25  ;;  %v956_v30 = vor.u32 %v955_v26, %v809_v17  ;;  %v826_v40 = vshll.u32 %v11275_v52, 16  ;;  %v830_v43 = vshrl.u32 %v11308_v32, 16 }
  0x41   : > { %v790_v35 = vunpack.c.l.b16 %v726_v28  ;;  %v961_v44 = vrot.slane %v833_v33, 1  ;;  %v964_v47 = vor.u32 %v963_v38, %v837_v36  ;;  %v861_v48 = vshll.u32 %v11321_v46, 16 }
  0x42   : > { %v791_v39 = vunpack.c.l.b16 %v727_v29  ;;  %v1006_v41 = vsel %vm11396_vm2, %v956_v30, 0  ;;  %v823_v50 = vshrl.u32 %v11275_v52, 16  ;;  %v959_v53 = vrot.slane %v826_v40, 1 }
  0x43   : > { %1046 = vrot.lane.b32.xlu0 %v11388_v19, %s11162_s20  ;;  %v962_v55 = vor.u32 %v961_v44, %v830_v43  ;;  %v854_v58 = vshll.u32 %v11344_v22, 16  ;;  %v1010_v59 = vsel %vm11396_vm2, %v964_v47, 0  ;;  %v858_v60 = vshrl.u32 %v11321_v46, 16 }
  0x44   : > { %v11420_v45 = vpack.c.b16 %v791_v39, %v790_v35  ;;  %v969_v61 = vrot.slane %v861_v48, 1  ;;  %v960_v62 = vor.u32 %v959_v53, %v823_v50  ;;  %v847_v63 = vshll.u32 %v11280_v57, 16 }
  0x45   : > { %v1009_v0 = vsel %vm11396_vm2, %v962_v55, 0  ;;  %v851_v1 = vshrl.u32 %v11344_v22, 16  ;;  %v967_v3 = vrot.slane %v854_v58, 1  ;;  %v882_v6 = vshll.u32 %v11352_v31, 16 }
  0x46   : > { %1072 = vrot.lane.b32.xlu2 %v1007_v34, %s11163_s21  ;;  %v970_v5 = vor.u32 %v969_v61, %v858_v60  ;;  %v1008_v7 = vsel %vm11396_vm2, %v960_v62, 0  ;;  %v844_v9 = vshrl.u32 %v11280_v57, 16  ;;  %v965_v11 = vrot.slane %v847_v63, 1 }
  0x47   : > { %v968_v12 = vor.u32 %v967_v3, %v851_v1  ;;  %v875_v13 = vshll.u32 %v11363_v49, 16  ;;  %v879_v16 = vshrl.u32 %v11352_v31, 16  ;;  %v975_v20 = vrot.slane %v882_v6, 1 }
  0x48   : > { %1070 = vrot.lane.b32.xlu1 %v1006_v41, %s11163_s21  ;;  %v1013_v15 = vsel %vm11396_vm2, %v970_v5, 0  ;;  %v839_v21 = vrot.slane %v837_v36, 7  ;;  %v966_v25 = vor.u32 %v965_v11, %v844_v9  ;;  %v868_v57 = vshll.u32 %v11316_v42, 16 }
  0x49   : > { %v846_v26 = vrot.slane %v844_v9, 7  ;;  %v1012_v28 = vsel %vm11396_vm2, %v968_v12, 0  ;;  %v872_v29 = vshrl.u32 %v11363_v49, 16  ;;  %v973_v30 = vrot.slane %v875_v13, 1 }
  0x4a   : > { %v976_v34 = vor.u32 %v975_v20, %v879_v16  ;;  %v903_v35 = vshll.u32 %v11380_v14, 16  ;;  %v1011_v36 = vsel %vm11396_vm2, %v966_v25, 0  ;;  %v865_v38 = vshrl.u32 %v11316_v42, 16 }
  0x4b   : > { %1052 = vrot.lane.b32.xlu0 %v11420_v45, %s11162_s20  ;;  %v971_v39 = vrot.slane %v868_v57, 1  ;;  %v842_v41 = vor.u32 %v840_v23, %v839_v21  ;;  %v974_v44 = vor.u32 %v973_v30, %v872_v29  ;;  %v896_v47 = vshll.u32 %v11388_v19, 16 }
  0x4c   : > { %v849_v53 = vor.u32 %v847_v63, %v846_v26  ;;  %v1016_v55 = vsel %vm11396_vm2, %v976_v34, 0  ;;  %v981_v42 = vrot.slane %v903_v35, 1  ;;  %v889_v51 = vshll.u32 %v11347_v27, 16 }
  0x4d   : > { %v972_v61 = vor.u32 %v971_v39, %v865_v38  ;;  %v867_v23 = vrot.slane %v865_v38, 7  ;;  %v1015_v62 = vsel %vm11396_vm2, %v974_v44, 0  ;;  %v979_v63 = vrot.slane %v896_v47, 1 }
  0x4e   : > { %1078 = vrot.lane.b32.xlu2 %v1010_v59, %s11163_s21  ;;  %v900_v59 = vshrl.u32 %v11380_v14, 16  ;;  %v977_v9 = vrot.slane %v889_v51, 1  ;;  %v917_v12 = vshll.u32 %v11420_v45, 16  ;;  %v910_v25 = vshll.u32 %v11378_v10, 16 }
  0x4f   : > { %v1014_v5 = vsel %vm11396_vm2, %v972_v61, 0  ;;  %v907_v34 = vshrl.u32 %v11378_v10, 16  ;;  %v943_v52 = vsel %vm11539_vm5, 0, %v842_v41  ;;  %v860_v56 = vrot.slane %v858_v60, 7 }
  0x50   : > { %1076 = vrot.lane.b32.xlu1 %v1009_v0, %s11163_s21  ;;  %v893_v0 = vshrl.u32 %v11388_v19, 16  ;;  %v982_v3 = vor.u32 %v981_v42, %v900_v59  ;;  %v985_v30 = vrot.slane %v917_v12, 1  ;;  %v825_v42 = vrot.slane %v823_v50, 7 }
  0x51   : > { %v832_v50 = vrot.slane %v830_v43, 7  ;;  %v11556_v43 = vor.u32 %v861_v48, %v860_v56  ;;  %v11164_v60 = vmov 0   ;;  %v853_v32 = vrot.slane %v851_v1, 7 }
  0x52   : > { %v980_v11 = vor.u32 %v979_v63, %v893_v0  ;;  %v1019_v20 = vsel %vm11396_vm2, %v982_v3, 0  ;;  %349 = vst.msk [vmem:[#allocation2 + $0x10] sm:$0xf] %vm344_vm7, %v11164_v60 }
  0x53   : > { %1074 = vrot.lane.b32.xlu0 %v1008_v7, %s11163_s21  ;;  %v886_v7 = vshrl.u32 %v11347_v27, 16  ;;  %v914_v27 = vshrl.u32 %v11420_v45, 16  ;;  %v11552_v3 = vor.u32 %v833_v33, %v832_v50  ;;  %350 = vst.msk [vmem:[#allocation2 + $0x14] sm:$0xf] %vm344_vm7, %v11164_v60  ;;  %v11584_v1 = vor.u32 %v854_v58, %v853_v32 }
  0x54   : > { %345 = vst.msk [vmem:[#allocation2] sm:$0xf] %vm344_vm7, %v11164_v60  ;;  %v902_v32 = vrot.slane %v900_v59, 7 }
  0x55   : > { %v978_v21 = vor.u32 %v977_v9, %v886_v7  ;;  %v888_v26 = vrot.slane %v886_v7, 7  ;;  %v986_v38 = vor.u32 %v985_v30, %v914_v27  ;;  %346 = vst.msk [vmem:[#allocation2 + $0x4] sm:$0xf] %vm344_vm7, %v11164_v60 }
  0x56   : > { %1084 = vrot.lane.b32.xlu2 %v1013_v15, %s11163_s21  ;;  %v870_v15 = vor.u32 %v868_v57, %v867_v23  ;;  %v909_v23 = vrot.slane %v907_v34, 7  ;;  %347 = vst.msk [vmem:[#allocation2 + $0x8] sm:$0xf] %vm344_vm7, %v11164_v60  ;;  %v905_v59 = vor.u32 %v903_v35, %v902_v32 }
  0x57   : > { %v1017_v57 = vsel %vm11396_vm2, %v978_v21, 0  ;;  %v891_v39 = vor.u32 %v889_v51, %v888_v26  ;;  %v1021_v61 = vsel %vm11396_vm2, %v986_v38, 0  ;;  %v11531_v51 = vor.u32 %v826_v40, %v825_v42  ;;  %348 = vst.msk [vmem:[#allocation2 + $0xc] sm:$0xf] %vm344_vm7, %v11164_v60 }
  0x58   : > { %1082 = vrot.lane.b32.xlu1 %v1012_v28, %s11163_s21  ;;  %v1018_v28 = vsel %vm11396_vm2, %v980_v11, 0  ;;  %v947_v46 = vsel %vm11539_vm5, 0, %v870_v15  ;;  %351 = vst.msk [vmem:[#allocation2 + $0x18] sm:$0xf] %vm344_vm7, %v11164_v60  ;;  %v952_v35 = vsel %vm11539_vm5, 0, %v905_v59 }
  0x59   : > { %352 = vst.msk [vmem:[#allocation2 + $0x1c] sm:$0xf] %vm344_vm7, %v11164_v60 }
  0x5a   : > { %353 = vst.msk [vmem:[#allocation2 + $0x20] sm:$0xf] %vm344_vm7, %v11164_v60 }
  0x5b   : > { %1080 = vrot.lane.b32.xlu0 %v1011_v36, %s11163_s21  ;;  %v983_v36 = vrot.slane %v910_v25, 1  ;;  %354 = vst.msk [vmem:[#allocation2 + $0x24] sm:$0xf] %vm344_vm7, %v11164_v60 }
  0x5c   : > { %355 = vst.msk [vmem:[#allocation2 + $0x28] sm:$0xf] %vm344_vm7, %v11164_v60 }
  0x5d   : > { %v984_v44 = vor.u32 %v983_v36, %v907_v34  ;;  %356 = vst.msk [vmem:[#allocation2 + $0x2c] sm:$0xf] %vm344_vm7, %v11164_v60 }
  0x5e   : > { %1090 = vrot.lane.b32.xlu2 %v1016_v55, %s11163_s21  ;;  %v811_v55 = vrot.slane %v809_v17, 7  ;;  %v912_v17 = vor.u32 %v910_v25, %v909_v23  ;;  %357 = vst.msk [vmem:[#allocation2 + $0x30] sm:$0xf] %vm344_vm7, %v11164_v60 }
  0x5f   : > { %v1020_v10 = vsel %vm11396_vm2, %v984_v44, 0  ;;  %358 = vst.msk [vmem:[#allocation2 + $0x34] sm:$0xf] %vm344_vm7, %v11164_v60 }
  0x60   : > { %1088 = vrot.lane.b32.xlu1 %v1015_v62, %s11163_s21  ;;  %v814_v62 = vor.u32 %v812_v18, %v811_v55  ;;  %359 = vst.msk [vmem:[#allocation2 + $0x38] sm:$0xf] %vm344_vm7, %v11164_v60  ;;  %v953_v21 = vsel %vm11539_vm5, 0, %v912_v17 }
  0x61   : > { %360 = vst.msk [vmem:[#allocation2 + $0x3c] sm:$0xf] %vm344_vm7, %v11164_v60 }
  0x62   : > { %v939_v22 = vsel %vm11539_vm5, 0, %v814_v62  ;;  %361 = vst.msk [vmem:[#allocation2 + $0x40] sm:$0xf] %vm344_vm7, %v11164_v60 }
  0x63   : > { %1086 = vrot.lane.b32.xlu0 %v1014_v5, %s11163_s21  ;;  %v944_v5 = vsel %vm11539_vm5, 0, %v849_v53  ;;  %v950_v53 = vsel %vm11539_vm5, 0, %v891_v39  ;;  %362 = vst.msk [vmem:[#allocation2 + $0x44] sm:$0xf] %vm344_vm7, %v11164_v60 }
  0x64   : > { %363 = vst.msk [vmem:[#allocation2 + $0x48] sm:$0xf] %vm344_vm7, %v11164_v60 }
  0x65   : > { %364 = vst.msk [vmem:[#allocation2 + $0x4c] sm:$0xf] %vm344_vm7, %v11164_v60 }
  0x66   : > { %1096 = vrot.lane.b32.xlu2 %v1019_v20, %s11163_s21  ;;  %v818_v20 = vrot.slane %v816_v4, 7  ;;  %365 = vst.msk [vmem:[#allocation2 + $0x50] sm:$0xf] %vm344_vm7, %v11164_v60 }
  0x67   : > { %366 = vst.msk [vmem:[#allocation2 + $0x54] sm:$0xf] %vm344_vm7, %v11164_v60 }
  0x68   : > { %1094 = vrot.lane.b32.xlu1 %v1018_v28, %s11163_s21  ;;  %v821_v4 = vor.u32 %v819_v54, %v818_v20  ;;  %367 = vst.msk [vmem:[#allocation2 + $0x58] sm:$0xf] %vm344_vm7, %v11164_v60 }
  0x69   : > { %368 = vst.msk [vmem:[#allocation2 + $0x5c] sm:$0xf] %vm344_vm7, %v11164_v60 }
  0x6a   : > { %369 = vst.msk [vmem:[#allocation2 + $0x60] sm:$0xf] %vm344_vm7, %v11164_v60  ;;  %v940_v28 = vsel %vm11539_vm5, 0, %v821_v4  ;;  %v874_v4 = vrot.slane %v872_v29, 7 }
  0x6b   : > { %1092 = vrot.lane.b32.xlu0 %v1017_v57, %s11163_s21  ;;  %370 = vst.msk [vmem:[#allocation2 + $0x64] sm:$0xf] %vm344_vm7, %v11164_v60 }
  0x6c   : > { %371 = vst.msk [vmem:[#allocation2 + $0x68] sm:$0xf] %vm344_vm7, %v11164_v60 }
  0x6d   : > { %372 = vst.msk [vmem:[#allocation2 + $0x6c] sm:$0xf] %vm344_vm7, %v11164_v60 }
  0x6e   : > { %373 = vst.msk [vmem:[#allocation2 + $0x70] sm:$0xf] %vm344_vm7, %v11164_v60 }
  0x6f   : > { %374 = vst.msk [vmem:[#allocation2 + $0x74] sm:$0xf] %vm344_vm7, %v11164_v60 }
  0x70   : > { %1100 = vrot.lane.b32.xlu1 %v1021_v61, %s11163_s21  ;;  %375 = vst.msk [vmem:[#allocation2 + $0x78] sm:$0xf] %vm344_vm7, %v11164_v60 }
  0x71   : > { %376 = vst.msk [vmem:[#allocation2 + $0x7c] sm:$0xf] %vm344_vm7, %v11164_v60 }
  0x72   : > { %377 = vst.msk [vmem:[#allocation2 + $0x80] sm:$0xf] %vm344_vm7, %v11164_v60 }
  0x73   : > { %1098 = vrot.lane.b32.xlu0 %v1020_v10, %s11163_s21  ;;  %378 = vst.msk [vmem:[#allocation2 + $0x84] sm:$0xf] %vm344_vm7, %v11164_v60 }
  0x74   : > { %379 = vst.msk [vmem:[#allocation2 + $0x88] sm:$0xf] %vm344_vm7, %v11164_v60 }
  0x75   : > { %380 = vst.msk [vmem:[#allocation2 + $0x8c] sm:$0xf] %vm344_vm7, %v11164_v60 }
  0x76   : > { %381 = vst.msk [vmem:[#allocation2 + $0x90] sm:$0xf] %vm344_vm7, %v11164_v60 }
  0x77   : > { %382 = vst.msk [vmem:[#allocation2 + $0x94] sm:$0xf] %vm344_vm7, %v11164_v60 }
  0x78   : > { %v1031_v18 = vpop.permute.xlu2 %1030  ;;  %383 = vst.msk [vmem:[#allocation2 + $0x98] sm:$0xf] %vm344_vm7, %v11164_v60 }
  0x79   : > { %v11548_v40 = vsel %vm1102_vm6, %v943_v52, %v1031_v18  ;;  %384 = vst.msk [vmem:[#allocation2 + $0x9c] sm:$0xf] %vm344_vm7, %v11164_v60 }
  0x7a   : > { %385 = vst.msk [vmem:[#allocation2 + $0xa0] sm:$0xf] %vm344_vm7, %v11164_v60 }
  0x7b   : > { %386 = vst.msk [vmem:[#allocation2 + $0xa4] sm:$0xf] %vm344_vm7, %v11164_v60 }
  0x7c   : > { %387 = vst.msk [vmem:[#allocation2 + $0xa8] sm:$0xf] %vm344_vm7, %v11164_v60 }
  0x7d   : > { %388 = vst.msk [vmem:[#allocation2 + $0xac] sm:$0xf] %vm344_vm7, %v11164_v60 }
  0x7e   : > { %389 = vst.msk [vmem:[#allocation2 + $0xb0] sm:$0xf] %vm344_vm7, %v11164_v60 }
  0x7f   : > { %390 = vst.msk [vmem:[#allocation2 + $0xb4] sm:$0xf] %vm344_vm7, %v11164_v60 }
  0x80   : > { %v1033_v41 = vpop.permute.xlu2 %1032  ;;  %391 = vst.msk [vmem:[#allocation2 + $0xb8] sm:$0xf] %vm344_vm7, %v11164_v60 }
  0x81   : > { %v11561_v7 = vsel %vm1102_vm6, %v944_v5, %v1033_v41  ;;  %392 = vst.msk [vmem:[#allocation2 + $0xbc] sm:$0xf] %vm344_vm7, %v11164_v60  ;;  %v881_v5 = vrot.slane %v879_v16, 7 }
  0x82   : > { %393 = vst.msk [vmem:[#allocation2 + $0xc0] sm:$0xf] %vm344_vm7, %v11164_v60 }
  0x83   : > { %394 = vst.msk [vmem:[#allocation2 + $0xc4] sm:$0xf] %vm344_vm7, %v11164_v60  ;;  %v884_v16 = vor.u32 %v882_v6, %v881_v5 }
  0x84   : > { %395 = vst.msk [vmem:[#allocation2 + $0xc8] sm:$0xf] %vm344_vm7, %v11164_v60 }
  0x85   : > { %396 = vst.msk [vmem:[#allocation2 + $0xcc] sm:$0xf] %vm344_vm7, %v11164_v60  ;;  %v949_v31 = vsel %vm11539_vm5, 0, %v884_v16  ;;  %v877_v16 = vor.u32 %v875_v13, %v874_v4  ;;  %v916_v4 = vrot.slane %v914_v27, 7 }
  0x86   : > { %397 = vst.msk [vmem:[#allocation2 + $0xd0] sm:$0xf] %vm344_vm7, %v11164_v60 }
  0x87   : > { %398 = vst.msk [vmem:[#allocation2 + $0xd4] sm:$0xf] %vm344_vm7, %v11164_v60 }
  0x88   : > { %v1039_v33 = vpop.permute.xlu2 %1038  ;;  %399 = vst.msk [vmem:[#allocation2 + $0xd8] sm:$0xf] %vm344_vm7, %v11164_v60 }
  0x89   : > { %v11578_v48 = vsel %vm1102_vm6, %v947_v46, %v1039_v33  ;;  %400 = vst.msk [vmem:[#allocation2 + $0xdc] sm:$0xf] %vm344_vm7, %v11164_v60  ;;  %v946_v33 = vsel %vm11539_vm5, 0, %v11556_v43 }
  0x8a   : > { %401 = vst.msk [vmem:[#allocation2 + $0xe0] sm:$0xf] %vm344_vm7, %v11164_v60 }
  0x8b   : > { %402 = vst.msk [vmem:[#allocation2 + $0xe4] sm:$0xf] %vm344_vm7, %v11164_v60 }
  0x8c   : > { %403 = vst.msk [vmem:[#allocation2 + $0xe8] sm:$0xf] %vm344_vm7, %v11164_v60 }
  0x8d   : > { %404 = vst.msk [vmem:[#allocation2 + $0xec] sm:$0xf] %vm344_vm7, %v11164_v60 }
  0x8e   : > { %405 = vst.msk [vmem:[#allocation2 + $0xf0] sm:$0xf] %vm344_vm7, %v11164_v60 }
  0x8f   : > { %406 = vst.msk [vmem:[#allocation2 + $0xf4] sm:$0xf] %vm344_vm7, %v11164_v60 }
  0x90   : > { %v1045_v58 = vpop.permute.xlu2 %1044  ;;  %v11673_v44 = vpop.permute.xlu1 %1026  ;;  %407 = vst.msk [vmem:[#allocation2 + $0xf8] sm:$0xf] %vm344_vm7, %v11164_v60 }
  0x91   : > { %v11605_v9 = vsel %vm1102_vm6, %v950_v53, %v1045_v58  ;;  %v1023_v11 = vpop.permute.xlu0 %1022  ;;  %408 = vst.msk [vmem:[#allocation2 + $0xfc] sm:$0xf] %vm344_vm7, %v11164_v60 }
  0x92   : > { %v11610_v15 = vsel %vm1102_vm6, %v939_v22, %v1023_v11  ;;  %409 = vst.msk [vmem:[#allocation2 + $0x100] sm:$0xf] %vm344_vm7, %v11164_v60 }
  0x93   : > { %410 = vst.msk [vmem:[#allocation2 + $0x104] sm:$0xf] %vm344_vm7, %v11164_v60 }
  0x94   : > { %411 = vst.msk [vmem:[#allocation2 + $0x108] sm:$0xf] %vm344_vm7, %v11164_v60 }
  0x95   : > { %412 = vst.msk [vmem:[#allocation2 + $0x10c] sm:$0xf] %vm344_vm7, %v11164_v60 }
  0x96   : > { %413 = vst.msk [vmem:[#allocation2 + $0x110] sm:$0xf] %vm344_vm7, %v11164_v60 }
  0x97   : > { %414 = vst.msk [vmem:[#allocation2 + $0x114] sm:$0xf] %vm344_vm7, %v11164_v60 }
  0x98   : > { %v1051_v25 = vpop.permute.xlu2 %1050  ;;  %415 = vst.msk [vmem:[#allocation2 + $0x118] sm:$0xf] %vm344_vm7, %v11164_v60 }
  0x99   : > { %v11631_v26 = vsel %vm1102_vm6, %v953_v21, %v1051_v25  ;;  %416 = vst.msk [vmem:[#allocation2 + $0x11c] sm:$0xf] %vm344_vm7, %v11164_v60 }
  0x9a   : > { %v11695_v55 = vpop.permute.xlu1 %1028  ;;  %417 = vst.msk [vmem:[#allocation2 + $0x120] sm:$0xf] %vm344_vm7, %v11164_v60 }
  0x9b   : > { %v1025_v30 = vpop.permute.xlu0 %1024  ;;  %418 = vst.msk [vmem:[#allocation2 + $0x124] sm:$0xf] %vm344_vm7, %v11164_v60 }
  0x9c   : > { %v1108_v37 = vsel %vm1102_vm6, %v940_v28, %v1025_v30  ;;  %419 = vst.msk [vmem:[#allocation2 + $0x128] sm:$0xf] %vm344_vm7, %v11164_v60  ;;  %v941_v28 = vsel %vm11539_vm5, 0, %v11531_v51 }
  0x9d   : > { %420 = vst.msk [vmem:[#allocation2 + $0x12c] sm:$0xf] %vm344_vm7, %v11164_v60 }
  0x9e   : > { %421 = vst.msk [vmem:[#allocation2 + $0x130] sm:$0xf] %vm344_vm7, %v11164_v60 }
  0x9f   : > { %422 = vst.msk [vmem:[#allocation2 + $0x134] sm:$0xf] %vm344_vm7, %v11164_v60 }
  0xa0   : > { %v1073_v54 = vpop.permute.xlu2 %1072  ;;  %423 = vst.msk [vmem:[#allocation2 + $0x138] sm:$0xf] %vm344_vm7, %v11164_v60 }
  0xa1   : > { %v1155_v57 = vsel %vm1151_vm8, %v1108_v37, %v1073_v54  ;;  %424 = vst.msk [vmem:[#allocation2 + $0x13c] sm:$0xf] %vm344_vm7, %v11164_v60 }
  0xa2   : > { %v1202_v34 = vunpack.c.l.b16 %v1155_v57  ;;  %v1203_v36 = vunpack.c.h.b16 %v1155_v57  ;;  %v1037_v42 = vpop.permute.xlu1 %1036  ;;  %425 = vst.msk [vmem:[#allocation2 + $0x140] sm:$0xf] %vm344_vm7, %v11164_v60  ;;  %v942_v57 = vsel %vm11539_vm5, 0, %v11552_v3  ;;  %v11866_v3 = vld [vmem:[%s14425_s5] sm:$0x1] }
  0xa3   : > { %426 = vst.msk [vmem:[#allocation2 + $0x144] sm:$0xf] %vm344_vm7, %v11164_v60  ;;  %v1126_v43 = vsel %vm1102_vm6, %v946_v33, %v1037_v42  ;;  %v1111_v42 = vsel %vm1102_vm6, %v941_v28, %v11673_v44  ;;  %v1114_v32 = vsel %vm1102_vm6, %v942_v57, %v11695_v55 }
  0xa4   : > { %v1234_v38 = vpack.c.b16 %v1202_v34, %v1202_v34  ;;  %v1235_v39 = vpack.c.b16 %v1203_v36, %v1203_v36  ;;  %427 = vst.msk [vmem:[#allocation2 + $0x148] sm:$0xf] %vm344_vm7, %v11164_v60 }
  0xa5   : > { %v11727_v61 = vpop.permute.xlu0 %1034  ;;  %428 = vst.msk [vmem:[#allocation2 + $0x14c] sm:$0xf] %vm344_vm7, %v11164_v60 }
  0xa6   : > { %1299 = vst.msk [vmem:[#allocation2 + $0x10] sm:$0xf] %vm344_vm7, %v1234_v38 }
  0xa7   : > { %1300 = vst.msk [vmem:[#allocation2 + $0x14] sm:$0xf] %vm344_vm7, %v1235_v39 }
  0xa8   : > { %v1079_v62 = vpop.permute.xlu2 %1078  ;;  %429 = vst.msk [vmem:[#allocation2 + $0x150] sm:$0xf] %vm344_vm7, %v11164_v60 }
  0xa9   : > { %430 = vst.msk [vmem:[#allocation2 + $0x154] sm:$0xf] %vm344_vm7, %v11164_v60  ;;  %v1161_v6 = vsel %vm1151_vm8, %v11548_v40, %v1079_v62 }
  0xaa   : > { %v1043_v23 = vpop.permute.xlu1 %1042  ;;  %431 = vst.msk [vmem:[#allocation2 + $0x158] sm:$0xf] %vm344_vm7, %v11164_v60  ;;  %v1208_v11 = vunpack.c.l.b16 %v1161_v6  ;;  %v1209_v14 = vunpack.c.h.b16 %v1161_v6 }
  0xab   : > { %432 = vst.msk [vmem:[#allocation2 + $0x15c] sm:$0xf] %vm344_vm7, %v11164_v60  ;;  %v1135_v58 = vsel %vm1102_vm6, %v949_v31, %v1043_v23 }
  0xac   : > { %433 = vst.msk [vmem:[#allocation2 + $0x160] sm:$0xf] %vm344_vm7, %v11164_v60  ;;  %v1240_v29 = vpack.c.b16 %v1208_v11, %v1208_v11  ;;  %v1241_v51 = vpack.c.b16 %v1209_v14, %v1209_v14  ;;  %v948_v14 = vsel %vm11539_vm5, 0, %v877_v16 }
  0xad   : > { %v11749_v10 = vpop.permute.xlu0 %1040  ;;  %434 = vst.msk [vmem:[#allocation2 + $0x164] sm:$0xf] %vm344_vm7, %v11164_v60 }
  0xae   : > { %435 = vst.msk [vmem:[#allocation2 + $0x168] sm:$0xf] %vm344_vm7, %v11164_v60 }
  0xaf   : > { %436 = vst.msk [vmem:[#allocation2 + $0x16c] sm:$0xf] %vm344_vm7, %v11164_v60 }
  0xb0   : > { %v1085_v52 = vpop.permute.xlu2 %1084  ;;  %437 = vst.msk [vmem:[#allocation2 + $0x170] sm:$0xf] %vm344_vm7, %v11164_v60 }
  0xb1   : > { %438 = vst.msk [vmem:[#allocation2 + $0x174] sm:$0xf] %vm344_vm7, %v11164_v60  ;;  %v1167_v22 = vsel %vm1151_vm8, %v1126_v43, %v1085_v52  ;;  %v11880_v52 = vld [vmem:[%s14428_s8] sm:$0x1] }
  0xb2   : > { %v1049_v17 = vpop.permute.xlu1 %1048  ;;  %439 = vst.msk [vmem:[#allocation2 + $0x178] sm:$0xf] %vm344_vm7, %v11164_v60  ;;  %v1214_v21 = vunpack.c.l.b16 %v1167_v22  ;;  %v1215_v30 = vunpack.c.h.b16 %v1167_v22 }
  0xb3   : > { %440 = vst.msk [vmem:[#allocation2 + $0x17c] sm:$0xf] %vm344_vm7, %v11164_v60  ;;  %v1144_v34 = vsel %vm1102_vm6, %v952_v35, %v1049_v17  ;;  %v11875_v17 = vld [vmem:[%s14426_s6] sm:$0x1] }
  0xb4   : > { %441 = vst.msk [vmem:[#allocation2 + $0x180] sm:$0xf] %vm344_vm7, %v11164_v60  ;;  %v1246_v23 = vpack.c.b16 %v1214_v21, %v1214_v21  ;;  %v1247_v44 = vpack.c.b16 %v1215_v30, %v1215_v30 }
  0xb5   : > { %v11767_v50 = vpop.permute.xlu0 %1046  ;;  %442 = vst.msk [vmem:[#allocation2 + $0x184] sm:$0xf] %vm344_vm7, %v11164_v60 }
  0xb6   : > { %443 = vst.msk [vmem:[#allocation2 + $0x188] sm:$0xf] %vm344_vm7, %v11164_v60 }
  0xb7   : > { %444 = vst.msk [vmem:[#allocation2 + $0x18c] sm:$0xf] %vm344_vm7, %v11164_v60 }
  0xb8   : > { %v1091_v41 = vpop.permute.xlu2 %1090  ;;  %445 = vst.msk [vmem:[#allocation2 + $0x190] sm:$0xf] %vm344_vm7, %v11164_v60 }
  0xb9   : > { %446 = vst.msk [vmem:[#allocation2 + $0x194] sm:$0xf] %vm344_vm7, %v11164_v60  ;;  %v1173_v40 = vsel %vm1151_vm8, %v1135_v58, %v1091_v41 }
  0xba   : > { %v1071_v56 = vpop.permute.xlu1 %1070  ;;  %447 = vst.msk [vmem:[#allocation2 + $0x198] sm:$0xf] %vm344_vm7, %v11164_v60  ;;  %v1220_v36 = vunpack.c.l.b16 %v1173_v40  ;;  %v1221_v38 = vunpack.c.h.b16 %v1173_v40 }
  0xbb   : > { %448 = vst.msk [vmem:[#allocation2 + $0x19c] sm:$0xf] %vm344_vm7, %v11164_v60  ;;  %v1153_v37 = vsel %vm1151_vm8, %v11610_v15, %v1071_v56  ;;  %v11861_v15 = vld [vmem:[%s14424_s4] sm:$0x1]  ;;  %v895_v56 = vrot.slane %v893_v0, 7  ;;  %v945_v0 = vsel %vm11539_vm5, 0, %v11584_v1 }
  0xbc   : > { %449 = vst.msk [vmem:[#allocation2 + $0x1a0] sm:$0xf] %vm344_vm7, %v11164_v60  ;;  %v1200_v62 = vunpack.c.l.b16 %v1153_v37  ;;  %v1201_v5 = vunpack.c.h.b16 %v1153_v37  ;;  %v1252_v33 = vpack.c.b16 %v1220_v36, %v1220_v36  ;;  %v1253_v6 = vpack.c.b16 %v1221_v38, %v1221_v38 }
  0xbd   : > { %v11785_v18 = vpop.permute.xlu0 %1052  ;;  %450 = vst.msk [vmem:[#allocation2 + $0x1a4] sm:$0xf] %vm344_vm7, %v11164_v60  ;;  %v1123_v11 = vsel %vm1102_vm6, %v945_v0, %v11727_v61  ;;  %v898_v40 = vor.u32 %v896_v47, %v895_v56  ;;  %v1132_v47 = vsel %vm1102_vm6, %v948_v14, %v11749_v10 }
  0xbe   : > { %451 = vst.msk [vmem:[#allocation2 + $0x1a8] sm:$0xf] %vm344_vm7, %v11164_v60  ;;  %v1232_v55 = vpack.c.b16 %v1200_v62, %v1200_v62  ;;  %v1233_v49 = vpack.c.b16 %v1201_v5, %v1201_v5 }
  0xbf   : > { %452 = vst.msk [vmem:[#allocation2 + $0x1ac] sm:$0xf] %vm344_vm7, %v11164_v60  ;;  %v951_v27 = vsel %vm11539_vm5, 0, %v898_v40 }
  0xc0   : > { %v1097_v25 = vpop.permute.xlu2 %1096  ;;  %1305 = vst.msk [vmem:[#allocation2 + $0x28] sm:$0xf] %vm344_vm7, %v1240_v29 }
  0xc1   : > { %v1179_v39 = vsel %vm1151_vm8, %v1144_v34, %v1097_v25  ;;  %1306 = vst.msk [vmem:[#allocation2 + $0x2c] sm:$0xf] %vm344_vm7, %v1241_v51 }
  0xc2   : > { %v11805_v46 = vpop.permute.xlu1 %1076  ;;  %v1226_v31 = vunpack.c.l.b16 %v1179_v39  ;;  %v1227_v59 = vunpack.c.h.b16 %v1179_v39  ;;  %1311 = vst.msk [vmem:[#allocation2 + $0x40] sm:$0xf] %vm344_vm7, %v1246_v23  ;;  %v1141_v23 = vsel %vm1102_vm6, %v951_v27, %v11767_v50 }
  0xc3   : > { %1312 = vst.msk [vmem:[#allocation2 + $0x44] sm:$0xf] %vm344_vm7, %v1247_v44 }
  0xc4   : > { %1317 = vst.msk [vmem:[#allocation2 + $0x58] sm:$0xf] %vm344_vm7, %v1252_v33  ;;  %v1259_v21 = vpack.c.b16 %v1227_v59, %v1227_v59 }
  0xc5   : > { %v1075_v53 = vpop.permute.xlu0 %1074  ;;  %1318 = vst.msk [vmem:[#allocation2 + $0x5c] sm:$0xf] %vm344_vm7, %v1253_v6 }
  0xc6   : > { %v1157_v41 = vsel %vm1151_vm8, %v1111_v42, %v1075_v53  ;;  %v1159_v53 = vsel %vm1151_vm8, %v1114_v32, %v11805_v46  ;;  %v1258_v46 = vpack.c.b16 %v1226_v31, %v1226_v31  ;;  %1297 = vst.msk [vmem:[#allocation2 + $0x8] sm:$0xf] %vm344_vm7, %v1232_v55 }
  0xc7   : > { %v1204_v22 = vunpack.c.l.b16 %v1157_v41  ;;  %v1205_v13 = vunpack.c.h.b16 %v1157_v41  ;;  %v1206_v35 = vunpack.c.l.b16 %v1159_v53  ;;  %v1207_v25 = vunpack.c.h.b16 %v1159_v53  ;;  %1298 = vst.msk [vmem:[#allocation2 + $0xc] sm:$0xf] %vm344_vm7, %v1233_v49 }
  0xc8   : > { %1323 = vst.msk [vmem:[#allocation2 + $0x70] sm:$0xf] %vm344_vm7, %v1258_v46 }
  0xc9   : > { %v1236_v61 = vpack.c.b16 %v1204_v22, %v1204_v22  ;;  %v1237_v30 = vpack.c.b16 %v1205_v13, %v1205_v13  ;;  %1324 = vst.msk [vmem:[#allocation2 + $0x74] sm:$0xf] %vm344_vm7, %v1259_v21  ;;  %v1239_v57 = vpack.c.b16 %v1207_v25, %v1207_v25 }
  0xca   : > { %v1083_v20 = vpop.permute.xlu1 %1082  ;;  %454 = vst.msk [vmem:[#allocation3] sm:$0xf] %vm453_vm9, %v11164_v60 }
  0xcb   : > { %1301 = vst.msk [vmem:[#allocation2 + $0x18] sm:$0xf] %vm344_vm7, %v1236_v61 }
  0xcc   : > { %1302 = vst.msk [vmem:[#allocation2 + $0x1c] sm:$0xf] %vm344_vm7, %v1237_v30 }
  0xcd   : > { %v1081_v54 = vpop.permute.xlu0 %1080  ;;  %1304 = vst.msk [vmem:[#allocation2 + $0x24] sm:$0xf] %vm344_vm7, %v1239_v57 }
  0xce   : > { %v1163_v58 = vsel %vm1151_vm8, %v11561_v7, %v1081_v54  ;;  %v1165_v7 = vsel %vm1151_vm8, %v1123_v11, %v1083_v20  ;;  %v1238_v20 = vpack.c.b16 %v1206_v35, %v1206_v35  ;;  %455 = vst.msk [vmem:[#allocation3 + $0x4] sm:$0xf] %vm453_vm9, %v11164_v60 }
  0xcf   : > { %v1210_v28 = vunpack.c.l.b16 %v1163_v58  ;;  %v1211_v37 = vunpack.c.h.b16 %v1163_v58  ;;  %v1212_v54 = vunpack.c.l.b16 %v1165_v7  ;;  %v1213_v29 = vunpack.c.h.b16 %v1165_v7  ;;  %456 = vst.msk [vmem:[#allocation3 + $0x8] sm:$0xf] %vm453_vm9, %v11164_v60 }
  0xd0   : > { %1303 = vst.msk [vmem:[#allocation2 + $0x20] sm:$0xf] %vm344_vm7, %v1238_v20 }
  0xd1   : > { %v1242_v10 = vpack.c.b16 %v1210_v28, %v1210_v28  ;;  %v1243_v38 = vpack.c.b16 %v1211_v37, %v1211_v37  ;;  %v1244_v62 = vpack.c.b16 %v1212_v54, %v1212_v54  ;;  %457 = vst.msk [vmem:[#allocation3 + $0xc] sm:$0xf] %vm453_vm9, %v11164_v60 }
  0xd2   : > { %v1089_v43 = vpop.permute.xlu1 %1088  ;;  %458 = vst.msk [vmem:[#allocation3 + $0x10] sm:$0xf] %vm453_vm9, %v11164_v60 }
  0xd3   : > { %v1171_v34 = vsel %vm1151_vm8, %v1132_v47, %v1089_v43  ;;  %1307 = vst.msk [vmem:[#allocation2 + $0x30] sm:$0xf] %vm344_vm7, %v1242_v10 }
  0xd4   : > { %v1218_v56 = vunpack.c.l.b16 %v1171_v34  ;;  %v1219_v44 = vunpack.c.h.b16 %v1171_v34  ;;  %1308 = vst.msk [vmem:[#allocation2 + $0x34] sm:$0xf] %vm344_vm7, %v1243_v38 }
  0xd5   : > { %v1087_v1 = vpop.permute.xlu0 %1086  ;;  %1309 = vst.msk [vmem:[#allocation2 + $0x38] sm:$0xf] %vm344_vm7, %v1244_v62 }
  0xd6   : > { %v1169_v19 = vsel %vm1151_vm8, %v11578_v48, %v1087_v1  ;;  %v919_v48 = vor.u32 %v917_v12, %v916_v4  ;;  %v1245_v12 = vpack.c.b16 %v1213_v29, %v1213_v29  ;;  %v1251_v6 = vpack.c.b16 %v1219_v44, %v1219_v44  ;;  %459 = vst.msk [vmem:[#allocation3 + $0x14] sm:$0xf] %vm453_vm9, %v11164_v60 }
  0xd7   : > { %v1216_v51 = vunpack.c.l.b16 %v1169_v19  ;;  %v1217_v39 = vunpack.c.h.b16 %v1169_v19  ;;  %460 = vst.msk [vmem:[#allocation3 + $0x18] sm:$0xf] %vm453_vm9, %v11164_v60 }
  0xd8   : > { %v954_v41 = vsel %vm11539_vm5, 0, %v919_v48  ;;  %1310 = vst.msk [vmem:[#allocation2 + $0x3c] sm:$0xf] %vm344_vm7, %v1245_v12 }
  0xd9   : > { %v1248_v32 = vpack.c.b16 %v1216_v51, %v1216_v51  ;;  %v1249_v16 = vpack.c.b16 %v1217_v39, %v1217_v39  ;;  %v1150_v0 = vsel %vm1102_vm6, %v954_v41, %v11785_v18  ;;  %1316 = vst.msk [vmem:[#allocation2 + $0x54] sm:$0xf] %vm344_vm7, %v1251_v6 }
  0xda   : > { %v1095_v36 = vpop.permute.xlu1 %1094  ;;  %461 = vst.msk [vmem:[#allocation3 + $0x1c] sm:$0xf] %vm453_vm9, %v11164_v60 }
  0xdb   : > { %v1177_v5 = vsel %vm1151_vm8, %v1141_v23, %v1095_v36  ;;  %1313 = vst.msk [vmem:[#allocation2 + $0x48] sm:$0xf] %vm344_vm7, %v1248_v32 }
  0xdc   : > { %v1224_v31 = vunpack.c.l.b16 %v1177_v5  ;;  %v1225_v59 = vunpack.c.h.b16 %v1177_v5  ;;  %1314 = vst.msk [vmem:[#allocation2 + $0x4c] sm:$0xf] %vm344_vm7, %v1249_v16 }
  0xdd   : > { %v1093_v42 = vpop.permute.xlu0 %1092  ;;  %462 = vst.msk [vmem:[#allocation3 + $0x20] sm:$0xf] %vm453_vm9, %v11164_v60 }
  0xde   : > { %v1175_v45 = vsel %vm1151_vm8, %v11605_v9, %v1093_v42  ;;  %v1250_v9 = vpack.c.b16 %v1218_v56, %v1218_v56  ;;  %v1256_v13 = vpack.c.b16 %v1224_v31, %v1224_v31  ;;  %v1257_v1 = vpack.c.b16 %v1225_v59, %v1225_v59  ;;  %463 = vst.msk [vmem:[#allocation3 + $0x24] sm:$0xf] %vm453_vm9, %v11164_v60 }
  0xdf   : > { %v1222_v50 = vunpack.c.l.b16 %v1175_v45  ;;  %v1223_v33 = vunpack.c.h.b16 %v1175_v45  ;;  %464 = vst.msk [vmem:[#allocation3 + $0x28] sm:$0xf] %vm453_vm9, %v11164_v60 }
  0xe0   : > { %1315 = vst.msk [vmem:[#allocation2 + $0x50] sm:$0xf] %vm344_vm7, %v1250_v9 }
  0xe1   : > { %v1254_v43 = vpack.c.b16 %v1222_v50, %v1222_v50  ;;  %v1255_v22 = vpack.c.b16 %v1223_v33, %v1223_v33  ;;  %1321 = vst.msk [vmem:[#allocation2 + $0x68] sm:$0xf] %vm344_vm7, %v1256_v13 }
  0xe2   : > { %v1101_v53 = vpop.permute.xlu1 %1100  ;;  %1322 = vst.msk [vmem:[#allocation2 + $0x6c] sm:$0xf] %vm344_vm7, %v1257_v1 }
  0xe3   : > { %v1183_v55 = vsel %vm1151_vm8, %v1150_v0, %v1101_v53  ;;  %1319 = vst.msk [vmem:[#allocation2 + $0x60] sm:$0xf] %vm344_vm7, %v1254_v43 }
  0xe4   : > { %v1230_v58 = vunpack.c.l.b16 %v1183_v55  ;;  %v1231_v46 = vunpack.c.h.b16 %v1183_v55  ;;  %1320 = vst.msk [vmem:[#allocation2 + $0x64] sm:$0xf] %vm344_vm7, %v1255_v22 }
  0xe5   : > { %v1099_v49 = vpop.permute.xlu0 %1098  ;;  %465 = vst.msk [vmem:[#allocation3 + $0x2c] sm:$0xf] %vm453_vm9, %v11164_v60 }
  0xe6   : > { %v1181_v18 = vsel %vm1151_vm8, %v11631_v26, %v1099_v49  ;;  %v1262_v21 = vpack.c.b16 %v1230_v58, %v1230_v58  ;;  %v1263_v25 = vpack.c.b16 %v1231_v46, %v1231_v46  ;;  %466 = vst.msk [vmem:[#allocation3 + $0x30] sm:$0xf] %vm453_vm9, %v11164_v60 }
  0xe7   : > { %v1228_v11 = vunpack.c.l.b16 %v1181_v18  ;;  %v1229_v14 = vunpack.c.h.b16 %v1181_v18  ;;  %467 = vst.msk [vmem:[#allocation3 + $0x34] sm:$0xf] %vm453_vm9, %v11164_v60 }
  0xe8   : > { %1327 = vst.msk [vmem:[#allocation2 + $0x80] sm:$0xf] %vm344_vm7, %v1262_v21 }
  0xe9   : > { %v1260_v35 = vpack.c.b16 %v1228_v11, %v1228_v11  ;;  %v1261_v40 = vpack.c.b16 %v1229_v14, %v1229_v14  ;;  %1328 = vst.msk [vmem:[#allocation2 + $0x84] sm:$0xf] %vm344_vm7, %v1263_v25 }
  0xea   : > { %468 = vst.msk [vmem:[#allocation3 + $0x38] sm:$0xf] %vm453_vm9, %v11164_v60 }
  0xeb   : > { %1325 = vst.msk [vmem:[#allocation2 + $0x78] sm:$0xf] %vm344_vm7, %v1260_v35 }
  0xec   : > { %1326 = vst.msk [vmem:[#allocation2 + $0x7c] sm:$0xf] %vm344_vm7, %v1261_v40 }
  0xed   : > { %469 = vst.msk [vmem:[#allocation3 + $0x3c] sm:$0xf] %vm453_vm9, %v11164_v60 }
  0xee   : > { %470 = vst.msk [vmem:[#allocation3 + $0x40] sm:$0xf] %vm453_vm9, %v11164_v60 }
  0xef   : > { %471 = vst.msk [vmem:[#allocation3 + $0x44] sm:$0xf] %vm453_vm9, %v11164_v60 }
  0xf0   : > { %472 = vst.msk [vmem:[#allocation3 + $0x48] sm:$0xf] %vm453_vm9, %v11164_v60 }
  0xf1   : > { %473 = vst.msk [vmem:[#allocation3 + $0x4c] sm:$0xf] %vm453_vm9, %v11164_v60 }
  0xf2   : > { %474 = vst.msk [vmem:[#allocation3 + $0x50] sm:$0xf] %vm453_vm9, %v11164_v60 }
  0xf3   : > { %475 = vst.msk [vmem:[#allocation3 + $0x54] sm:$0xf] %vm453_vm9, %v11164_v60 }
  0xf4   : > { %476 = vst.msk [vmem:[#allocation3 + $0x58] sm:$0xf] %vm453_vm9, %v11164_v60 }
  0xf5   : > { %477 = vst.msk [vmem:[#allocation3 + $0x5c] sm:$0xf] %vm453_vm9, %v11164_v60 }
  0xf6   : > { %478 = vst.msk [vmem:[#allocation3 + $0x60] sm:$0xf] %vm453_vm9, %v11164_v60 }
  0xf7   : > { %479 = vst.msk [vmem:[#allocation3 + $0x64] sm:$0xf] %vm453_vm9, %v11164_v60 }
  0xf8   : > { %480 = vst.msk [vmem:[#allocation3 + $0x68] sm:$0xf] %vm453_vm9, %v11164_v60 }
  0xf9   : > { %481 = vst.msk [vmem:[#allocation3 + $0x6c] sm:$0xf] %vm453_vm9, %v11164_v60 }
  0xfa   : > { %482 = vst.msk [vmem:[#allocation3 + $0x70] sm:$0xf] %vm453_vm9, %v11164_v60 }
  0xfb   : > { %483 = vst.msk [vmem:[#allocation3 + $0x74] sm:$0xf] %vm453_vm9, %v11164_v60 }
  0xfc   : > { %484 = vst.msk [vmem:[#allocation3 + $0x78] sm:$0xf] %vm453_vm9, %v11164_v60 }
  0xfd   : > { %485 = vst.msk [vmem:[#allocation3 + $0x7c] sm:$0xf] %vm453_vm9, %v11164_v60 }
  0xfe   : > { %486 = vst.msk [vmem:[#allocation3 + $0x80] sm:$0xf] %vm453_vm9, %v11164_v60 }
  0xff   : > { %487 = vst.msk [vmem:[#allocation3 + $0x84] sm:$0xf] %vm453_vm9, %v11164_v60 }
 0x100   : > { %488 = vst.msk [vmem:[#allocation3 + $0x88] sm:$0xf] %vm453_vm9, %v11164_v60 }
 0x101   : > { %489 = vst.msk [vmem:[#allocation3 + $0x8c] sm:$0xf] %vm453_vm9, %v11164_v60 }
 0x102   : > { %490 = vst.msk [vmem:[#allocation3 + $0x90] sm:$0xf] %vm453_vm9, %v11164_v60 }
 0x103   : > { %491 = vst.msk [vmem:[#allocation3 + $0x94] sm:$0xf] %vm453_vm9, %v11164_v60 }
 0x104   : > { %492 = vst.msk [vmem:[#allocation3 + $0x98] sm:$0xf] %vm453_vm9, %v11164_v60 }
 0x105   : > { %493 = vst.msk [vmem:[#allocation3 + $0x9c] sm:$0xf] %vm453_vm9, %v11164_v60 }
 0x106   : > { %494 = vst.msk [vmem:[#allocation3 + $0xa0] sm:$0xf] %vm453_vm9, %v11164_v60 }
 0x107   : > { %495 = vst.msk [vmem:[#allocation3 + $0xa4] sm:$0xf] %vm453_vm9, %v11164_v60 }
 0x108   : > { %496 = vst.msk [vmem:[#allocation3 + $0xa8] sm:$0xf] %vm453_vm9, %v11164_v60 }
 0x109   : > { %497 = vst.msk [vmem:[#allocation3 + $0xac] sm:$0xf] %vm453_vm9, %v11164_v60 }
 0x10a   : > { %498 = vst.msk [vmem:[#allocation3 + $0xb0] sm:$0xf] %vm453_vm9, %v11164_v60 }
 0x10b   : > { %499 = vst.msk [vmem:[#allocation3 + $0xb4] sm:$0xf] %vm453_vm9, %v11164_v60 }
 0x10c   : > { %500 = vst.msk [vmem:[#allocation3 + $0xb8] sm:$0xf] %vm453_vm9, %v11164_v60 }
 0x10d   : > { %501 = vst.msk [vmem:[#allocation3 + $0xbc] sm:$0xf] %vm453_vm9, %v11164_v60 }
 0x10e   : > { %502 = vst.msk [vmem:[#allocation3 + $0xc0] sm:$0xf] %vm453_vm9, %v11164_v60 }
 0x10f   : > { %503 = vst.msk [vmem:[#allocation3 + $0xc4] sm:$0xf] %vm453_vm9, %v11164_v60 }
 0x110   : > { %504 = vst.msk [vmem:[#allocation3 + $0xc8] sm:$0xf] %vm453_vm9, %v11164_v60 }
 0x111   : > { %505 = vst.msk [vmem:[#allocation3 + $0xcc] sm:$0xf] %vm453_vm9, %v11164_v60 }
 0x112   : > { %506 = vst.msk [vmem:[#allocation3 + $0xd0] sm:$0xf] %vm453_vm9, %v11164_v60 }
 0x113   : > { %507 = vst.msk [vmem:[#allocation3 + $0xd4] sm:$0xf] %vm453_vm9, %v11164_v60 }
 0x114   : > { %508 = vst.msk [vmem:[#allocation3 + $0xd8] sm:$0xf] %vm453_vm9, %v11164_v60 }
 0x115   : > { %509 = vst.msk [vmem:[#allocation3 + $0xdc] sm:$0xf] %vm453_vm9, %v11164_v60 }
 0x116   : > { %510 = vst.msk [vmem:[#allocation3 + $0xe0] sm:$0xf] %vm453_vm9, %v11164_v60 }
 0x117   : > { %511 = vst.msk [vmem:[#allocation3 + $0xe4] sm:$0xf] %vm453_vm9, %v11164_v60 }
 0x118   : > { %512 = vst.msk [vmem:[#allocation3 + $0xe8] sm:$0xf] %vm453_vm9, %v11164_v60 }
 0x119   : > { %513 = vst.msk [vmem:[#allocation3 + $0xec] sm:$0xf] %vm453_vm9, %v11164_v60 }
 0x11a   : > { %514 = vst.msk [vmem:[#allocation3 + $0xf0] sm:$0xf] %vm453_vm9, %v11164_v60 }
 0x11b   : > { %515 = vst.msk [vmem:[#allocation3 + $0xf4] sm:$0xf] %vm453_vm9, %v11164_v60 }
 0x11c   : > { %516 = vst.msk [vmem:[#allocation3 + $0xf8] sm:$0xf] %vm453_vm9, %v11164_v60 }
 0x11d   : > { %517 = vst.msk [vmem:[#allocation3 + $0xfc] sm:$0xf] %vm453_vm9, %v11164_v60 }
 0x11e   : > { %518 = vst.msk [vmem:[#allocation3 + $0x100] sm:$0xf] %vm453_vm9, %v11164_v60 }
 0x11f   : > { %519 = vst.msk [vmem:[#allocation3 + $0x104] sm:$0xf] %vm453_vm9, %v11164_v60 }
 0x120   : > { %520 = vst.msk [vmem:[#allocation3 + $0x108] sm:$0xf] %vm453_vm9, %v11164_v60 }
 0x121   : > { %521 = vst.msk [vmem:[#allocation3 + $0x10c] sm:$0xf] %vm453_vm9, %v11164_v60 }
 0x122   : > { %522 = vst.msk [vmem:[#allocation3 + $0x110] sm:$0xf] %vm453_vm9, %v11164_v60 }
 0x123   : > { %523 = vst.msk [vmem:[#allocation3 + $0x114] sm:$0xf] %vm453_vm9, %v11164_v60 }
 0x124   : > { %524 = vst.msk [vmem:[#allocation3 + $0x118] sm:$0xf] %vm453_vm9, %v11164_v60 }
 0x125   : > { %525 = vst.msk [vmem:[#allocation3 + $0x11c] sm:$0xf] %vm453_vm9, %v11164_v60 }
 0x126   : > { %526 = vst.msk [vmem:[#allocation3 + $0x120] sm:$0xf] %vm453_vm9, %v11164_v60 }
 0x127   : > { %527 = vst.msk [vmem:[#allocation3 + $0x124] sm:$0xf] %vm453_vm9, %v11164_v60 }
 0x128   : > { %528 = vst.msk [vmem:[#allocation3 + $0x128] sm:$0xf] %vm453_vm9, %v11164_v60 }
 0x129   : > { %529 = vst.msk [vmem:[#allocation3 + $0x12c] sm:$0xf] %vm453_vm9, %v11164_v60 }
 0x12a   : > { %530 = vst.msk [vmem:[#allocation3 + $0x130] sm:$0xf] %vm453_vm9, %v11164_v60 }
 0x12b   : > { %531 = vst.msk [vmem:[#allocation3 + $0x134] sm:$0xf] %vm453_vm9, %v11164_v60 }
 0x12c   : > { %532 = vst.msk [vmem:[#allocation3 + $0x138] sm:$0xf] %vm453_vm9, %v11164_v60 }
 0x12d   : > { %533 = vst.msk [vmem:[#allocation3 + $0x13c] sm:$0xf] %vm453_vm9, %v11164_v60 }
 0x12e   : > { %534 = vst.msk [vmem:[#allocation3 + $0x140] sm:$0xf] %vm453_vm9, %v11164_v60 }
 0x12f   : > { %535 = vst.msk [vmem:[#allocation3 + $0x144] sm:$0xf] %vm453_vm9, %v11164_v60 }
 0x130   : > { %536 = vst.msk [vmem:[#allocation3 + $0x148] sm:$0xf] %vm453_vm9, %v11164_v60 }
 0x131   : > { %537 = vst.msk [vmem:[#allocation3 + $0x14c] sm:$0xf] %vm453_vm9, %v11164_v60 }
 0x132   : > { %538 = vst.msk [vmem:[#allocation3 + $0x150] sm:$0xf] %vm453_vm9, %v11164_v60 }
 0x133   : > { %539 = vst.msk [vmem:[#allocation3 + $0x154] sm:$0xf] %vm453_vm9, %v11164_v60 }
 0x134   : > { %540 = vst.msk [vmem:[#allocation3 + $0x158] sm:$0xf] %vm453_vm9, %v11164_v60 }
 0x135   : > { %541 = vst.msk [vmem:[#allocation3 + $0x15c] sm:$0xf] %vm453_vm9, %v11164_v60 }
 0x136   : > { %542 = vst.msk [vmem:[#allocation3 + $0x160] sm:$0xf] %vm453_vm9, %v11164_v60 }
 0x137   : > { %543 = vst.msk [vmem:[#allocation3 + $0x164] sm:$0xf] %vm453_vm9, %v11164_v60 }
 0x138   : > { %544 = vst.msk [vmem:[#allocation3 + $0x168] sm:$0xf] %vm453_vm9, %v11164_v60 }
 0x139   : > { %545 = vst.msk [vmem:[#allocation3 + $0x16c] sm:$0xf] %vm453_vm9, %v11164_v60 }
 0x13a   : > { %546 = vst.msk [vmem:[#allocation3 + $0x170] sm:$0xf] %vm453_vm9, %v11164_v60 }
 0x13b   : > { %547 = vst.msk [vmem:[#allocation3 + $0x174] sm:$0xf] %vm453_vm9, %v11164_v60 }
 0x13c   : > { %548 = vst.msk [vmem:[#allocation3 + $0x178] sm:$0xf] %vm453_vm9, %v11164_v60 }
 0x13d   : > { %549 = vst.msk [vmem:[#allocation3 + $0x17c] sm:$0xf] %vm453_vm9, %v11164_v60 }
 0x13e   : > { %550 = vst.msk [vmem:[#allocation3 + $0x180] sm:$0xf] %vm453_vm9, %v11164_v60 }
 0x13f   : > { %551 = vst.msk [vmem:[#allocation3 + $0x184] sm:$0xf] %vm453_vm9, %v11164_v60 }
 0x140   : > { %552 = vst.msk [vmem:[#allocation3 + $0x188] sm:$0xf] %vm453_vm9, %v11164_v60 }
 0x141   : > { %553 = vst.msk [vmem:[#allocation3 + $0x18c] sm:$0xf] %vm453_vm9, %v11164_v60 }
 0x142   : > { %554 = vst.msk [vmem:[#allocation3 + $0x190] sm:$0xf] %vm453_vm9, %v11164_v60 }
 0x143   : > { %555 = vst.msk [vmem:[#allocation3 + $0x194] sm:$0xf] %vm453_vm9, %v11164_v60 }
 0x144   : > { %556 = vst.msk [vmem:[#allocation3 + $0x198] sm:$0xf] %vm453_vm9, %v11164_v60 }
 0x145   : > { %557 = vst.msk [vmem:[#allocation3 + $0x19c] sm:$0xf] %vm453_vm9, %v11164_v60 }
 0x146   : > { %558 = vst.msk [vmem:[#allocation3 + $0x1a0] sm:$0xf] %vm453_vm9, %v11164_v60 }
 0x147   : > { %559 = vst.msk [vmem:[#allocation3 + $0x1a4] sm:$0xf] %vm453_vm9, %v11164_v60 }
 0x148   : > { %560 = vst.msk [vmem:[#allocation3 + $0x1a8] sm:$0xf] %vm453_vm9, %v11164_v60 }
 0x149   : > { %561 = vst.msk [vmem:[#allocation3 + $0x1ac] sm:$0xf] %vm453_vm9, %v11164_v60 }
 0x14a LB: >> { %p8556_p4 = scmp.ge.s32.totalorder %s11160_s30, 16  ;;  %s11160_s30 = sphi %s12174_s30, %s1334_s30  }
 0x14b   : >> { %s12181_s10 = sadd.s32 (!%p8556_p4), 1, %s11160_s30 }
 0x14c   : >> { %1338 = sbr.rel (%p8556_p4) target bundleno = 1495 (0x5d7), region = 67  ;;  %p8557_p5 = scmp.ge.s32.totalorder (!%p8556_p4), %s12181_s10, 16 }
 0x151   : >> { %1343 = sbr.rel (%p8557_p5) target bundleno = 562 (0x232), region = 71  ;;  %s8558_s11 = sshll.u32 (!%p8557_p5), %s11160_s30, 7 }
 0x152   : >> { %s12186_s12 = scalar_lea.vmem (!%p8557_p5), %s11239_s16, %s8558_s11  ;;  %s1956_s14 = ssub.s32 (!%p8557_p5), 0, %s12181_s10 }
 0x153   : >> { %s8591_s1 = smin.u32 (!%p8557_p5), %s1956_s14, %s12181_s10  ;;  %s11165_s2 = smov (!%p8557_p5), 1  }
 0x154   : >> { %11116 = sdivrem.u32 (!%p8557_p5), %s8591_s1, 3  ;;  %s11166_s17 = smov (!%p8557_p5), 2  }
 0x155   : >> { %p1955_p6 = scmp.lt.s32.totalorder (!%p8557_p5), %s12181_s10, 0 }
 0x156   : >> { %v11062_v60 = vld [vmem:[%s12186_s12 + $0xa0] sm:$0xff]   ;;  %v11060_v26 = vld [vmem:[%s12186_s12 + $0x90] sm:$0xff]   ;;  %v11063_v37 = vld [vmem:[%s12186_s12 + $0xa8] sm:$0xff]  }
 0x157   : >> { %v11058_v7 = vld [vmem:[%s12186_s12 + $0x80] sm:$0xff]   ;;  %v10997_v4 = vunpack.c.l.bf16 %v11062_v60  ;;  %v10998_v61 = vunpack.c.h.bf16 %v11062_v60  ;;  %v10989_v28 = vunpack.c.l.bf16 %v11060_v26  ;;  %v10990_v30 = vunpack.c.h.bf16 %v11060_v26  ;;  %v11061_v31 = vld [vmem:[%s12186_s12 + $0x98] sm:$0xff]   ;;  %v11059_v43 = vld [vmem:[%s12186_s12 + $0x88] sm:$0xff]  }
 0x158   : >> { %v10981_v19 = vunpack.c.l.bf16 %v11058_v7  ;;  %v10982_v47 = vunpack.c.h.bf16 %v11058_v7  ;;  %v11001_v20 = vunpack.c.l.bf16 %v11063_v37  ;;  %v11002_v54 = vunpack.c.h.bf16 %v11063_v37  ;;  %v11066_v18 = vld [vmem:[%s12186_s12 + $0xc0] sm:$0xff]   ;;  %v11065_v46 = vld [vmem:[%s12186_s12 + $0xb8] sm:$0xff]  }
 0x159   : >> { %v1419_v27 = vmul.f32 %v11246_v2, %v10997_v4  ;;  %v1420_v57 = vmul.f32 %v11246_v2, %v10998_v61  ;;  %v1415_v29 = vmul.f32 %v11246_v2, %v10989_v28  ;;  %v1416_v34 = vmul.f32 %v11246_v2, %v10990_v30 }
 0x15a   : >> { %v1411_v36 = vmul.f32 %v11246_v2, %v10981_v19  ;;  %v1412_v48 = vmul.f32 %v11246_v2, %v10982_v47  ;;  %v1421_v10 = vmul.f32 %v11246_v2, %v11001_v20  ;;  %v1422_v51 = vmul.f32 %v11246_v2, %v11002_v54 }
 0x15b   : >> { %v1451_v38 = vadd.f32 %v11251_v8, %v1419_v27  ;;  %v1452_v39 = vadd.f32 %v11251_v8, %v1420_v57  ;;  %v1447_v42 = vadd.f32 %v11251_v8, %v1415_v29  ;;  %v1448_v23 = vadd.f32 %v11251_v8, %v1416_v34 }
 0x15c   : >> { %v1443_v62 = vadd.f32 %v11251_v8, %v1411_v36  ;;  %v1444_v56 = vadd.f32 %v11251_v8, %v1412_v48  ;;  %v1453_v45 = vadd.f32 %v11251_v8, %v1421_v10  ;;  %v1454_v12 = vadd.f32 %v11251_v8, %v1422_v51 }
 0x15d   : >> { %v1483_v44 = vpack.c.bf16 %v1451_v38, %v1451_v38  ;;  %v1484_v5 = vpack.c.bf16 %v1452_v39, %v1452_v39  ;;  %v1479_v41 = vpack.c.bf16 %v1447_v42, %v1447_v42  ;;  %v1480_v32 = vpack.c.bf16 %v1448_v23, %v1448_v23  ;;  %s11117_s15 = spop.drf %11116 }
 0x15e   : >> { %v1475_v50 = vpack.c.bf16 %v1443_v62, %v1443_v62  ;;  %v1476_v16 = vpack.c.bf16 %v1444_v56, %v1444_v56  ;;  %v1485_v33 = vpack.c.bf16 %v1453_v45, %v1453_v45  ;;  %v1486_v9 = vpack.c.bf16 %v1454_v12, %v1454_v12  ;;  %v11064_v62 = vld [vmem:[%s12186_s12 + $0xb0] sm:$0xff]   ;;  %s11118_s18 = spop.drf %11116 }
 0x15f   : >> { %v1547_v0 = vunpack.c.l.b16 %v1483_v44  ;;  %v1548_v6 = vunpack.c.l.b16 %v1484_v5  ;;  %v1543_v59 = vunpack.c.l.b16 %v1479_v41  ;;  %v1544_v53 = vunpack.c.l.b16 %v1480_v32  ;;  %s1960_s20 = ssub.s32 0, %s11118_s18 }
 0x160   : >> { %v1539_v55 = vunpack.c.l.b16 %v1475_v50  ;;  %v1540_v22 = vunpack.c.l.b16 %v1476_v16  ;;  %v1549_v49 = vunpack.c.l.b16 %v1485_v33  ;;  %v1550_v13 = vunpack.c.l.b16 %v1486_v9  ;;  %v11069_v16 = vld [vmem:[%s12186_s12 + $0xd8] sm:$0xff]   ;;  %s14438_s20 = smov (!%p1955_p6, %s1960_s20), %s11118_s18 }
 0x161   : >> { %v12213_v58 = vpack.c.b16 %v1548_v6, %v1547_v0  ;;  %v12215_v1 = vpack.c.b16 %v1544_v53, %v1543_v59  ;;  %v10993_v11 = vunpack.c.l.bf16 %v11061_v31  ;;  %v10994_v14 = vunpack.c.h.bf16 %v11061_v31  ;;  %v11068_v6 = vld [vmem:[%s12186_s12 + $0xd0] sm:$0xff]   ;;  %p8593_p7 = scmp.lt.s32.totalorder %s14438_s20, 0  ;;  %s1966_s21 = sadd.s32 3, %s14438_s20 }
 0x162   : >> { %v12218_v35 = vpack.c.b16 %v1540_v22, %v1539_v55  ;;  %v12220_v40 = vpack.c.b16 %v1550_v13, %v1549_v49  ;;  %v10985_v21 = vunpack.c.l.bf16 %v11059_v43  ;;  %v10986_v25 = vunpack.c.h.bf16 %v11059_v43  ;;  %v11067_v22 = vld [vmem:[%s12186_s12 + $0xc8] sm:$0xff]  }
 0x163   : >> { %1803 = vrot.lane.b32.xlu2 %v12213_v58, %s11165_s2  ;;  %1799 = vrot.lane.b32.xlu1 %v12215_v1, %s11165_s2  ;;  %v1417_v60 = vmul.f32 %v11246_v2, %v10993_v11  ;;  %v1418_v26 = vmul.f32 %v11246_v2, %v10994_v14  ;;  %v11013_v7 = vunpack.c.l.bf16 %v11066_v18  ;;  %v11014_v4 = vunpack.c.h.bf16 %v11066_v18  ;;  %s14440_s21 = smov (!%p8593_p7, %s1966_s21), %s14438_s20 }
 0x164   : >> { %1795 = vrot.lane.b32.xlu0 %v12218_v35, %s11165_s2  ;;  %v1413_v61 = vmul.f32 %v11246_v2, %v10985_v21  ;;  %v1414_v28 = vmul.f32 %v11246_v2, %v10986_v25  ;;  %v11009_v30 = vunpack.c.l.bf16 %v11065_v46  ;;  %v11010_v37 = vunpack.c.h.bf16 %v11065_v46  ;;  %s8594_s22 = smul.u32 144, %s14440_s21 }
 0x165   : >> { %v1449_v19 = vadd.f32 %v11251_v8, %v1417_v60  ;;  %v1450_v47 = vadd.f32 %v11251_v8, %v1418_v26  ;;  %v1427_v20 = vmul.f32 %v11246_v2, %v11013_v7  ;;  %v1428_v54 = vmul.f32 %v11246_v2, %v11014_v4 }
 0x166   : >> { %v1445_v27 = vadd.f32 %v11251_v8, %v1413_v61  ;;  %v1446_v57 = vadd.f32 %v11251_v8, %v1414_v28  ;;  %v1425_v29 = vmul.f32 %v11246_v2, %v11009_v30  ;;  %v1426_v34 = vmul.f32 %v11246_v2, %v11010_v37  ;;  %s12530_s23 = scalar_lea.vmem [#allocation2], %s8594_s22 }
 0x167   : >> { %v1481_v36 = vpack.c.bf16 %v1449_v19, %v1449_v19  ;;  %v1482_v48 = vpack.c.bf16 %v1450_v47, %v1450_v47  ;;  %v1459_v10 = vadd.f32 %v11251_v8, %v1427_v20  ;;  %v1460_v51 = vadd.f32 %v11251_v8, %v1428_v54 }
 0x168   : >> { %v1477_v38 = vpack.c.bf16 %v1445_v27, %v1445_v27  ;;  %v1478_v39 = vpack.c.bf16 %v1446_v57, %v1446_v57  ;;  %v1457_v42 = vadd.f32 %v11251_v8, %v1425_v29  ;;  %v1458_v23 = vadd.f32 %v11251_v8, %v1426_v34 }
 0x169   : >> { %v1545_v56 = vunpack.c.l.b16 %v1481_v36  ;;  %v1546_v45 = vunpack.c.l.b16 %v1482_v48  ;;  %v1491_v12 = vpack.c.bf16 %v1459_v10, %v1459_v10  ;;  %v1492_v44 = vpack.c.bf16 %v1460_v51, %v1460_v51  ;;  %v11072_v36 = vld [vmem:[%s12186_s12 + $0xf0] sm:$0xff]  }
 0x16a   : >> { %v1541_v5 = vunpack.c.l.b16 %v1477_v38  ;;  %v1542_v41 = vunpack.c.l.b16 %v1478_v39  ;;  %v1489_v32 = vpack.c.bf16 %v1457_v42, %v1457_v42  ;;  %v1490_v50 = vpack.c.bf16 %v1458_v23, %v1458_v23 }
 0x16b   : >> { %1805 = vrot.lane.b32.xlu2 %v12220_v40, %s11165_s2  ;;  %v12248_v33 = vpack.c.b16 %v1546_v45, %v1545_v56  ;;  %v1555_v9 = vunpack.c.l.b16 %v1491_v12  ;;  %v1556_v31 = vunpack.c.l.b16 %v1492_v44  ;;  %v11005_v0 = vunpack.c.l.bf16 %v11064_v62 }
 0x16c   : >> { %v12251_v59 = vpack.c.b16 %v1542_v41, %v1541_v5  ;;  %v1553_v53 = vunpack.c.l.b16 %v1489_v32  ;;  %v1554_v43 = vunpack.c.l.b16 %v1490_v50  ;;  %v11006_v55 = vunpack.c.h.bf16 %v11064_v62  ;;  %v11071_v5 = vld [vmem:[%s12186_s12 + $0xe8] sm:$0xff]  }
 0x16d   : >> { %1801 = vrot.lane.b32.xlu1 %v12248_v33, %s11165_s2  ;;  %v12256_v49 = vpack.c.b16 %v1556_v31, %v1555_v9  ;;  %v1423_v13 = vmul.f32 %v11246_v2, %v11005_v0  ;;  %v11025_v18 = vunpack.c.l.bf16 %v11069_v16  ;;  %v11026_v11 = vunpack.c.h.bf16 %v11069_v16  ;;  %v11070_v9 = vld [vmem:[%s12186_s12 + $0xe0] sm:$0xff]  }
 0x16e   : >> { %1797 = vrot.lane.b32.xlu0 %v12251_v59, %s11165_s2  ;;  %v12261_v14 = vpack.c.b16 %v1554_v43, %v1553_v53  ;;  %v1424_v46 = vmul.f32 %v11246_v2, %v11006_v55  ;;  %v11021_v21 = vunpack.c.l.bf16 %v11068_v6  ;;  %v11022_v25 = vunpack.c.h.bf16 %v11068_v6 }
 0x16f   : >> { %v1455_v60 = vadd.f32 %v11251_v8, %v1423_v13  ;;  %v1433_v26 = vmul.f32 %v11246_v2, %v11025_v18  ;;  %v1434_v7 = vmul.f32 %v11246_v2, %v11026_v11  ;;  %v11017_v4 = vunpack.c.l.bf16 %v11067_v22 }
 0x170   : >> { %v1456_v61 = vadd.f32 %v11251_v8, %v1424_v46  ;;  %v1431_v28 = vmul.f32 %v11246_v2, %v11021_v21  ;;  %v1432_v30 = vmul.f32 %v11246_v2, %v11022_v25  ;;  %v11018_v37 = vunpack.c.h.bf16 %v11067_v22  ;;  %v11073_v25 = vld [vmem:[%s12186_s12 + $0xf8] sm:$0xff]  }
 0x171   : >> { %v1487_v19 = vpack.c.bf16 %v1455_v60, %v1455_v60  ;;  %v1465_v47 = vadd.f32 %v11251_v8, %v1433_v26  ;;  %v1466_v20 = vadd.f32 %v11251_v8, %v1434_v7  ;;  %v1429_v54 = vmul.f32 %v11246_v2, %v11017_v4 }
 0x172   : >> { %v1488_v27 = vpack.c.bf16 %v1456_v61, %v1456_v61  ;;  %v1463_v57 = vadd.f32 %v11251_v8, %v1431_v28  ;;  %v1464_v29 = vadd.f32 %v11251_v8, %v1432_v30  ;;  %v1430_v34 = vmul.f32 %v11246_v2, %v11018_v37 }
 0x173   : >> { %1811 = vrot.lane.b32.xlu2 %v12256_v49, %s11165_s2  ;;  %v1551_v48 = vunpack.c.l.b16 %v1487_v19  ;;  %v1497_v10 = vpack.c.bf16 %v1465_v47, %v1465_v47  ;;  %v1498_v51 = vpack.c.bf16 %v1466_v20, %v1466_v20  ;;  %v1461_v38 = vadd.f32 %v11251_v8, %v1429_v54 }
 0x174   : >> { %v1552_v39 = vunpack.c.l.b16 %v1488_v27  ;;  %v1495_v42 = vpack.c.bf16 %v1463_v57, %v1463_v57  ;;  %v1496_v23 = vpack.c.bf16 %v1464_v29, %v1464_v29  ;;  %v1462_v62 = vadd.f32 %v11251_v8, %v1430_v34 }
 0x175   : >> { %1809 = vrot.lane.b32.xlu1 %v12261_v14, %s11165_s2  ;;  %v1561_v56 = vunpack.c.l.b16 %v1497_v10  ;;  %v1562_v45 = vunpack.c.l.b16 %v1498_v51  ;;  %v1493_v12 = vpack.c.bf16 %v1461_v38, %v1461_v38  ;;  %v11037_v44 = vunpack.c.l.bf16 %v11072_v36 }
 0x176   : >> { %v12284_v41 = vpack.c.b16 %v1552_v39, %v1551_v48  ;;  %v1559_v32 = vunpack.c.l.b16 %v1495_v42  ;;  %v1560_v50 = vunpack.c.l.b16 %v1496_v23  ;;  %v1494_v16 = vpack.c.bf16 %v1462_v62, %v1462_v62 }
 0x177   : >> { %v12287_v31 = vpack.c.b16 %v1562_v45, %v1561_v56  ;;  %v1557_v0 = vunpack.c.l.b16 %v1493_v12  ;;  %v11038_v6 = vunpack.c.h.bf16 %v11072_v36  ;;  %v1439_v53 = vmul.f32 %v11246_v2, %v11037_v44 }
 0x178   : >> { %1807 = vrot.lane.b32.xlu0 %v12284_v41, %s11165_s2  ;;  %v12292_v43 = vpack.c.b16 %v1560_v50, %v1559_v32  ;;  %v1558_v55 = vunpack.c.l.b16 %v1494_v16  ;;  %v11033_v22 = vunpack.c.l.bf16 %v11071_v5  ;;  %v11034_v13 = vunpack.c.h.bf16 %v11071_v5 }
 0x179   : >> { %v1440_v18 = vmul.f32 %v11246_v2, %v11038_v6  ;;  %v1471_v11 = vadd.f32 %v11251_v8, %v1439_v53  ;;  %v11029_v46 = vunpack.c.l.bf16 %v11070_v9  ;;  %v11030_v21 = vunpack.c.h.bf16 %v11070_v9 }
 0x17a   : >> { %v12297_v60 = vpack.c.b16 %v1558_v55, %v1557_v0  ;;  %v1437_v26 = vmul.f32 %v11246_v2, %v11033_v22  ;;  %v1438_v7 = vmul.f32 %v11246_v2, %v11034_v13  ;;  %v1595_v4 = vshrl.u32 %v12251_v59, 16 }
 0x17b   : >> { %1817 = vrot.lane.b32.xlu2 %v12287_v31, %s11165_s2  ;;  %v1472_v61 = vadd.f32 %v11251_v8, %v1440_v18  ;;  %v1503_v28 = vpack.c.bf16 %v1471_v11, %v1471_v11  ;;  %v1435_v30 = vmul.f32 %v11246_v2, %v11029_v46  ;;  %v1436_v37 = vmul.f32 %v11246_v2, %v11030_v21 }
 0x17c   : >> { %v1469_v19 = vadd.f32 %v11251_v8, %v1437_v26  ;;  %v1470_v47 = vadd.f32 %v11251_v8, %v1438_v7  ;;  %v1598_v20 = vshll.u32 %v12251_v59, 16  ;;  %v11041_v54 = vunpack.c.l.bf16 %v11073_v25 }
 0x17d   : >> { %1815 = vrot.lane.b32.xlu1 %v12292_v43, %s11165_s2  ;;  %v1504_v27 = vpack.c.bf16 %v1472_v61, %v1472_v61  ;;  %v1567_v57 = vunpack.c.l.b16 %v1503_v28  ;;  %v1467_v29 = vadd.f32 %v11251_v8, %v1435_v30  ;;  %v1468_v34 = vadd.f32 %v11251_v8, %v1436_v37 }
 0x17e   : >> { %v1501_v36 = vpack.c.bf16 %v1469_v19, %v1469_v19  ;;  %v1502_v48 = vpack.c.bf16 %v1470_v47, %v1470_v47  ;;  %v1733_v10 = vrot.slane %v1598_v20, 1  ;;  %v11042_v51 = vunpack.c.h.bf16 %v11073_v25 }
 0x17f   : >> { %v1568_v38 = vunpack.c.l.b16 %v1504_v27  ;;  %v1499_v39 = vpack.c.bf16 %v1467_v29, %v1467_v29  ;;  %v1500_v42 = vpack.c.bf16 %v1468_v34, %v1468_v34  ;;  %v1441_v23 = vmul.f32 %v11246_v2, %v11041_v54 }
 0x180   : >> { %1813 = vrot.lane.b32.xlu0 %v12297_v60, %s11165_s2  ;;  %v1565_v62 = vunpack.c.l.b16 %v1501_v36  ;;  %v1566_v56 = vunpack.c.l.b16 %v1502_v48  ;;  %v1442_v45 = vmul.f32 %v11246_v2, %v11042_v51  ;;  %v1734_v9 = vor.u32 %v1733_v10, %v1595_v4 }
 0x181   : >> { %v12320_v12 = vpack.c.b16 %v1568_v38, %v1567_v57  ;;  %v1563_v44 = vunpack.c.l.b16 %v1499_v39  ;;  %v1564_v5 = vunpack.c.l.b16 %v1500_v42  ;;  %v1473_v32 = vadd.f32 %v11251_v8, %v1441_v23 }
 0x182   : >> { %v12323_v50 = vpack.c.b16 %v1566_v56, %v1565_v62  ;;  %v1474_v16 = vadd.f32 %v11251_v8, %v1442_v45  ;;  %v1588_v0 = vshrl.u32 %v12218_v35, 16  ;;  %v1591_v6 = vshll.u32 %v12218_v35, 16 }
 0x183   : >> { %1823 = vrot.lane.b32.xlu2 %v12320_v12, %s11165_s2  ;;  %v12332_v53 = vpack.c.b16 %v1564_v5, %v1563_v44  ;;  %v1505_v55 = vpack.c.bf16 %v1473_v32, %v1473_v32  ;;  %v1619_v13 = vshll.u32 %v12213_v58, 16  ;;  %v1612_v11 = vshll.u32 %v12248_v33, 16 }
 0x184   : >> { %v1506_v22 = vpack.c.bf16 %v1474_v16, %v1474_v16  ;;  %v1731_v18 = vrot.slane %v1591_v6, 1  ;;  %v1780_v46 = vsel %vm11396_vm2, %v1734_v9, 0  ;;  %v1616_v7 = vshrl.u32 %v12213_v58, 16 }
 0x185   : >> { %1821 = vrot.lane.b32.xlu1 %v12323_v50, %s11165_s2  ;;  %v1569_v25 = vunpack.c.l.b16 %v1505_v55  ;;  %v1739_v61 = vrot.slane %v1619_v13, 1  ;;  %v1605_v28 = vshll.u32 %v12215_v1, 16  ;;  %v1609_v37 = vshrl.u32 %v12248_v33, 16 }
 0x186   : >> { %v1732_v21 = vor.u32 %v1731_v18, %v1588_v0  ;;  %v1570_v26 = vunpack.c.l.b16 %v1506_v22  ;;  %v1737_v19 = vrot.slane %v1612_v11, 1  ;;  %v1640_v27 = vshll.u32 %v12261_v14, 16 }
 0x187   : >> { %v1740_v54 = vor.u32 %v1739_v61, %v1616_v7  ;;  %v1602_v57 = vshrl.u32 %v12215_v1, 16  ;;  %v1735_v29 = vrot.slane %v1605_v28, 1  ;;  %v1633_v36 = vshll.u32 %v12284_v41, 16 }
 0x188   : >> { %1819 = vrot.lane.b32.xlu0 %v12332_v53, %s11165_s2  ;;  %v1779_v30 = vsel %vm11396_vm2, %v1732_v21, 0  ;;  %v12356_v47 = vpack.c.b16 %v1570_v26, %v1569_v25  ;;  %v1738_v34 = vor.u32 %v1737_v19, %v1609_v37  ;;  %v1637_v10 = vshrl.u32 %v12261_v14, 16 }
 0x189   : >> { %v1783_v48 = vsel %vm11396_vm2, %v1740_v54, 0  ;;  %v1745_v51 = vrot.slane %v1640_v27, 1  ;;  %v1736_v38 = vor.u32 %v1735_v29, %v1602_v57  ;;  %v1626_v39 = vshll.u32 %v12220_v40, 16 }
 0x18a   : >> { %v1782_v42 = vsel %vm11396_vm2, %v1738_v34, 0  ;;  %v1630_v23 = vshrl.u32 %v12284_v41, 16  ;;  %v1743_v62 = vrot.slane %v1633_v36, 1  ;;  %v1661_v45 = vshll.u32 %v12292_v43, 16 }
 0x18b   : >> { %1845 = vrot.lane.b32.xlu2 %v1780_v46, %s11166_s17  ;;  %v1746_v56 = vor.u32 %v1745_v51, %v1637_v10  ;;  %v1781_v44 = vsel %vm11396_vm2, %v1736_v38, 0  ;;  %v1623_v5 = vshrl.u32 %v12220_v40, 16  ;;  %v1741_v32 = vrot.slane %v1626_v39, 1 }
 0x18c   : >> { %v1744_v16 = vor.u32 %v1743_v62, %v1630_v23  ;;  %v1654_v9 = vshll.u32 %v12297_v60, 16  ;;  %v1658_v22 = vshrl.u32 %v12292_v43, 16  ;;  %v1751_v18 = vrot.slane %v1661_v45, 1 }
 0x18d   : >> { %1843 = vrot.lane.b32.xlu1 %v1779_v30, %s11166_s17  ;;  %v1786_v55 = vsel %vm11396_vm2, %v1746_v56, 0  ;;  %v1742_v46 = vor.u32 %v1741_v32, %v1623_v5  ;;  %v1647_v21 = vshll.u32 %v12256_v49, 16  ;;  %v1651_v25 = vshrl.u32 %v12297_v60, 16 }
 0x18e   : >> { %v1785_v40 = vsel %vm11396_vm2, %v1744_v16, 0  ;;  %v1749_v26 = vrot.slane %v1654_v9, 1  ;;  %v1752_v61 = vor.u32 %v1751_v18, %v1658_v22  ;;  %v1682_v30 = vshll.u32 %v12323_v50, 16 }
 0x18f   : >> { %v1784_v19 = vsel %vm11396_vm2, %v1742_v46, 0  ;;  %v1644_v54 = vshrl.u32 %v12256_v49, 16  ;;  %v1747_v29 = vrot.slane %v1647_v21, 1  ;;  %v1618_v34 = vrot.slane %v1616_v7, 7 }
 0x190   : >> { %1825 = vrot.lane.b32.xlu0 %v12356_v47, %s11165_s2  ;;  %v1675_v51 = vshll.u32 %v12332_v53, 16  ;;  %v1625_v38 = vrot.slane %v1623_v5, 7  ;;  %v1789_v62 = vsel %vm11396_vm2, %v1752_v61, 0  ;;  %v1679_v56 = vshrl.u32 %v12323_v50, 16 }
 0x191   : >> { %v1757_v49 = vrot.slane %v1682_v30, 1  ;;  %v1668_v32 = vshll.u32 %v12287_v31, 16  ;;  %v1672_v58 = vshrl.u32 %v12332_v53, 16 }
 0x192   : >> { %v1628_v7 = vor.u32 %v1626_v39, %v1625_v38  ;;  %v1665_v39 = vshrl.u32 %v12287_v31, 16  ;;  %v1693_v31 = vshrl.u32 %v12356_v47, 16 }
 0x193   : >> { %1851 = vrot.lane.b32.xlu2 %v1783_v48, %s11166_s17  ;;  %v1750_v48 = vor.u32 %v1749_v26, %v1651_v25  ;;  %v1758_v16 = vor.u32 %v1757_v49, %v1679_v56  ;;  %v1753_v18 = vrot.slane %v1668_v32, 1  ;;  %v1646_v26 = vrot.slane %v1644_v54, 7 }
 0x194   : >> { %v1720_v1 = vsel %vm11539_vm5, 0, %v1628_v7 }
 0x195   : >> { %1849 = vrot.lane.b32.xlu1 %v1782_v42, %s11166_s17  ;;  %v12417_v42 = vor.u32 %v1619_v13, %v1618_v34  ;;  %v1788_v5 = vsel %vm11396_vm2, %v1750_v48, 0  ;;  %v1755_v13 = vrot.slane %v1675_v51, 1  ;;  %v1792_v61 = vsel %vm11396_vm2, %v1758_v16, 0 }
 0x196   : >> { %v1689_v34 = vshll.u32 %v12320_v12, 16 }
 0x197   : >> { %v1756_v46 = vor.u32 %v1755_v13, %v1672_v58  ;;  %v1719_v59 = vsel %vm11539_vm5, 0, %v12417_v42 }
 0x198   : >> { %1847 = vrot.lane.b32.xlu0 %v1781_v44, %s11166_s17  ;;  %v1748_v44 = vor.u32 %v1747_v29, %v1644_v54  ;;  %v1754_v29 = vor.u32 %v1753_v18, %v1665_v39  ;;  %v1590_v18 = vrot.slane %v1588_v0, 7 }
 0x199   : >> { %v1791_v48 = vsel %vm11396_vm2, %v1756_v46, 0 }
 0x19a   : >> { %v1790_v54 = vsel %vm11396_vm2, %v1754_v29, 0  ;;  %v1639_v29 = vrot.slane %v1637_v10, 7 }
 0x19b   : >> { %1857 = vrot.lane.b32.xlu2 %v1786_v55, %s11166_s17  ;;  %v1787_v55 = vsel %vm11396_vm2, %v1748_v44, 0  ;;  %v1667_v44 = vrot.slane %v1665_v39, 7  ;;  %v12474_v39 = vor.u32 %v1591_v6, %v1590_v18 }
 0x19c   : >> { %v1642_v35 = vor.u32 %v1640_v27, %v1639_v29 }
 0x19d   : >> { %1855 = vrot.lane.b32.xlu1 %v1785_v40, %s11166_s17  ;;  %v1696_v40 = vshll.u32 %v12356_v47, 16  ;;  %v1715_v43 = vsel %vm11539_vm5, 0, %v12474_v39 }
 0x19f   : >> { %v1761_v38 = vrot.slane %v1696_v40, 1 }
 0x1a0   : >> { %1853 = vrot.lane.b32.xlu0 %v1784_v19, %s11166_s17  ;;  %v1649_v19 = vor.u32 %v1647_v21, %v1646_v26  ;;  %v1686_v21 = vshrl.u32 %v12320_v12, 16  ;;  %v1604_v12 = vrot.slane %v1602_v57, 7  ;;  %v1611_v57 = vrot.slane %v1609_v37, 7 }
 0x1a1   : >> { %v1762_v49 = vor.u32 %v1761_v38, %v1693_v31  ;;  %v1632_v37 = vrot.slane %v1630_v23, 7  ;;  %v1597_v23 = vrot.slane %v1595_v4, 7 }
 0x1a2   : >> { %v1688_v46 = vrot.slane %v1686_v21, 7  ;;  %v12480_v0 = vor.u32 %v1612_v11, %v1611_v57  ;;  %v1723_v11 = vsel %vm11539_vm5, 0, %v1649_v19 }
 0x1a3   : >> { %1863 = vrot.lane.b32.xlu2 %v1789_v62, %s11166_s17  ;;  %v1759_v62 = vrot.slane %v1689_v34, 1  ;;  %v1794_v16 = vsel %vm11396_vm2, %v1762_v49, 0  ;;  %v12495_v33 = vor.u32 %v1633_v36, %v1632_v37 }
 0x1a4   : >> { %v1691_v26 = vor.u32 %v1689_v34, %v1688_v46 }
 0x1a5   : >> { %1861 = vrot.lane.b32.xlu1 %v1788_v5, %s11166_s17  ;;  %v1670_v5 = vor.u32 %v1668_v32, %v1667_v44  ;;  %v1760_v13 = vor.u32 %v1759_v62, %v1686_v21  ;;  %v12470_v32 = vor.u32 %v1605_v28, %v1604_v12 }
 0x1a6   : >> { %v1729_v19 = vsel %vm11539_vm5, 0, %v1691_v26 }
 0x1a7   : >> { %v1726_v14 = vsel %vm11539_vm5, 0, %v1670_v5 }
 0x1a8   : >> { %1859 = vrot.lane.b32.xlu0 %v1787_v55, %s11166_s17  ;;  %v1793_v55 = vsel %vm11396_vm2, %v1760_v13, 0 }
 0x1ab   : >> { %1869 = vrot.lane.b32.xlu2 %v1792_v61, %s11166_s17 }
 0x1ad   : >> { %1867 = vrot.lane.b32.xlu1 %v1791_v48, %s11166_s17 }
 0x1b0   : >> { %1865 = vrot.lane.b32.xlu0 %v1790_v54, %s11166_s17  ;;  %v1600_v54 = vor.u32 %v1598_v20, %v1597_v23 }
 0x1b2   : >> { %v1716_v49 = vsel %vm11539_vm5, 0, %v1600_v54 }
 0x1b5   : >> { %1873 = vrot.lane.b32.xlu1 %v1794_v16, %s11166_s17 }
 0x1b8   : >> { %1871 = vrot.lane.b32.xlu0 %v1793_v55, %s11166_s17 }
 0x1bd   : >> { %v1804_v61 = vpop.permute.xlu2 %1803 }
 0x1be   : >> { %v1889_v46 = vsel %vm1102_vm6, %v1719_v59, %v1804_v61 }
 0x1c5   : >> { %v1806_v6 = vpop.permute.xlu2 %1805 }
 0x1c6   : >> { %v12489_v28 = vsel %vm1102_vm6, %v1720_v1, %v1806_v6 }
 0x1cd   : >> { %v1812_v10 = vpop.permute.xlu2 %1811 }
 0x1ce   : >> { %v12500_v7 = vsel %vm1102_vm6, %v1723_v11, %v1812_v10  ;;  %v1722_v11 = vsel %vm11539_vm5, 0, %v1642_v35  ;;  %v1660_v10 = vrot.slane %v1658_v22, 7 }
 0x1d0   : >> { %v1663_v23 = vor.u32 %v1661_v45, %v1660_v10 }
 0x1d5   : >> { %v1818_v27 = vpop.permute.xlu2 %1817  ;;  %v12505_v34 = vpop.permute.xlu1 %1799 }
 0x1d6   : >> { %v12508_v41 = vsel %vm1102_vm6, %v1726_v14, %v1818_v27  ;;  %v1796_v36 = vpop.permute.xlu0 %1795 }
 0x1dd   : >> { %v1824_v48 = vpop.permute.xlu2 %1823 }
 0x1de   : >> { %v12515_v38 = vsel %vm1102_vm6, %v1729_v19, %v1824_v48 }
 0x1df   : >> { %v12519_v21 = vpop.permute.xlu1 %1801 }
 0x1e0   : >> { %v1798_v62 = vpop.permute.xlu0 %1797 }
 0x1e1   : >> { %v1880_v4 = vsel %vm1102_vm6, %v1716_v49, %v1798_v62  ;;  %v1725_v49 = vsel %vm11539_vm5, 0, %v1663_v23 }
 0x1e5   : >> { %v1846_v44 = vpop.permute.xlu2 %1845 }
 0x1e6   : >> { %v1926_v5 = vsel %vm1151_vm8, %v1880_v4, %v1846_v44  ;;  %v1681_v4 = vrot.slane %v1679_v56, 7  ;;  %v1877_v56 = vsel %vm1102_vm6, %v1715_v43, %v1796_v36  ;;  %v1653_v43 = vrot.slane %v1651_v25, 7 }
 0x1e7   : >> { %v1810_v13 = vpop.permute.xlu1 %1809  ;;  %v1986_v16 = vunpack.c.l.b16 %v1926_v5  ;;  %v1987_v55 = vunpack.c.h.b16 %v1926_v5 }
 0x1e8   : >> { %v1898_v61 = vsel %vm1102_vm6, %v1722_v11, %v1810_v13  ;;  %v1684_v13 = vor.u32 %v1682_v30, %v1681_v4  ;;  %v1717_v11 = vsel %vm11539_vm5, 0, %v12470_v32  ;;  %v1721_v4 = vsel %vm11539_vm5, 0, %v12495_v33 }
 0x1e9   : >> { %v2018_v12 = vpack.c.b16 %v1986_v16, %v1986_v16  ;;  %v2019_v18 = vpack.c.b16 %v1987_v55, %v1987_v55  ;;  %v1656_v33 = vor.u32 %v1654_v9, %v1653_v43  ;;  %v1674_v9 = vrot.slane %v1672_v58, 7 }
 0x1ea   : >> { %v12528_v20 = vpop.permute.xlu0 %1807  ;;  %v1728_v50 = vsel %vm11539_vm5, 0, %v1684_v13 }
 0x1eb   : >> { %8597 = vst.msk [vmem:[%s12530_s23 + $0x10] sm:$0xf] %vm344_vm7, %v2018_v12  ;;  %v1724_v60 = vsel %vm11539_vm5, 0, %v1656_v33 }
 0x1ec   : >> { %8598 = vst.msk [vmem:[%s12530_s23 + $0x14] sm:$0xf] %vm344_vm7, %v2019_v18 }
 0x1ed   : >> { %v1852_v26 = vpop.permute.xlu2 %1851 }
 0x1ee   : >> { %v1932_v57 = vsel %vm1151_vm8, %v1889_v46, %v1852_v26 }
 0x1ef   : >> { %v1816_v29 = vpop.permute.xlu1 %1815  ;;  %v1992_v1 = vunpack.c.l.b16 %v1932_v57  ;;  %v1993_v42 = vunpack.c.h.b16 %v1932_v57 }
 0x1f0   : >> { %v1907_v45 = vsel %vm1102_vm6, %v1725_v49, %v1816_v29 }
 0x1f1   : >> { %v2024_v6 = vpack.c.b16 %v1992_v1, %v1992_v1  ;;  %v2025_v37 = vpack.c.b16 %v1993_v42, %v1993_v42  ;;  %v1718_v1 = vsel %vm11539_vm5, 0, %v12480_v0 }
 0x1f2   : >> { %v12542_v14 = vpop.permute.xlu0 %1813  ;;  %v1886_v10 = vsel %vm1102_vm6, %v1718_v1, %v12519_v21 }
 0x1f3   : >> { %8603 = vst.msk [vmem:[%s12530_s23 + $0x28] sm:$0xf] %vm344_vm7, %v2024_v6 }
 0x1f4   : >> { %8604 = vst.msk [vmem:[%s12530_s23 + $0x2c] sm:$0xf] %vm344_vm7, %v2025_v37 }
 0x1f5   : >> { %v1858_v27 = vpop.permute.xlu2 %1857 }
 0x1f6   : >> { %v1938_v19 = vsel %vm1151_vm8, %v1898_v61, %v1858_v27 }
 0x1f7   : >> { %v1822_v35 = vpop.permute.xlu1 %1821  ;;  %v1998_v48 = vunpack.c.l.b16 %v1938_v19  ;;  %v1999_v54 = vunpack.c.h.b16 %v1938_v19 }
 0x1f8   : >> { %v1916_v42 = vsel %vm1102_vm6, %v1728_v50, %v1822_v35 }
 0x1f9   : >> { %v2030_v22 = vpack.c.b16 %v1998_v48, %v1998_v48  ;;  %v2031_v62 = vpack.c.b16 %v1999_v54, %v1999_v54 }
 0x1fa   : >> { %v12556_v44 = vpop.permute.xlu0 %1819 }
 0x1fb   : >> { %8609 = vst.msk [vmem:[%s12530_s23 + $0x40] sm:$0xf] %vm344_vm7, %v2030_v22  ;;  %v1883_v22 = vsel %vm1102_vm6, %v1717_v11, %v12505_v34 }
 0x1fc   : >> { %8610 = vst.msk [vmem:[%s12530_s23 + $0x44] sm:$0xf] %vm344_vm7, %v2031_v62 }
 0x1fd   : >> { %v1864_v5 = vpop.permute.xlu2 %1863 }
 0x1fe   : >> { %v1944_v16 = vsel %vm1151_vm8, %v1907_v45, %v1864_v5 }
 0x1ff   : >> { %v2004_v55 = vunpack.c.l.b16 %v1944_v16  ;;  %v2005_v12 = vunpack.c.h.b16 %v1944_v16  ;;  %v1844_v18 = vpop.permute.xlu1 %1843  ;;  %v1895_v16 = vsel %vm1102_vm6, %v1721_v4, %v12528_v20 }
 0x200   : >> { %v1924_v39 = vsel %vm1151_vm8, %v1877_v56, %v1844_v18 }
 0x201   : >> { %v2036_v59 = vpack.c.b16 %v2004_v55, %v2004_v55  ;;  %v2037_v46 = vpack.c.b16 %v2005_v12, %v2005_v12  ;;  %v1984_v26 = vunpack.c.l.b16 %v1924_v39  ;;  %v1985_v57 = vunpack.c.h.b16 %v1924_v39 }
 0x202   : >> { %v12573_v30 = vpop.permute.xlu0 %1825 }
 0x203   : >> { %8615 = vst.msk [vmem:[%s12530_s23 + $0x58] sm:$0xf] %vm344_vm7, %v2036_v59  ;;  %v2016_v29 = vpack.c.b16 %v1984_v26, %v1984_v26  ;;  %v2017_v36 = vpack.c.b16 %v1985_v57, %v1985_v57 }
 0x204   : >> { %8616 = vst.msk [vmem:[%s12530_s23 + $0x5c] sm:$0xf] %vm344_vm7, %v2037_v46 }
 0x205   : >> { %8595 = vst.msk [vmem:[%s12530_s23 + $0x8] sm:$0xf] %vm344_vm7, %v2016_v29  ;;  %v1870_v6 = vpop.permute.xlu2 %1869 }
 0x206   : >> { %8596 = vst.msk [vmem:[%s12530_s23 + $0xc] sm:$0xf] %vm344_vm7, %v2017_v36  ;;  %v1950_v37 = vsel %vm1151_vm8, %v1916_v42, %v1870_v6  ;;  %v1677_v36 = vor.u32 %v1675_v51, %v1674_v9  ;;  %v1695_v51 = vrot.slane %v1693_v31, 7 }
 0x207   : >> { %v2010_v0 = vunpack.c.l.b16 %v1950_v37  ;;  %v2011_v61 = vunpack.c.h.b16 %v1950_v37  ;;  %v1850_v27 = vpop.permute.xlu1 %1849 }
 0x208   : >> { %v1930_v23 = vsel %vm1151_vm8, %v1886_v10, %v1850_v27  ;;  %v1727_v53 = vsel %vm11539_vm5, 0, %v1677_v36 }
 0x209   : >> { %v2042_v19 = vpack.c.b16 %v2010_v0, %v2010_v0  ;;  %v2043_v35 = vpack.c.b16 %v2011_v61, %v2011_v61  ;;  %v1990_v48 = vunpack.c.l.b16 %v1930_v23  ;;  %v1991_v54 = vunpack.c.h.b16 %v1930_v23 }
 0x20a   : >> { %v1848_v62 = vpop.permute.xlu0 %1847 }
 0x20b   : >> { %8621 = vst.msk [vmem:[%s12530_s23 + $0x70] sm:$0xf] %vm344_vm7, %v2042_v19  ;;  %v1928_v32 = vsel %vm1151_vm8, %v1883_v22, %v1848_v62  ;;  %v2022_v21 = vpack.c.b16 %v1990_v48, %v1990_v48  ;;  %v2023_v49 = vpack.c.b16 %v1991_v54, %v1991_v54  ;;  %v1698_v19 = vor.u32 %v1696_v40, %v1695_v51 }
 0x20c   : >> { %8622 = vst.msk [vmem:[%s12530_s23 + $0x74] sm:$0xf] %vm344_vm7, %v2043_v35  ;;  %v1988_v45 = vunpack.c.l.b16 %v1928_v32  ;;  %v1989_v34 = vunpack.c.h.b16 %v1928_v32 }
 0x20d   : >> { %8601 = vst.msk [vmem:[%s12530_s23 + $0x20] sm:$0xf] %vm344_vm7, %v2022_v21  ;;  %v1730_v47 = vsel %vm11539_vm5, 0, %v1698_v19 }
 0x20e   : >> { %v2020_v5 = vpack.c.b16 %v1988_v45, %v1988_v45  ;;  %v2021_v13 = vpack.c.b16 %v1989_v34, %v1989_v34  ;;  %8602 = vst.msk [vmem:[%s12530_s23 + $0x24] sm:$0xf] %vm344_vm7, %v2023_v49  ;;  %v1922_v4 = vsel %vm1102_vm6, %v1730_v47, %v12573_v30 }
 0x20f   : >> { %v1856_v56 = vpop.permute.xlu1 %1855 }
 0x210   : >> { %8599 = vst.msk [vmem:[%s12530_s23 + $0x18] sm:$0xf] %vm344_vm7, %v2020_v5  ;;  %v1936_v25 = vsel %vm1151_vm8, %v1895_v16, %v1856_v56 }
 0x211   : >> { %8600 = vst.msk [vmem:[%s12530_s23 + $0x1c] sm:$0xf] %vm344_vm7, %v2021_v13  ;;  %v1996_v55 = vunpack.c.l.b16 %v1936_v25  ;;  %v1997_v12 = vunpack.c.h.b16 %v1936_v25 }
 0x212   : >> { %v1854_v18 = vpop.permute.xlu0 %1853 }
 0x213   : >> { %v1934_v39 = vsel %vm1151_vm8, %v12489_v28, %v1854_v18  ;;  %v2028_v20 = vpack.c.b16 %v1996_v55, %v1996_v55  ;;  %v2029_v59 = vpack.c.b16 %v1997_v12, %v1997_v12  ;;  %v1904_v28 = vsel %vm1102_vm6, %v1724_v60, %v12542_v14 }
 0x214   : >> { %v1994_v46 = vunpack.c.l.b16 %v1934_v39  ;;  %v1995_v26 = vunpack.c.h.b16 %v1934_v39 }
 0x215   : >> { %8607 = vst.msk [vmem:[%s12530_s23 + $0x38] sm:$0xf] %vm344_vm7, %v2028_v20 }
 0x216   : >> { %v2026_v57 = vpack.c.b16 %v1994_v46, %v1994_v46  ;;  %v2027_v50 = vpack.c.b16 %v1995_v26, %v1995_v26  ;;  %8608 = vst.msk [vmem:[%s12530_s23 + $0x3c] sm:$0xf] %vm344_vm7, %v2029_v59 }
 0x217   : >> { %v1862_v29 = vpop.permute.xlu1 %1861 }
 0x218   : >> { %8605 = vst.msk [vmem:[%s12530_s23 + $0x30] sm:$0xf] %vm344_vm7, %v2026_v57  ;;  %v1942_v58 = vsel %vm1151_vm8, %v1904_v28, %v1862_v29 }
 0x219   : >> { %8606 = vst.msk [vmem:[%s12530_s23 + $0x34] sm:$0xf] %vm344_vm7, %v2027_v50  ;;  %v2002_v1 = vunpack.c.l.b16 %v1942_v58  ;;  %v2003_v42 = vunpack.c.h.b16 %v1942_v58 }
 0x21a   : >> { %v1860_v6 = vpop.permute.xlu0 %1859 }
 0x21b   : >> { %v1940_v37 = vsel %vm1151_vm8, %v12500_v7, %v1860_v6  ;;  %v2034_v14 = vpack.c.b16 %v2002_v1, %v2002_v1  ;;  %v2035_v11 = vpack.c.b16 %v2003_v42, %v2003_v42  ;;  %v1913_v7 = vsel %vm1102_vm6, %v1727_v53, %v12556_v44 }
 0x21c   : >> { %v2000_v10 = vunpack.c.l.b16 %v1940_v37  ;;  %v2001_v0 = vunpack.c.h.b16 %v1940_v37 }
 0x21d   : >> { %8613 = vst.msk [vmem:[%s12530_s23 + $0x50] sm:$0xf] %vm344_vm7, %v2034_v14 }
 0x21e   : >> { %v2032_v61 = vpack.c.b16 %v2000_v10, %v2000_v10  ;;  %v2033_v27 = vpack.c.b16 %v2001_v0, %v2001_v0  ;;  %8614 = vst.msk [vmem:[%s12530_s23 + $0x54] sm:$0xf] %vm344_vm7, %v2035_v11 }
 0x21f   : >> { %v1868_v23 = vpop.permute.xlu1 %1867 }
 0x220   : >> { %8611 = vst.msk [vmem:[%s12530_s23 + $0x48] sm:$0xf] %vm344_vm7, %v2032_v61  ;;  %v1948_v31 = vsel %vm1151_vm8, %v1913_v7, %v1868_v23 }
 0x221   : >> { %8612 = vst.msk [vmem:[%s12530_s23 + $0x4c] sm:$0xf] %vm344_vm7, %v2033_v27  ;;  %v2008_v35 = vunpack.c.l.b16 %v1948_v31  ;;  %v2009_v48 = vunpack.c.h.b16 %v1948_v31 }
 0x222   : >> { %v1866_v54 = vpop.permute.xlu0 %1865 }
 0x223   : >> { %v1946_v22 = vsel %vm1151_vm8, %v12508_v41, %v1866_v54  ;;  %v2040_v44 = vpack.c.b16 %v2008_v35, %v2008_v35  ;;  %v2041_v62 = vpack.c.b16 %v2009_v48, %v2009_v48 }
 0x224   : >> { %v2006_v40 = vunpack.c.l.b16 %v1946_v22  ;;  %v2007_v32 = vunpack.c.h.b16 %v1946_v22 }
 0x225   : >> { %8619 = vst.msk [vmem:[%s12530_s23 + $0x68] sm:$0xf] %vm344_vm7, %v2040_v44 }
 0x226   : >> { %v2038_v21 = vpack.c.b16 %v2006_v40, %v2006_v40  ;;  %v2039_v49 = vpack.c.b16 %v2007_v32, %v2007_v32  ;;  %8620 = vst.msk [vmem:[%s12530_s23 + $0x6c] sm:$0xf] %vm344_vm7, %v2041_v62 }
 0x227   : >> { %v1874_v43 = vpop.permute.xlu1 %1873 }
 0x228   : >> { %8617 = vst.msk [vmem:[%s12530_s23 + $0x60] sm:$0xf] %vm344_vm7, %v2038_v21  ;;  %v1954_v41 = vsel %vm1151_vm8, %v1922_v4, %v1874_v43 }
 0x229   : >> { %8618 = vst.msk [vmem:[%s12530_s23 + $0x64] sm:$0xf] %vm344_vm7, %v2039_v49  ;;  %v2014_v45 = vunpack.c.l.b16 %v1954_v41  ;;  %v2015_v34 = vunpack.c.h.b16 %v1954_v41 }
 0x22a   : >> { %v1872_v5 = vpop.permute.xlu0 %1871 }
 0x22b   : >> { %v1952_v13 = vsel %vm1151_vm8, %v12515_v38, %v1872_v5  ;;  %v2046_v16 = vpack.c.b16 %v2014_v45, %v2014_v45  ;;  %v2047_v56 = vpack.c.b16 %v2015_v34, %v2015_v34 }
 0x22c   : >> { %v2012_v33 = vunpack.c.l.b16 %v1952_v13  ;;  %v2013_v30 = vunpack.c.h.b16 %v1952_v13 }
 0x22d   : >> { %8625 = vst.msk [vmem:[%s12530_s23 + $0x80] sm:$0xf] %vm344_vm7, %v2046_v16 }
 0x22e   : >> { %v2044_v25 = vpack.c.b16 %v2012_v33, %v2012_v33  ;;  %v2045_v55 = vpack.c.b16 %v2013_v30, %v2013_v30  ;;  %8626 = vst.msk [vmem:[%s12530_s23 + $0x84] sm:$0xf] %vm344_vm7, %v2047_v56 }
 0x230   : >> { %8623 = vst.msk [vmem:[%s12530_s23 + $0x78] sm:$0xf] %vm344_vm7, %v2044_v25 }
 0x231   : >> { %8624 = vst.msk [vmem:[%s12530_s23 + $0x7c] sm:$0xf] %vm344_vm7, %v2045_v55 }
 0x232 PF: >> { %p8627_p8 = scmp.ne.s32.totalorder %s12181_s10, 16 }
 0x233   : >> { %s2121_s24 = ssub.s32 (!%p8627_p8), 0, %s12181_s10  ;;  %p2120_p9 = scmp.lt.s32.totalorder (!%p8627_p8), %s12181_s10, 0 }
 0x234   : >> { %2119 = sbr.rel (%p8627_p8) target bundleno = 620 (0x26c), region = 75  ;;  %s8628_s25 = smin.u32 (!%p8627_p8), %s2121_s24, %s12181_s10 }
 0x235   : >> { %11119 = sdivrem.u32 (!%p8627_p8), %s8628_s25, 3 }
 0x239   : >> { %v11167_v38 = vmov 0  }
 0x23e   : >> { %s11120_s26 = spop.drf %11119 }
 0x23f   : >> { %s11121_s27 = spop.drf %11119 }
 0x240   : >> { %s2125_s28 = ssub.s32 0, %s11121_s27 }
 0x241   : >> { %s14442_s28 = smov (!%p2120_p9, %s2125_s28), %s11121_s27 }
 0x242   : >> { %p8630_p10 = scmp.lt.s32.totalorder %s14442_s28, 0  ;;  %s2131_s29 = sadd.s32 3, %s14442_s28 }
 0x244   : >> { %s14444_s29 = smov (!%p8630_p10, %s2131_s29), %s14442_s28 }
 0x245   : >> { %s10609_s11 = smul.u32 144, %s14444_s29 }
 0x247   : >> { %s12686_s12 = scalar_lea.vmem [#allocation2], %s10609_s11 }
 0x248   : >> { %2136 = vst.msk [vmem:[%s12686_s12] sm:$0xf] %vm344_vm7, %v11167_v38 }
 0x249   : >> { %2137 = vst.msk [vmem:[%s12686_s12 + $0x4] sm:$0xf] %vm344_vm7, %v11167_v38 }
 0x24a   : >> { %2138 = vst.msk [vmem:[%s12686_s12 + $0x8] sm:$0xf] %vm344_vm7, %v11167_v38 }
 0x24b   : >> { %2139 = vst.msk [vmem:[%s12686_s12 + $0xc] sm:$0xf] %vm344_vm7, %v11167_v38 }
 0x24c   : >> { %2140 = vst.msk [vmem:[%s12686_s12 + $0x10] sm:$0xf] %vm344_vm7, %v11167_v38 }
 0x24d   : >> { %2141 = vst.msk [vmem:[%s12686_s12 + $0x14] sm:$0xf] %vm344_vm7, %v11167_v38 }
 0x24e   : >> { %2142 = vst.msk [vmem:[%s12686_s12 + $0x18] sm:$0xf] %vm344_vm7, %v11167_v38 }
 0x24f   : >> { %2143 = vst.msk [vmem:[%s12686_s12 + $0x1c] sm:$0xf] %vm344_vm7, %v11167_v38 }
 0x250   : >> { %2144 = vst.msk [vmem:[%s12686_s12 + $0x20] sm:$0xf] %vm344_vm7, %v11167_v38 }
 0x251   : >> { %2145 = vst.msk [vmem:[%s12686_s12 + $0x24] sm:$0xf] %vm344_vm7, %v11167_v38 }
 0x252   : >> { %2146 = vst.msk [vmem:[%s12686_s12 + $0x28] sm:$0xf] %vm344_vm7, %v11167_v38 }
 0x253   : >> { %2147 = vst.msk [vmem:[%s12686_s12 + $0x2c] sm:$0xf] %vm344_vm7, %v11167_v38 }
 0x254   : >> { %2148 = vst.msk [vmem:[%s12686_s12 + $0x30] sm:$0xf] %vm344_vm7, %v11167_v38 }
 0x255   : >> { %2149 = vst.msk [vmem:[%s12686_s12 + $0x34] sm:$0xf] %vm344_vm7, %v11167_v38 }
 0x256   : >> { %2150 = vst.msk [vmem:[%s12686_s12 + $0x38] sm:$0xf] %vm344_vm7, %v11167_v38 }
 0x257   : >> { %2151 = vst.msk [vmem:[%s12686_s12 + $0x3c] sm:$0xf] %vm344_vm7, %v11167_v38 }
 0x258   : >> { %2152 = vst.msk [vmem:[%s12686_s12 + $0x40] sm:$0xf] %vm344_vm7, %v11167_v38 }
 0x259   : >> { %2153 = vst.msk [vmem:[%s12686_s12 + $0x44] sm:$0xf] %vm344_vm7, %v11167_v38 }
 0x25a   : >> { %2154 = vst.msk [vmem:[%s12686_s12 + $0x48] sm:$0xf] %vm344_vm7, %v11167_v38 }
 0x25b   : >> { %2155 = vst.msk [vmem:[%s12686_s12 + $0x4c] sm:$0xf] %vm344_vm7, %v11167_v38 }
 0x25c   : >> { %2156 = vst.msk [vmem:[%s12686_s12 + $0x50] sm:$0xf] %vm344_vm7, %v11167_v38 }
 0x25d   : >> { %2157 = vst.msk [vmem:[%s12686_s12 + $0x54] sm:$0xf] %vm344_vm7, %v11167_v38 }
 0x25e   : >> { %2158 = vst.msk [vmem:[%s12686_s12 + $0x58] sm:$0xf] %vm344_vm7, %v11167_v38 }
 0x25f   : >> { %2159 = vst.msk [vmem:[%s12686_s12 + $0x5c] sm:$0xf] %vm344_vm7, %v11167_v38 }
 0x260   : >> { %2160 = vst.msk [vmem:[%s12686_s12 + $0x60] sm:$0xf] %vm344_vm7, %v11167_v38 }
 0x261   : >> { %2161 = vst.msk [vmem:[%s12686_s12 + $0x64] sm:$0xf] %vm344_vm7, %v11167_v38 }
 0x262   : >> { %2162 = vst.msk [vmem:[%s12686_s12 + $0x68] sm:$0xf] %vm344_vm7, %v11167_v38 }
 0x263   : >> { %2163 = vst.msk [vmem:[%s12686_s12 + $0x6c] sm:$0xf] %vm344_vm7, %v11167_v38 }
 0x264   : >> { %2164 = vst.msk [vmem:[%s12686_s12 + $0x70] sm:$0xf] %vm344_vm7, %v11167_v38 }
 0x265   : >> { %2165 = vst.msk [vmem:[%s12686_s12 + $0x74] sm:$0xf] %vm344_vm7, %v11167_v38 }
 0x266   : >> { %2166 = vst.msk [vmem:[%s12686_s12 + $0x78] sm:$0xf] %vm344_vm7, %v11167_v38 }
 0x267   : >> { %2167 = vst.msk [vmem:[%s12686_s12 + $0x7c] sm:$0xf] %vm344_vm7, %v11167_v38 }
 0x268   : >> { %2168 = vst.msk [vmem:[%s12686_s12 + $0x80] sm:$0xf] %vm344_vm7, %v11167_v38 }
 0x269   : >> { %2169 = vst.msk [vmem:[%s12686_s12 + $0x84] sm:$0xf] %vm344_vm7, %v11167_v38 }
 0x26a   : >> { %2170 = vst.msk [vmem:[%s12686_s12 + $0x88] sm:$0xf] %vm344_vm7, %v11167_v38 }
 0x26b   : >> { %2171 = vst.msk [vmem:[%s12686_s12 + $0x8c] sm:$0xf] %vm344_vm7, %v11167_v38 }
 0x26c PF: >> { %v8675_v12 = vld [vmem:[%s14423_s3 + $0x2] sm:$0x3]  ;;  %vm2417_vm10 = vcmask 1041408   ;;  %s12764_s1 = sadd.s32 2, %s11160_s30  ;;  %v11168_v18 = vmov 65535   ;;  %s12775_s20 = sadd.s32 4, %s11160_s30 }
 0x26d   : >> { %v2418_v39 = vsel %vm936_vm3, 4294967295, %v11168_v18  ;;  %s2174_s2 = ssub.s32 0, %s12764_s1  ;;  %v8869_v20 = vld [vmem:[%s14423_s3 + $0x4] sm:$0x3]  ;;  %v8951_v60 = vld [vmem:[%s14423_s3 + $0x6] sm:$0x3] }
 0x26e   : >> { %v12771_v59 = vsel %vm2417_vm10, %v2418_v39, 0  ;;  %s8632_s18 = smin.u32 %s2174_s2, %s12764_s1  ;;  %v2249_v9 = vld [vmem:[%s14423_s3] sm:$0x3]  ;;  %s2202_s25 = ssub.s32 0, %s12775_s20  ;;  %v9065_v50 = vld [vmem:[%s14423_s3 + $0x8] sm:$0x3] }
 0x26f   : >> { %v2421_v46 = vand.u32 %v8675_v12, %v12771_v59  ;;  %11122 = sdivrem.u32 %s8632_s18, 3  ;;  %v2898_v26 = vand.u32 %v8869_v20, %v12771_v59  ;;  %v3187_v57 = vand.u32 %v8951_v60, %v12771_v59  ;;  %s8638_s28 = smin.u32 %s2202_s25, %s12775_s20  ;;  %v2641_v28 = vand.u32 %v12771_v59, %v2249_v9  ;;  %v9261_v61 = vld [vmem:[%s14423_s3 + $0xc] sm:$0x3]  ;;  %v9375_v27 = vld [vmem:[%s14423_s3 + $0xe] sm:$0x3] }
 0x270   : >> { %v3476_v29 = vand.u32 %v9065_v50, %v12771_v59  ;;  %s12794_s29 = sadd.s32 3, %s11160_s30  ;;  %11125 = sdivrem.u32 %s8638_s28, 3  ;;  %vm2367_vm11 = vcmask 23552   ;;  %v4054_v7 = vand.u32 %v9261_v61, %v12771_v59  ;;  %v4343_v23 = vand.u32 %v9375_v27, %v12771_v59  ;;  %v9179_v19 = vld [vmem:[%s14423_s3 + $0xa] sm:$0x3] }
 0x271   : >> { %11074 = vmatpush.bf16.msra.mxu1 %v2421_v46  ;;  %11075 = vmatpush.bf16.msra.mxu2 %v2421_v46  ;;  %s2188_s11 = ssub.s32 0, %s12794_s29  ;;  %p2173_p11 = scmp.lt.s32.totalorder %s12764_s1, 0  ;;  %v9489_v31 = vld [vmem:[%s14423_s3 + $0x10] sm:$0x3]  ;;  %v3765_v35 = vand.u32 %v9179_v19, %v12771_v59  ;;  %vm5292_vm12 = vcmask 64512   ;;  %vm5341_vm13 = vcmask 130048  }
 0x272   : >> { %11076 = vmatpush.bf16.msra.mxu3 %v2421_v46  ;;  %2430 = vmatpush.bf16.msra.mxu0 %v2421_v46  ;;  %s8635_s12 = smin.u32 %s2188_s11, %s12794_s29  ;;  %p2201_p13 = scmp.lt.s32.totalorder %s12775_s20, 0  ;;  %v4632_v48 = vand.u32 %v9489_v31, %v12771_v59 }
 0x273   : >> { %11128 = sdivrem.u32 %s8635_s12, 3  ;;  %p2187_p0 = scmp.lt.s32.totalorder %s12794_s29, 0 }
 0x274   : >> { %s11170_s20 = smov 16   ;;  %p5374_p3 = scmp.lt.s32.totalorder %s11160_s30, 0 }
 0x275   : >> { %2907 = vmatpush.bf16.msrb.mxu2 %v2898_v26  ;;  %2650 = vmatpush.bf16.msrb.mxu1 %v2641_v28 }
 0x276   : >> { %3196 = vmatpush.bf16.msrb.mxu3 %v3187_v57  ;;  %3485 = vmatpush.bf16.msrb.mxu0 %v3476_v29 }
 0x278   : >> { %s11123_s10 = spop.drf %11122 }
 0x279   : >> { %s11124_s14 = spop.drf %11122 }
 0x27a   : >> { %s2178_s2 = ssub.s32 0, %s11124_s14  ;;  %s11126_s15 = spop.drf %11125 }
 0x27b   : >> { %s14446_s2 = smov (!%p2173_p11, %s2178_s2), %s11124_s14  ;;  %s11127_s17 = spop.drf %11125 }
 0x27c   : >> { %p8634_p12 = scmp.lt.s32.totalorder %s14446_s2, 0  ;;  %s2184_s18 = sadd.s32 3, %s14446_s2 }
 0x27d   : >> { %s11129_s21 = spop.drf %11128  ;;  %s2206_s23 = ssub.s32 0, %s11127_s17 }
 0x27e   : >> { %s14448_s18 = smov (!%p8634_p12, %s2184_s18), %s14446_s2  ;;  %s14450_s23 = smov (!%p2201_p13, %s2206_s23), %s11127_s17 }
 0x27f   : >> { %s10610_s22 = smul.u32 144, %s14448_s18  ;;  %s11130_s10 = spop.drf %11128 }
 0x280   : >> { %s2192_s14 = ssub.s32 0, %s11130_s10  ;;  %p8640_p2 = scmp.lt.s32.totalorder %s14450_s23, 0 }
 0x281   : >> { %s12800_s24 = scalar_lea.vmem [#allocation2], %s10610_s22  ;;  %s14452_s14 = smov (!%p2187_p0, %s2192_s14), %s11130_s10 }
 0x282   : >> { %v10631_v36 = vld [vmem:[%s12800_s24 + $0x28] sm:$0xff]  ;;  %v10632_v6 = vld [vmem:[%s12800_s24 + $0x30] sm:$0xff]  ;;  %v10633_v53 = vld [vmem:[%s12800_s24 + $0x38] sm:$0xff]  ;;  %p8637_p1 = scmp.lt.s32.totalorder %s14452_s14, 0  ;;  %s2198_s2 = sadd.s32 3, %s14452_s14 }
 0x283   : >> { %v10635_v58 = vld [vmem:[%s12800_s24 + $0x48] sm:$0xff]  ;;  %8744 = vmatmul.msk.bf16.vlgmr.msra.gmra.mxu1 %vm2367_vm11, %v10631_v36  ;;  %v10636_v37 = vld [vmem:[%s12800_s24 + $0x50] sm:$0xff]  ;;  %v10637_v51 = vld [vmem:[%s12800_s24 + $0x58] sm:$0xff]  ;;  %s2212_s17 = sadd.s32 3, %s14450_s23  ;;  %s5375_s22 = ssub.s32 0, %s11160_s30 }
 0x284   : >> { %v10639_v1 = vld [vmem:[%s12800_s24 + $0x68] sm:$0xff]  ;;  %8748 = vmatmul.msk.bf16.vlgmr.msra.gmra.mxu2 %vm2367_vm11, %v10635_v58  ;;  %v10640_v14 = vld [vmem:[%s12800_s24 + $0x70] sm:$0xff]  ;;  %v10641_v10 = vld [vmem:[%s12800_s24 + $0x78] sm:$0xff]  ;;  %3774 = vmatpush.bf16.msra.mxu1 %v3765_v35  ;;  %s14454_s2 = smov (!%p8637_p1, %s2198_s2), %s14452_s14  ;;  %s14456_s17 = smov (!%p8640_p2, %s2212_s17), %s14450_s23 }
 0x285   : >> { %v10627_v42 = vld [vmem:[%s12800_s24 + $0x8] sm:$0xff]  ;;  %8752 = vmatmul.msk.bf16.vlgmr.msra.gmra.mxu3 %vm2367_vm11, %v10639_v1  ;;  %v10628_v11 = vld [vmem:[%s12800_s24 + $0x10] sm:$0xff]  ;;  %v10629_v0 = vld [vmem:[%s12800_s24 + $0x18] sm:$0xff]  ;;  %4063 = vmatpush.bf16.msra.mxu2 %v4054_v7  ;;  %s10659_s29 = smul.u32 144, %s14454_s2  ;;  %s9570_s23 = smin.u32 %s11160_s30, %s5375_s22 }
 0x286   : >> { %8740 = vmatmul.msk.bf16.vlgmr.msra.gmra.mxu0 %vm2367_vm11, %v10627_v42  ;;  %4352 = vmatpush.bf16.msra.mxu3 %v4343_v23  ;;  %v10634_v54 = vld [vmem:[%s12800_s24 + $0x40] sm:$0xff]  ;;  %v10643_v21 = vld [vmem:[%s12800_s24 + $0x10] sm:$0xff]  ;;  %v10612_v49 = vld [vmem:[%s12800_s24 + $0x8] sm:$0xff]  ;;  %s10708_s18 = smul.u32 144, %s14456_s17 }
 0x287   : >> { %4641 = vmatpush.bf16.msra.mxu0 %v4632_v48  ;;  %v10638_v22 = vld [vmem:[%s12800_s24 + $0x60] sm:$0xff]  ;;  %s12853_s15 = scalar_lea.vmem [#allocation2], %s10659_s29  ;;  %v10644_v4 = vld [vmem:[%s12800_s24 + $0x18] sm:$0xff]  ;;  %v10613_v45 = vld [vmem:[%s12800_s24 + $0x10] sm:$0xff]  ;;  %11131 = sdivrem.u32 %s9570_s23, 3 }
 0x288   : >> { %v10642_v44 = vld [vmem:[%s12800_s24 + $0x80] sm:$0xff]  ;;  %v10676_v40 = vld [vmem:[%s12853_s15 + $0x8] sm:$0xff]  ;;  %v10677_v41 = vld [vmem:[%s12853_s15 + $0x10] sm:$0xff]  ;;  %s13097_s21 = scalar_lea.vmem [#allocation2], %s10708_s18 }
 0x289   : >> { %v10630_v62 = vld [vmem:[%s12800_s24 + $0x20] sm:$0xff]  ;;  %v10661_v43 = vld [vmem:[%s12853_s15 + $0x8] sm:$0xff]  ;;  %v10662_v5 = vld [vmem:[%s12853_s15 + $0x10] sm:$0xff] }
 0x28a   : >> { %v10660_v47 = vld [vmem:[%s12853_s15] sm:$0xff]  ;;  %v10678_v13 = vld [vmem:[%s12853_s15 + $0x18] sm:$0xff]  ;;  %v10646_v56 = vld [vmem:[%s12800_s24 + $0x28] sm:$0xff] }
 0x28b   : >> { %v10611_v32 = vld [vmem:[%s12800_s24] sm:$0xff]  ;;  %v10614_v16 = vld [vmem:[%s12800_s24 + $0x18] sm:$0xff]  ;;  %v10647_v12 = vld [vmem:[%s12800_s24 + $0x30] sm:$0xff] }
 0x28c   : >> { %v10645_v34 = vld [vmem:[%s12800_s24 + $0x20] sm:$0xff]  ;;  %v10663_v33 = vld [vmem:[%s12853_s15 + $0x18] sm:$0xff]  ;;  %v10680_v39 = vld [vmem:[%s12853_s15 + $0x28] sm:$0xff] }
 0x28d   : >> { %v10679_v30 = vld [vmem:[%s12853_s15 + $0x20] sm:$0xff]  ;;  %v10616_v28 = vld [vmem:[%s12800_s24 + $0x28] sm:$0xff]  ;;  %v10648_v29 = vld [vmem:[%s12800_s24 + $0x38] sm:$0xff] }
 0x28e   : >> { %v10615_v38 = vld [vmem:[%s12800_s24 + $0x20] sm:$0xff]  ;;  %v10665_v36 = vld [vmem:[%s12853_s15 + $0x28] sm:$0xff]  ;;  %v10681_v58 = vld [vmem:[%s12853_s15 + $0x30] sm:$0xff] }
 0x28f   : >> { %v10664_v18 = vld [vmem:[%s12853_s15 + $0x20] sm:$0xff]  ;;  %v10666_v61 = vld [vmem:[%s12853_s15 + $0x30] sm:$0xff]  ;;  %v10682_v27 = vld [vmem:[%s12853_s15 + $0x38] sm:$0xff] }
 0x290   : >> { %s11132_s1 = spop.drf %11131 }
 0x291   : >> { %s11133_s25 = spop.drf %11131 }
 0x292   : >> { %s5379_s26 = ssub.s32 0, %s11133_s25 }
 0x293   : >> { %8745 = vmatmul.msk.bf16.gmra.mxu1 %vm2367_vm11, %v10632_v6  ;;  %s14458_s26 = smov (!%p5374_p3, %s5379_s26), %s11133_s25 }
 0x294   : >> { %8749 = vmatmul.msk.bf16.gmra.mxu2 %vm2367_vm11, %v10636_v37  ;;  %p9572_p4 = scmp.lt.s32.totalorder %s14458_s26, 0  ;;  %s5385_s27 = sadd.s32 3, %s14458_s26 }
 0x295   : >> { %8753 = vmatmul.msk.bf16.gmra.mxu3 %vm2367_vm11, %v10640_v14 }
 0x296   : >> { %8741 = vmatmul.msk.bf16.gmra.mxu0 %vm2367_vm11, %v10628_v11  ;;  %s14460_s27 = smov (!%p9572_p4, %s5385_s27), %s14458_s26 }
 0x297   : >> { %s9573_s28 = smul.u32 144, %s14460_s27 }
 0x299   : >> { %s13420_s11 = scalar_lea.vmem [#allocation3], %s9573_s28 }
 0x2a3   : >> { %8746 = vmatmul.msk.bf16.gmra.mxu1 %vm2367_vm11, %v10633_v53 }
 0x2a4   : >> { %8750 = vmatmul.msk.bf16.gmra.mxu2 %vm2367_vm11, %v10637_v51 }
 0x2a5   : >> { %8754 = vmatmul.msk.bf16.gmra.mxu3 %vm2367_vm11, %v10641_v10  ;;  %v10617_v10 = vld [vmem:[%s12800_s24 + $0x30] sm:$0xff] }
 0x2a6   : >> { %8742 = vmatmul.msk.bf16.gmra.mxu0 %vm2367_vm11, %v10629_v0  ;;  %v10649_v0 = vld [vmem:[%s12800_s24 + $0x40] sm:$0xff] }
 0x2b3   : >> { %8747 = vmatmul.msk.bf16.gmra.mxu1 %vm2367_vm11, %v10634_v54 }
 0x2b4   : >> { %8751 = vmatmul.msk.bf16.gmra.mxu2 %vm2367_vm11, %v10638_v22 }
 0x2b5   : >> { %8755 = vmatmul.msk.bf16.gmra.mxu3 %vm2367_vm11, %v10642_v44  ;;  %v10618_v44 = vld [vmem:[%s12800_s24 + $0x38] sm:$0xff] }
 0x2b6   : >> { %8743 = vmatmul.msk.bf16.gmra.mxu0 %vm2367_vm11, %v10630_v62  ;;  %v10650_v62 = vld [vmem:[%s12800_s24 + $0x48] sm:$0xff] }
 0x2c3   : >> { %8820 = vmatmul.msk.bf16.vlgmr.msrb.gmra.mxu1 %vm2367_vm11, %v10611_v32 }
 0x2c4   : >> { %8934 = vmatmul.msk.bf16.vlgmr.msrb.gmra.mxu2 %vm2367_vm11, %v10643_v21 }
 0x2c5   : >> { %9016 = vmatmul.msk.bf16.vlgmr.msrb.gmra.mxu3 %vm2367_vm11, %v10660_v47  ;;  %v10667_v47 = vld [vmem:[%s12853_s15 + $0x38] sm:$0xff] }
 0x2c6   : >> { %9130 = vmatmul.msk.bf16.vlgmr.msrb.gmra.mxu0 %vm2367_vm11, %v10676_v40  ;;  %v10683_v40 = vld [vmem:[%s12853_s15 + $0x40] sm:$0xff] }
 0x2d3   : >> { %8821 = vmatmul.msk.bf16.gmra.mxu1 %vm2367_vm11, %v10612_v49 }
 0x2d4   : >> { %8935 = vmatmul.msk.bf16.gmra.mxu2 %vm2367_vm11, %v10644_v4 }
 0x2d5   : >> { %9017 = vmatmul.msk.bf16.gmra.mxu3 %vm2367_vm11, %v10661_v43 }
 0x2d6   : >> { %9131 = vmatmul.msk.bf16.gmra.mxu0 %vm2367_vm11, %v10677_v41 }
 0x2e3   : >> { %8822 = vmatmul.msk.bf16.gmra.mxu1 %vm2367_vm11, %v10613_v45 }
 0x2e4   : >> { %8936 = vmatmul.msk.bf16.gmra.mxu2 %vm2367_vm11, %v10645_v34 }
 0x2e5   : >> { %9018 = vmatmul.msk.bf16.gmra.mxu3 %vm2367_vm11, %v10662_v5 }
 0x2e6   : >> { %9132 = vmatmul.msk.bf16.gmra.mxu0 %vm2367_vm11, %v10678_v13  ;;  %v10619_v13 = vld [vmem:[%s12800_s24 + $0x40] sm:$0xff] }
 0x2f3   : >> { %8823 = vmatmul.msk.bf16.gmra.mxu1 %vm2367_vm11, %v10614_v16  ;;  %v10651_v16 = vld [vmem:[%s12800_s24 + $0x50] sm:$0xff] }
 0x2f4   : >> { %8937 = vmatmul.msk.bf16.gmra.mxu2 %vm2367_vm11, %v10646_v56  ;;  %v10668_v56 = vld [vmem:[%s12853_s15 + $0x40] sm:$0xff] }
 0x2f5   : >> { %9019 = vmatmul.msk.bf16.gmra.mxu3 %vm2367_vm11, %v10663_v33  ;;  %v10684_v33 = vld [vmem:[%s12853_s15 + $0x48] sm:$0xff] }
 0x2f6   : >> { %9133 = vmatmul.msk.bf16.gmra.mxu0 %vm2367_vm11, %v10679_v30 }
 0x300   : >> { %v12887_v25 = vpop.f32.mrf.mxu1 }
 0x303   : >> { %v12889_v55 = vpop.f32.mrf.mxu0  ;;  %8824 = vmatmul.msk.bf16.gmra.mxu1 %vm2367_vm11, %v10615_v38 }
 0x304   : >> { %8938 = vmatmul.msk.bf16.gmra.mxu2 %vm2367_vm11, %v10647_v12 }
 0x305   : >> { %9020 = vmatmul.msk.bf16.gmra.mxu3 %vm2367_vm11, %v10664_v18 }
 0x306   : >> { %9134 = vmatmul.msk.bf16.gmra.mxu0 %vm2367_vm11, %v10680_v39 }
 0x307   : >> { %v12899_v20 = vpop.f32.mrf.mxu2 }
 0x308   : >> { %v12901_v59 = vpop.f32.mrf.mxu3  ;;  %v12903_v60 = vpop.f32.mrf.mxu1 }
 0x30b   : >> { %v12905_v9 = vpop.f32.mrf.mxu0 }
 0x30f   : >> { %v12907_v46 = vpop.f32.mrf.mxu2 }
 0x310   : >> { %v12909_v26 = vpop.f32.mrf.mxu3  ;;  %v12911_v57 = vpop.f32.mrf.mxu1 }
 0x313   : >> { %v12913_v50 = vpop.f32.mrf.mxu0  ;;  %8825 = vmatmul.msk.bf16.gmra.mxu1 %vm2367_vm11, %v10616_v28 }
 0x314   : >> { %8939 = vmatmul.msk.bf16.gmra.mxu2 %vm2367_vm11, %v10648_v29 }
 0x315   : >> { %9021 = vmatmul.msk.bf16.gmra.mxu3 %vm2367_vm11, %v10665_v36 }
 0x316   : >> { %9135 = vmatmul.msk.bf16.gmra.mxu0 %vm2367_vm11, %v10681_v58 }
 0x317   : >> { %v12923_v1 = vpop.f32.mrf.mxu2 }
 0x318   : >> { %v12925_v42 = vpop.f32.mrf.mxu3  ;;  %v12927_v6 = vpop.f32.mrf.mxu1 }
 0x31b   : >> { %v12929_v37 = vpop.f32.mrf.mxu0 }
 0x31f   : >> { %v12931_v14 = vpop.f32.mrf.mxu2 }
 0x320   : >> { %v12933_v11 = vpop.f32.mrf.mxu3  ;;  %v12935_v53 = vpop.f32.mrf.mxu1 }
 0x323   : >> { %v12937_v51 = vpop.f32.mrf.mxu0  ;;  %8826 = vmatmul.msk.bf16.gmra.mxu1 %vm2367_vm11, %v10617_v10 }
 0x324   : >> { %8940 = vmatmul.msk.bf16.gmra.mxu2 %vm2367_vm11, %v10649_v0 }
 0x325   : >> { %9022 = vmatmul.msk.bf16.gmra.mxu3 %vm2367_vm11, %v10666_v61 }
 0x326   : >> { %9136 = vmatmul.msk.bf16.gmra.mxu0 %vm2367_vm11, %v10682_v27 }
 0x327   : >> { %v12947_v7 = vpop.f32.mrf.mxu2 }
 0x328   : >> { %v12949_v23 = vpop.f32.mrf.mxu3  ;;  %v12951_v19 = vpop.f32.mrf.mxu1 }
 0x32b   : >> { %v12953_v31 = vpop.f32.mrf.mxu0 }
 0x32f   : >> { %v12955_v35 = vpop.f32.mrf.mxu2 }
 0x330   : >> { %v12957_v48 = vpop.f32.mrf.mxu3  ;;  %v12959_v54 = vpop.f32.mrf.mxu1 }
 0x333   : >> { %v12961_v22 = vpop.f32.mrf.mxu0  ;;  %8827 = vmatmul.msk.bf16.gmra.mxu1 %vm2367_vm11, %v10618_v44 }
 0x334   : >> { %8941 = vmatmul.msk.bf16.gmra.mxu2 %vm2367_vm11, %v10650_v62  ;;  %v10620_v62 = vld [vmem:[%s12800_s24 + $0x48] sm:$0xff] }
 0x335   : >> { %9023 = vmatmul.msk.bf16.gmra.mxu3 %vm2367_vm11, %v10667_v47  ;;  %v10652_v47 = vld [vmem:[%s12800_s24 + $0x58] sm:$0xff] }
 0x336   : >> { %9137 = vmatmul.msk.bf16.gmra.mxu0 %vm2367_vm11, %v10683_v40  ;;  %v10669_v40 = vld [vmem:[%s12853_s15 + $0x48] sm:$0xff] }
 0x337   : >> { %v12971_v32 = vpop.f32.mrf.mxu2 }
 0x338   : >> { %v12973_v21 = vpop.f32.mrf.mxu3  ;;  %v12975_v49 = vpop.f32.mrf.mxu1 }
 0x33b   : >> { %v12977_v4 = vpop.f32.mrf.mxu0 }
 0x33f   : >> { %v12979_v43 = vpop.f32.mrf.mxu2 }
 0x340   : >> { %v12981_v41 = vpop.f32.mrf.mxu3  ;;  %v2652_v45 = vpop.f32.mrf.mxu1 }
 0x341   : >> { %v2653_v34 = vadd.f32 %v2652_v45, %v12889_v55  ;;  %v10685_v45 = vld [vmem:[%s12853_s15 + $0x50] sm:$0xff] }
 0x343   : >> { %v3487_v5 = vpop.f32.mrf.mxu0  ;;  %8828 = vmatmul.msk.bf16.gmra.mxu1 %vm2367_vm11, %v10619_v13 }
 0x344   : >> { %8942 = vmatmul.msk.bf16.gmra.mxu2 %vm2367_vm11, %v10651_v16 }
 0x345   : >> { %9024 = vmatmul.msk.bf16.gmra.mxu3 %vm2367_vm11, %v10668_v56 }
 0x346   : >> { %9138 = vmatmul.msk.bf16.gmra.mxu0 %vm2367_vm11, %v10684_v33 }
 0x347   : >> { %v2909_v30 = vpop.f32.mrf.mxu2 }
 0x348   : >> { %v2989_v38 = vadd.f32 %v2909_v30, %v2653_v34  ;;  %v3198_v12 = vpop.f32.mrf.mxu3  ;;  %v2654_v55 = vpop.f32.mrf.mxu1 }
 0x349   : >> { %v2655_v39 = vadd.f32 %v2654_v55, %v12905_v9 }
 0x34a   : >> { %v3278_v18 = vadd.f32 %v3198_v12, %v2989_v38 }
 0x34b   : >> { %v3489_v28 = vpop.f32.mrf.mxu0 }
 0x34c   : >> { %v12993_v29 = vadd.f32 %v3487_v5, %v3278_v18 }
 0x34f   : >> { %v2911_v36 = vpop.f32.mrf.mxu2 }
 0x350   : >> { %v2990_v58 = vadd.f32 %v2911_v36, %v2655_v39  ;;  %v3200_v10 = vpop.f32.mrf.mxu3  ;;  %v2657_v0 = vpop.f32.mrf.mxu1 }
 0x351   : >> { %v2658_v27 = vadd.f32 %v2657_v0, %v12913_v50  ;;  %v10670_v0 = vld [vmem:[%s12853_s15 + $0x50] sm:$0xff] }
 0x352   : >> { %v3279_v61 = vadd.f32 %v3200_v10, %v2990_v58  ;;  %v10621_v58 = vld [vmem:[%s12800_s24 + $0x50] sm:$0xff]  ;;  %v10653_v10 = vld [vmem:[%s12800_s24 + $0x60] sm:$0xff] }
 0x353   : >> { %v3492_v44 = vpop.f32.mrf.mxu0  ;;  %8829 = vmatmul.msk.bf16.gmra.mxu1 %vm2367_vm11, %v10620_v62 }
 0x354   : >> { %8943 = vmatmul.msk.bf16.gmra.mxu2 %vm2367_vm11, %v10652_v47  ;;  %v13002_v9 = vadd.f32 %v3489_v28, %v3279_v61  ;;  %v10686_v61 = vld [vmem:[%s12853_s15 + $0x58] sm:$0xff] }
 0x355   : >> { %9025 = vmatmul.msk.bf16.gmra.mxu3 %vm2367_vm11, %v10669_v40 }
 0x356   : >> { %9139 = vmatmul.msk.bf16.gmra.mxu0 %vm2367_vm11, %v10685_v45 }
 0x357   : >> { %v2914_v34 = vpop.f32.mrf.mxu2 }
 0x358   : >> { %v2991_v5 = vadd.f32 %v2914_v34, %v2658_v27  ;;  %v3203_v50 = vpop.f32.mrf.mxu3  ;;  %v2659_v13 = vpop.f32.mrf.mxu1 }
 0x359   : >> { %v2660_v56 = vadd.f32 %v2659_v13, %v12929_v37 }
 0x35a   : >> { %v3280_v16 = vadd.f32 %v3203_v50, %v2991_v5 }
 0x35b   : >> { %v3494_v33 = vpop.f32.mrf.mxu0 }
 0x35c   : >> { %v13007_v30 = vadd.f32 %v3492_v44, %v3280_v16 }
 0x35f   : >> { %v2916_v38 = vpop.f32.mrf.mxu2 }
 0x360   : >> { %v2992_v12 = vadd.f32 %v2916_v38, %v2660_v56  ;;  %v3205_v55 = vpop.f32.mrf.mxu3  ;;  %v2662_v18 = vpop.f32.mrf.mxu1 }
 0x361   : >> { %v2663_v28 = vadd.f32 %v2662_v18, %v12937_v51  ;;  %v10671_v18 = vld [vmem:[%s12853_s15 + $0x58] sm:$0xff] }
 0x362   : >> { %v3281_v39 = vadd.f32 %v3205_v55, %v2992_v12  ;;  %v10622_v12 = vld [vmem:[%s12800_s24 + $0x58] sm:$0xff]  ;;  %v10654_v55 = vld [vmem:[%s12800_s24 + $0x68] sm:$0xff] }
 0x363   : >> { %v3497_v36 = vpop.f32.mrf.mxu0  ;;  %8830 = vmatmul.msk.bf16.gmra.mxu1 %vm2367_vm11, %v10621_v58 }
 0x364   : >> { %8944 = vmatmul.msk.bf16.gmra.mxu2 %vm2367_vm11, %v10653_v10  ;;  %v13016_v37 = vadd.f32 %v3494_v33, %v3281_v39  ;;  %v10687_v39 = vld [vmem:[%s12853_s15 + $0x60] sm:$0xff] }
 0x365   : >> { %9026 = vmatmul.msk.bf16.gmra.mxu3 %vm2367_vm11, %v10670_v0 }
 0x366   : >> { %9140 = vmatmul.msk.bf16.gmra.mxu0 %vm2367_vm11, %v10686_v61 }
 0x367   : >> { %v2919_v27 = vpop.f32.mrf.mxu2 }
 0x368   : >> { %v2993_v44 = vadd.f32 %v2919_v27, %v2663_v28  ;;  %v3208_v51 = vpop.f32.mrf.mxu3  ;;  %v2664_v62 = vpop.f32.mrf.mxu1 }
 0x369   : >> { %v2665_v40 = vadd.f32 %v2664_v62, %v12953_v31 }
 0x36a   : >> { %v3282_v47 = vadd.f32 %v3208_v51, %v2993_v44 }
 0x36b   : >> { %v3499_v45 = vpop.f32.mrf.mxu0 }
 0x36c   : >> { %v13021_v34 = vadd.f32 %v3497_v36, %v3282_v47 }
 0x36f   : >> { %v2921_v5 = vpop.f32.mrf.mxu2 }
 0x370   : >> { %v2994_v50 = vadd.f32 %v2921_v5, %v2665_v40  ;;  %v3210_v13 = vpop.f32.mrf.mxu3  ;;  %v2667_v16 = vpop.f32.mrf.mxu1  ;;  %v10623_v5 = vld [vmem:[%s12800_s24 + $0x60] sm:$0xff] }
 0x371   : >> { %v2668_v33 = vadd.f32 %v2667_v16, %v12961_v22  ;;  %v10688_v16 = vld [vmem:[%s12853_s15 + $0x68] sm:$0xff] }
 0x372   : >> { %v3283_v56 = vadd.f32 %v3210_v13, %v2994_v50  ;;  %v10655_v50 = vld [vmem:[%s12800_s24 + $0x70] sm:$0xff]  ;;  %v10672_v13 = vld [vmem:[%s12853_s15 + $0x60] sm:$0xff] }
 0x373   : >> { %v3502_v38 = vpop.f32.mrf.mxu0  ;;  %8831 = vmatmul.msk.bf16.gmra.mxu1 %vm2367_vm11, %v10622_v12 }
 0x374   : >> { %8945 = vmatmul.msk.bf16.gmra.mxu2 %vm2367_vm11, %v10654_v55  ;;  %v13030_v31 = vadd.f32 %v3499_v45, %v3283_v56 }
 0x375   : >> { %9027 = vmatmul.msk.bf16.gmra.mxu3 %vm2367_vm11, %v10671_v18 }
 0x376   : >> { %9141 = vmatmul.msk.bf16.gmra.mxu0 %vm2367_vm11, %v10687_v39 }
 0x377   : >> { %v2924_v28 = vpop.f32.mrf.mxu2 }
 0x378   : >> { %v2995_v22 = vadd.f32 %v2924_v28, %v2668_v33  ;;  %v3213_v36 = vpop.f32.mrf.mxu3  ;;  %v2669_v58 = vpop.f32.mrf.mxu1 }
 0x379   : >> { %v2670_v0 = vadd.f32 %v2669_v58, %v12977_v4 }
 0x37a   : >> { %v3284_v10 = vadd.f32 %v3213_v36, %v2995_v22 }
 0x37b   : >> { %v3504_v61 = vpop.f32.mrf.mxu0 }
 0x37c   : >> { %v13035_v27 = vadd.f32 %v3502_v38, %v3284_v10 }
 0x37f   : >> { %v2926_v44 = vpop.f32.mrf.mxu2 }
 0x380   : >> { %v2996_v51 = vadd.f32 %v2926_v44, %v2670_v0  ;;  %v3215_v62 = vpop.f32.mrf.mxu3  ;;  %v2672_v47 = vpop.f32.mrf.mxu1 }
 0x381   : >> { %v2673_v4 = vadd.f32 %v2672_v47, %v12887_v25  ;;  %v10624_v25 = vld [vmem:[%s12800_s24 + $0x68] sm:$0xff]  ;;  %v10689_v47 = vld [vmem:[%s12853_s15 + $0x70] sm:$0xff] }
 0x382   : >> { %v3285_v40 = vadd.f32 %v3215_v62, %v2996_v51  ;;  %v10656_v51 = vld [vmem:[%s12800_s24 + $0x78] sm:$0xff]  ;;  %v10673_v62 = vld [vmem:[%s12853_s15 + $0x68] sm:$0xff] }
 0x383   : >> { %v3507_v45 = vpop.f32.mrf.mxu0  ;;  %8832 = vmatmul.msk.bf16.gmra.mxu1 %vm2367_vm11, %v10623_v5 }
 0x384   : >> { %8946 = vmatmul.msk.bf16.gmra.mxu2 %vm2367_vm11, %v10655_v50  ;;  %v13043_v56 = vadd.f32 %v3504_v61, %v3285_v40 }
 0x385   : >> { %9028 = vmatmul.msk.bf16.gmra.mxu3 %vm2367_vm11, %v10672_v13 }
 0x386   : >> { %9142 = vmatmul.msk.bf16.gmra.mxu0 %vm2367_vm11, %v10688_v16 }
 0x387   : >> { %v2929_v33 = vpop.f32.mrf.mxu2 }
 0x388   : >> { %v2997_v38 = vadd.f32 %v2929_v33, %v2673_v4  ;;  %v3218_v12 = vpop.f32.mrf.mxu3  ;;  %v2674_v55 = vpop.f32.mrf.mxu1 }
 0x389   : >> { %v2675_v22 = vadd.f32 %v2674_v55, %v12903_v60 }
 0x38a   : >> { %v3286_v18 = vadd.f32 %v3218_v12, %v2997_v38 }
 0x38b   : >> { %v3509_v39 = vpop.f32.mrf.mxu0 }
 0x38c   : >> { %v13048_v28 = vadd.f32 %v3507_v45, %v3286_v18 }
 0x38f   : >> { %v2931_v36 = vpop.f32.mrf.mxu2 }
 0x390   : >> { %v2998_v58 = vadd.f32 %v2931_v36, %v2675_v22  ;;  %v3220_v10 = vpop.f32.mrf.mxu3  ;;  %v2677_v0 = vpop.f32.mrf.mxu1 }
 0x391   : >> { %v2678_v60 = vadd.f32 %v2677_v0, %v12911_v57  ;;  %v10625_v57 = vld [vmem:[%s12800_s24 + $0x70] sm:$0xff]  ;;  %v10690_v0 = vld [vmem:[%s12853_s15 + $0x78] sm:$0xff] }
 0x392   : >> { %v3287_v61 = vadd.f32 %v3220_v10, %v2998_v58  ;;  %v10657_v58 = vld [vmem:[%s12800_s24 + $0x80] sm:$0xff]  ;;  %v10674_v10 = vld [vmem:[%s12853_s15 + $0x70] sm:$0xff] }
 0x393   : >> { %v3512_v44 = vpop.f32.mrf.mxu0  ;;  %8833 = vmatmul.msk.bf16.gmra.mxu1 %vm2367_vm11, %v10624_v25 }
 0x394   : >> { %8947 = vmatmul.msk.bf16.gmra.mxu2 %vm2367_vm11, %v10656_v51  ;;  %v13057_v40 = vadd.f32 %v3509_v39, %v3287_v61 }
 0x395   : >> { %9029 = vmatmul.msk.bf16.gmra.mxu3 %vm2367_vm11, %v10673_v62 }
 0x396   : >> { %9143 = vmatmul.msk.bf16.gmra.mxu0 %vm2367_vm11, %v10689_v47 }
 0x397   : >> { %v2934_v45 = vpop.f32.mrf.mxu2 }
 0x398   : >> { %v2999_v5 = vadd.f32 %v2934_v45, %v2678_v60  ;;  %v3223_v50 = vpop.f32.mrf.mxu3  ;;  %v2679_v13 = vpop.f32.mrf.mxu1 }
 0x399   : >> { %v2680_v38 = vadd.f32 %v2679_v13, %v12927_v6 }
 0x39a   : >> { %v3288_v16 = vadd.f32 %v3223_v50, %v2999_v5 }
 0x39b   : >> { %v3514_v4 = vpop.f32.mrf.mxu0 }
 0x39c   : >> { %v13062_v33 = vadd.f32 %v3512_v44, %v3288_v16 }
 0x39f   : >> { %v2936_v12 = vpop.f32.mrf.mxu2 }
 0x3a0   : >> { %v3000_v55 = vadd.f32 %v2936_v12, %v2680_v38  ;;  %v3225_v18 = vpop.f32.mrf.mxu3  ;;  %v2682_v39 = vpop.f32.mrf.mxu1  ;;  %v10626_v12 = vld [vmem:[%s12800_s24 + $0x78] sm:$0xff] }
 0x3a1   : >> { %v2683_v6 = vadd.f32 %v2682_v39, %v12935_v53  ;;  %v10691_v39 = vld [vmem:[%s12853_s15 + $0x80] sm:$0xff] }
 0x3a2   : >> { %v3289_v22 = vadd.f32 %v3225_v18, %v3000_v55  ;;  %v10658_v55 = vld [vmem:[%s12800_s24 + $0x88] sm:$0xff]  ;;  %v10675_v18 = vld [vmem:[%s12853_s15 + $0x78] sm:$0xff]  ;;  %s11169_s24 = smov 8  }
 0x3a3   : >> { %v3517_v36 = vpop.f32.mrf.mxu0  ;;  %8834 = vmatmul.msk.bf16.gmra.mxu1 %vm2367_vm11, %v10625_v57 }
 0x3a4   : >> { %8948 = vmatmul.msk.bf16.gmra.mxu2 %vm2367_vm11, %v10657_v58  ;;  %v13071_v61 = vadd.f32 %v3514_v4, %v3289_v22 }
 0x3a5   : >> { %9030 = vmatmul.msk.bf16.gmra.mxu3 %vm2367_vm11, %v10674_v10 }
 0x3a6   : >> { %9144 = vmatmul.msk.bf16.gmra.mxu0 %vm2367_vm11, %v10690_v0 }
 0x3a7   : >> { %v2939_v44 = vpop.f32.mrf.mxu2 }
 0x3a8   : >> { %v3001_v25 = vadd.f32 %v2939_v44, %v2683_v6  ;;  %v3228_v51 = vpop.f32.mrf.mxu3  ;;  %v2684_v62 = vpop.f32.mrf.mxu1 }
 0x3a9   : >> { %v2685_v5 = vadd.f32 %v2684_v62, %v12951_v19 }
 0x3aa   : >> { %v3290_v47 = vadd.f32 %v3228_v51, %v3001_v25 }
 0x3ab   : >> { %v3519_v60 = vpop.f32.mrf.mxu0 }
 0x3ac   : >> { %v13076_v45 = vadd.f32 %v3517_v36, %v3290_v47 }
 0x3af   : >> { %v2941_v50 = vpop.f32.mrf.mxu2 }
 0x3b0   : >> { %v3002_v13 = vadd.f32 %v2941_v50, %v2685_v5  ;;  %v3230_v16 = vpop.f32.mrf.mxu3  ;;  %v2687_v4 = vpop.f32.mrf.mxu1 }
 0x3b1   : >> { %v2688_v19 = vadd.f32 %v2687_v4, %v12959_v54  ;;  %v10692_v54 = vld [vmem:[%s12853_s15 + $0x10] sm:$0xff] }
 0x3b2   : >> { %v3291_v53 = vadd.f32 %v3230_v16, %v3002_v13  ;;  %v10709_v13 = vld [vmem:[%s13097_s21] sm:$0xff]  ;;  %v10725_v16 = vld [vmem:[%s13097_s21 + $0x8] sm:$0xff]  ;;  %v10741_v4 = vld [vmem:[%s13097_s21 + $0x10] sm:$0xff] }
 0x3b3   : >> { %v3522_v38 = vpop.f32.mrf.mxu0  ;;  %8835 = vmatmul.msk.bf16.gmra.mxu1 %vm2367_vm11, %v10626_v12 }
 0x3b4   : >> { %8949 = vmatmul.msk.bf16.gmra.mxu2 %vm2367_vm11, %v10658_v55  ;;  %v13087_v22 = vadd.f32 %v3519_v60, %v3291_v53 }
 0x3b5   : >> { %9031 = vmatmul.msk.bf16.gmra.mxu3 %vm2367_vm11, %v10675_v18 }
 0x3b6   : >> { %9145 = vmatmul.msk.bf16.gmra.mxu0 %vm2367_vm11, %v10691_v39 }
 0x3b7   : >> { %v2944_v36 = vpop.f32.mrf.mxu2 }
 0x3b8   : >> { %v3003_v57 = vadd.f32 %v2944_v36, %v2688_v19  ;;  %v3233_v58 = vpop.f32.mrf.mxu3  ;;  %v2689_v10 = vpop.f32.mrf.mxu1 }
 0x3b9   : >> { %v2690_v25 = vadd.f32 %v2689_v10, %v12975_v49 }
 0x3ba   : >> { %v3292_v0 = vadd.f32 %v3233_v58, %v3003_v57 }
 0x3bb   : >> { %v3524_v6 = vpop.f32.mrf.mxu0 }
 0x3bc   : >> { %v13093_v44 = vadd.f32 %v3522_v38, %v3292_v0 }
 0x3bf   : >> { %v2946_v51 = vpop.f32.mrf.mxu2 }
 0x3c0   : >> { %v3004_v62 = vadd.f32 %v2946_v51, %v2690_v25  ;;  %v3235_v47 = vpop.f32.mrf.mxu3  ;;  %v2692_v60 = vpop.f32.mrf.mxu1 }
 0x3c1   : >> { %v2693_v53 = vadd.f32 %v2692_v60, %v12899_v20  ;;  %v10693_v20 = vld [vmem:[%s12853_s15 + $0x18] sm:$0xff] }
 0x3c2   : >> { %v3293_v5 = vadd.f32 %v3235_v47, %v3004_v62  ;;  %v10710_v62 = vld [vmem:[%s13097_s21 + $0x8] sm:$0xff]  ;;  %v10726_v47 = vld [vmem:[%s13097_s21 + $0x10] sm:$0xff]  ;;  %v10742_v60 = vld [vmem:[%s13097_s21 + $0x18] sm:$0xff] }
 0x3c3   : >> { %v3527_v50 = vpop.f32.mrf.mxu0  ;;  %9244 = vmatmul.msk.bf16.vlgmr.msra.gmra.mxu1 %vm2367_vm11, %v10692_v54 }
 0x3c4   : >> { %9326 = vmatmul.msk.bf16.vlgmr.msra.gmra.mxu2 %vm2367_vm11, %v10709_v13  ;;  %v13104_v49 = vadd.f32 %v3524_v6, %v3293_v5 }
 0x3c5   : >> { %9440 = vmatmul.msk.bf16.vlgmr.msra.gmra.mxu3 %vm2367_vm11, %v10725_v16 }
 0x3c6   : >> { %9554 = vmatmul.msk.bf16.vlgmr.msra.gmra.mxu0 %vm2367_vm11, %v10741_v4 }
 0x3c7   : >> { %v2949_v38 = vpop.f32.mrf.mxu2 }
 0x3c8   : >> { %v3005_v12 = vadd.f32 %v2949_v38, %v2693_v53  ;;  %v3238_v55 = vpop.f32.mrf.mxu3  ;;  %v2694_v18 = vpop.f32.mrf.mxu1 }
 0x3c9   : >> { %v2695_v57 = vadd.f32 %v2694_v18, %v12907_v46 }
 0x3ca   : >> { %v3294_v39 = vadd.f32 %v3238_v55, %v3005_v12 }
 0x3cb   : >> { %v3529_v19 = vpop.f32.mrf.mxu0 }
 0x3cc   : >> { %v13109_v36 = vadd.f32 %v3527_v50, %v3294_v39 }
 0x3cf   : >> { %v2951_v58 = vpop.f32.mrf.mxu2 }
 0x3d0   : >> { %v3006_v10 = vadd.f32 %v2951_v58, %v2695_v57  ;;  %v3240_v0 = vpop.f32.mrf.mxu3  ;;  %v2697_v6 = vpop.f32.mrf.mxu1 }
 0x3d1   : >> { %v2698_v46 = vadd.f32 %v2697_v6, %v12923_v1  ;;  %v10694_v1 = vld [vmem:[%s12853_s15 + $0x20] sm:$0xff] }
 0x3d2   : >> { %v3295_v25 = vadd.f32 %v3240_v0, %v3006_v10  ;;  %v10711_v10 = vld [vmem:[%s13097_s21 + $0x10] sm:$0xff]  ;;  %v10727_v0 = vld [vmem:[%s13097_s21 + $0x18] sm:$0xff]  ;;  %v10743_v6 = vld [vmem:[%s13097_s21 + $0x20] sm:$0xff] }
 0x3d3   : >> { %v3532_v51 = vpop.f32.mrf.mxu0  ;;  %9245 = vmatmul.msk.bf16.gmra.mxu1 %vm2367_vm11, %v10693_v20 }
 0x3d4   : >> { %9327 = vmatmul.msk.bf16.gmra.mxu2 %vm2367_vm11, %v10710_v62  ;;  %v13118_v5 = vadd.f32 %v3529_v19, %v3295_v25 }
 0x3d5   : >> { %9441 = vmatmul.msk.bf16.gmra.mxu3 %vm2367_vm11, %v10726_v47 }
 0x3d6   : >> { %9555 = vmatmul.msk.bf16.gmra.mxu0 %vm2367_vm11, %v10742_v60 }
 0x3d7   : >> { %v2954_v50 = vpop.f32.mrf.mxu2 }
 0x3d8   : >> { %v3007_v54 = vadd.f32 %v2954_v50, %v2698_v46  ;;  %v3243_v13 = vpop.f32.mrf.mxu3  ;;  %v2699_v16 = vpop.f32.mrf.mxu1 }
 0x3d9   : >> { %v2700_v12 = vadd.f32 %v2699_v16, %v12931_v14 }
 0x3da   : >> { %v3296_v4 = vadd.f32 %v3243_v13, %v3007_v54 }
 0x3db   : >> { %v3534_v53 = vpop.f32.mrf.mxu0 }
 0x3dc   : >> { %v13123_v38 = vadd.f32 %v3532_v51, %v3296_v4 }
 0x3df   : >> { %v2956_v55 = vpop.f32.mrf.mxu2 }
 0x3e0   : >> { %v3008_v18 = vadd.f32 %v2956_v55, %v2700_v12  ;;  %v3245_v39 = vpop.f32.mrf.mxu3  ;;  %v2702_v19 = vpop.f32.mrf.mxu1 }
 0x3e1   : >> { %v2703_v14 = vadd.f32 %v2702_v19, %v12947_v7  ;;  %v10695_v7 = vld [vmem:[%s12853_s15 + $0x28] sm:$0xff] }
 0x3e2   : >> { %v3297_v57 = vadd.f32 %v3245_v39, %v3008_v18  ;;  %v10712_v18 = vld [vmem:[%s13097_s21 + $0x18] sm:$0xff]  ;;  %v10728_v39 = vld [vmem:[%s13097_s21 + $0x20] sm:$0xff]  ;;  %v10744_v19 = vld [vmem:[%s13097_s21 + $0x28] sm:$0xff] }
 0x3e3   : >> { %v3537_v58 = vpop.f32.mrf.mxu0  ;;  %9246 = vmatmul.msk.bf16.gmra.mxu1 %vm2367_vm11, %v10694_v1 }
 0x3e4   : >> { %9328 = vmatmul.msk.bf16.gmra.mxu2 %vm2367_vm11, %v10711_v10  ;;  %v13132_v25 = vadd.f32 %v3534_v53, %v3297_v57 }
 0x3e5   : >> { %9442 = vmatmul.msk.bf16.gmra.mxu3 %vm2367_vm11, %v10727_v0 }
 0x3e6   : >> { %9556 = vmatmul.msk.bf16.gmra.mxu0 %vm2367_vm11, %v10743_v6 }
 0x3e7   : >> { %v2959_v51 = vpop.f32.mrf.mxu2 }
 0x3e8   : >> { %v3009_v20 = vadd.f32 %v2959_v51, %v2703_v14  ;;  %v3248_v62 = vpop.f32.mrf.mxu3  ;;  %v2704_v47 = vpop.f32.mrf.mxu1 }
 0x3e9   : >> { %v2705_v54 = vadd.f32 %v2704_v47, %v12955_v35 }
 0x3ea   : >> { %v3298_v60 = vadd.f32 %v3248_v62, %v3009_v20 }
 0x3eb   : >> { %v3539_v46 = vpop.f32.mrf.mxu0 }
 0x3ec   : >> { %v13137_v50 = vadd.f32 %v3537_v58, %v3298_v60 }
 0x3ef   : >> { %v2961_v13 = vpop.f32.mrf.mxu2 }
 0x3f0   : >> { %v3010_v16 = vadd.f32 %v2961_v13, %v2705_v54  ;;  %v3250_v4 = vpop.f32.mrf.mxu3  ;;  %v2707_v53 = vpop.f32.mrf.mxu1 }
 0x3f1   : >> { %v2708_v35 = vadd.f32 %v2707_v53, %v12971_v32  ;;  %v10696_v32 = vld [vmem:[%s12853_s15 + $0x30] sm:$0xff] }
 0x3f2   : >> { %v3299_v12 = vadd.f32 %v3250_v4, %v3010_v16  ;;  %v10713_v16 = vld [vmem:[%s13097_s21 + $0x20] sm:$0xff]  ;;  %v10729_v4 = vld [vmem:[%s13097_s21 + $0x28] sm:$0xff]  ;;  %v10745_v53 = vld [vmem:[%s13097_s21 + $0x30] sm:$0xff] }
 0x3f3   : >> { %v3542_v55 = vpop.f32.mrf.mxu0  ;;  %9247 = vmatmul.msk.bf16.gmra.mxu1 %vm2367_vm11, %v10695_v7 }
 0x3f4   : >> { %9329 = vmatmul.msk.bf16.gmra.mxu2 %vm2367_vm11, %v10712_v18  ;;  %v13146_v57 = vadd.f32 %v3539_v46, %v3299_v12 }
 0x3f5   : >> { %9443 = vmatmul.msk.bf16.gmra.mxu3 %vm2367_vm11, %v10728_v39 }
 0x3f6   : >> { %9557 = vmatmul.msk.bf16.gmra.mxu0 %vm2367_vm11, %v10744_v19 }
 0x3f7   : >> { %v2964_v58 = vpop.f32.mrf.mxu2 }
 0x3f8   : >> { %v3011_v1 = vadd.f32 %v2964_v58, %v2708_v35  ;;  %v3253_v10 = vpop.f32.mrf.mxu3  ;;  %v2709_v0 = vpop.f32.mrf.mxu1 }
 0x3f9   : >> { %v2710_v20 = vadd.f32 %v2709_v0, %v12979_v43 }
 0x3fa   : >> { %v3300_v6 = vadd.f32 %v3253_v10, %v3011_v1 }
 0x3fb   : >> { %v3544_v14 = vpop.f32.mrf.mxu0 }
 0x3fc   : >> { %v13151_v51 = vadd.f32 %v3542_v55, %v3300_v6 }
 0x3ff   : >> { %v2966_v62 = vpop.f32.mrf.mxu2 }
 0x400   : >> { %v3012_v47 = vadd.f32 %v2966_v62, %v2710_v20  ;;  %v3255_v60 = vpop.f32.mrf.mxu3  ;;  %v2712_v46 = vpop.f32.mrf.mxu1 }
 0x401   : >> { %v2713_v43 = vadd.f32 %v2712_v46, %v12901_v59  ;;  %v10697_v59 = vld [vmem:[%s12853_s15 + $0x38] sm:$0xff] }
 0x402   : >> { %v3301_v54 = vadd.f32 %v3255_v60, %v3012_v47  ;;  %v10714_v47 = vld [vmem:[%s13097_s21 + $0x28] sm:$0xff]  ;;  %v10730_v60 = vld [vmem:[%s13097_s21 + $0x30] sm:$0xff]  ;;  %v10746_v46 = vld [vmem:[%s13097_s21 + $0x38] sm:$0xff] }
 0x403   : >> { %v3547_v13 = vpop.f32.mrf.mxu0  ;;  %9248 = vmatmul.msk.bf16.gmra.mxu1 %vm2367_vm11, %v10696_v32 }
 0x404   : >> { %9330 = vmatmul.msk.bf16.gmra.mxu2 %vm2367_vm11, %v10713_v16  ;;  %v13160_v12 = vadd.f32 %v3544_v14, %v3301_v54 }
 0x405   : >> { %9444 = vmatmul.msk.bf16.gmra.mxu3 %vm2367_vm11, %v10729_v4 }
 0x406   : >> { %9558 = vmatmul.msk.bf16.gmra.mxu0 %vm2367_vm11, %v10745_v53 }
 0x407   : >> { %v2969_v55 = vpop.f32.mrf.mxu2 }
 0x408   : >> { %v3013_v7 = vadd.f32 %v2969_v55, %v2713_v43  ;;  %v3258_v18 = vpop.f32.mrf.mxu3  ;;  %v2714_v39 = vpop.f32.mrf.mxu1 }
 0x409   : >> { %v2715_v1 = vadd.f32 %v2714_v39, %v12909_v26 }
 0x40a   : >> { %v3302_v19 = vadd.f32 %v3258_v18, %v3013_v7 }
 0x40b   : >> { %v3549_v35 = vpop.f32.mrf.mxu0 }
 0x40c   : >> { %v13165_v58 = vadd.f32 %v3547_v13, %v3302_v19 }
 0x40f   : >> { %v2971_v10 = vpop.f32.mrf.mxu2 }
 0x410   : >> { %v3014_v0 = vadd.f32 %v2971_v10, %v2715_v1  ;;  %v3260_v6 = vpop.f32.mrf.mxu3  ;;  %v2717_v14 = vpop.f32.mrf.mxu1 }
 0x411   : >> { %v2718_v26 = vadd.f32 %v2717_v14, %v12925_v42  ;;  %v10698_v42 = vld [vmem:[%s12853_s15 + $0x40] sm:$0xff] }
 0x412   : >> { %v3303_v20 = vadd.f32 %v3260_v6, %v3014_v0  ;;  %v10715_v0 = vld [vmem:[%s13097_s21 + $0x30] sm:$0xff]  ;;  %v10731_v6 = vld [vmem:[%s13097_s21 + $0x38] sm:$0xff]  ;;  %v10747_v14 = vld [vmem:[%s13097_s21 + $0x40] sm:$0xff] }
 0x413   : >> { %v3552_v62 = vpop.f32.mrf.mxu0  ;;  %9249 = vmatmul.msk.bf16.gmra.mxu1 %vm2367_vm11, %v10697_v59 }
 0x414   : >> { %9331 = vmatmul.msk.bf16.gmra.mxu2 %vm2367_vm11, %v10714_v47  ;;  %v13174_v54 = vadd.f32 %v3549_v35, %v3303_v20 }
 0x415   : >> { %9445 = vmatmul.msk.bf16.gmra.mxu3 %vm2367_vm11, %v10730_v60 }
 0x416   : >> { %9559 = vmatmul.msk.bf16.gmra.mxu0 %vm2367_vm11, %v10746_v46 }
 0x417   : >> { %v2974_v13 = vpop.f32.mrf.mxu2 }
 0x418   : >> { %v3015_v32 = vadd.f32 %v2974_v13, %v2718_v26  ;;  %v3263_v16 = vpop.f32.mrf.mxu3  ;;  %v2719_v4 = vpop.f32.mrf.mxu1 }
 0x419   : >> { %v2720_v7 = vadd.f32 %v2719_v4, %v12933_v11 }
 0x41a   : >> { %v3304_v53 = vadd.f32 %v3263_v16, %v3015_v32 }
 0x41b   : >> { %v3554_v43 = vpop.f32.mrf.mxu0 }
 0x41c   : >> { %v13179_v55 = vadd.f32 %v3552_v62, %v3304_v53 }
 0x41f   : >> { %v2976_v18 = vpop.f32.mrf.mxu2 }
 0x420   : >> { %v3016_v39 = vadd.f32 %v2976_v18, %v2720_v7  ;;  %v3265_v19 = vpop.f32.mrf.mxu3  ;;  %v2722_v35 = vpop.f32.mrf.mxu1 }
 0x421   : >> { %v2723_v11 = vadd.f32 %v2722_v35, %v12949_v23  ;;  %v10699_v23 = vld [vmem:[%s12853_s15 + $0x48] sm:$0xff] }
 0x422   : >> { %v3305_v1 = vadd.f32 %v3265_v19, %v3016_v39  ;;  %v10716_v39 = vld [vmem:[%s13097_s21 + $0x38] sm:$0xff]  ;;  %v10732_v19 = vld [vmem:[%s13097_s21 + $0x40] sm:$0xff]  ;;  %v10748_v35 = vld [vmem:[%s13097_s21 + $0x48] sm:$0xff] }
 0x423   : >> { %v3557_v10 = vpop.f32.mrf.mxu0  ;;  %9250 = vmatmul.msk.bf16.gmra.mxu1 %vm2367_vm11, %v10698_v42 }
 0x424   : >> { %9332 = vmatmul.msk.bf16.gmra.mxu2 %vm2367_vm11, %v10715_v0  ;;  %v13188_v20 = vadd.f32 %v3554_v43, %v3305_v1 }
 0x425   : >> { %9446 = vmatmul.msk.bf16.gmra.mxu3 %vm2367_vm11, %v10731_v6 }
 0x426   : >> { %9560 = vmatmul.msk.bf16.gmra.mxu0 %vm2367_vm11, %v10747_v14 }
 0x427   : >> { %v2979_v62 = vpop.f32.mrf.mxu2 }
 0x428   : >> { %v3017_v59 = vadd.f32 %v2979_v62, %v2723_v11  ;;  %v3268_v47 = vpop.f32.mrf.mxu3  ;;  %v2724_v60 = vpop.f32.mrf.mxu1 }
 0x429   : >> { %v2725_v32 = vadd.f32 %v2724_v60, %v12957_v48 }
 0x42a   : >> { %v3306_v46 = vadd.f32 %v3268_v47, %v3017_v59 }
 0x42b   : >> { %v3559_v26 = vpop.f32.mrf.mxu0 }
 0x42c   : >> { %v13193_v13 = vadd.f32 %v3557_v10, %v3306_v46 }
 0x42f   : >> { %v2981_v16 = vpop.f32.mrf.mxu2 }
 0x430   : >> { %v3018_v4 = vadd.f32 %v2981_v16, %v2725_v32  ;;  %v3270_v53 = vpop.f32.mrf.mxu3  ;;  %v2727_v43 = vpop.f32.mrf.mxu1 }
 0x431   : >> { %v2728_v48 = vadd.f32 %v2727_v43, %v12973_v21  ;;  %v10700_v21 = vld [vmem:[%s12853_s15 + $0x50] sm:$0xff] }
 0x432   : >> { %v3307_v7 = vadd.f32 %v3270_v53, %v3018_v4  ;;  %v10717_v4 = vld [vmem:[%s13097_s21 + $0x40] sm:$0xff]  ;;  %v10733_v53 = vld [vmem:[%s13097_s21 + $0x48] sm:$0xff]  ;;  %v10749_v43 = vld [vmem:[%s13097_s21 + $0x50] sm:$0xff] }
 0x433   : >> { %v3562_v18 = vpop.f32.mrf.mxu0  ;;  %9251 = vmatmul.msk.bf16.gmra.mxu1 %vm2367_vm11, %v10699_v23 }
 0x434   : >> { %9333 = vmatmul.msk.bf16.gmra.mxu2 %vm2367_vm11, %v10716_v39  ;;  %v13202_v1 = vadd.f32 %v3559_v26, %v3307_v7 }
 0x435   : >> { %9447 = vmatmul.msk.bf16.gmra.mxu3 %vm2367_vm11, %v10732_v19 }
 0x436   : >> { %9561 = vmatmul.msk.bf16.gmra.mxu0 %vm2367_vm11, %v10748_v35 }
 0x437   : >> { %v2984_v10 = vpop.f32.mrf.mxu2 }
 0x438   : >> { %v3019_v42 = vadd.f32 %v2984_v10, %v2728_v48  ;;  %v3273_v0 = vpop.f32.mrf.mxu3  ;;  %v2729_v6 = vpop.f32.mrf.mxu1  ;;  %v13222_v48 = vperm.slane %v11861_v15, 0 }
 0x439   : >> { %v2730_v59 = vadd.f32 %v2729_v6, %v12981_v41 }
 0x43a   : >> { %v3308_v14 = vadd.f32 %v3273_v0, %v3019_v42 }
 0x43b   : >> { %v3564_v11 = vpop.f32.mrf.mxu0 }
 0x43c   : >> { %v13207_v62 = vadd.f32 %v3562_v18, %v3308_v14 }
 0x43f   : >> { %v2986_v47 = vpop.f32.mrf.mxu2 }
 0x440   : >> { %v3020_v60 = vadd.f32 %v2986_v47, %v2730_v59  ;;  %v3275_v46 = vpop.f32.mrf.mxu3  ;;  %v3776_v26 = vpop.f32.mrf.mxu1 }
 0x441   : >> { %v3856_v41 = vadd.f32 %v3776_v26, %v12993_v29 }
 0x442   : >> { %v3309_v32 = vadd.f32 %v3275_v46, %v3020_v60 }
 0x443   : >> { %v4643_v16 = vpop.f32.mrf.mxu0  ;;  %9252 = vmatmul.msk.bf16.gmra.mxu1 %vm2367_vm11, %v10700_v21  ;;  %v10718_v21 = vld [vmem:[%s13097_s21 + $0x48] sm:$0xff] }
 0x444   : >> { %9334 = vmatmul.msk.bf16.gmra.mxu2 %vm2367_vm11, %v10717_v4  ;;  %v13216_v7 = vadd.f32 %v3564_v11, %v3309_v32  ;;  %v13227_v11 = vperm.slane %v11866_v3, 0  ;;  %v10701_v32 = vld [vmem:[%s12853_s15 + $0x58] sm:$0xff]  ;;  %v10734_v4 = vld [vmem:[%s13097_s21 + $0x50] sm:$0xff] }
 0x445   : >> { %9448 = vmatmul.msk.bf16.gmra.mxu3 %vm2367_vm11, %v10733_v53  ;;  %v10750_v53 = vld [vmem:[%s13097_s21 + $0x58] sm:$0xff] }
 0x446   : >> { %9562 = vmatmul.msk.bf16.gmra.mxu0 %vm2367_vm11, %v10749_v43 }
 0x447   : >> { %v4065_v18 = vpop.f32.mrf.mxu2 }
 0x448   : >> { %v4145_v23 = vadd.f32 %v4065_v18, %v3856_v41  ;;  %v4354_v39 = vpop.f32.mrf.mxu3  ;;  %v3778_v19 = vpop.f32.mrf.mxu1 }
 0x449   : >> { %v3857_v6 = vadd.f32 %v3778_v19, %v13002_v9  ;;  %v13237_v9 = vperm.slane %v11875_v17, 0 }
 0x44a   : >> { %v4434_v35 = vadd.f32 %v4354_v39, %v4145_v23 }
 0x44b   : >> { %v4645_v10 = vpop.f32.mrf.mxu0 }
 0x44c   : >> { %v4723_v42 = vadd.f32 %v4643_v16, %v4434_v35 }
 0x44e   : >> { %v4758_v0 = vadd.f32 %v13222_v48, %v4723_v42 }
 0x44f   : >> { %v4067_v14 = vpop.f32.mrf.mxu2 }
 0x450   : >> { %v4790_v29 = vmax.f32 %v4758_v0, 0.0  ;;  %v4146_v59 = vadd.f32 %v4067_v14, %v3857_v6  ;;  %v4356_v47 = vpop.f32.mrf.mxu3  ;;  %v3781_v60 = vpop.f32.mrf.mxu1 }
 0x451   : >> { %v3858_v18 = vadd.f32 %v3781_v60, %v13007_v30 }
 0x452   : >> { %v4435_v46 = vadd.f32 %v4356_v47, %v4146_v59  ;;  %v4825_v16 = vmul.f32 %v13227_v11, %v4790_v29 }
 0x453   : >> { %v4648_v26 = vpop.f32.mrf.mxu0  ;;  %9253 = vmatmul.msk.bf16.gmra.mxu1 %vm2367_vm11, %v10701_v32 }
 0x454   : >> { %v4724_v43 = vadd.f32 %v4645_v10, %v4435_v46  ;;  %9335 = vmatmul.msk.bf16.gmra.mxu2 %vm2367_vm11, %v10718_v21  ;;  %v4860_v10 = vadd.f32 %v13237_v9, %v4825_v16 }
 0x455   : >> { %9449 = vmatmul.msk.bf16.gmra.mxu3 %vm2367_vm11, %v10734_v4 }
 0x456   : >> { %9563 = vmatmul.msk.bf16.gmra.mxu0 %vm2367_vm11, %v10750_v53  ;;  %v4759_v41 = vadd.f32 %v13222_v48, %v4724_v43  ;;  %v4892_v47 = vpack.c.bf16 %v4860_v10, %v4860_v10 }
 0x457   : >> { %v4070_v23 = vpop.f32.mrf.mxu2 }
 0x458   : >> { %v4791_v39 = vmax.f32 %v4759_v41, 0.0  ;;  %v4147_v19 = vadd.f32 %v4070_v23, %v3858_v18  ;;  %v4359_v35 = vpop.f32.mrf.mxu3  ;;  %v3783_v42 = vpop.f32.mrf.mxu1  ;;  %v10702_v23 = vld [vmem:[%s12853_s15 + $0x60] sm:$0xff] }
 0x459   : >> { %v3859_v60 = vadd.f32 %v3783_v42, %v13016_v37  ;;  %v10751_v37 = vld [vmem:[%s13097_s21 + $0x60] sm:$0xff] }
 0x45a   : >> { %v4826_v0 = vmul.f32 %v13227_v11, %v4791_v39  ;;  %v4436_v6 = vadd.f32 %v4359_v35, %v4147_v19  ;;  %v10719_v39 = vld [vmem:[%s13097_s21 + $0x50] sm:$0xff]  ;;  %v10735_v35 = vld [vmem:[%s13097_s21 + $0x58] sm:$0xff] }
 0x45b   : >> { %v4650_v14 = vpop.f32.mrf.mxu0 }
 0x45c   : >> { %v4725_v29 = vadd.f32 %v4648_v26, %v4436_v6  ;;  %v4861_v59 = vadd.f32 %v13237_v9, %v4826_v0  ;;  %v4956_v26 = vunpack.c.l.b16 %v4892_v47 }
 0x45e   : >> { %v4760_v30 = vadd.f32 %v13222_v48, %v4725_v29  ;;  %v4893_v46 = vpack.c.bf16 %v4861_v59, %v4861_v59 }
 0x45f   : >> { %v4072_v32 = vpop.f32.mrf.mxu2 }
 0x460   : >> { %v4792_v21 = vmax.f32 %v4760_v30, 0.0  ;;  %v4148_v4 = vadd.f32 %v4072_v32, %v3859_v60  ;;  %v4361_v53 = vpop.f32.mrf.mxu3  ;;  %v4957_v16 = vunpack.c.l.b16 %v4893_v46  ;;  %v3786_v43 = vpop.f32.mrf.mxu1 }
 0x461   : >> { %v3860_v59 = vadd.f32 %v3786_v43, %v13021_v34 }
 0x462   : >> { %v4437_v41 = vadd.f32 %v4361_v53, %v4148_v4  ;;  %v4988_v19 = vpack.c.b16 %v4957_v16, %v4956_v26  ;;  %v4827_v10 = vmul.f32 %v13227_v11, %v4792_v21 }
 0x463   : >> { %v4653_v18 = vpop.f32.mrf.mxu0  ;;  %9254 = vmatmul.msk.bf16.gmra.mxu1 %vm2367_vm11, %v10702_v23 }
 0x464   : >> { %v4726_v0 = vadd.f32 %v4650_v14, %v4437_v41  ;;  %9336 = vmatmul.msk.bf16.gmra.mxu2 %vm2367_vm11, %v10719_v39  ;;  %v5005_v42 = vshrl.u32 %v4988_v19, 16  ;;  %v5008_v6 = vshll.u32 %v4988_v19, 16  ;;  %5212 = vrot.lane.b32.xlu0 %v4988_v19, %s11169_s24  ;;  %v4862_v4 = vadd.f32 %v13237_v9, %v4827_v10 }
 0x465   : >> { %9450 = vmatmul.msk.bf16.gmra.mxu3 %vm2367_vm11, %v10735_v35 }
 0x466   : >> { %v4761_v29 = vadd.f32 %v13222_v48, %v4726_v0  ;;  %9564 = vmatmul.msk.bf16.gmra.mxu0 %vm2367_vm11, %v10751_v37  ;;  %v5148_v47 = vrot.slane %v5008_v6, 1  ;;  %v5007_v14 = vrot.slane %v5005_v42, 7  ;;  %v4894_v19 = vpack.c.bf16 %v4862_v4, %v4862_v4 }
 0x467   : >> { %v4075_v30 = vpop.f32.mrf.mxu2 }
 0x468   : >> { %v4793_v60 = vmax.f32 %v4761_v29, 0.0  ;;  %v4149_v46 = vadd.f32 %v4075_v30, %v3860_v59  ;;  %v4364_v32 = vpop.f32.mrf.mxu3  ;;  %v5149_v21 = vor.u32 %v5148_v47, %v5005_v42  ;;  %v3788_v53 = vpop.f32.mrf.mxu1  ;;  %v13263_v26 = vor.u32 %v5008_v6, %v5007_v14 }
 0x469   : >> { %v3861_v10 = vadd.f32 %v3788_v53, %v13030_v31  ;;  %v4958_v59 = vunpack.c.l.b16 %v4894_v19  ;;  %v10752_v31 = vld [vmem:[%s13097_s21 + $0x68] sm:$0xff] }
 0x46a   : >> { %v4828_v16 = vmul.f32 %v13227_v11, %v4793_v60  ;;  %v4438_v41 = vadd.f32 %v4364_v32, %v4149_v46  ;;  %v5196_v34 = vsel %vm11396_vm2, %v5149_v21, 0  ;;  %v10703_v60 = vld [vmem:[%s12853_s15 + $0x68] sm:$0xff]  ;;  %v10720_v46 = vld [vmem:[%s13097_s21 + $0x58] sm:$0xff]  ;;  %v10736_v21 = vld [vmem:[%s13097_s21 + $0x60] sm:$0xff] }
 0x46b   : >> { %v4655_v23 = vpop.f32.mrf.mxu0  ;;  %5260 = vrot.lane.b32.xlu1 %v5196_v34, %s11170_s20 }
 0x46c   : >> { %v4727_v43 = vadd.f32 %v4653_v18, %v4438_v41  ;;  %v4863_v39 = vadd.f32 %v13237_v9, %v4828_v16 }
 0x46e   : >> { %v4762_v35 = vadd.f32 %v13222_v48, %v4727_v43  ;;  %v4895_v0 = vpack.c.bf16 %v4863_v39, %v4863_v39 }
 0x46f   : >> { %v4077_v37 = vpop.f32.mrf.mxu2 }
 0x470   : >> { %v4794_v42 = vmax.f32 %v4762_v35, 0.0  ;;  %v4150_v6 = vadd.f32 %v4077_v37, %v3861_v10  ;;  %v4366_v29 = vpop.f32.mrf.mxu3  ;;  %v4959_v47 = vunpack.c.l.b16 %v4895_v0  ;;  %v3791_v14 = vpop.f32.mrf.mxu1 }
 0x471   : >> { %v3862_v43 = vadd.f32 %v3791_v14, %v13035_v27 }
 0x472   : >> { %v4439_v30 = vadd.f32 %v4366_v29, %v4150_v6  ;;  %v4989_v32 = vpack.c.b16 %v4959_v47, %v4958_v59  ;;  %v4829_v4 = vmul.f32 %v13227_v11, %v4794_v42 }
 0x473   : >> { %v4658_v18 = vpop.f32.mrf.mxu0  ;;  %9255 = vmatmul.msk.bf16.gmra.mxu1 %vm2367_vm11, %v10703_v60 }
 0x474   : >> { %v4728_v16 = vadd.f32 %v4655_v23, %v4439_v30  ;;  %9337 = vmatmul.msk.bf16.gmra.mxu2 %vm2367_vm11, %v10720_v46  ;;  %v5012_v53 = vshrl.u32 %v4989_v32, 16  ;;  %v5015_v41 = vshll.u32 %v4989_v32, 16  ;;  %5214 = vrot.lane.b32.xlu0 %v4989_v32, %s11169_s24  ;;  %v4864_v42 = vadd.f32 %v13237_v9, %v4829_v4 }
 0x475   : >> { %9451 = vmatmul.msk.bf16.gmra.mxu3 %vm2367_vm11, %v10736_v21 }
 0x476   : >> { %v4763_v34 = vadd.f32 %v13222_v48, %v4728_v16  ;;  %9565 = vmatmul.msk.bf16.gmra.mxu0 %vm2367_vm11, %v10752_v31  ;;  %v5150_v39 = vrot.slane %v5015_v41, 1  ;;  %v5014_v19 = vrot.slane %v5012_v53, 7  ;;  %v4896_v46 = vpack.c.bf16 %v4864_v42, %v4864_v42 }
 0x477   : >> { %v4080_v23 = vpop.f32.mrf.mxu2 }
 0x478   : >> { %v4795_v35 = vmax.f32 %v4763_v34, 0.0  ;;  %v4151_v10 = vadd.f32 %v4080_v23, %v3862_v43  ;;  %v4369_v0 = vpop.f32.mrf.mxu3  ;;  %v5151_v37 = vor.u32 %v5150_v39, %v5012_v53  ;;  %v3793_v6 = vpop.f32.mrf.mxu1  ;;  %v13285_v29 = vor.u32 %v5015_v41, %v5014_v19  ;;  %v10704_v23 = vld [vmem:[%s12853_s15 + $0x70] sm:$0xff] }
 0x479   : >> { %v3863_v21 = vadd.f32 %v3793_v6, %v13043_v56  ;;  %v4960_v34 = vunpack.c.l.b16 %v4896_v46  ;;  %v10753_v56 = vld [vmem:[%s13097_s21 + $0x70] sm:$0xff] }
 0x47a   : >> { %v4830_v59 = vmul.f32 %v13227_v11, %v4795_v35  ;;  %v4440_v47 = vadd.f32 %v4369_v0, %v4151_v10  ;;  %v5197_v27 = vsel %vm11396_vm2, %v5151_v37, 0  ;;  %v10721_v35 = vld [vmem:[%s13097_s21 + $0x60] sm:$0xff]  ;;  %v10737_v0 = vld [vmem:[%s13097_s21 + $0x68] sm:$0xff] }
 0x47b   : >> { %v4660_v30 = vpop.f32.mrf.mxu0  ;;  %5262 = vrot.lane.b32.xlu2 %v5197_v27, %s11170_s20 }
 0x47c   : >> { %v4729_v14 = vadd.f32 %v4658_v18, %v4440_v47  ;;  %v4865_v60 = vadd.f32 %v13237_v9, %v4830_v59 }
 0x47e   : >> { %v4764_v32 = vadd.f32 %v13222_v48, %v4729_v14  ;;  %v4897_v4 = vpack.c.bf16 %v4865_v60, %v4865_v60 }
 0x47f   : >> { %v4082_v16 = vpop.f32.mrf.mxu2 }
 0x480   : >> { %v4796_v31 = vmax.f32 %v4764_v32, 0.0  ;;  %v4152_v53 = vadd.f32 %v4082_v16, %v3863_v21  ;;  %v4371_v41 = vpop.f32.mrf.mxu3  ;;  %v4961_v43 = vunpack.c.l.b16 %v4897_v4  ;;  %v3796_v39 = vpop.f32.mrf.mxu1 }
 0x481   : >> { %v3864_v27 = vadd.f32 %v3796_v39, %v13048_v28 }
 0x482   : >> { %v4441_v19 = vadd.f32 %v4371_v41, %v4152_v53  ;;  %v4990_v10 = vpack.c.b16 %v4961_v43, %v4960_v34  ;;  %v4831_v37 = vmul.f32 %v13227_v11, %v4796_v31 }
 0x483   : >> { %v4663_v18 = vpop.f32.mrf.mxu0  ;;  %9256 = vmatmul.msk.bf16.gmra.mxu1 %vm2367_vm11, %v10704_v23 }
 0x484   : >> { %v4730_v42 = vadd.f32 %v4660_v30, %v4441_v19  ;;  %9338 = vmatmul.msk.bf16.gmra.mxu2 %vm2367_vm11, %v10721_v35  ;;  %v5019_v6 = vshrl.u32 %v4990_v10, 16  ;;  %v5022_v59 = vshll.u32 %v4990_v10, 16  ;;  %5216 = vrot.lane.b32.xlu1 %v4990_v10, %s11169_s24  ;;  %v4866_v16 = vadd.f32 %v13237_v9, %v4831_v37 }
 0x485   : >> { %9452 = vmatmul.msk.bf16.gmra.mxu3 %vm2367_vm11, %v10737_v0 }
 0x486   : >> { %v4765_v47 = vadd.f32 %v13222_v48, %v4730_v42  ;;  %9566 = vmatmul.msk.bf16.gmra.mxu0 %vm2367_vm11, %v10753_v56  ;;  %v5021_v14 = vrot.slane %v5019_v6, 7  ;;  %v5152_v60 = vrot.slane %v5022_v59, 1  ;;  %v4898_v23 = vpack.c.bf16 %v4866_v16, %v4866_v16 }
 0x487   : >> { %v4085_v30 = vpop.f32.mrf.mxu2 }
 0x488   : >> { %v4797_v46 = vmax.f32 %v4765_v47, 0.0  ;;  %v4153_v32 = vadd.f32 %v4085_v30, %v3864_v27  ;;  %v4374_v21 = vpop.f32.mrf.mxu3  ;;  %v5153_v4 = vor.u32 %v5152_v60, %v5019_v6  ;;  %v3798_v31 = vpop.f32.mrf.mxu1  ;;  %v13307_v53 = vor.u32 %v5022_v59, %v5021_v14  ;;  %v10705_v60 = vld [vmem:[%s12853_s15 + $0x78] sm:$0xff]  ;;  %v10722_v30 = vld [vmem:[%s13097_s21 + $0x68] sm:$0xff] }
 0x489   : >> { %v3865_v10 = vadd.f32 %v3798_v31, %v13057_v40  ;;  %v4962_v59 = vunpack.c.l.b16 %v4898_v23  ;;  %v10754_v40 = vld [vmem:[%s13097_s21 + $0x78] sm:$0xff] }
 0x48a   : >> { %v4832_v41 = vmul.f32 %v13227_v11, %v4797_v46  ;;  %v4442_v34 = vadd.f32 %v4374_v21, %v4153_v32  ;;  %v5198_v28 = vsel %vm11396_vm2, %v5153_v4, 0  ;;  %v10738_v32 = vld [vmem:[%s13097_s21 + $0x70] sm:$0xff] }
 0x48b   : >> { %v4665_v43 = vpop.f32.mrf.mxu0  ;;  %5264 = vrot.lane.b32.xlu0 %v5198_v28, %s11170_s20 }
 0x48c   : >> { %v4731_v39 = vadd.f32 %v4663_v18, %v4442_v34  ;;  %v4867_v19 = vadd.f32 %v13237_v9, %v4832_v41 }
 0x48e   : >> { %v4766_v35 = vadd.f32 %v13222_v48, %v4731_v39  ;;  %v4899_v0 = vpack.c.bf16 %v4867_v19, %v4867_v19 }
 0x48f   : >> { %v4087_v37 = vpop.f32.mrf.mxu2 }
 0x490   : >> { %v4798_v42 = vmax.f32 %v4766_v35, 0.0  ;;  %v4154_v56 = vadd.f32 %v4087_v37, %v3865_v10  ;;  %v4376_v6 = vpop.f32.mrf.mxu3  ;;  %v4963_v47 = vunpack.c.l.b16 %v4899_v0  ;;  %v3801_v27 = vpop.f32.mrf.mxu1 }
 0x491   : >> { %v3866_v34 = vadd.f32 %v3801_v27, %v13062_v33 }
 0x492   : >> { %v4443_v14 = vadd.f32 %v4376_v6, %v4154_v56  ;;  %v4991_v46 = vpack.c.b16 %v4963_v47, %v4962_v59  ;;  %v4833_v21 = vmul.f32 %v13227_v11, %v4798_v42 }
 0x493   : >> { %v4668_v18 = vpop.f32.mrf.mxu0  ;;  %9257 = vmatmul.msk.bf16.gmra.mxu1 %vm2367_vm11, %v10705_v60 }
 0x494   : >> { %v4732_v4 = vadd.f32 %v4665_v43, %v4443_v14  ;;  %9339 = vmatmul.msk.bf16.gmra.mxu2 %vm2367_vm11, %v10722_v30  ;;  %v5026_v16 = vshrl.u32 %v4991_v46, 16  ;;  %v5029_v31 = vshll.u32 %v4991_v46, 16  ;;  %5218 = vrot.lane.b32.xlu1 %v4991_v46, %s11169_s24  ;;  %v4868_v0 = vadd.f32 %v13237_v9, %v4833_v21 }
 0x495   : >> { %9453 = vmatmul.msk.bf16.gmra.mxu3 %vm2367_vm11, %v10738_v32 }
 0x496   : >> { %v4767_v41 = vadd.f32 %v13222_v48, %v4732_v4  ;;  %9567 = vmatmul.msk.bf16.gmra.mxu0 %vm2367_vm11, %v10754_v40  ;;  %v5028_v28 = vrot.slane %v5026_v16, 7  ;;  %v5154_v39 = vrot.slane %v5029_v31, 1  ;;  %v4900_v14 = vpack.c.bf16 %v4868_v0, %v4868_v0 }
 0x497   : >> { %v4090_v43 = vpop.f32.mrf.mxu2 }
 0x498   : >> { %v4799_v19 = vmax.f32 %v4767_v41, 0.0  ;;  %v4155_v23 = vadd.f32 %v4090_v43, %v3866_v34  ;;  %v4379_v35 = vpop.f32.mrf.mxu3  ;;  %v5155_v10 = vor.u32 %v5154_v39, %v5026_v16  ;;  %v3803_v37 = vpop.f32.mrf.mxu1  ;;  %v13329_v42 = vor.u32 %v5029_v31, %v5028_v28  ;;  %v10706_v28 = vld [vmem:[%s12853_s15 + $0x80] sm:$0xff]  ;;  %v10723_v39 = vld [vmem:[%s13097_s21 + $0x70] sm:$0xff] }
 0x499   : >> { %v3867_v30 = vadd.f32 %v3803_v37, %v13071_v61  ;;  %v4964_v16 = vunpack.c.l.b16 %v4900_v14  ;;  %v10755_v61 = vld [vmem:[%s13097_s21 + $0x80] sm:$0xff] }
 0x49a   : >> { %v4834_v56 = vmul.f32 %v13227_v11, %v4799_v19  ;;  %v4444_v6 = vadd.f32 %v4379_v35, %v4155_v23  ;;  %v5199_v33 = vsel %vm11396_vm2, %v5155_v10, 0  ;;  %v10739_v19 = vld [vmem:[%s13097_s21 + $0x78] sm:$0xff] }
 0x49b   : >> { %v4670_v59 = vpop.f32.mrf.mxu0 }
 0x49c   : >> { %v4733_v47 = vadd.f32 %v4668_v18, %v4444_v6  ;;  %v4869_v27 = vadd.f32 %v13237_v9, %v4834_v56  ;;  %5266 = vrot.lane.b32.xlu1 %v5199_v33, %s11170_s20 }
 0x49e   : >> { %v4768_v60 = vadd.f32 %v13222_v48, %v4733_v47  ;;  %v4901_v46 = vpack.c.bf16 %v4869_v27, %v4869_v27 }
 0x49f   : >> { %v4092_v32 = vpop.f32.mrf.mxu2 }
 0x4a0   : >> { %v4800_v21 = vmax.f32 %v4768_v60, 0.0  ;;  %v4156_v4 = vadd.f32 %v4092_v32, %v3867_v30  ;;  %v4381_v40 = vpop.f32.mrf.mxu3  ;;  %v4965_v18 = vunpack.c.l.b16 %v4901_v46  ;;  %v3806_v31 = vpop.f32.mrf.mxu1 }
 0x4a1   : >> { %v3868_v56 = vadd.f32 %v3806_v31, %v13076_v45 }
 0x4a2   : >> { %v4445_v41 = vadd.f32 %v4381_v40, %v4156_v4  ;;  %v4992_v43 = vpack.c.b16 %v4965_v18, %v4964_v16  ;;  %v4835_v23 = vmul.f32 %v13227_v11, %v4800_v21 }
 0x4a3   : >> { %v4673_v34 = vpop.f32.mrf.mxu0  ;;  %9258 = vmatmul.msk.bf16.gmra.mxu1 %vm2367_vm11, %v10706_v28 }
 0x4a4   : >> { %v4734_v35 = vadd.f32 %v4670_v59, %v4445_v41  ;;  %9340 = vmatmul.msk.bf16.gmra.mxu2 %vm2367_vm11, %v10723_v39  ;;  %v5033_v10 = vshrl.u32 %v4992_v43, 16  ;;  %v5036_v0 = vshll.u32 %v4992_v43, 16  ;;  %5220 = vrot.lane.b32.xlu2 %v4992_v43, %s11169_s24  ;;  %v4870_v30 = vadd.f32 %v13237_v9, %v4835_v23 }
 0x4a5   : >> { %9454 = vmatmul.msk.bf16.gmra.mxu3 %vm2367_vm11, %v10739_v19 }
 0x4a6   : >> { %v4769_v37 = vadd.f32 %v13222_v48, %v4734_v35  ;;  %9568 = vmatmul.msk.bf16.gmra.mxu0 %vm2367_vm11, %v10755_v61  ;;  %v5035_v6 = vrot.slane %v5033_v10, 7  ;;  %v5156_v33 = vrot.slane %v5036_v0, 1  ;;  %v4902_v31 = vpack.c.bf16 %v4870_v30, %v4870_v30 }
 0x4a7   : >> { %v4095_v59 = vpop.f32.mrf.mxu2 }
 0x4a8   : >> { %v4801_v47 = vmax.f32 %v4769_v37, 0.0  ;;  %v4157_v27 = vadd.f32 %v4095_v59, %v3868_v56  ;;  %v4384_v14 = vpop.f32.mrf.mxu3  ;;  %v5157_v60 = vor.u32 %v5156_v33, %v5033_v10  ;;  %v3808_v46 = vpop.f32.mrf.mxu1  ;;  %v13351_v32 = vor.u32 %v5036_v0, %v5035_v6  ;;  %v10707_v56 = vld [vmem:[%s12853_s15 + $0x88] sm:$0xff]  ;;  %v10724_v6 = vld [vmem:[%s13097_s21 + $0x78] sm:$0xff]  ;;  %v10740_v59 = vld [vmem:[%s13097_s21 + $0x80] sm:$0xff] }
 0x4a9   : >> { %v3869_v28 = vadd.f32 %v3808_v46, %v13087_v22  ;;  %v4966_v61 = vunpack.c.l.b16 %v4902_v31  ;;  %v10756_v22 = vld [vmem:[%s13097_s21 + $0x88] sm:$0xff] }
 0x4aa   : >> { %v4836_v21 = vmul.f32 %v13227_v11, %v4801_v47  ;;  %v4446_v4 = vadd.f32 %v4384_v14, %v4157_v27  ;;  %v5200_v45 = vsel %vm11396_vm2, %v5157_v60, 0 }
 0x4ab   : >> { %v4675_v40 = vpop.f32.mrf.mxu0 }
 0x4ac   : >> { %v4735_v16 = vadd.f32 %v4673_v34, %v4446_v4  ;;  %v4871_v18 = vadd.f32 %v13237_v9, %v4836_v21  ;;  %5268 = vrot.lane.b32.xlu2 %v5200_v45, %s11170_s20 }
 0x4ae   : >> { %v4770_v41 = vadd.f32 %v13222_v48, %v4735_v16  ;;  %v4903_v39 = vpack.c.bf16 %v4871_v18, %v4871_v18 }
 0x4af   : >> { %v4097_v43 = vpop.f32.mrf.mxu2 }
 0x4b0   : >> { %v4802_v19 = vmax.f32 %v4770_v41, 0.0  ;;  %v4158_v23 = vadd.f32 %v4097_v43, %v3869_v28  ;;  %v4386_v35 = vpop.f32.mrf.mxu3  ;;  %v4967_v34 = vunpack.c.l.b16 %v4903_v39  ;;  %v3811_v10 = vpop.f32.mrf.mxu1 }
 0x4b1   : >> { %v3870_v46 = vadd.f32 %v3811_v10, %v13093_v44 }
 0x4b2   : >> { %v4447_v0 = vadd.f32 %v4386_v35, %v4158_v23  ;;  %v4993_v33 = vpack.c.b16 %v4967_v34, %v4966_v61  ;;  %v4837_v47 = vmul.f32 %v13227_v11, %v4802_v19 }
 0x4b3   : >> { %v4678_v37 = vpop.f32.mrf.mxu0  ;;  %9259 = vmatmul.msk.bf16.gmra.mxu1 %vm2367_vm11, %v10707_v56 }
 0x4b4   : >> { %v4736_v27 = vadd.f32 %v4675_v40, %v4447_v0  ;;  %9341 = vmatmul.msk.bf16.gmra.mxu2 %vm2367_vm11, %v10724_v6  ;;  %v5040_v14 = vshrl.u32 %v4993_v33, 16  ;;  %v5043_v60 = vshll.u32 %v4993_v33, 16  ;;  %5222 = vrot.lane.b32.xlu2 %v4993_v33, %s11169_s24  ;;  %v4872_v41 = vadd.f32 %v13237_v9, %v4837_v47 }
 0x4b5   : >> { %9455 = vmatmul.msk.bf16.gmra.mxu3 %vm2367_vm11, %v10740_v59 }
 0x4b6   : >> { %v4771_v30 = vadd.f32 %v13222_v48, %v4736_v27  ;;  %9569 = vmatmul.msk.bf16.gmra.mxu0 %vm2367_vm11, %v10756_v22  ;;  %v5042_v21 = vrot.slane %v5040_v14, 7  ;;  %v5158_v4 = vrot.slane %v5043_v60, 1  ;;  %v4904_v34 = vpack.c.bf16 %v4872_v41, %v4872_v41 }
 0x4b7   : >> { %v4100_v40 = vpop.f32.mrf.mxu2 }
 0x4b8   : >> { %v4803_v45 = vmax.f32 %v4771_v30, 0.0  ;;  %v4159_v16 = vadd.f32 %v4100_v40, %v3870_v46  ;;  %v4389_v18 = vpop.f32.mrf.mxu3  ;;  %v5159_v31 = vor.u32 %v5158_v4, %v5040_v14  ;;  %v3813_v28 = vpop.f32.mrf.mxu1  ;;  %v13373_v39 = vor.u32 %v5043_v60, %v5042_v21 }
 0x4b9   : >> { %v3871_v0 = vadd.f32 %v3813_v28, %v13104_v49  ;;  %v4968_v27 = vunpack.c.l.b16 %v4904_v34 }
 0x4ba   : >> { %v4838_v43 = vmul.f32 %v13227_v11, %v4803_v45  ;;  %v4448_v19 = vadd.f32 %v4389_v18, %v4159_v16  ;;  %v5201_v44 = vsel %vm11396_vm2, %v5159_v31, 0 }
 0x4bb   : >> { %v4680_v23 = vpop.f32.mrf.mxu0  ;;  %5270 = vrot.lane.b32.xlu0 %v5201_v44, %s11170_s20 }
 0x4bc   : >> { %v4737_v35 = vadd.f32 %v4678_v37, %v4448_v19  ;;  %v4873_v61 = vadd.f32 %v13237_v9, %v4838_v43 }
 0x4be   : >> { %v4772_v10 = vadd.f32 %v13222_v48, %v4737_v35  ;;  %v4905_v56 = vpack.c.bf16 %v4873_v61, %v4873_v61 }
 0x4bf   : >> { %v4102_v6 = vpop.f32.mrf.mxu2 }
 0x4c0   : >> { %v4804_v33 = vmax.f32 %v4772_v10, 0.0  ;;  %v4160_v59 = vadd.f32 %v4102_v6, %v3871_v0  ;;  %v4391_v47 = vpop.f32.mrf.mxu3  ;;  %v4969_v22 = vunpack.c.l.b16 %v4905_v56  ;;  %v3816_v14 = vpop.f32.mrf.mxu1 }
 0x4c1   : >> { %v3872_v45 = vadd.f32 %v3816_v14, %v13109_v36 }
 0x4c2   : >> { %v4449_v60 = vadd.f32 %v4391_v47, %v4160_v59  ;;  %v4994_v46 = vpack.c.b16 %v4969_v22, %v4968_v27  ;;  %v4839_v37 = vmul.f32 %v13227_v11, %v4804_v33 }
 0x4c3   : >> { %v4683_v30 = vpop.f32.mrf.mxu0 }
 0x4c4   : >> { %v4738_v21 = vadd.f32 %v4680_v23, %v4449_v60  ;;  %5224 = vrot.lane.b32.xlu0 %v4994_v46, %s11169_s24  ;;  %v5047_v4 = vshrl.u32 %v4994_v46, 16  ;;  %v5050_v40 = vshll.u32 %v4994_v46, 16  ;;  %v4874_v44 = vadd.f32 %v13237_v9, %v4839_v37 }
 0x4c6   : >> { %v4773_v49 = vadd.f32 %v13222_v48, %v4738_v21  ;;  %v5049_v16 = vrot.slane %v5047_v4, 7  ;;  %v5160_v18 = vrot.slane %v5050_v40, 1  ;;  %v4906_v6 = vpack.c.bf16 %v4874_v44, %v4874_v44 }
 0x4c7   : >> { %v4105_v31 = vpop.f32.mrf.mxu2 }
 0x4c8   : >> { %v4805_v41 = vmax.f32 %v4773_v49, 0.0  ;;  %v4161_v28 = vadd.f32 %v4105_v31, %v3872_v45  ;;  %v4394_v43 = vpop.f32.mrf.mxu3  ;;  %v5161_v19 = vor.u32 %v5160_v18, %v5047_v4  ;;  %v3818_v35 = vpop.f32.mrf.mxu1  ;;  %v13387_v23 = vor.u32 %v5050_v40, %v5049_v16 }
 0x4c9   : >> { %v3873_v59 = vadd.f32 %v3818_v35, %v13118_v5  ;;  %v4970_v46 = vunpack.c.l.b16 %v4906_v6 }
 0x4ca   : >> { %v4840_v61 = vmul.f32 %v13227_v11, %v4805_v41  ;;  %v4450_v34 = vadd.f32 %v4394_v43, %v4161_v28  ;;  %v5202_v36 = vsel %vm11396_vm2, %v5161_v19, 0 }
 0x4cb   : >> { %v4685_v10 = vpop.f32.mrf.mxu0  ;;  %5272 = vrot.lane.b32.xlu1 %v5202_v36, %s11170_s20 }
 0x4cc   : >> { %v4739_v0 = vadd.f32 %v4683_v30, %v4450_v34  ;;  %v4875_v56 = vadd.f32 %v13237_v9, %v4840_v61 }
 0x4ce   : >> { %v4774_v33 = vadd.f32 %v13222_v48, %v4739_v0  ;;  %v4907_v47 = vpack.c.bf16 %v4875_v56, %v4875_v56 }
 0x4cf   : >> { %v4107_v27 = vpop.f32.mrf.mxu2 }
 0x4d0   : >> { %v4806_v22 = vmax.f32 %v4774_v33, 0.0  ;;  %v4162_v14 = vadd.f32 %v4107_v27, %v3873_v59  ;;  %v4396_v60 = vpop.f32.mrf.mxu3  ;;  %v4971_v37 = vunpack.c.l.b16 %v4907_v47  ;;  %v3821_v21 = vpop.f32.mrf.mxu1  ;;  %v5132_v59 = vsel %vm11539_vm5, 0, %v13263_v26 }
 0x4d1   : >> { %v3874_v31 = vadd.f32 %v3821_v21, %v13123_v38 }
 0x4d2   : >> { %v4451_v4 = vadd.f32 %v4396_v60, %v4162_v14  ;;  %v4995_v40 = vpack.c.b16 %v4971_v37, %v4970_v46  ;;  %v4841_v49 = vmul.f32 %v13227_v11, %v4806_v22 }
 0x4d3   : >> { %v4688_v30 = vpop.f32.mrf.mxu0 }
 0x4d4   : >> { %v4740_v45 = vadd.f32 %v4685_v10, %v4451_v4  ;;  %5226 = vrot.lane.b32.xlu1 %v4995_v40, %s11169_s24  ;;  %v5054_v16 = vshrl.u32 %v4995_v40, 16  ;;  %v5057_v18 = vshll.u32 %v4995_v40, 16  ;;  %v4876_v34 = vadd.f32 %v13237_v9, %v4841_v49 }
 0x4d6   : >> { %v4775_v5 = vadd.f32 %v13222_v48, %v4740_v45  ;;  %v5056_v41 = vrot.slane %v5054_v16, 7  ;;  %v5162_v28 = vrot.slane %v5057_v18, 1  ;;  %v5213_v56 = vpop.permute.xlu0 %5212  ;;  %v4908_v22 = vpack.c.bf16 %v4876_v34, %v4876_v34 }
 0x4d7   : >> { %v4110_v43 = vpop.f32.mrf.mxu2  ;;  %v5295_v14 = vsel %vm5292_vm12, %v5132_v59, %v5213_v56 }
 0x4d8   : >> { %v4807_v19 = vmax.f32 %v4775_v5, 0.0  ;;  %v4163_v44 = vadd.f32 %v4110_v43, %v3874_v31  ;;  %v4399_v35 = vpop.f32.mrf.mxu3  ;;  %v5163_v61 = vor.u32 %v5162_v28, %v5054_v16  ;;  %v3823_v10 = vpop.f32.mrf.mxu1  ;;  %v13404_v36 = vor.u32 %v5057_v18, %v5056_v41 }
 0x4d9   : >> { %v3875_v37 = vadd.f32 %v3823_v10, %v13132_v25  ;;  %v4972_v18 = vunpack.c.l.b16 %v4908_v22  ;;  %v5263_v22 = vpop.permute.xlu2 %5262 }
 0x4da   : >> { %v4842_v0 = vmul.f32 %v13227_v11, %v4807_v19  ;;  %v4452_v38 = vadd.f32 %v4399_v35, %v4163_v44  ;;  %v5203_v33 = vsel %vm11396_vm2, %v5163_v61, 0 }
 0x4db   : >> { %v4690_v6 = vpop.f32.mrf.mxu0  ;;  %5274 = vrot.lane.b32.xlu2 %v5203_v33, %s11170_s20  ;;  %v5133_v33 = vsel %vm11539_vm5, 0, %v13285_v29 }
 0x4dc   : >> { %v4741_v47 = vadd.f32 %v4688_v30, %v4452_v38  ;;  %v4877_v27 = vadd.f32 %v13237_v9, %v4842_v0 }
 0x4dd   : >> { %v5261_v60 = vpop.permute.xlu1 %5260 }
 0x4de   : >> { %v4776_v46 = vadd.f32 %v13222_v48, %v4741_v47  ;;  %v5343_v21 = vsel %vm5341_vm13, %v5295_v14, %v5261_v60  ;;  %v4909_v4 = vpack.c.bf16 %v4877_v27, %v4877_v27 }
 0x4df   : >> { %v5403_v40 = vunpack.c.l.b16 %v5343_v21  ;;  %v5404_v49 = vunpack.c.h.b16 %v5343_v21  ;;  %v4112_v45 = vpop.f32.mrf.mxu2 }
 0x4e0   : >> { %v4808_v16 = vmax.f32 %v4776_v46, 0.0  ;;  %v4164_v26 = vadd.f32 %v4112_v45, %v3875_v37  ;;  %v4401_v30 = vpop.f32.mrf.mxu3  ;;  %v4973_v5 = vunpack.c.l.b16 %v4909_v4  ;;  %v3826_v28 = vpop.f32.mrf.mxu1 }
 0x4e1   : >> { %v5435_v31 = vpack.c.b16 %v5403_v40, %v5403_v40  ;;  %v5436_v41 = vpack.c.b16 %v5404_v49, %v5404_v49  ;;  %v3876_v0 = vadd.f32 %v3826_v28, %v13137_v50 }
 0x4e2   : >> { %v4453_v43 = vadd.f32 %v4401_v30, %v4164_v26  ;;  %v4996_v19 = vpack.c.b16 %v4973_v5, %v4972_v18  ;;  %v4843_v44 = vmul.f32 %v13227_v11, %v4808_v16 }
 0x4e3   : >> { %9574 = vst.msk [vmem:[%s13420_s11 + $0x8] sm:$0xf] %vm453_vm9, %v5435_v31  ;;  %v4693_v25 = vpop.f32.mrf.mxu0 }
 0x4e4   : >> { %9575 = vst.msk [vmem:[%s13420_s11 + $0xc] sm:$0xf] %vm453_vm9, %v5436_v41  ;;  %v4742_v35 = vadd.f32 %v4690_v6, %v4453_v43  ;;  %5228 = vrot.lane.b32.xlu2 %v4996_v19, %s11169_s24  ;;  %v5061_v61 = vshrl.u32 %v4996_v19, 16  ;;  %v5064_v34 = vshll.u32 %v4996_v19, 16  ;;  %v4878_v27 = vadd.f32 %v13237_v9, %v4843_v44 }
 0x4e6   : >> { %v4777_v10 = vadd.f32 %v13222_v48, %v4742_v35  ;;  %v5063_v56 = vrot.slane %v5061_v61, 7  ;;  %v5164_v38 = vrot.slane %v5064_v34, 1  ;;  %v5215_v59 = vpop.permute.xlu0 %5214  ;;  %v4910_v30 = vpack.c.bf16 %v4878_v27, %v4878_v27 }
 0x4e7   : >> { %v4115_v47 = vpop.f32.mrf.mxu2  ;;  %v5298_v14 = vsel %vm5292_vm12, %v5133_v33, %v5215_v59 }
 0x4e8   : >> { %v4809_v6 = vmax.f32 %v4777_v10, 0.0  ;;  %v4165_v60 = vadd.f32 %v4115_v47, %v3876_v0  ;;  %v4404_v46 = vpop.f32.mrf.mxu3  ;;  %v5165_v37 = vor.u32 %v5164_v38, %v5061_v61  ;;  %v5345_v50 = vsel %vm5341_vm13, %v5298_v14, %v5263_v22  ;;  %v3828_v21 = vpop.f32.mrf.mxu1 }
 0x4e9   : >> { %v13435_v4 = vor.u32 %v5064_v34, %v5063_v56  ;;  %v5405_v29 = vunpack.c.l.b16 %v5345_v50  ;;  %v5406_v49 = vunpack.c.h.b16 %v5345_v50  ;;  %v3877_v43 = vadd.f32 %v3828_v21, %v13146_v57 }
 0x4ea   : >> { %v4844_v40 = vmul.f32 %v13227_v11, %v4809_v6  ;;  %v4454_v45 = vadd.f32 %v4404_v46, %v4165_v60  ;;  %v5204_v26 = vsel %vm11396_vm2, %v5165_v37, 0  ;;  %v4974_v10 = vunpack.c.l.b16 %v4910_v30 }
 0x4eb   : >> { %v4695_v16 = vpop.f32.mrf.mxu0  ;;  %v5437_v18 = vpack.c.b16 %v5405_v29, %v5405_v29  ;;  %v5438_v5 = vpack.c.b16 %v5406_v49, %v5406_v49  ;;  %5276 = vrot.lane.b32.xlu0 %v5204_v26, %s11170_s20 }
 0x4ec   : >> { %v4743_v31 = vadd.f32 %v4693_v25, %v4454_v45  ;;  %v4879_v41 = vadd.f32 %v13237_v9, %v4844_v40 }
 0x4ed   : >> { %9576 = vst.msk [vmem:[%s13420_s11 + $0x10] sm:$0xf] %vm453_vm9, %v5437_v18 }
 0x4ee   : >> { %v4778_v28 = vadd.f32 %v13222_v48, %v4743_v31  ;;  %v4911_v19 = vpack.c.bf16 %v4879_v41, %v4879_v41  ;;  %9577 = vst.msk [vmem:[%s13420_s11 + $0x14] sm:$0xf] %vm453_vm9, %v5438_v5  ;;  %v5134_v5 = vsel %vm11539_vm5, 0, %v13307_v53 }
 0x4ef   : >> { %v4117_v44 = vpop.f32.mrf.mxu2 }
 0x4f0   : >> { %v4810_v35 = vmax.f32 %v4778_v28, 0.0  ;;  %v4166_v61 = vadd.f32 %v4117_v44, %v3877_v43  ;;  %v4406_v34 = vpop.f32.mrf.mxu3  ;;  %v4975_v0 = vunpack.c.l.b16 %v4911_v19  ;;  %v3831_v25 = vpop.f32.mrf.mxu1 }
 0x4f1   : >> { %v3878_v6 = vadd.f32 %v3831_v25, %v13151_v51 }
 0x4f2   : >> { %v4455_v56 = vadd.f32 %v4406_v34, %v4166_v61  ;;  %v4997_v38 = vpack.c.b16 %v4975_v0, %v4974_v10  ;;  %v4845_v59 = vmul.f32 %v13227_v11, %v4810_v35 }
 0x4f3   : >> { %v4698_v33 = vpop.f32.mrf.mxu0 }
 0x4f4   : >> { %v4744_v47 = vadd.f32 %v4695_v16, %v4455_v56  ;;  %5230 = vrot.lane.b32.xlu0 %v4997_v38, %s11169_s24  ;;  %v5068_v27 = vshrl.u32 %v4997_v38, 16  ;;  %v5071_v57 = vshll.u32 %v4997_v38, 16  ;;  %v4880_v29 = vadd.f32 %v13237_v9, %v4845_v59 }
 0x4f6   : >> { %v4779_v22 = vadd.f32 %v13222_v48, %v4744_v47  ;;  %v5070_v14 = vrot.slane %v5068_v27, 7  ;;  %v5166_v60 = vrot.slane %v5071_v57, 1  ;;  %v5217_v26 = vpop.permute.xlu1 %5216  ;;  %v4912_v28 = vpack.c.bf16 %v4880_v29, %v4880_v29 }
 0x4f7   : >> { %v4120_v46 = vpop.f32.mrf.mxu2  ;;  %v5301_v43 = vsel %vm5292_vm12, %v5134_v5, %v5217_v26 }
 0x4f8   : >> { %v4811_v37 = vmax.f32 %v4779_v22, 0.0  ;;  %v4167_v50 = vadd.f32 %v4120_v46, %v3878_v6  ;;  %v4409_v21 = vpop.f32.mrf.mxu3  ;;  %v5167_v40 = vor.u32 %v5166_v60, %v5068_v27  ;;  %v3833_v49 = vpop.f32.mrf.mxu1  ;;  %v13453_v45 = vor.u32 %v5071_v57, %v5070_v14 }
 0x4f9   : >> { %v3879_v35 = vadd.f32 %v3833_v49, %v13160_v12  ;;  %v4976_v59 = vunpack.c.l.b16 %v4912_v28 }
 0x4fa   : >> { %v4846_v16 = vmul.f32 %v13227_v11, %v4811_v37  ;;  %v4456_v30 = vadd.f32 %v4409_v21, %v4167_v50  ;;  %v5205_v18 = vsel %vm11396_vm2, %v5167_v40, 0  ;;  %v5136_v21 = vsel %vm11539_vm5, 0, %v13351_v32 }
 0x4fb   : >> { %v4700_v51 = vpop.f32.mrf.mxu0  ;;  %5278 = vrot.lane.b32.xlu1 %v5205_v18, %s11170_s20 }
 0x4fc   : >> { %v4745_v31 = vadd.f32 %v4698_v33, %v4456_v30  ;;  %v4881_v41 = vadd.f32 %v13237_v9, %v4846_v16 }
 0x4fd   : >> { %v5265_v19 = vpop.permute.xlu0 %5264 }
 0x4fe   : >> { %v4780_v44 = vadd.f32 %v13222_v48, %v4745_v31  ;;  %v5347_v61 = vsel %vm5341_vm13, %v5301_v43, %v5265_v19  ;;  %v4913_v34 = vpack.c.bf16 %v4881_v41, %v4881_v41  ;;  %v5221_v25 = vpop.permute.xlu2 %5220 }
 0x4ff   : >> { %v5407_v10 = vunpack.c.l.b16 %v5347_v61  ;;  %v5408_v0 = vunpack.c.h.b16 %v5347_v61  ;;  %v4122_v53 = vpop.f32.mrf.mxu2  ;;  %v5307_v16 = vsel %vm5292_vm12, %v5136_v21, %v5221_v25 }
 0x500   : >> { %v4812_v56 = vmax.f32 %v4780_v44, 0.0  ;;  %v4168_v38 = vadd.f32 %v4122_v53, %v3879_v35  ;;  %v4411_v33 = vpop.f32.mrf.mxu3  ;;  %v4977_v47 = vunpack.c.l.b16 %v4913_v34  ;;  %v3836_v22 = vpop.f32.mrf.mxu1 }
 0x501   : >> { %v5439_v27 = vpack.c.b16 %v5407_v10, %v5407_v10  ;;  %v5440_v57 = vpack.c.b16 %v5408_v0, %v5408_v0  ;;  %v3880_v26 = vadd.f32 %v3836_v22, %v13165_v58 }
 0x502   : >> { %v4457_v6 = vadd.f32 %v4411_v33, %v4168_v38  ;;  %v4998_v14 = vpack.c.b16 %v4977_v47, %v4976_v59  ;;  %v4847_v60 = vmul.f32 %v13227_v11, %v4812_v56  ;;  %v5135_v59 = vsel %vm11539_vm5, 0, %v13329_v42 }
 0x503   : >> { %9578 = vst.msk [vmem:[%s13420_s11 + $0x18] sm:$0xf] %vm453_vm9, %v5439_v27  ;;  %v4703_v12 = vpop.f32.mrf.mxu0 }
 0x504   : >> { %9579 = vst.msk [vmem:[%s13420_s11 + $0x1c] sm:$0xf] %vm453_vm9, %v5440_v57  ;;  %v4746_v46 = vadd.f32 %v4700_v51, %v4457_v6  ;;  %5232 = vrot.lane.b32.xlu1 %v4998_v14, %s11169_s24  ;;  %v5075_v37 = vshrl.u32 %v4998_v14, 16  ;;  %v5078_v50 = vshll.u32 %v4998_v14, 16  ;;  %v4882_v43 = vadd.f32 %v13237_v9, %v4847_v60 }
 0x506   : >> { %v4781_v40 = vadd.f32 %v13222_v48, %v4746_v46  ;;  %v5077_v29 = vrot.slane %v5075_v37, 7  ;;  %v5168_v49 = vrot.slane %v5078_v50, 1  ;;  %v5269_v30 = vpop.permute.xlu2 %5268  ;;  %v5219_v18 = vpop.permute.xlu1 %5218  ;;  %v4914_v38 = vpack.c.bf16 %v4882_v43, %v4882_v43 }
 0x507   : >> { %v5351_v51 = vsel %vm5341_vm13, %v5307_v16, %v5269_v30  ;;  %v4125_v31 = vpop.f32.mrf.mxu2  ;;  %v5304_v27 = vsel %vm5292_vm12, %v5135_v59, %v5219_v18 }
 0x508   : >> { %v4813_v5 = vmax.f32 %v4781_v40, 0.0  ;;  %v4414_v41 = vpop.f32.mrf.mxu3  ;;  %v5169_v28 = vor.u32 %v5168_v49, %v5075_v37  ;;  %v5411_v32 = vunpack.c.l.b16 %v5351_v51  ;;  %v5412_v19 = vunpack.c.h.b16 %v5351_v51  ;;  %v3838_v35 = vpop.f32.mrf.mxu1 }
 0x509   : >> { %v4169_v44 = vadd.f32 %v4125_v31, %v3880_v26  ;;  %v13484_v34 = vor.u32 %v5078_v50, %v5077_v29  ;;  %v3881_v22 = vadd.f32 %v3838_v35, %v13174_v54  ;;  %v4978_v37 = vunpack.c.l.b16 %v4914_v38 }
 0x50a   : >> { %v4848_v61 = vmul.f32 %v13227_v11, %v4813_v5  ;;  %v5206_v58 = vsel %vm11396_vm2, %v5169_v28, 0  ;;  %v5443_v10 = vpack.c.b16 %v5411_v32, %v5411_v32  ;;  %v5444_v0 = vpack.c.b16 %v5412_v19, %v5412_v19 }
 0x50b   : >> { %v4458_v25 = vadd.f32 %v4414_v41, %v4169_v44  ;;  %v4705_v53 = vpop.f32.mrf.mxu0  ;;  %5280 = vrot.lane.b32.xlu2 %v5206_v58, %s11170_s20 }
 0x50c   : >> { %v4883_v56 = vadd.f32 %v13237_v9, %v4848_v61  ;;  %9582 = vst.msk [vmem:[%s13420_s11 + $0x28] sm:$0xf] %vm453_vm9, %v5443_v10 }
 0x50d   : >> { %v4747_v33 = vadd.f32 %v4703_v12, %v4458_v25  ;;  %9583 = vst.msk [vmem:[%s13420_s11 + $0x2c] sm:$0xf] %vm453_vm9, %v5444_v0 }
 0x50e   : >> { %v4915_v47 = vpack.c.bf16 %v4883_v56, %v4883_v56  ;;  %v5267_v6 = vpop.permute.xlu1 %5266 }
 0x50f   : >> { %v4782_v57 = vadd.f32 %v13222_v48, %v4747_v33  ;;  %v5349_v14 = vsel %vm5341_vm13, %v5304_v27, %v5267_v6  ;;  %v4127_v60 = vpop.f32.mrf.mxu2 }
 0x510   : >> { %v4416_v46 = vpop.f32.mrf.mxu3  ;;  %v4979_v12 = vunpack.c.l.b16 %v4915_v47  ;;  %v5409_v21 = vunpack.c.l.b16 %v5349_v14  ;;  %v5410_v40 = vunpack.c.h.b16 %v5349_v14  ;;  %v4170_v42 = vadd.f32 %v4127_v60, %v3881_v22  ;;  %v3841_v29 = vpop.f32.mrf.mxu1 }
 0x511   : >> { %v4814_v50 = vmax.f32 %v4782_v57, 0.0  ;;  %v3882_v32 = vadd.f32 %v3841_v29, %v13179_v55 }
 0x512   : >> { %v4999_v49 = vpack.c.b16 %v4979_v12, %v4978_v37  ;;  %v5441_v16 = vpack.c.b16 %v5409_v21, %v5409_v21  ;;  %v5442_v26 = vpack.c.b16 %v5410_v40, %v5410_v40  ;;  %v4459_v30 = vadd.f32 %v4416_v46, %v4170_v42 }
 0x513   : >> { %v4708_v18 = vpop.f32.mrf.mxu0  ;;  %v4849_v51 = vmul.f32 %v13227_v11, %v4814_v50 }
 0x514   : >> { %5234 = vrot.lane.b32.xlu2 %v4999_v49, %s11169_s24  ;;  %v5082_v54 = vshrl.u32 %v4999_v49, 16  ;;  %v5085_v5 = vshll.u32 %v4999_v49, 16  ;;  %9580 = vst.msk [vmem:[%s13420_s11 + $0x20] sm:$0xf] %vm453_vm9, %v5441_v16  ;;  %v4748_v31 = vadd.f32 %v4705_v53, %v4459_v30 }
 0x515   : >> { %9581 = vst.msk [vmem:[%s13420_s11 + $0x24] sm:$0xf] %vm453_vm9, %v5442_v26  ;;  %v4884_v25 = vadd.f32 %v13237_v9, %v4849_v51 }
 0x516   : >> { %v5084_v41 = vrot.slane %v5082_v54, 7  ;;  %v5170_v28 = vrot.slane %v5085_v5, 1  ;;  %v4783_v43 = vadd.f32 %v13222_v48, %v4748_v31 }
 0x517   : >> { %v4130_v19 = vpop.f32.mrf.mxu2  ;;  %v4916_v47 = vpack.c.bf16 %v4884_v25, %v4884_v25 }
 0x518   : >> { %v4419_v44 = vpop.f32.mrf.mxu3  ;;  %v5171_v35 = vor.u32 %v5170_v28, %v5082_v54  ;;  %v13507_v61 = vor.u32 %v5085_v5, %v5084_v41  ;;  %v4815_v58 = vmax.f32 %v4783_v43, 0.0  ;;  %v4171_v10 = vadd.f32 %v4130_v19, %v3882_v32  ;;  %v3843_v0 = vpop.f32.mrf.mxu1 }
 0x519   : >> { %v3883_v57 = vadd.f32 %v3843_v0, %v13188_v20  ;;  %v4980_v37 = vunpack.c.l.b16 %v4916_v47  ;;  %v5223_v32 = vpop.permute.xlu2 %5222 }
 0x51a   : >> { %v5207_v53 = vsel %vm11396_vm2, %v5171_v35, 0  ;;  %v4850_v56 = vmul.f32 %v13227_v11, %v4815_v58  ;;  %v4460_v38 = vadd.f32 %v4419_v44, %v4171_v10 }
 0x51b   : >> { %v4710_v33 = vpop.f32.mrf.mxu0  ;;  %5282 = vrot.lane.b32.xlu0 %v5207_v53, %s11170_s20 }
 0x51c   : >> { %v4749_v55 = vadd.f32 %v4708_v18, %v4460_v38  ;;  %v4885_v59 = vadd.f32 %v13237_v9, %v4850_v56 }
 0x51e   : >> { %v4784_v27 = vadd.f32 %v13222_v48, %v4749_v55  ;;  %v4917_v22 = vpack.c.bf16 %v4885_v59, %v4885_v59 }
 0x51f   : >> { %v4132_v6 = vpop.f32.mrf.mxu2 }
 0x520   : >> { %v4421_v14 = vpop.f32.mrf.mxu3  ;;  %v4172_v60 = vadd.f32 %v4132_v6, %v3883_v57  ;;  %v3846_v46 = vpop.f32.mrf.mxu1  ;;  %v4981_v12 = vunpack.c.l.b16 %v4917_v22  ;;  %v4816_v50 = vmax.f32 %v4784_v27, 0.0 }
 0x521   : >> { %v3884_v30 = vadd.f32 %v3846_v46, %v13193_v13  ;;  %v5137_v13 = vsel %vm11539_vm5, 0, %v13373_v39 }
 0x522   : >> { %v4461_v21 = vadd.f32 %v4421_v14, %v4172_v60  ;;  %v5000_v40 = vpack.c.b16 %v4981_v12, %v4980_v37  ;;  %v4851_v26 = vmul.f32 %v13227_v11, %v4816_v50  ;;  %v5310_v0 = vsel %vm5292_vm12, %v5137_v13, %v5223_v32 }
 0x523   : >> { %v4713_v29 = vpop.f32.mrf.mxu0 }
 0x524   : >> { %v4750_v42 = vadd.f32 %v4710_v33, %v4461_v21  ;;  %5236 = vrot.lane.b32.xlu0 %v5000_v40, %s11169_s24  ;;  %v5089_v49 = vshrl.u32 %v5000_v40, 16  ;;  %v5092_v16 = vshll.u32 %v5000_v40, 16  ;;  %v4886_v19 = vadd.f32 %v13237_v9, %v4851_v26 }
 0x526   : >> { %v4785_v20 = vadd.f32 %v13222_v48, %v4750_v42  ;;  %v5091_v18 = vrot.slane %v5089_v49, 7  ;;  %v5172_v54 = vrot.slane %v5092_v16, 1  ;;  %v4918_v55 = vpack.c.bf16 %v4886_v19, %v4886_v19 }
 0x527   : >> { %v4135_v5 = vpop.f32.mrf.mxu2 }
 0x528   : >> { %v4424_v51 = vpop.f32.mrf.mxu3  ;;  %v4817_v31 = vmax.f32 %v4785_v20, 0.0  ;;  %v4173_v41 = vadd.f32 %v4135_v5, %v3884_v30  ;;  %v3848_v28 = vpop.f32.mrf.mxu1  ;;  %v5173_v43 = vor.u32 %v5172_v54, %v5089_v49  ;;  %v13522_v44 = vor.u32 %v5092_v16, %v5091_v18 }
 0x529   : >> { %v3885_v38 = vadd.f32 %v3848_v28, %v13202_v1  ;;  %v4982_v50 = vunpack.c.l.b16 %v4918_v55 }
 0x52a   : >> { %v4852_v35 = vmul.f32 %v13227_v11, %v4817_v31  ;;  %v4462_v58 = vadd.f32 %v4424_v51, %v4173_v41  ;;  %v5208_v10 = vsel %vm11396_vm2, %v5173_v43, 0 }
 0x52b   : >> { %5284 = vrot.lane.b32.xlu1 %v5208_v10, %s11170_s20  ;;  %v4715_v47 = vpop.f32.mrf.mxu0 }
 0x52c   : >> { %v4751_v25 = vadd.f32 %v4713_v29, %v4462_v58  ;;  %v4887_v56 = vadd.f32 %v13237_v9, %v4852_v35  ;;  %v5138_v35 = vsel %vm11539_vm5, 0, %v13387_v23 }
 0x52d   : >> { %v5271_v53 = vpop.permute.xlu0 %5270 }
 0x52e   : >> { %v5353_v33 = vsel %vm5341_vm13, %v5310_v0, %v5271_v53  ;;  %v4786_v59 = vadd.f32 %v13222_v48, %v4751_v25  ;;  %v4919_v57 = vpack.c.bf16 %v4887_v56, %v4887_v56 }
 0x52f   : >> { %v5413_v27 = vunpack.c.l.b16 %v5353_v33  ;;  %v5414_v39 = vunpack.c.h.b16 %v5353_v33  ;;  %v4137_v22 = vpop.f32.mrf.mxu2 }
 0x530   : >> { %v4426_v6 = vpop.f32.mrf.mxu3  ;;  %v4174_v46 = vadd.f32 %v4137_v22, %v3885_v38  ;;  %v4818_v37 = vmax.f32 %v4786_v59, 0.0  ;;  %v3851_v12 = vpop.f32.mrf.mxu1  ;;  %v4983_v1 = vunpack.c.l.b16 %v4919_v57 }
 0x531   : >> { %v5445_v14 = vpack.c.b16 %v5413_v27, %v5413_v27  ;;  %v5446_v60 = vpack.c.b16 %v5414_v39, %v5414_v39  ;;  %v3886_v26 = vadd.f32 %v3851_v12, %v13207_v62 }
 0x532   : >> { %v4463_v21 = vadd.f32 %v4426_v6, %v4174_v46  ;;  %v5001_v40 = vpack.c.b16 %v4983_v1, %v4982_v50  ;;  %v4853_v29 = vmul.f32 %v13227_v11, %v4818_v37  ;;  %v5139_v1 = vsel %vm11539_vm5, 0, %v13404_v36 }
 0x533   : >> { %9584 = vst.msk [vmem:[%s13420_s11 + $0x30] sm:$0xf] %vm453_vm9, %v5445_v14  ;;  %v4718_v31 = vpop.f32.mrf.mxu0 }
 0x534   : >> { %9585 = vst.msk [vmem:[%s13420_s11 + $0x34] sm:$0xf] %vm453_vm9, %v5446_v60  ;;  %v4752_v42 = vadd.f32 %v4715_v47, %v4463_v21  ;;  %5238 = vrot.lane.b32.xlu1 %v5001_v40, %s11169_s24  ;;  %v5096_v49 = vshrl.u32 %v5001_v40, 16  ;;  %v5099_v54 = vshll.u32 %v5001_v40, 16  ;;  %v4888_v28 = vadd.f32 %v13237_v9, %v4853_v29 }
 0x536   : >> { %v4787_v16 = vadd.f32 %v13222_v48, %v4752_v42  ;;  %v5098_v18 = vrot.slane %v5096_v49, 7  ;;  %v5225_v41 = vpop.permute.xlu0 %5224  ;;  %v4920_v53 = vpack.c.bf16 %v4888_v28, %v4888_v28  ;;  %v5174_v12 = vrot.slane %v5099_v54, 1  ;;  %v5275_v42 = vpop.permute.xlu2 %5274 }
 0x537   : >> { %v4140_v20 = vpop.f32.mrf.mxu2  ;;  %v5313_v58 = vsel %vm5292_vm12, %v5138_v35, %v5225_v41 }
 0x538   : >> { %v4429_v30 = vpop.f32.mrf.mxu3  ;;  %v4819_v5 = vmax.f32 %v4787_v16, 0.0  ;;  %v4175_v51 = vadd.f32 %v4140_v20, %v3886_v26  ;;  %v13545_v43 = vor.u32 %v5099_v54, %v5098_v18  ;;  %v3853_v62 = vpop.f32.mrf.mxu1  ;;  %v4984_v6 = vunpack.c.l.b16 %v4920_v53 }
 0x539   : >> { %v3887_v38 = vadd.f32 %v3853_v62, %v13216_v7  ;;  %v5175_v20 = vor.u32 %v5174_v12, %v5096_v49 }
 0x53a   : >> { %v4854_v32 = vmul.f32 %v13227_v11, %v4819_v5  ;;  %v4464_v19 = vadd.f32 %v4429_v30, %v4175_v51 }
 0x53b   : >> { %v4720_v46 = vpop.f32.mrf.mxu0 }
 0x53c   : >> { %v4753_v10 = vadd.f32 %v4718_v31, %v4464_v19  ;;  %v4889_v0 = vadd.f32 %v13237_v9, %v4854_v32 }
 0x53d   : >> { %v5273_v13 = vpop.permute.xlu1 %5272 }
 0x53e   : >> { %v5355_v25 = vsel %vm5341_vm13, %v5313_v58, %v5273_v13  ;;  %v4788_v56 = vadd.f32 %v13222_v48, %v4753_v10  ;;  %v4921_v23 = vpack.c.bf16 %v4889_v0, %v4889_v0 }
 0x53f   : >> { %v5415_v33 = vunpack.c.l.b16 %v5355_v25  ;;  %v5416_v55 = vunpack.c.h.b16 %v5355_v25  ;;  %v4142_v59 = vpop.f32.mrf.mxu2 }
 0x540   : >> { %v4820_v47 = vmax.f32 %v4788_v56, 0.0  ;;  %v4176_v57 = vadd.f32 %v4142_v59, %v3887_v38  ;;  %v4431_v22 = vpop.f32.mrf.mxu3  ;;  %v4985_v14 = vunpack.c.l.b16 %v4921_v23  ;;  %v5140_v23 = vsel %vm11539_vm5, 0, %v13435_v4 }
 0x541   : >> { %v5447_v27 = vpack.c.b16 %v5415_v33, %v5415_v33  ;;  %v5448_v39 = vpack.c.b16 %v5416_v55, %v5416_v55  ;;  %v5229_v33 = vpop.permute.xlu2 %5228  ;;  %v5141_v4 = vsel %vm11539_vm5, 0, %v13453_v45 }
 0x542   : >> { %v4465_v60 = vadd.f32 %v4431_v22, %v4176_v57  ;;  %v5002_v37 = vpack.c.b16 %v4985_v14, %v4984_v6  ;;  %v4855_v7 = vmul.f32 %v13227_v11, %v4820_v47  ;;  %v5319_v47 = vsel %vm5292_vm12, %v5140_v23, %v5229_v33 }
 0x543   : >> { %9586 = vst.msk [vmem:[%s13420_s11 + $0x38] sm:$0xf] %vm453_vm9, %v5447_v27 }
 0x544   : >> { %9587 = vst.msk [vmem:[%s13420_s11 + $0x3c] sm:$0xf] %vm453_vm9, %v5448_v39  ;;  %v4754_v50 = vadd.f32 %v4720_v46, %v4465_v60  ;;  %5240 = vrot.lane.b32.xlu2 %v5002_v37, %s11169_s24  ;;  %v5103_v40 = vshrl.u32 %v5002_v37, 16  ;;  %v5106_v18 = vshll.u32 %v5002_v37, 16  ;;  %v4890_v31 = vadd.f32 %v13237_v9, %v4855_v7 }
 0x546   : >> { %v5227_v21 = vpop.permute.xlu1 %5226  ;;  %v4789_v29 = vadd.f32 %v13222_v48, %v4754_v50  ;;  %v5105_v30 = vrot.slane %v5103_v40, 7  ;;  %v5209_v48 = vsel %vm11396_vm2, %v5175_v20, 0  ;;  %v4922_v19 = vpack.c.bf16 %v4890_v31, %v4890_v31 }
 0x547   : >> { %v5316_v16 = vsel %vm5292_vm12, %v5139_v1, %v5227_v21  ;;  %v5176_v13 = vrot.slane %v5106_v18, 1 }
 0x548   : >> { %v5357_v26 = vsel %vm5341_vm13, %v5316_v16, %v5275_v42  ;;  %v4821_v54 = vmax.f32 %v4789_v29, 0.0  ;;  %v13569_v36 = vor.u32 %v5106_v18, %v5105_v30  ;;  %v4986_v62 = vunpack.c.l.b16 %v4922_v19 }
 0x549   : >> { %v5417_v5 = vunpack.c.l.b16 %v5357_v26  ;;  %v5418_v51 = vunpack.c.h.b16 %v5357_v26  ;;  %v5177_v56 = vor.u32 %v5176_v13, %v5103_v40  ;;  %v5142_v40 = vsel %vm11539_vm5, 0, %v13484_v34 }
 0x54a   : >> { %v4856_v41 = vmul.f32 %v13227_v11, %v4821_v54  ;;  %v5143_v34 = vsel %vm11539_vm5, 0, %v13507_v61  ;;  %v5144_v61 = vsel %vm11539_vm5, 0, %v13522_v44  ;;  %v5145_v44 = vsel %vm11539_vm5, 0, %v13545_v43 }
 0x54b   : >> { %v5449_v28 = vpack.c.b16 %v5417_v5, %v5417_v5  ;;  %v5450_v32 = vpack.c.b16 %v5418_v51, %v5418_v51  ;;  %v5210_v59 = vsel %vm11396_vm2, %v5177_v56, 0  ;;  %v5146_v43 = vsel %vm11539_vm5, 0, %v13569_v36 }
 0x54c   : >> { %v4891_v49 = vadd.f32 %v13237_v9, %v4856_v41  ;;  %5286 = vrot.lane.b32.xlu2 %v5209_v48, %s11170_s20 }
 0x54d   : >> { %9588 = vst.msk [vmem:[%s13420_s11 + $0x40] sm:$0xf] %vm453_vm9, %v5449_v28 }
 0x54e   : >> { %9589 = vst.msk [vmem:[%s13420_s11 + $0x44] sm:$0xf] %vm453_vm9, %v5450_v32  ;;  %v4923_v35 = vpack.c.bf16 %v4891_v49, %v4891_v49 }
 0x550   : >> { %v4987_v58 = vunpack.c.l.b16 %v4923_v35 }
 0x552   : >> { %v5003_v10 = vpack.c.b16 %v4987_v58, %v4986_v62 }
 0x554   : >> { %5242 = vrot.lane.b32.xlu0 %v5003_v10, %s11169_s24  ;;  %v5110_v11 = vshrl.u32 %v5003_v10, 16  ;;  %v5113_v0 = vshll.u32 %v5003_v10, 16 }
 0x556   : >> { %v5112_v25 = vrot.slane %v5110_v11, 7  ;;  %v5178_v53 = vrot.slane %v5113_v0, 1 }
 0x558   : >> { %v5179_v38 = vor.u32 %v5178_v53, %v5110_v11  ;;  %v13581_v9 = vor.u32 %v5113_v0, %v5112_v25 }
 0x55a   : >> { %v5211_v55 = vsel %vm11396_vm2, %v5179_v38, 0 }
 0x55b   : >> { %5290 = vrot.lane.b32.xlu1 %v5211_v55, %s11170_s20 }
 0x55c   : >> { %5288 = vrot.lane.b32.xlu0 %v5210_v59, %s11170_s20 }
 0x55d   : >> { %v5277_v27 = vpop.permute.xlu0 %5276 }
 0x55e   : >> { %v5359_v39 = vsel %vm5341_vm13, %v5319_v47, %v5277_v27  ;;  %v5147_v27 = vsel %vm11539_vm5, 0, %v13581_v9 }
 0x55f   : >> { %v5419_v57 = vunpack.c.l.b16 %v5359_v39  ;;  %v5420_v22 = vunpack.c.h.b16 %v5359_v39 }
 0x561   : >> { %v5451_v6 = vpack.c.b16 %v5419_v57, %v5419_v57  ;;  %v5452_v14 = vpack.c.b16 %v5420_v22, %v5420_v22 }
 0x563   : >> { %9590 = vst.msk [vmem:[%s13420_s11 + $0x48] sm:$0xf] %vm453_vm9, %v5451_v6 }
 0x564   : >> { %9591 = vst.msk [vmem:[%s13420_s11 + $0x4c] sm:$0xf] %vm453_vm9, %v5452_v14 }
 0x565   : >> { %v5281_v42 = vpop.permute.xlu2 %5280 }
 0x566   : >> { %v5231_v60 = vpop.permute.xlu0 %5230 }
 0x567   : >> { %v5322_v46 = vsel %vm5292_vm12, %v5141_v4, %v5231_v60 }
 0x56d   : >> { %v5279_v37 = vpop.permute.xlu1 %5278 }
 0x56e   : >> { %v5361_v12 = vsel %vm5341_vm13, %v5322_v46, %v5279_v37  ;;  %v5235_v54 = vpop.permute.xlu2 %5234 }
 0x56f   : >> { %v5421_v7 = vunpack.c.l.b16 %v5361_v12  ;;  %v5422_v50 = vunpack.c.h.b16 %v5361_v12  ;;  %v5328_v5 = vsel %vm5292_vm12, %v5143_v34, %v5235_v54 }
 0x571   : >> { %v5453_v1 = vpack.c.b16 %v5421_v7, %v5421_v7  ;;  %v5454_v21 = vpack.c.b16 %v5422_v50, %v5422_v50 }
 0x573   : >> { %9592 = vst.msk [vmem:[%s13420_s11 + $0x50] sm:$0xf] %vm453_vm9, %v5453_v1 }
 0x574   : >> { %9593 = vst.msk [vmem:[%s13420_s11 + $0x54] sm:$0xf] %vm453_vm9, %v5454_v21 }
 0x576   : >> { %v5233_v45 = vpop.permute.xlu1 %5232 }
 0x577   : >> { %v5325_v29 = vsel %vm5292_vm12, %v5142_v40, %v5233_v45 }
 0x578   : >> { %v5363_v16 = vsel %vm5341_vm13, %v5325_v29, %v5281_v42 }
 0x579   : >> { %v5423_v26 = vunpack.c.l.b16 %v5363_v16  ;;  %v5424_v20 = vunpack.c.h.b16 %v5363_v16 }
 0x57b   : >> { %v5455_v30 = vpack.c.b16 %v5423_v26, %v5423_v26  ;;  %v5456_v18 = vpack.c.b16 %v5424_v20, %v5424_v20 }
 0x57d   : >> { %9594 = vst.msk [vmem:[%s13420_s11 + $0x58] sm:$0xf] %vm453_vm9, %v5455_v30 }
 0x57e   : >> { %9595 = vst.msk [vmem:[%s13420_s11 + $0x5c] sm:$0xf] %vm453_vm9, %v5456_v18 }
 0x58d   : >> { %v5283_v51 = vpop.permute.xlu0 %5282 }
 0x58e   : >> { %v5365_v31 = vsel %vm5341_vm13, %v5328_v5, %v5283_v51 }
 0x58f   : >> { %v5425_v41 = vunpack.c.l.b16 %v5365_v31  ;;  %v5426_v28 = vunpack.c.h.b16 %v5365_v31 }
 0x591   : >> { %v5457_v32 = vpack.c.b16 %v5425_v41, %v5425_v41  ;;  %v5458_v48 = vpack.c.b16 %v5426_v28, %v5426_v28 }
 0x593   : >> { %9596 = vst.msk [vmem:[%s13420_s11 + $0x60] sm:$0xf] %vm453_vm9, %v5457_v32 }
 0x594   : >> { %9597 = vst.msk [vmem:[%s13420_s11 + $0x64] sm:$0xf] %vm453_vm9, %v5458_v48 }
 0x596   : >> { %v5237_v49 = vpop.permute.xlu0 %5236 }
 0x597   : >> { %v5331_v19 = vsel %vm5292_vm12, %v5144_v61, %v5237_v49 }
 0x59d   : >> { %v5285_v35 = vpop.permute.xlu1 %5284 }
 0x59e   : >> { %v5367_v62 = vsel %vm5341_vm13, %v5331_v19, %v5285_v35  ;;  %v5241_v13 = vpop.permute.xlu2 %5240 }
 0x59f   : >> { %v5427_v58 = vunpack.c.l.b16 %v5367_v62  ;;  %v5428_v10 = vunpack.c.h.b16 %v5367_v62  ;;  %v5337_v22 = vsel %vm5292_vm12, %v5146_v43, %v5241_v13 }
 0x5a1   : >> { %v5459_v11 = vpack.c.b16 %v5427_v58, %v5427_v58  ;;  %v5460_v0 = vpack.c.b16 %v5428_v10, %v5428_v10 }
 0x5a3   : >> { %9598 = vst.msk [vmem:[%s13420_s11 + $0x68] sm:$0xf] %vm453_vm9, %v5459_v11 }
 0x5a4   : >> { %9599 = vst.msk [vmem:[%s13420_s11 + $0x6c] sm:$0xf] %vm453_vm9, %v5460_v0 }
 0x5a6   : >> { %v5287_v25 = vpop.permute.xlu2 %5286  ;;  %v5239_v53 = vpop.permute.xlu1 %5238 }
 0x5a7   : >> { %v5334_v56 = vsel %vm5292_vm12, %v5145_v44, %v5239_v53 }
 0x5a8   : >> { %v5369_v38 = vsel %vm5341_vm13, %v5334_v56, %v5287_v25 }
 0x5a9   : >> { %v5429_v33 = vunpack.c.l.b16 %v5369_v38  ;;  %v5430_v55 = vunpack.c.h.b16 %v5369_v38 }
 0x5ab   : >> { %v5461_v59 = vpack.c.b16 %v5429_v33, %v5429_v33  ;;  %v5462_v23 = vpack.c.b16 %v5430_v55, %v5430_v55 }
 0x5ad   : >> { %9600 = vst.msk [vmem:[%s13420_s11 + $0x70] sm:$0xf] %vm453_vm9, %v5461_v59 }
 0x5ae   : >> { %9601 = vst.msk [vmem:[%s13420_s11 + $0x74] sm:$0xf] %vm453_vm9, %v5462_v23 }
 0x5c6   : >> { %v5243_v47 = vpop.permute.xlu0 %5242 }
 0x5c7   : >> { %v5340_v39 = vsel %vm5292_vm12, %v5147_v27, %v5243_v47 }
 0x5cd   : >> { %v5291_v57 = vpop.permute.xlu1 %5290 }
 0x5ce   : >> { %v5373_v6 = vsel %vm5341_vm13, %v5340_v39, %v5291_v57  ;;  %v5289_v14 = vpop.permute.xlu0 %5288 }
 0x5cf   : >> { %v5433_v60 = vunpack.c.l.b16 %v5373_v6  ;;  %v5434_v4 = vunpack.c.h.b16 %v5373_v6  ;;  %v5371_v9 = vsel %vm5341_vm13, %v5337_v22, %v5289_v14 }
 0x5d0   : >> { %v5431_v46 = vunpack.c.l.b16 %v5371_v9  ;;  %v5432_v37 = vunpack.c.h.b16 %v5371_v9 }
 0x5d1   : >> { %v5465_v12 = vpack.c.b16 %v5433_v60, %v5433_v60  ;;  %v5466_v7 = vpack.c.b16 %v5434_v4, %v5434_v4 }
 0x5d2   : >> { %v5463_v36 = vpack.c.b16 %v5431_v46, %v5431_v46  ;;  %v5464_v50 = vpack.c.b16 %v5432_v37, %v5432_v37 }
 0x5d3   : >> { %9604 = vst.msk [vmem:[%s13420_s11 + $0x80] sm:$0xf] %vm453_vm9, %v5465_v12 }
 0x5d4   : >> { %9605 = vst.msk [vmem:[%s13420_s11 + $0x84] sm:$0xf] %vm453_vm9, %v5466_v7 }
 0x5d5   : >> { %9602 = vst.msk [vmem:[%s13420_s11 + $0x78] sm:$0xf] %vm453_vm9, %v5463_v36 }
 0x5d6   : >> { %9603 = vst.msk [vmem:[%s13420_s11 + $0x7c] sm:$0xf] %vm453_vm9, %v5464_v50 }
 0x5d7 PF: >> { %p9606_p5 = scmp.ne.s32.totalorder %s11160_s30, 16 }
 0x5d8   : >> { %s5540_s12 = ssub.s32 (!%p9606_p5), 0, %s11160_s30  ;;  %p5539_p6 = scmp.lt.s32.totalorder (!%p9606_p5), %s11160_s30, 0 }
 0x5d9   : >> { %5538 = sbr.rel (%p9606_p5) target bundleno = 1553 (0x611), region = 79  ;;  %s9607_s10 = smin.u32 (!%p9606_p5), %s11160_s30, %s5540_s12 }
 0x5da   : >> { %11134 = sdivrem.u32 (!%p9606_p5), %s9607_s10, 3 }
 0x5de   : >> { %v11171_v1 = vmov 0  }
 0x5e3   : >> { %s11135_s14 = spop.drf %11134 }
 0x5e4   : >> { %s11136_s2 = spop.drf %11134 }
 0x5e5   : >> { %s5544_s29 = ssub.s32 0, %s11136_s2 }
 0x5e6   : >> { %s14462_s29 = smov (!%p5539_p6, %s5544_s29), %s11136_s2 }
 0x5e7   : >> { %p9609_p7 = scmp.lt.s32.totalorder %s14462_s29, 0  ;;  %s5550_s15 = sadd.s32 3, %s14462_s29 }
 0x5e9   : >> { %s14464_s15 = smov (!%p9609_p7, %s5550_s15), %s14462_s29 }
 0x5ea   : >> { %s10757_s17 = smul.u32 144, %s14464_s15 }
 0x5ec   : >> { %s13665_s18 = scalar_lea.vmem [#allocation3], %s10757_s17 }
 0x5ed   : >> { %5555 = vst.msk [vmem:[%s13665_s18] sm:$0xf] %vm453_vm9, %v11171_v1 }
 0x5ee   : >> { %5556 = vst.msk [vmem:[%s13665_s18 + $0x4] sm:$0xf] %vm453_vm9, %v11171_v1 }
 0x5ef   : >> { %5557 = vst.msk [vmem:[%s13665_s18 + $0x8] sm:$0xf] %vm453_vm9, %v11171_v1 }
 0x5f0   : >> { %5558 = vst.msk [vmem:[%s13665_s18 + $0xc] sm:$0xf] %vm453_vm9, %v11171_v1 }
 0x5f1   : >> { %5559 = vst.msk [vmem:[%s13665_s18 + $0x10] sm:$0xf] %vm453_vm9, %v11171_v1 }
 0x5f2   : >> { %5560 = vst.msk [vmem:[%s13665_s18 + $0x14] sm:$0xf] %vm453_vm9, %v11171_v1 }
 0x5f3   : >> { %5561 = vst.msk [vmem:[%s13665_s18 + $0x18] sm:$0xf] %vm453_vm9, %v11171_v1 }
 0x5f4   : >> { %5562 = vst.msk [vmem:[%s13665_s18 + $0x1c] sm:$0xf] %vm453_vm9, %v11171_v1 }
 0x5f5   : >> { %5563 = vst.msk [vmem:[%s13665_s18 + $0x20] sm:$0xf] %vm453_vm9, %v11171_v1 }
 0x5f6   : >> { %5564 = vst.msk [vmem:[%s13665_s18 + $0x24] sm:$0xf] %vm453_vm9, %v11171_v1 }
 0x5f7   : >> { %5565 = vst.msk [vmem:[%s13665_s18 + $0x28] sm:$0xf] %vm453_vm9, %v11171_v1 }
 0x5f8   : >> { %5566 = vst.msk [vmem:[%s13665_s18 + $0x2c] sm:$0xf] %vm453_vm9, %v11171_v1 }
 0x5f9   : >> { %5567 = vst.msk [vmem:[%s13665_s18 + $0x30] sm:$0xf] %vm453_vm9, %v11171_v1 }
 0x5fa   : >> { %5568 = vst.msk [vmem:[%s13665_s18 + $0x34] sm:$0xf] %vm453_vm9, %v11171_v1 }
 0x5fb   : >> { %5569 = vst.msk [vmem:[%s13665_s18 + $0x38] sm:$0xf] %vm453_vm9, %v11171_v1 }
 0x5fc   : >> { %5570 = vst.msk [vmem:[%s13665_s18 + $0x3c] sm:$0xf] %vm453_vm9, %v11171_v1 }
 0x5fd   : >> { %5571 = vst.msk [vmem:[%s13665_s18 + $0x40] sm:$0xf] %vm453_vm9, %v11171_v1 }
 0x5fe   : >> { %5572 = vst.msk [vmem:[%s13665_s18 + $0x44] sm:$0xf] %vm453_vm9, %v11171_v1 }
 0x5ff   : >> { %5573 = vst.msk [vmem:[%s13665_s18 + $0x48] sm:$0xf] %vm453_vm9, %v11171_v1 }
 0x600   : >> { %5574 = vst.msk [vmem:[%s13665_s18 + $0x4c] sm:$0xf] %vm453_vm9, %v11171_v1 }
 0x601   : >> { %5575 = vst.msk [vmem:[%s13665_s18 + $0x50] sm:$0xf] %vm453_vm9, %v11171_v1 }
 0x602   : >> { %5576 = vst.msk [vmem:[%s13665_s18 + $0x54] sm:$0xf] %vm453_vm9, %v11171_v1 }
 0x603   : >> { %5577 = vst.msk [vmem:[%s13665_s18 + $0x58] sm:$0xf] %vm453_vm9, %v11171_v1 }
 0x604   : >> { %5578 = vst.msk [vmem:[%s13665_s18 + $0x5c] sm:$0xf] %vm453_vm9, %v11171_v1 }
 0x605   : >> { %5579 = vst.msk [vmem:[%s13665_s18 + $0x60] sm:$0xf] %vm453_vm9, %v11171_v1 }
 0x606   : >> { %5580 = vst.msk [vmem:[%s13665_s18 + $0x64] sm:$0xf] %vm453_vm9, %v11171_v1 }
 0x607   : >> { %5581 = vst.msk [vmem:[%s13665_s18 + $0x68] sm:$0xf] %vm453_vm9, %v11171_v1 }
 0x608   : >> { %5582 = vst.msk [vmem:[%s13665_s18 + $0x6c] sm:$0xf] %vm453_vm9, %v11171_v1 }
 0x609   : >> { %5583 = vst.msk [vmem:[%s13665_s18 + $0x70] sm:$0xf] %vm453_vm9, %v11171_v1 }
 0x60a   : >> { %5584 = vst.msk [vmem:[%s13665_s18 + $0x74] sm:$0xf] %vm453_vm9, %v11171_v1 }
 0x60b   : >> { %5585 = vst.msk [vmem:[%s13665_s18 + $0x78] sm:$0xf] %vm453_vm9, %v11171_v1 }
 0x60c   : >> { %5586 = vst.msk [vmem:[%s13665_s18 + $0x7c] sm:$0xf] %vm453_vm9, %v11171_v1 }
 0x60d   : >> { %5587 = vst.msk [vmem:[%s13665_s18 + $0x80] sm:$0xf] %vm453_vm9, %v11171_v1 }
 0x60e   : >> { %5588 = vst.msk [vmem:[%s13665_s18 + $0x84] sm:$0xf] %vm453_vm9, %v11171_v1 }
 0x60f   : >> { %5589 = vst.msk [vmem:[%s13665_s18 + $0x88] sm:$0xf] %vm453_vm9, %v11171_v1 }
 0x610   : >> { %5590 = vst.msk [vmem:[%s13665_s18 + $0x8c] sm:$0xf] %vm453_vm9, %v11171_v1 }
 0x611 PF: >> { %p9611_p8 = scmp.lt.s32.totalorder %s11160_s30, 1 }
 0x612   : >> { %s13744_s23 = sadd.s32 (!%p9611_p8), 1, %s11160_s30  ;;  %s13752_s26 = sadd.s32 (!%p9611_p8), 3, %s11160_s30 }
 0x613   : >> { %5594 = sbr.rel (%p9611_p8) target bundleno = 2291 (0x8f3), region = 83  ;;  %s5598_s24 = ssub.s32 (!%p9611_p8), 0, %s13744_s23 }
 0x614   : >> { %s9613_s25 = smin.u32 (!%p9611_p8), %s5598_s24, %s13744_s23  ;;  %s5626_s10 = ssub.s32 (!%p9611_p8), 0, %s13752_s26 }
 0x615   : >> { %11137 = sdivrem.u32 (!%p9611_p8), %s9613_s25, 3  ;;  %s9619_s29 = smin.u32 (!%p9611_p8), %s5626_s10, %s13752_s26 }
 0x616   : >> { %s13766_s15 = sadd.s32 (!%p9611_p8), 2, %s11160_s30  ;;  %11140 = sdivrem.u32 (!%p9611_p8), %s9619_s29, 3 }
 0x617   : >> { %s5612_s21 = ssub.s32 (!%p9611_p8), 0, %s13766_s15  ;;  %p5597_p9 = scmp.lt.s32.totalorder (!%p9611_p8), %s13744_s23, 0 }
 0x618   : >> { %v9658_v21 = vld [vmem:[%s14427_s7 + $0x14] sm:$0xf]  ;;  %v9862_v45 = vld [vmem:[%s14427_s7 + $0x20] sm:$0xf]  ;;  %vm5853_vm14 = vcmask 1043456   ;;  %v10792_v31 = vld [vmem:[%s14427_s7 + $0xc] sm:$0xff]  ;;  %s9616_s22 = smin.u32 %s5612_s21, %s13766_s15 }
 0x619   : >> { %v5800_v40 = vunpack.c.l.b16 %v9658_v21  ;;  %v6299_v42 = vunpack.c.l.b16 %v9862_v45  ;;  %v9950_v29 = vld [vmem:[%s14427_s7 + $0x2c] sm:$0xf]  ;;  %v5675_v16 = vld [vmem:[%s14427_s7 + $0x8] sm:$0xf]  ;;  %v10070_v18 = vld [vmem:[%s14427_s7 + $0x38] sm:$0xf] }
 0x61a   : >> { %v6599_v20 = vunpack.c.l.b16 %v9950_v29  ;;  %v6031_v30 = vunpack.c.l.b16 %v5675_v16  ;;  %v6899_v54 = vunpack.c.l.b16 %v10070_v18  ;;  %11143 = sdivrem.u32 %s9616_s22, 3  ;;  %p5625_p11 = scmp.lt.s32.totalorder %s13752_s26, 0  ;;  %vm5804_vm15 = vcmask 195584   ;;  %v10809_v10 = vld [vmem:[%s14427_s7 + $0x18] sm:$0xff]  ;;  %v10827_v13 = vld [vmem:[%s14427_s7 + $0x24] sm:$0xff]  ;;  %v10844_v0 = vld [vmem:[%s14427_s7 + $0x30] sm:$0xff] }
 0x61b   : >> { %v5802_v26 = vpack.c.b16 %v5800_v40, %v5800_v40  ;;  %v6301_v5 = vpack.c.b16 %v6299_v42, %v6299_v42  ;;  %v10775_v11 = vld [vmem:[%s14427_s7] sm:$0xff]  ;;  %v10278_v23 = vld [vmem:[%s14427_s7 + $0x50] sm:$0xf]  ;;  %v10398_v47 = vld [vmem:[%s14427_s7 + $0x5c] sm:$0xf]  ;;  %p5611_p12 = scmp.lt.s32.totalorder %s13766_s15, 0 }
 0x61c   : >> { %v6601_v51 = vpack.c.b16 %v6599_v20, %v6599_v20  ;;  %v6033_v41 = vpack.c.b16 %v6031_v30, %v6031_v30  ;;  %v6901_v28 = vpack.c.b16 %v6899_v54, %v6899_v54  ;;  %v7499_v27 = vunpack.c.l.b16 %v10278_v23  ;;  %v10190_v39 = vld [vmem:[%s14427_s7 + $0x44] sm:$0xf]  ;;  %v10518_v57 = vld [vmem:[%s14427_s7 + $0x68] sm:$0xf] }
 0x61d   : >> { %v5855_v34 = vsel %vm5853_vm14, %v5802_v26, 0  ;;  %v6352_v32 = vsel %vm5853_vm14, %v6301_v5, 0  ;;  %v7799_v43 = vunpack.c.l.b16 %v10398_v47  ;;  %v7199_v22 = vunpack.c.l.b16 %v10190_v39 }
 0x61e   : >> { %11077 = vmatpush.bf16.msra.mxu1 %v5855_v34  ;;  %11078 = vmatpush.bf16.msra.mxu2 %v5855_v34  ;;  %v6652_v48 = vsel %vm5853_vm14, %v6601_v51, 0  ;;  %v6084_v49 = vsel %vm5853_vm14, %v6033_v41, 0  ;;  %v6952_v61 = vsel %vm5853_vm14, %v6901_v28, 0  ;;  %s11138_s24 = spop.drf %11137  ;;  %v8099_v6 = vunpack.c.l.b16 %v10518_v57 }
 0x61f   : >> { %11079 = vmatpush.bf16.msra.mxu3 %v5855_v34  ;;  %5863 = vmatpush.bf16.msra.mxu0 %v5855_v34  ;;  %s11139_s1 = spop.drf %11137  ;;  %v7501_v14 = vpack.c.b16 %v7499_v27, %v7499_v27  ;;  %v7801_v60 = vpack.c.b16 %v7799_v43, %v7799_v43  ;;  %v7201_v4 = vpack.c.b16 %v7199_v22, %v7199_v22  ;;  %vm8377_vm0 = vcmask 60416  }
 0x620   : >> { %s5602_s20 = ssub.s32 0, %s11139_s1  ;;  %s11141_s25 = spop.drf %11140  ;;  %v8101_v9 = vpack.c.b16 %v8099_v6, %v8099_v6 }
 0x621   : >> { %s14466_s20 = smov (!%p5597_p9, %s5602_s20), %s11139_s1  ;;  %s11142_s27 = spop.drf %11140  ;;  %v7552_v46 = vsel %vm5853_vm14, %v7501_v14, 0  ;;  %v7852_v37 = vsel %vm5853_vm14, %v7801_v60, 0  ;;  %v7252_v12 = vsel %vm5853_vm14, %v7201_v4, 0  ;;  %v10879_v4 = vld [vmem:[%s14427_s7 + $0x48] sm:$0xff] }
 0x622   : >> { %11080 = vmatpush.bf16.msra.mxu1 %v10792_v31  ;;  %11081 = vmatpush.bf16.msra.mxu2 %v10792_v31  ;;  %p9615_p10 = scmp.lt.s32.totalorder %s14466_s20, 0  ;;  %s5608_s28 = sadd.s32 3, %s14466_s20  ;;  %v8152_v7 = vsel %vm5853_vm14, %v8101_v9, 0  ;;  %v10896_v9 = vld [vmem:[%s14427_s7 + $0x54] sm:$0xff] }
 0x623   : >> { %11082 = vmatpush.bf16.msra.mxu3 %v10792_v31  ;;  %5864 = vmatpush.bf16.msra.mxu0 %v10792_v31  ;;  %s11144_s11 = spop.drf %11143  ;;  %s5630_s10 = ssub.s32 0, %s11142_s27 }
 0x624   : >> { %s14468_s28 = smov (!%p9615_p10, %s5608_s28), %s14466_s20  ;;  %s14470_s10 = smov (!%p5625_p11, %s5630_s10), %s11142_s27 }
 0x625   : >> { %s10758_s12 = smul.u32 144, %s14468_s28  ;;  %s11145_s26 = spop.drf %11143 }
 0x626   : >> { %6360 = vmatpush.bf16.msrb.mxu2 %v6352_v32  ;;  %6092 = vmatpush.bf16.msrb.mxu1 %v6084_v49  ;;  %s5616_s14 = ssub.s32 0, %s11145_s26  ;;  %p9621_p0 = scmp.lt.s32.totalorder %s14470_s10, 0 }
 0x627   : >> { %6660 = vmatpush.bf16.msrb.mxu3 %v6652_v48  ;;  %6960 = vmatpush.bf16.msrb.mxu0 %v6952_v61  ;;  %s13780_s23 = scalar_lea.vmem [#allocation3], %s10758_s12  ;;  %s14472_s14 = smov (!%p5611_p12, %s5616_s14), %s11145_s26 }
 0x628   : >> { %v10780_v19 = vld [vmem:[%s13780_s23 + $0x28] sm:$0xff]  ;;  %v10781_v25 = vld [vmem:[%s13780_s23 + $0x30] sm:$0xff]  ;;  %v10782_v38 = vld [vmem:[%s13780_s23 + $0x38] sm:$0xff]  ;;  %p9618_p13 = scmp.lt.s32.totalorder %s14472_s14, 0  ;;  %s5622_s15 = sadd.s32 3, %s14472_s14 }
 0x629   : >> { %v10784_v35 = vld [vmem:[%s13780_s23 + $0x48] sm:$0xff]  ;;  %9731 = vmatmul.msk.bf16.vlgmr.msra.gmra.mxu1 %vm5804_vm15, %v10780_v19  ;;  %v10785_v44 = vld [vmem:[%s13780_s23 + $0x50] sm:$0xff]  ;;  %v10786_v33 = vld [vmem:[%s13780_s23 + $0x58] sm:$0xff]  ;;  %s5636_s27 = sadd.s32 3, %s14470_s10 }
 0x62a   : >> { %v10788_v62 = vld [vmem:[%s13780_s23 + $0x68] sm:$0xff]  ;;  %9735 = vmatmul.msk.bf16.vlgmr.msra.gmra.mxu2 %vm5804_vm15, %v10784_v35  ;;  %6093 = vmatpush.bf16.msrb.mxu1 %v10775_v11  ;;  %v10789_v53 = vld [vmem:[%s13780_s23 + $0x70] sm:$0xff]  ;;  %v10790_v55 = vld [vmem:[%s13780_s23 + $0x78] sm:$0xff]  ;;  %s14474_s15 = smov (!%p9618_p13, %s5622_s15), %s14472_s14  ;;  %s14476_s27 = smov (!%p9621_p0, %s5636_s27), %s14470_s10 }
 0x62b   : >> { %v10776_v58 = vld [vmem:[%s13780_s23 + $0x8] sm:$0xff]  ;;  %9739 = vmatmul.msk.bf16.vlgmr.msra.gmra.mxu3 %vm5804_vm15, %v10788_v62  ;;  %6361 = vmatpush.bf16.msrb.mxu2 %v10809_v10  ;;  %v10777_v56 = vld [vmem:[%s13780_s23 + $0x10] sm:$0xff]  ;;  %v10778_v59 = vld [vmem:[%s13780_s23 + $0x18] sm:$0xff]  ;;  %s10810_s2 = smul.u32 144, %s14474_s15  ;;  %s9612_s10 = sadd.s32 4294967295, %s11160_s30 }
 0x62c   : >> { %9727 = vmatmul.msk.bf16.vlgmr.msra.gmra.mxu0 %vm5804_vm15, %v10776_v58  ;;  %6661 = vmatpush.bf16.msrb.mxu3 %v10827_v13  ;;  %v10783_v36 = vld [vmem:[%s13780_s23 + $0x40] sm:$0xff]  ;;  %v10793_v29 = vld [vmem:[%s13780_s23 + $0x10] sm:$0xff]  ;;  %v10760_v16 = vld [vmem:[%s13780_s23 + $0x8] sm:$0xff]  ;;  %s10914_s11 = sshll.u32 %s9612_s10, 7 }
 0x62d   : >> { %6961 = vmatpush.bf16.msrb.mxu0 %v10844_v0  ;;  %v10787_v50 = vld [vmem:[%s13780_s23 + $0x60] sm:$0xff]  ;;  %s13845_s29 = scalar_lea.vmem [#allocation3], %s10810_s2  ;;  %v10794_v26 = vld [vmem:[%s13780_s23 + $0x18] sm:$0xff]  ;;  %v10761_v18 = vld [vmem:[%s13780_s23 + $0x10] sm:$0xff]  ;;  %s14232_s12 = scalar_lea.vmem %s11244_s19, %s10914_s11 }
 0x62e   : >> { %7260 = vmatpush.bf16.msra.mxu1 %v7252_v12  ;;  %v10791_v1 = vld [vmem:[%s13780_s23 + $0x80] sm:$0xff]  ;;  %v10828_v45 = vld [vmem:[%s13845_s29 + $0x8] sm:$0xff]  ;;  %v10829_v30 = vld [vmem:[%s13845_s29 + $0x10] sm:$0xff] }
 0x62f   : >> { %7560 = vmatpush.bf16.msra.mxu2 %v7552_v46  ;;  %v10779_v21 = vld [vmem:[%s13780_s23 + $0x20] sm:$0xff]  ;;  %v10812_v20 = vld [vmem:[%s13845_s29 + $0x8] sm:$0xff]  ;;  %v10813_v34 = vld [vmem:[%s13845_s29 + $0x10] sm:$0xff] }
 0x630   : >> { %7860 = vmatpush.bf16.msra.mxu3 %v7852_v37  ;;  %v10811_v40 = vld [vmem:[%s13845_s29] sm:$0xff]  ;;  %v10830_v5 = vld [vmem:[%s13845_s29 + $0x18] sm:$0xff]  ;;  %v10796_v31 = vld [vmem:[%s13780_s23 + $0x28] sm:$0xff] }
 0x631   : >> { %8160 = vmatpush.bf16.msra.mxu0 %v8152_v7  ;;  %v10759_v42 = vld [vmem:[%s13780_s23] sm:$0xff]  ;;  %v10762_v51 = vld [vmem:[%s13780_s23 + $0x18] sm:$0xff]  ;;  %v10797_v61 = vld [vmem:[%s13780_s23 + $0x30] sm:$0xff] }
 0x632   : >> { %v10795_v54 = vld [vmem:[%s13780_s23 + $0x20] sm:$0xff]  ;;  %v10814_v41 = vld [vmem:[%s13845_s29 + $0x18] sm:$0xff]  ;;  %v10832_v35 = vld [vmem:[%s13845_s29 + $0x28] sm:$0xff] }
 0x633   : >> { %v10831_v28 = vld [vmem:[%s13845_s29 + $0x20] sm:$0xff]  ;;  %v10765_v22 = vld [vmem:[%s13780_s23 + $0x30] sm:$0xff]  ;;  %v10834_v60 = vld [vmem:[%s13845_s29 + $0x38] sm:$0xff]  ;;  %7561 = vmatpush.bf16.msra.mxu2 %v10879_v4 }
 0x634   : >> { %v10763_v49 = vld [vmem:[%s13780_s23 + $0x20] sm:$0xff]  ;;  %v10817_v14 = vld [vmem:[%s13845_s29 + $0x30] sm:$0xff]  ;;  %7861 = vmatpush.bf16.msra.mxu3 %v10896_v9 }
 0x635   : >> { %v10815_v19 = vld [vmem:[%s13845_s29 + $0x20] sm:$0xff] }
 0x636   : >> { %v10799_v6 = vld [vmem:[%s13780_s23 + $0x40] sm:$0xff] }
 0x639   : >> { %9732 = vmatmul.msk.bf16.gmra.mxu1 %vm5804_vm15, %v10781_v25 }
 0x63a   : >> { %9736 = vmatmul.msk.bf16.gmra.mxu2 %vm5804_vm15, %v10785_v44 }
 0x63b   : >> { %9740 = vmatmul.msk.bf16.gmra.mxu3 %vm5804_vm15, %v10789_v53  ;;  %v10764_v53 = vld [vmem:[%s13780_s23 + $0x28] sm:$0xff] }
 0x63c   : >> { %9728 = vmatmul.msk.bf16.gmra.mxu0 %vm5804_vm15, %v10777_v56  ;;  %v10798_v56 = vld [vmem:[%s13780_s23 + $0x38] sm:$0xff] }
 0x649   : >> { %9733 = vmatmul.msk.bf16.gmra.mxu1 %vm5804_vm15, %v10782_v38  ;;  %v10816_v38 = vld [vmem:[%s13845_s29 + $0x28] sm:$0xff] }
 0x64a   : >> { %9737 = vmatmul.msk.bf16.gmra.mxu2 %vm5804_vm15, %v10786_v33  ;;  %v10833_v33 = vld [vmem:[%s13845_s29 + $0x30] sm:$0xff] }
 0x64b   : >> { %9741 = vmatmul.msk.bf16.gmra.mxu3 %vm5804_vm15, %v10790_v55 }
 0x64c   : >> { %9729 = vmatmul.msk.bf16.gmra.mxu0 %vm5804_vm15, %v10778_v59 }
 0x659   : >> { %9734 = vmatmul.msk.bf16.gmra.mxu1 %vm5804_vm15, %v10783_v36  ;;  %v10861_v36 = vld [vmem:[%s14427_s7 + $0x3c] sm:$0xff] }
 0x65a   : >> { %9738 = vmatmul.msk.bf16.gmra.mxu2 %vm5804_vm15, %v10787_v50  ;;  %v10913_v50 = vld [vmem:[%s14427_s7 + $0x60] sm:$0xff]  ;;  %7261 = vmatpush.bf16.msra.mxu1 %v10861_v36 }
 0x65b   : >> { %9742 = vmatmul.msk.bf16.gmra.mxu3 %vm5804_vm15, %v10791_v1  ;;  %8161 = vmatpush.bf16.msra.mxu0 %v10913_v50 }
 0x65c   : >> { %9730 = vmatmul.msk.bf16.gmra.mxu0 %vm5804_vm15, %v10779_v21 }
 0x669   : >> { %9811 = vmatmul.msk.bf16.vlgmr.msrb.gmra.mxu1 %vm5804_vm15, %v10759_v42  ;;  %v10766_v42 = vld [vmem:[%s13780_s23 + $0x38] sm:$0xff] }
 0x66a   : >> { %9931 = vmatmul.msk.bf16.vlgmr.msrb.gmra.mxu2 %vm5804_vm15, %v10793_v29  ;;  %v10800_v29 = vld [vmem:[%s13780_s23 + $0x48] sm:$0xff] }
 0x66b   : >> { %10019 = vmatmul.msk.bf16.vlgmr.msrb.gmra.mxu3 %vm5804_vm15, %v10811_v40 }
 0x66c   : >> { %10139 = vmatmul.msk.bf16.vlgmr.msrb.gmra.mxu0 %vm5804_vm15, %v10828_v45 }
 0x679   : >> { %9812 = vmatmul.msk.bf16.gmra.mxu1 %vm5804_vm15, %v10760_v16  ;;  %v10818_v16 = vld [vmem:[%s13845_s29 + $0x38] sm:$0xff] }
 0x67a   : >> { %9932 = vmatmul.msk.bf16.gmra.mxu2 %vm5804_vm15, %v10794_v26  ;;  %v10835_v26 = vld [vmem:[%s13845_s29 + $0x40] sm:$0xff] }
 0x67b   : >> { %10020 = vmatmul.msk.bf16.gmra.mxu3 %vm5804_vm15, %v10812_v20 }
 0x67c   : >> { %10140 = vmatmul.msk.bf16.gmra.mxu0 %vm5804_vm15, %v10829_v30 }
 0x689   : >> { %9813 = vmatmul.msk.bf16.gmra.mxu1 %vm5804_vm15, %v10761_v18 }
 0x68a   : >> { %9933 = vmatmul.msk.bf16.gmra.mxu2 %vm5804_vm15, %v10795_v54 }
 0x68b   : >> { %10021 = vmatmul.msk.bf16.gmra.mxu3 %vm5804_vm15, %v10813_v34 }
 0x68c   : >> { %10141 = vmatmul.msk.bf16.gmra.mxu0 %vm5804_vm15, %v10830_v5 }
 0x699   : >> { %9814 = vmatmul.msk.bf16.gmra.mxu1 %vm5804_vm15, %v10762_v51 }
 0x69a   : >> { %9934 = vmatmul.msk.bf16.gmra.mxu2 %vm5804_vm15, %v10796_v31 }
 0x69b   : >> { %10022 = vmatmul.msk.bf16.gmra.mxu3 %vm5804_vm15, %v10814_v41 }
 0x69c   : >> { %10142 = vmatmul.msk.bf16.gmra.mxu0 %vm5804_vm15, %v10831_v28  ;;  %v10767_v28 = vld [vmem:[%s13780_s23 + $0x40] sm:$0xff] }
 0x6a6   : >> { %v13879_v32 = vpop.f32.mrf.mxu1 }
 0x6a9   : >> { %v13881_v48 = vpop.f32.mrf.mxu0  ;;  %9815 = vmatmul.msk.bf16.gmra.mxu1 %vm5804_vm15, %v10763_v49  ;;  %v10801_v49 = vld [vmem:[%s13780_s23 + $0x50] sm:$0xff] }
 0x6aa   : >> { %9935 = vmatmul.msk.bf16.gmra.mxu2 %vm5804_vm15, %v10797_v61  ;;  %v10819_v61 = vld [vmem:[%s13845_s29 + $0x40] sm:$0xff] }
 0x6ab   : >> { %10023 = vmatmul.msk.bf16.gmra.mxu3 %vm5804_vm15, %v10815_v19  ;;  %v10836_v19 = vld [vmem:[%s13845_s29 + $0x48] sm:$0xff] }
 0x6ac   : >> { %10143 = vmatmul.msk.bf16.gmra.mxu0 %vm5804_vm15, %v10832_v35 }
 0x6ad   : >> { %v13891_v62 = vpop.f32.mrf.mxu2 }
 0x6ae   : >> { %v13893_v58 = vpop.f32.mrf.mxu3  ;;  %v13895_v10 = vpop.f32.mrf.mxu1 }
 0x6b1   : >> { %v13897_v13 = vpop.f32.mrf.mxu0 }
 0x6b5   : >> { %v13899_v11 = vpop.f32.mrf.mxu2 }
 0x6b6   : >> { %v13901_v0 = vpop.f32.mrf.mxu3  ;;  %v13903_v25 = vpop.f32.mrf.mxu1 }
 0x6b9   : >> { %v13905_v44 = vpop.f32.mrf.mxu0  ;;  %9816 = vmatmul.msk.bf16.gmra.mxu1 %vm5804_vm15, %v10764_v53 }
 0x6ba   : >> { %9936 = vmatmul.msk.bf16.gmra.mxu2 %vm5804_vm15, %v10798_v56 }
 0x6bb   : >> { %10024 = vmatmul.msk.bf16.gmra.mxu3 %vm5804_vm15, %v10816_v38 }
 0x6bc   : >> { %10144 = vmatmul.msk.bf16.gmra.mxu0 %vm5804_vm15, %v10833_v33 }
 0x6bd   : >> { %v13915_v55 = vpop.f32.mrf.mxu2 }
 0x6be   : >> { %v13917_v59 = vpop.f32.mrf.mxu3  ;;  %v13919_v23 = vpop.f32.mrf.mxu1 }
 0x6c1   : >> { %v13921_v47 = vpop.f32.mrf.mxu0 }
 0x6c5   : >> { %v13923_v27 = vpop.f32.mrf.mxu2 }
 0x6c6   : >> { %v13925_v43 = vpop.f32.mrf.mxu3  ;;  %v13927_v39 = vpop.f32.mrf.mxu1 }
 0x6c9   : >> { %v13929_v57 = vpop.f32.mrf.mxu0  ;;  %9817 = vmatmul.msk.bf16.gmra.mxu1 %vm5804_vm15, %v10765_v22 }
 0x6ca   : >> { %9937 = vmatmul.msk.bf16.gmra.mxu2 %vm5804_vm15, %v10799_v6 }
 0x6cb   : >> { %10025 = vmatmul.msk.bf16.gmra.mxu3 %vm5804_vm15, %v10817_v14 }
 0x6cc   : >> { %10145 = vmatmul.msk.bf16.gmra.mxu0 %vm5804_vm15, %v10834_v60 }
 0x6cd   : >> { %v13945_v46 = vpop.f32.mrf.mxu2 }
 0x6ce   : >> { %v13947_v37 = vpop.f32.mrf.mxu3  ;;  %v13949_v12 = vpop.f32.mrf.mxu1 }
 0x6d1   : >> { %v13951_v7 = vpop.f32.mrf.mxu0 }
 0x6d5   : >> { %v13959_v1 = vpop.f32.mrf.mxu2 }
 0x6d6   : >> { %v13961_v21 = vpop.f32.mrf.mxu3  ;;  %v13963_v40 = vpop.f32.mrf.mxu1 }
 0x6d9   : >> { %v13965_v45 = vpop.f32.mrf.mxu0  ;;  %9818 = vmatmul.msk.bf16.gmra.mxu1 %vm5804_vm15, %v10766_v42 }
 0x6da   : >> { %9938 = vmatmul.msk.bf16.gmra.mxu2 %vm5804_vm15, %v10800_v29  ;;  %v10768_v29 = vld [vmem:[%s13780_s23 + $0x48] sm:$0xff] }
 0x6db   : >> { %10026 = vmatmul.msk.bf16.gmra.mxu3 %vm5804_vm15, %v10818_v16  ;;  %v10802_v16 = vld [vmem:[%s13780_s23 + $0x58] sm:$0xff] }
 0x6dc   : >> { %10146 = vmatmul.msk.bf16.gmra.mxu0 %vm5804_vm15, %v10835_v26  ;;  %v10820_v26 = vld [vmem:[%s13845_s29 + $0x48] sm:$0xff] }
 0x6dd   : >> { %v13975_v20 = vpop.f32.mrf.mxu2 }
 0x6de   : >> { %v13977_v30 = vpop.f32.mrf.mxu3  ;;  %v13979_v18 = vpop.f32.mrf.mxu1 }
 0x6e1   : >> { %v13981_v54 = vpop.f32.mrf.mxu0 }
 0x6e5   : >> { %v13983_v34 = vpop.f32.mrf.mxu2 }
 0x6e6   : >> { %v13985_v5 = vpop.f32.mrf.mxu3  ;;  %v6095_v51 = vpop.f32.mrf.mxu1 }
 0x6e7   : >> { %v6096_v31 = vadd.f32 %v6095_v51, %v13881_v48  ;;  %v10837_v51 = vld [vmem:[%s13845_s29 + $0x50] sm:$0xff] }
 0x6e9   : >> { %v6963_v41 = vpop.f32.mrf.mxu0  ;;  %9819 = vmatmul.msk.bf16.gmra.mxu1 %vm5804_vm15, %v10767_v28 }
 0x6ea   : >> { %9939 = vmatmul.msk.bf16.gmra.mxu2 %vm5804_vm15, %v10801_v49 }
 0x6eb   : >> { %10027 = vmatmul.msk.bf16.gmra.mxu3 %vm5804_vm15, %v10819_v61 }
 0x6ec   : >> { %10147 = vmatmul.msk.bf16.gmra.mxu0 %vm5804_vm15, %v10836_v19 }
 0x6ed   : >> { %v6363_v35 = vpop.f32.mrf.mxu2 }
 0x6ee   : >> { %v6443_v53 = vadd.f32 %v6363_v35, %v6096_v31  ;;  %v6663_v56 = vpop.f32.mrf.mxu3  ;;  %v6097_v48 = vpop.f32.mrf.mxu1 }
 0x6ef   : >> { %v6098_v33 = vadd.f32 %v6097_v48, %v13897_v13 }
 0x6f0   : >> { %v6743_v38 = vadd.f32 %v6663_v56, %v6443_v53 }
 0x6f1   : >> { %v6965_v22 = vpop.f32.mrf.mxu0 }
 0x6f2   : >> { %v13997_v6 = vadd.f32 %v6963_v41, %v6743_v38 }
 0x6f5   : >> { %v6365_v14 = vpop.f32.mrf.mxu2 }
 0x6f6   : >> { %v6444_v60 = vadd.f32 %v6365_v14, %v6098_v33  ;;  %v6665_v4 = vpop.f32.mrf.mxu3  ;;  %v6100_v9 = vpop.f32.mrf.mxu1 }
 0x6f7   : >> { %v6101_v50 = vadd.f32 %v6100_v9, %v13905_v44  ;;  %v10821_v9 = vld [vmem:[%s13845_s29 + $0x50] sm:$0xff] }
 0x6f8   : >> { %v6744_v36 = vadd.f32 %v6665_v4, %v6444_v60  ;;  %v10769_v60 = vld [vmem:[%s13780_s23 + $0x50] sm:$0xff]  ;;  %v10803_v4 = vld [vmem:[%s13780_s23 + $0x60] sm:$0xff] }
 0x6f9   : >> { %v6968_v42 = vpop.f32.mrf.mxu0  ;;  %9820 = vmatmul.msk.bf16.gmra.mxu1 %vm5804_vm15, %v10768_v29 }
 0x6fa   : >> { %9940 = vmatmul.msk.bf16.gmra.mxu2 %vm5804_vm15, %v10802_v16  ;;  %v14006_v13 = vadd.f32 %v6965_v22, %v6744_v36  ;;  %v10838_v36 = vld [vmem:[%s13845_s29 + $0x58] sm:$0xff] }
 0x6fb   : >> { %10028 = vmatmul.msk.bf16.gmra.mxu3 %vm5804_vm15, %v10820_v26 }
 0x6fc   : >> { %10148 = vmatmul.msk.bf16.gmra.mxu0 %vm5804_vm15, %v10837_v51 }
 0x6fd   : >> { %v6368_v31 = vpop.f32.mrf.mxu2 }
 0x6fe   : >> { %v6445_v41 = vadd.f32 %v6368_v31, %v6101_v50  ;;  %v6668_v44 = vpop.f32.mrf.mxu3  ;;  %v6102_v28 = vpop.f32.mrf.mxu1 }
 0x6ff   : >> { %v6103_v61 = vadd.f32 %v6102_v28, %v13921_v47 }
 0x700   : >> { %v6745_v49 = vadd.f32 %v6668_v44, %v6445_v41 }
 0x701   : >> { %v6970_v19 = vpop.f32.mrf.mxu0 }
 0x702   : >> { %v14011_v35 = vadd.f32 %v6968_v42, %v6745_v49 }
 0x705   : >> { %v6370_v53 = vpop.f32.mrf.mxu2 }
 0x706   : >> { %v6446_v56 = vadd.f32 %v6370_v53, %v6103_v61  ;;  %v6670_v48 = vpop.f32.mrf.mxu3  ;;  %v6105_v38 = vpop.f32.mrf.mxu1 }
 0x707   : >> { %v6106_v22 = vadd.f32 %v6105_v38, %v13929_v57  ;;  %v10822_v38 = vld [vmem:[%s13845_s29 + $0x58] sm:$0xff] }
 0x708   : >> { %v6746_v33 = vadd.f32 %v6670_v48, %v6446_v56  ;;  %v10770_v56 = vld [vmem:[%s13780_s23 + $0x58] sm:$0xff]  ;;  %v10804_v48 = vld [vmem:[%s13780_s23 + $0x68] sm:$0xff] }
 0x709   : >> { %v6973_v14 = vpop.f32.mrf.mxu0  ;;  %9821 = vmatmul.msk.bf16.gmra.mxu1 %vm5804_vm15, %v10769_v60 }
 0x70a   : >> { %9941 = vmatmul.msk.bf16.gmra.mxu2 %vm5804_vm15, %v10803_v4  ;;  %v14020_v47 = vadd.f32 %v6970_v19, %v6746_v33  ;;  %v10839_v33 = vld [vmem:[%s13845_s29 + $0x60] sm:$0xff] }
 0x70b   : >> { %10029 = vmatmul.msk.bf16.gmra.mxu3 %vm5804_vm15, %v10821_v9 }
 0x70c   : >> { %10149 = vmatmul.msk.bf16.gmra.mxu0 %vm5804_vm15, %v10838_v36 }
 0x70d   : >> { %v6373_v50 = vpop.f32.mrf.mxu2 }
 0x70e   : >> { %v6447_v42 = vadd.f32 %v6373_v50, %v6106_v22  ;;  %v6673_v57 = vpop.f32.mrf.mxu3  ;;  %v6107_v29 = vpop.f32.mrf.mxu1 }
 0x70f   : >> { %v6108_v26 = vadd.f32 %v6107_v29, %v13951_v7 }
 0x710   : >> { %v6747_v16 = vadd.f32 %v6673_v57, %v6447_v42 }
 0x711   : >> { %v6975_v51 = vpop.f32.mrf.mxu0 }
 0x712   : >> { %v14025_v31 = vadd.f32 %v6973_v14, %v6747_v16 }
 0x715   : >> { %v6375_v41 = vpop.f32.mrf.mxu2 }
 0x716   : >> { %v6448_v44 = vadd.f32 %v6375_v41, %v6108_v26  ;;  %v6675_v28 = vpop.f32.mrf.mxu3  ;;  %v6110_v49 = vpop.f32.mrf.mxu1  ;;  %v10771_v41 = vld [vmem:[%s13780_s23 + $0x60] sm:$0xff] }
 0x717   : >> { %v6111_v19 = vadd.f32 %v6110_v49, %v13965_v45  ;;  %v10840_v49 = vld [vmem:[%s13845_s29 + $0x68] sm:$0xff] }
 0x718   : >> { %v6748_v61 = vadd.f32 %v6675_v28, %v6448_v44  ;;  %v10805_v44 = vld [vmem:[%s13780_s23 + $0x70] sm:$0xff]  ;;  %v10823_v28 = vld [vmem:[%s13845_s29 + $0x60] sm:$0xff] }
 0x719   : >> { %v6978_v53 = vpop.f32.mrf.mxu0  ;;  %9822 = vmatmul.msk.bf16.gmra.mxu1 %vm5804_vm15, %v10770_v56 }
 0x71a   : >> { %9942 = vmatmul.msk.bf16.gmra.mxu2 %vm5804_vm15, %v10804_v48  ;;  %v14034_v7 = vadd.f32 %v6975_v51, %v6748_v61 }
 0x71b   : >> { %10030 = vmatmul.msk.bf16.gmra.mxu3 %vm5804_vm15, %v10822_v38 }
 0x71c   : >> { %10150 = vmatmul.msk.bf16.gmra.mxu0 %vm5804_vm15, %v10839_v33 }
 0x71d   : >> { %v6378_v22 = vpop.f32.mrf.mxu2 }
 0x71e   : >> { %v6449_v45 = vadd.f32 %v6378_v22, %v6111_v19  ;;  %v6678_v14 = vpop.f32.mrf.mxu3  ;;  %v6112_v60 = vpop.f32.mrf.mxu1 }
 0x71f   : >> { %v6113_v9 = vadd.f32 %v6112_v60, %v13981_v54 }
 0x720   : >> { %v6749_v4 = vadd.f32 %v6678_v14, %v6449_v45 }
 0x721   : >> { %v6980_v36 = vpop.f32.mrf.mxu0 }
 0x722   : >> { %v14039_v50 = vadd.f32 %v6978_v53, %v6749_v4 }
 0x725   : >> { %v6380_v42 = vpop.f32.mrf.mxu2 }
 0x726   : >> { %v6450_v57 = vadd.f32 %v6380_v42, %v6113_v9  ;;  %v6680_v29 = vpop.f32.mrf.mxu3  ;;  %v6115_v16 = vpop.f32.mrf.mxu1 }
 0x727   : >> { %v6116_v54 = vadd.f32 %v6115_v16, %v13879_v32  ;;  %v10772_v32 = vld [vmem:[%s13780_s23 + $0x68] sm:$0xff]  ;;  %v10841_v16 = vld [vmem:[%s13845_s29 + $0x70] sm:$0xff] }
 0x728   : >> { %v6750_v26 = vadd.f32 %v6680_v29, %v6450_v57  ;;  %v10806_v57 = vld [vmem:[%s13780_s23 + $0x78] sm:$0xff]  ;;  %v10824_v29 = vld [vmem:[%s13845_s29 + $0x68] sm:$0xff] }
 0x729   : >> { %v6983_v51 = vpop.f32.mrf.mxu0  ;;  %9823 = vmatmul.msk.bf16.gmra.mxu1 %vm5804_vm15, %v10771_v41 }
 0x72a   : >> { %9943 = vmatmul.msk.bf16.gmra.mxu2 %vm5804_vm15, %v10805_v44  ;;  %v14047_v61 = vadd.f32 %v6980_v36, %v6750_v26 }
 0x72b   : >> { %10031 = vmatmul.msk.bf16.gmra.mxu3 %vm5804_vm15, %v10823_v28 }
 0x72c   : >> { %10151 = vmatmul.msk.bf16.gmra.mxu0 %vm5804_vm15, %v10840_v49 }
 0x72d   : >> { %v6383_v19 = vpop.f32.mrf.mxu2 }
 0x72e   : >> { %v6451_v53 = vadd.f32 %v6383_v19, %v6116_v54  ;;  %v6683_v56 = vpop.f32.mrf.mxu3  ;;  %v6117_v48 = vpop.f32.mrf.mxu1 }
 0x72f   : >> { %v6118_v45 = vadd.f32 %v6117_v48, %v13895_v10 }
 0x730   : >> { %v6751_v38 = vadd.f32 %v6683_v56, %v6451_v53 }
 0x731   : >> { %v6985_v33 = vpop.f32.mrf.mxu0 }
 0x732   : >> { %v14052_v22 = vadd.f32 %v6983_v51, %v6751_v38 }
 0x735   : >> { %v6385_v14 = vpop.f32.mrf.mxu2 }
 0x736   : >> { %v6452_v60 = vadd.f32 %v6385_v14, %v6118_v45  ;;  %v6685_v4 = vpop.f32.mrf.mxu3  ;;  %v6120_v9 = vpop.f32.mrf.mxu1 }
 0x737   : >> { %v6121_v10 = vadd.f32 %v6120_v9, %v13903_v25  ;;  %v10773_v25 = vld [vmem:[%s13780_s23 + $0x70] sm:$0xff]  ;;  %v10842_v9 = vld [vmem:[%s13845_s29 + $0x78] sm:$0xff] }
 0x738   : >> { %v6752_v36 = vadd.f32 %v6685_v4, %v6452_v60  ;;  %v10807_v60 = vld [vmem:[%s13780_s23 + $0x80] sm:$0xff]  ;;  %v10825_v4 = vld [vmem:[%s13845_s29 + $0x70] sm:$0xff] }
 0x739   : >> { %v6988_v42 = vpop.f32.mrf.mxu0  ;;  %9824 = vmatmul.msk.bf16.gmra.mxu1 %vm5804_vm15, %v10772_v32 }
 0x73a   : >> { %9944 = vmatmul.msk.bf16.gmra.mxu2 %vm5804_vm15, %v10806_v57  ;;  %v14061_v26 = vadd.f32 %v6985_v33, %v6752_v36 }
 0x73b   : >> { %10032 = vmatmul.msk.bf16.gmra.mxu3 %vm5804_vm15, %v10824_v29 }
 0x73c   : >> { %10152 = vmatmul.msk.bf16.gmra.mxu0 %vm5804_vm15, %v10841_v16 }
 0x73d   : >> { %v6388_v51 = vpop.f32.mrf.mxu2 }
 0x73e   : >> { %v6453_v41 = vadd.f32 %v6388_v51, %v6121_v10  ;;  %v6688_v44 = vpop.f32.mrf.mxu3  ;;  %v6122_v28 = vpop.f32.mrf.mxu1 }
 0x73f   : >> { %v6123_v53 = vadd.f32 %v6122_v28, %v13919_v23 }
 0x740   : >> { %v6753_v49 = vadd.f32 %v6688_v44, %v6453_v41 }
 0x741   : >> { %v6990_v54 = vpop.f32.mrf.mxu0 }
 0x742   : >> { %v14066_v19 = vadd.f32 %v6988_v42, %v6753_v49 }
 0x745   : >> { %v6390_v56 = vpop.f32.mrf.mxu2 }
 0x746   : >> { %v6454_v48 = vadd.f32 %v6390_v56, %v6123_v53  ;;  %v6690_v38 = vpop.f32.mrf.mxu3  ;;  %v6125_v33 = vpop.f32.mrf.mxu1  ;;  %v10774_v56 = vld [vmem:[%s13780_s23 + $0x78] sm:$0xff] }
 0x747   : >> { %v6126_v23 = vadd.f32 %v6125_v33, %v13927_v39  ;;  %v10843_v33 = vld [vmem:[%s13845_s29 + $0x80] sm:$0xff] }
 0x748   : >> { %v6754_v45 = vadd.f32 %v6690_v38, %v6454_v48  ;;  %v10808_v48 = vld [vmem:[%s13780_s23 + $0x88] sm:$0xff]  ;;  %v10826_v38 = vld [vmem:[%s13845_s29 + $0x78] sm:$0xff]  ;;  %s10862_s23 = smul.u32 144, %s14476_s27 }
 0x749   : >> { %v6993_v14 = vpop.f32.mrf.mxu0  ;;  %9825 = vmatmul.msk.bf16.gmra.mxu1 %vm5804_vm15, %v10773_v25 }
 0x74a   : >> { %9945 = vmatmul.msk.bf16.gmra.mxu2 %vm5804_vm15, %v10807_v60  ;;  %v14075_v36 = vadd.f32 %v6990_v54, %v6754_v45  ;;  %s14101_s28 = scalar_lea.vmem [#allocation3], %s10862_s23 }
 0x74b   : >> { %10033 = vmatmul.msk.bf16.gmra.mxu3 %vm5804_vm15, %v10825_v4 }
 0x74c   : >> { %10153 = vmatmul.msk.bf16.gmra.mxu0 %vm5804_vm15, %v10842_v9 }
 0x74d   : >> { %v6393_v42 = vpop.f32.mrf.mxu2 }
 0x74e   : >> { %v6455_v32 = vadd.f32 %v6393_v42, %v6126_v23  ;;  %v6693_v57 = vpop.f32.mrf.mxu3  ;;  %v6127_v29 = vpop.f32.mrf.mxu1 }
 0x74f   : >> { %v6128_v41 = vadd.f32 %v6127_v29, %v13949_v12 }
 0x750   : >> { %v6755_v16 = vadd.f32 %v6693_v57, %v6455_v32 }
 0x751   : >> { %v6995_v10 = vpop.f32.mrf.mxu0 }
 0x752   : >> { %v14080_v51 = vadd.f32 %v6993_v14, %v6755_v16 }
 0x755   : >> { %v6395_v44 = vpop.f32.mrf.mxu2 }
 0x756   : >> { %v6456_v28 = vadd.f32 %v6395_v44, %v6128_v41  ;;  %v6695_v49 = vpop.f32.mrf.mxu3  ;;  %v6130_v54 = vpop.f32.mrf.mxu1 }
 0x757   : >> { %v6131_v12 = vadd.f32 %v6130_v54, %v13963_v40  ;;  %v10845_v40 = vld [vmem:[%s13845_s29 + $0x10] sm:$0xff] }
 0x758   : >> { %v6756_v39 = vadd.f32 %v6695_v49, %v6456_v28  ;;  %v10863_v28 = vld [vmem:[%s14101_s28] sm:$0xff]  ;;  %v10880_v49 = vld [vmem:[%s14101_s28 + $0x8] sm:$0xff]  ;;  %v10897_v54 = vld [vmem:[%s14101_s28 + $0x10] sm:$0xff] }
 0x759   : >> { %v6998_v53 = vpop.f32.mrf.mxu0  ;;  %9826 = vmatmul.msk.bf16.gmra.mxu1 %vm5804_vm15, %v10774_v56 }
 0x75a   : >> { %9946 = vmatmul.msk.bf16.gmra.mxu2 %vm5804_vm15, %v10808_v48  ;;  %v14091_v45 = vadd.f32 %v6995_v10, %v6756_v39 }
 0x75b   : >> { %10034 = vmatmul.msk.bf16.gmra.mxu3 %vm5804_vm15, %v10826_v38 }
 0x75c   : >> { %10154 = vmatmul.msk.bf16.gmra.mxu0 %vm5804_vm15, %v10843_v33 }
 0x75d   : >> { %v6398_v14 = vpop.f32.mrf.mxu2 }
 0x75e   : >> { %v6457_v25 = vadd.f32 %v6398_v14, %v6131_v12  ;;  %v6698_v60 = vpop.f32.mrf.mxu3  ;;  %v6132_v4 = vpop.f32.mrf.mxu1 }
 0x75f   : >> { %v6133_v32 = vadd.f32 %v6132_v4, %v13979_v18 }
 0x760   : >> { %v6757_v9 = vadd.f32 %v6698_v60, %v6457_v25 }
 0x761   : >> { %v7000_v23 = vpop.f32.mrf.mxu0 }
 0x762   : >> { %v14097_v42 = vadd.f32 %v6998_v53, %v6757_v9 }
 0x765   : >> { %v6400_v57 = vpop.f32.mrf.mxu2 }
 0x766   : >> { %v6458_v29 = vadd.f32 %v6400_v57, %v6133_v32  ;;  %v6700_v16 = vpop.f32.mrf.mxu3  ;;  %v6135_v10 = vpop.f32.mrf.mxu1 }
 0x767   : >> { %v6136_v39 = vadd.f32 %v6135_v10, %v13891_v62  ;;  %v10846_v62 = vld [vmem:[%s13845_s29 + $0x18] sm:$0xff] }
 0x768   : >> { %v6758_v41 = vadd.f32 %v6700_v16, %v6458_v29  ;;  %v10864_v29 = vld [vmem:[%s14101_s28 + $0x8] sm:$0xff]  ;;  %v10881_v16 = vld [vmem:[%s14101_s28 + $0x10] sm:$0xff]  ;;  %v10898_v10 = vld [vmem:[%s14101_s28 + $0x18] sm:$0xff] }
 0x769   : >> { %v7003_v44 = vpop.f32.mrf.mxu0  ;;  %10259 = vmatmul.msk.bf16.vlgmr.msra.gmra.mxu1 %vm5804_vm15, %v10845_v40 }
 0x76a   : >> { %10347 = vmatmul.msk.bf16.vlgmr.msra.gmra.mxu2 %vm5804_vm15, %v10863_v28  ;;  %v14108_v18 = vadd.f32 %v7000_v23, %v6758_v41 }
 0x76b   : >> { %10467 = vmatmul.msk.bf16.vlgmr.msra.gmra.mxu3 %vm5804_vm15, %v10880_v49 }
 0x76c   : >> { %10587 = vmatmul.msk.bf16.vlgmr.msra.gmra.mxu0 %vm5804_vm15, %v10897_v54 }
 0x76d   : >> { %v6403_v53 = vpop.f32.mrf.mxu2 }
 0x76e   : >> { %v6459_v56 = vadd.f32 %v6403_v53, %v6136_v39  ;;  %v6703_v48 = vpop.f32.mrf.mxu3  ;;  %v6137_v38 = vpop.f32.mrf.mxu1 }
 0x76f   : >> { %v6138_v25 = vadd.f32 %v6137_v38, %v13899_v11 }
 0x770   : >> { %v6759_v33 = vadd.f32 %v6703_v48, %v6459_v56 }
 0x771   : >> { %v7005_v12 = vpop.f32.mrf.mxu0 }
 0x772   : >> { %v14113_v14 = vadd.f32 %v7003_v44, %v6759_v33 }
 0x775   : >> { %v6405_v60 = vpop.f32.mrf.mxu2 }
 0x776   : >> { %v6460_v4 = vadd.f32 %v6405_v60, %v6138_v25  ;;  %v6705_v9 = vpop.f32.mrf.mxu3  ;;  %v6140_v23 = vpop.f32.mrf.mxu1 }
 0x777   : >> { %v6141_v11 = vadd.f32 %v6140_v23, %v13915_v55  ;;  %v10847_v55 = vld [vmem:[%s13845_s29 + $0x20] sm:$0xff] }
 0x778   : >> { %v6760_v32 = vadd.f32 %v6705_v9, %v6460_v4  ;;  %v10865_v4 = vld [vmem:[%s14101_s28 + $0x10] sm:$0xff]  ;;  %v10882_v9 = vld [vmem:[%s14101_s28 + $0x18] sm:$0xff]  ;;  %v10899_v23 = vld [vmem:[%s14101_s28 + $0x20] sm:$0xff] }
 0x779   : >> { %v7008_v57 = vpop.f32.mrf.mxu0  ;;  %10260 = vmatmul.msk.bf16.gmra.mxu1 %vm5804_vm15, %v10846_v62 }
 0x77a   : >> { %10348 = vmatmul.msk.bf16.gmra.mxu2 %vm5804_vm15, %v10864_v29  ;;  %v14122_v41 = vadd.f32 %v7005_v12, %v6760_v32 }
 0x77b   : >> { %10468 = vmatmul.msk.bf16.gmra.mxu3 %vm5804_vm15, %v10881_v16 }
 0x77c   : >> { %10588 = vmatmul.msk.bf16.gmra.mxu0 %vm5804_vm15, %v10898_v10 }
 0x77d   : >> { %v6408_v44 = vpop.f32.mrf.mxu2 }
 0x77e   : >> { %v6461_v40 = vadd.f32 %v6408_v44, %v6141_v11  ;;  %v6708_v28 = vpop.f32.mrf.mxu3  ;;  %v6142_v49 = vpop.f32.mrf.mxu1 }
 0x77f   : >> { %v6143_v56 = vadd.f32 %v6142_v49, %v13923_v27 }
 0x780   : >> { %v6761_v54 = vadd.f32 %v6708_v28, %v6461_v40 }
 0x781   : >> { %v7010_v39 = vpop.f32.mrf.mxu0 }
 0x782   : >> { %v14127_v53 = vadd.f32 %v7008_v57, %v6761_v54 }
 0x785   : >> { %v6410_v48 = vpop.f32.mrf.mxu2 }
 0x786   : >> { %v6462_v38 = vadd.f32 %v6410_v48, %v6143_v56  ;;  %v6710_v33 = vpop.f32.mrf.mxu3  ;;  %v6145_v12 = vpop.f32.mrf.mxu1 }
 0x787   : >> { %v6146_v27 = vadd.f32 %v6145_v12, %v13945_v46  ;;  %v10848_v46 = vld [vmem:[%s13845_s29 + $0x28] sm:$0xff] }
 0x788   : >> { %v6762_v25 = vadd.f32 %v6710_v33, %v6462_v38  ;;  %v10866_v38 = vld [vmem:[%s14101_s28 + $0x18] sm:$0xff]  ;;  %v10883_v33 = vld [vmem:[%s14101_s28 + $0x20] sm:$0xff]  ;;  %v10900_v12 = vld [vmem:[%s14101_s28 + $0x28] sm:$0xff] }
 0x789   : >> { %v7013_v60 = vpop.f32.mrf.mxu0  ;;  %10261 = vmatmul.msk.bf16.gmra.mxu1 %vm5804_vm15, %v10847_v55 }
 0x78a   : >> { %10349 = vmatmul.msk.bf16.gmra.mxu2 %vm5804_vm15, %v10865_v4  ;;  %v14136_v32 = vadd.f32 %v7010_v39, %v6762_v25 }
 0x78b   : >> { %10469 = vmatmul.msk.bf16.gmra.mxu3 %vm5804_vm15, %v10882_v9 }
 0x78c   : >> { %10589 = vmatmul.msk.bf16.gmra.mxu0 %vm5804_vm15, %v10899_v23 }
 0x78d   : >> { %v6413_v57 = vpop.f32.mrf.mxu2 }
 0x78e   : >> { %v6463_v62 = vadd.f32 %v6413_v57, %v6146_v27  ;;  %v6713_v29 = vpop.f32.mrf.mxu3  ;;  %v6147_v16 = vpop.f32.mrf.mxu1 }
 0x78f   : >> { %v6148_v40 = vadd.f32 %v6147_v16, %v13959_v1 }
 0x790   : >> { %v6763_v10 = vadd.f32 %v6713_v29, %v6463_v62 }
 0x791   : >> { %v7015_v11 = vpop.f32.mrf.mxu0 }
 0x792   : >> { %v14141_v44 = vadd.f32 %v7013_v60, %v6763_v10 }
 0x795   : >> { %v6415_v28 = vpop.f32.mrf.mxu2 }
 0x796   : >> { %v6464_v49 = vadd.f32 %v6415_v28, %v6148_v40  ;;  %v6715_v54 = vpop.f32.mrf.mxu3  ;;  %v6150_v39 = vpop.f32.mrf.mxu1 }
 0x797   : >> { %v6151_v1 = vadd.f32 %v6150_v39, %v13975_v20  ;;  %v10849_v20 = vld [vmem:[%s13845_s29 + $0x30] sm:$0xff] }
 0x798   : >> { %v6764_v56 = vadd.f32 %v6715_v54, %v6464_v49  ;;  %v10867_v49 = vld [vmem:[%s14101_s28 + $0x20] sm:$0xff]  ;;  %v10884_v54 = vld [vmem:[%s14101_s28 + $0x28] sm:$0xff]  ;;  %v10901_v39 = vld [vmem:[%s14101_s28 + $0x30] sm:$0xff] }
 0x799   : >> { %v7018_v48 = vpop.f32.mrf.mxu0  ;;  %10262 = vmatmul.msk.bf16.gmra.mxu1 %vm5804_vm15, %v10848_v46 }
 0x79a   : >> { %10350 = vmatmul.msk.bf16.gmra.mxu2 %vm5804_vm15, %v10866_v38  ;;  %v14150_v25 = vadd.f32 %v7015_v11, %v6764_v56 }
 0x79b   : >> { %10470 = vmatmul.msk.bf16.gmra.mxu3 %vm5804_vm15, %v10883_v33 }
 0x79c   : >> { %10590 = vmatmul.msk.bf16.gmra.mxu0 %vm5804_vm15, %v10900_v12 }
 0x79d   : >> { %v6418_v60 = vpop.f32.mrf.mxu2 }
 0x79e   : >> { %v6465_v55 = vadd.f32 %v6418_v60, %v6151_v1  ;;  %v6718_v4 = vpop.f32.mrf.mxu3  ;;  %v6152_v9 = vpop.f32.mrf.mxu1 }
 0x79f   : >> { %v6153_v62 = vadd.f32 %v6152_v9, %v13983_v34 }
 0x7a0   : >> { %v6765_v23 = vadd.f32 %v6718_v4, %v6465_v55 }
 0x7a1   : >> { %v7020_v27 = vpop.f32.mrf.mxu0 }
 0x7a2   : >> { %v14155_v57 = vadd.f32 %v7018_v48, %v6765_v23 }
 0x7a5   : >> { %v6420_v29 = vpop.f32.mrf.mxu2 }
 0x7a6   : >> { %v6466_v16 = vadd.f32 %v6420_v29, %v6153_v62  ;;  %v6720_v10 = vpop.f32.mrf.mxu3  ;;  %v6155_v11 = vpop.f32.mrf.mxu1 }
 0x7a7   : >> { %v6156_v34 = vadd.f32 %v6155_v11, %v13893_v58  ;;  %v10850_v58 = vld [vmem:[%s13845_s29 + $0x38] sm:$0xff] }
 0x7a8   : >> { %v6766_v40 = vadd.f32 %v6720_v10, %v6466_v16  ;;  %v10868_v16 = vld [vmem:[%s14101_s28 + $0x28] sm:$0xff]  ;;  %v10885_v10 = vld [vmem:[%s14101_s28 + $0x30] sm:$0xff]  ;;  %v10902_v11 = vld [vmem:[%s14101_s28 + $0x38] sm:$0xff] }
 0x7a9   : >> { %v7023_v28 = vpop.f32.mrf.mxu0  ;;  %10263 = vmatmul.msk.bf16.gmra.mxu1 %vm5804_vm15, %v10849_v20 }
 0x7aa   : >> { %10351 = vmatmul.msk.bf16.gmra.mxu2 %vm5804_vm15, %v10867_v49  ;;  %v14164_v56 = vadd.f32 %v7020_v27, %v6766_v40 }
 0x7ab   : >> { %10471 = vmatmul.msk.bf16.gmra.mxu3 %vm5804_vm15, %v10884_v54 }
 0x7ac   : >> { %10591 = vmatmul.msk.bf16.gmra.mxu0 %vm5804_vm15, %v10901_v39 }
 0x7ad   : >> { %v6423_v48 = vpop.f32.mrf.mxu2 }
 0x7ae   : >> { %v6467_v46 = vadd.f32 %v6423_v48, %v6156_v34  ;;  %v6723_v38 = vpop.f32.mrf.mxu3  ;;  %v6157_v33 = vpop.f32.mrf.mxu1 }
 0x7af   : >> { %v6158_v55 = vadd.f32 %v6157_v33, %v13901_v0 }
 0x7b0   : >> { %v6767_v12 = vadd.f32 %v6723_v38, %v6467_v46 }
 0x7b1   : >> { %v7025_v1 = vpop.f32.mrf.mxu0 }
 0x7b2   : >> { %v14169_v60 = vadd.f32 %v7023_v28, %v6767_v12 }
 0x7b5   : >> { %v6425_v4 = vpop.f32.mrf.mxu2 }
 0x7b6   : >> { %v6468_v9 = vadd.f32 %v6425_v4, %v6158_v55  ;;  %v6725_v23 = vpop.f32.mrf.mxu3  ;;  %v6160_v27 = vpop.f32.mrf.mxu1 }
 0x7b7   : >> { %v6161_v0 = vadd.f32 %v6160_v27, %v13917_v59  ;;  %v10851_v59 = vld [vmem:[%s13845_s29 + $0x40] sm:$0xff] }
 0x7b8   : >> { %v6768_v62 = vadd.f32 %v6725_v23, %v6468_v9  ;;  %v10869_v9 = vld [vmem:[%s14101_s28 + $0x30] sm:$0xff]  ;;  %v10886_v23 = vld [vmem:[%s14101_s28 + $0x38] sm:$0xff]  ;;  %v10903_v27 = vld [vmem:[%s14101_s28 + $0x40] sm:$0xff] }
 0x7b9   : >> { %v7028_v29 = vpop.f32.mrf.mxu0  ;;  %10264 = vmatmul.msk.bf16.gmra.mxu1 %vm5804_vm15, %v10850_v58 }
 0x7ba   : >> { %10352 = vmatmul.msk.bf16.gmra.mxu2 %vm5804_vm15, %v10868_v16  ;;  %v14178_v40 = vadd.f32 %v7025_v1, %v6768_v62 }
 0x7bb   : >> { %10472 = vmatmul.msk.bf16.gmra.mxu3 %vm5804_vm15, %v10885_v10 }
 0x7bc   : >> { %10592 = vmatmul.msk.bf16.gmra.mxu0 %vm5804_vm15, %v10902_v11 }
 0x7bd   : >> { %v6428_v28 = vpop.f32.mrf.mxu2 }
 0x7be   : >> { %v6469_v20 = vadd.f32 %v6428_v28, %v6161_v0  ;;  %v6728_v49 = vpop.f32.mrf.mxu3  ;;  %v6162_v54 = vpop.f32.mrf.mxu1 }
 0x7bf   : >> { %v6163_v46 = vadd.f32 %v6162_v54, %v13925_v43 }
 0x7c0   : >> { %v6769_v39 = vadd.f32 %v6728_v49, %v6469_v20 }
 0x7c1   : >> { %v7030_v34 = vpop.f32.mrf.mxu0 }
 0x7c2   : >> { %v14183_v48 = vadd.f32 %v7028_v29, %v6769_v39 }
 0x7c5   : >> { %v6430_v38 = vpop.f32.mrf.mxu2 }
 0x7c6   : >> { %v6470_v33 = vadd.f32 %v6430_v38, %v6163_v46  ;;  %v6730_v12 = vpop.f32.mrf.mxu3  ;;  %v6165_v1 = vpop.f32.mrf.mxu1 }
 0x7c7   : >> { %v6166_v43 = vadd.f32 %v6165_v1, %v13947_v37  ;;  %v10852_v37 = vld [vmem:[%s13845_s29 + $0x48] sm:$0xff] }
 0x7c8   : >> { %v6770_v55 = vadd.f32 %v6730_v12, %v6470_v33  ;;  %v10870_v33 = vld [vmem:[%s14101_s28 + $0x38] sm:$0xff]  ;;  %v10887_v12 = vld [vmem:[%s14101_s28 + $0x40] sm:$0xff]  ;;  %v10904_v1 = vld [vmem:[%s14101_s28 + $0x48] sm:$0xff] }
 0x7c9   : >> { %v7033_v4 = vpop.f32.mrf.mxu0  ;;  %10265 = vmatmul.msk.bf16.gmra.mxu1 %vm5804_vm15, %v10851_v59 }
 0x7ca   : >> { %10353 = vmatmul.msk.bf16.gmra.mxu2 %vm5804_vm15, %v10869_v9  ;;  %v14192_v62 = vadd.f32 %v7030_v34, %v6770_v55 }
 0x7cb   : >> { %10473 = vmatmul.msk.bf16.gmra.mxu3 %vm5804_vm15, %v10886_v23 }
 0x7cc   : >> { %10593 = vmatmul.msk.bf16.gmra.mxu0 %vm5804_vm15, %v10903_v27 }
 0x7cd   : >> { %v6433_v29 = vpop.f32.mrf.mxu2 }
 0x7ce   : >> { %v6471_v58 = vadd.f32 %v6433_v29, %v6166_v43  ;;  %v6733_v16 = vpop.f32.mrf.mxu3  ;;  %v6167_v10 = vpop.f32.mrf.mxu1 }
 0x7cf   : >> { %v6168_v20 = vadd.f32 %v6167_v10, %v13961_v21 }
 0x7d0   : >> { %v6771_v11 = vadd.f32 %v6733_v16, %v6471_v58 }
 0x7d1   : >> { %v7035_v0 = vpop.f32.mrf.mxu0 }
 0x7d2   : >> { %v14197_v28 = vadd.f32 %v7033_v4, %v6771_v11 }
 0x7d5   : >> { %v6435_v49 = vpop.f32.mrf.mxu2 }
 0x7d6   : >> { %v6472_v54 = vadd.f32 %v6435_v49, %v6168_v20  ;;  %v6735_v39 = vpop.f32.mrf.mxu3  ;;  %v6170_v34 = vpop.f32.mrf.mxu1 }
 0x7d7   : >> { %v6171_v21 = vadd.f32 %v6170_v34, %v13977_v30  ;;  %v10853_v30 = vld [vmem:[%s13845_s29 + $0x50] sm:$0xff] }
 0x7d8   : >> { %v6772_v46 = vadd.f32 %v6735_v39, %v6472_v54  ;;  %v10871_v54 = vld [vmem:[%s14101_s28 + $0x40] sm:$0xff]  ;;  %v10888_v39 = vld [vmem:[%s14101_s28 + $0x48] sm:$0xff]  ;;  %v10905_v34 = vld [vmem:[%s14101_s28 + $0x50] sm:$0xff] }
 0x7d9   : >> { %v7038_v38 = vpop.f32.mrf.mxu0  ;;  %10266 = vmatmul.msk.bf16.gmra.mxu1 %vm5804_vm15, %v10852_v37 }
 0x7da   : >> { %10354 = vmatmul.msk.bf16.gmra.mxu2 %vm5804_vm15, %v10870_v33  ;;  %v14206_v55 = vadd.f32 %v7035_v0, %v6772_v46 }
 0x7db   : >> { %10474 = vmatmul.msk.bf16.gmra.mxu3 %vm5804_vm15, %v10887_v12 }
 0x7dc   : >> { %10594 = vmatmul.msk.bf16.gmra.mxu0 %vm5804_vm15, %v10904_v1 }
 0x7dd   : >> { %v6438_v4 = vpop.f32.mrf.mxu2 }
 0x7de   : >> { %v6473_v59 = vadd.f32 %v6438_v4, %v6171_v21  ;;  %v6738_v9 = vpop.f32.mrf.mxu3  ;;  %v6172_v23 = vpop.f32.mrf.mxu1  ;;  %v14226_v21 = vperm.slane %v11880_v52, 0 }
 0x7df   : >> { %v6173_v58 = vadd.f32 %v6172_v23, %v13985_v5 }
 0x7e0   : >> { %v6773_v27 = vadd.f32 %v6738_v9, %v6473_v59 }
 0x7e1   : >> { %v7040_v43 = vpop.f32.mrf.mxu0 }
 0x7e2   : >> { %v14211_v29 = vadd.f32 %v7038_v38, %v6773_v27 }
 0x7e5   : >> { %v6440_v16 = vpop.f32.mrf.mxu2 }
 0x7e6   : >> { %v6474_v10 = vadd.f32 %v6440_v16, %v6173_v58  ;;  %v6740_v11 = vpop.f32.mrf.mxu3  ;;  %v7263_v0 = vpop.f32.mrf.mxu1 }
 0x7e7   : >> { %v7343_v5 = vadd.f32 %v7263_v0, %v13997_v6 }
 0x7e8   : >> { %v6774_v20 = vadd.f32 %v6740_v11, %v6474_v10 }
 0x7e9   : >> { %v8163_v49 = vpop.f32.mrf.mxu0  ;;  %10267 = vmatmul.msk.bf16.gmra.mxu1 %vm5804_vm15, %v10853_v30  ;;  %v10889_v30 = vld [vmem:[%s14101_s28 + $0x50] sm:$0xff] }
 0x7ea   : >> { %10355 = vmatmul.msk.bf16.gmra.mxu2 %vm5804_vm15, %v10871_v54  ;;  %v14220_v46 = vadd.f32 %v7040_v43, %v6774_v20  ;;  %v10854_v20 = vld [vmem:[%s13845_s29 + $0x58] sm:$0xff] }
 0x7eb   : >> { %10475 = vmatmul.msk.bf16.gmra.mxu3 %vm5804_vm15, %v10888_v39  ;;  %v10906_v54 = vld [vmem:[%s14101_s28 + $0x58] sm:$0xff] }
 0x7ec   : >> { %10595 = vmatmul.msk.bf16.gmra.mxu0 %vm5804_vm15, %v10905_v34 }
 0x7ed   : >> { %v7563_v38 = vpop.f32.mrf.mxu2 }
 0x7ee   : >> { %v7643_v37 = vadd.f32 %v7563_v38, %v7343_v5  ;;  %v7863_v33 = vpop.f32.mrf.mxu3  ;;  %v7265_v12 = vpop.f32.mrf.mxu1 }
 0x7ef   : >> { %v7344_v6 = vadd.f32 %v7265_v12, %v14006_v13 }
 0x7f0   : >> { %v7943_v1 = vadd.f32 %v7863_v33, %v7643_v37 }
 0x7f1   : >> { %v8165_v4 = vpop.f32.mrf.mxu0 }
 0x7f2   : >> { %v8243_v59 = vadd.f32 %v8163_v49, %v7943_v1  ;;  %v10872_v49 = vld [vmem:[%s14101_s28 + $0x48] sm:$0xff] }
 0x7f4   : >> { %v8278_v9 = vadd.f32 %v14226_v21, %v8243_v59 }
 0x7f5   : >> { %v7565_v23 = vpop.f32.mrf.mxu2 }
 0x7f6   : >> { %v8310_v27 = vmax.f32 %v8278_v9, 0.0  ;;  %v7644_v43 = vadd.f32 %v7565_v23, %v7344_v6  ;;  %v7865_v58 = vpop.f32.mrf.mxu3  ;;  %v7268_v16 = vpop.f32.mrf.mxu1 }
 0x7f7   : >> { %v7345_v34 = vadd.f32 %v7268_v16, %v14011_v35 }
 0x7f8   : >> { %v8342_v10 = vpack.c.bf16 %v8310_v27, %v8310_v27  ;;  %v7944_v11 = vadd.f32 %v7865_v58, %v7644_v43 }
 0x7f9   : >> { %v8168_v0 = vpop.f32.mrf.mxu0  ;;  %10268 = vmatmul.msk.bf16.gmra.mxu1 %vm5804_vm15, %v10854_v20 }
 0x7fa   : >> { %8378 = vst.msk [vmem:[%s14232_s12] sm:$0xf] %vm8377_vm0, %v8342_v10  ;;  %v8244_v13 = vadd.f32 %v8165_v4, %v7944_v11  ;;  %10356 = vmatmul.msk.bf16.gmra.mxu2 %vm5804_vm15, %v10872_v49  ;;  %v10855_v49 = vld [vmem:[%s13845_s29 + $0x60] sm:$0xff] }
 0x7fb   : >> { %10476 = vmatmul.msk.bf16.gmra.mxu3 %vm5804_vm15, %v10889_v30  ;;  %v10873_v30 = vld [vmem:[%s14101_s28 + $0x50] sm:$0xff] }
 0x7fc   : >> { %10596 = vmatmul.msk.bf16.gmra.mxu0 %vm5804_vm15, %v10906_v54  ;;  %v8279_v39 = vadd.f32 %v14226_v21, %v8244_v13  ;;  %v10890_v54 = vld [vmem:[%s14101_s28 + $0x58] sm:$0xff]  ;;  %v10907_v13 = vld [vmem:[%s14101_s28 + $0x60] sm:$0xff] }
 0x7fd   : >> { %v7568_v5 = vpop.f32.mrf.mxu2 }
 0x7fe   : >> { %v8311_v38 = vmax.f32 %v8279_v39, 0.0  ;;  %v7645_v37 = vadd.f32 %v7568_v5, %v7345_v34  ;;  %v7868_v33 = vpop.f32.mrf.mxu3  ;;  %v7270_v12 = vpop.f32.mrf.mxu1 }
 0x7ff   : >> { %v7346_v35 = vadd.f32 %v7270_v12, %v14020_v47 }
 0x800   : >> { %v8343_v1 = vpack.c.bf16 %v8311_v38, %v8311_v38  ;;  %v7945_v4 = vadd.f32 %v7868_v33, %v7645_v37 }
 0x801   : >> { %v8170_v59 = vpop.f32.mrf.mxu0 }
 0x802   : >> { %8379 = vst.msk [vmem:[%s14232_s12 + $0x4] sm:$0xf] %vm8377_vm0, %v8343_v1  ;;  %v8245_v9 = vadd.f32 %v8168_v0, %v7945_v4 }
 0x804   : >> { %v8280_v6 = vadd.f32 %v14226_v21, %v8245_v9 }
 0x805   : >> { %v7570_v23 = vpop.f32.mrf.mxu2 }
 0x806   : >> { %v8312_v27 = vmax.f32 %v8280_v6, 0.0  ;;  %v7646_v43 = vadd.f32 %v7570_v23, %v7346_v35  ;;  %v7870_v58 = vpop.f32.mrf.mxu3  ;;  %v7273_v16 = vpop.f32.mrf.mxu1 }
 0x807   : >> { %v7347_v39 = vadd.f32 %v7273_v16, %v14025_v31 }
 0x808   : >> { %v8344_v10 = vpack.c.bf16 %v8312_v27, %v8312_v27  ;;  %v7946_v11 = vadd.f32 %v7870_v58, %v7646_v43 }
 0x809   : >> { %v8173_v20 = vpop.f32.mrf.mxu0  ;;  %10269 = vmatmul.msk.bf16.gmra.mxu1 %vm5804_vm15, %v10855_v49  ;;  %v10874_v49 = vld [vmem:[%s14101_s28 + $0x58] sm:$0xff] }
 0x80a   : >> { %8380 = vst.msk [vmem:[%s14232_s12 + $0x8] sm:$0xf] %vm8377_vm0, %v8344_v10  ;;  %v8246_v0 = vadd.f32 %v8170_v59, %v7946_v11  ;;  %10357 = vmatmul.msk.bf16.gmra.mxu2 %vm5804_vm15, %v10873_v30  ;;  %v10856_v11 = vld [vmem:[%s13845_s29 + $0x68] sm:$0xff]  ;;  %v10891_v30 = vld [vmem:[%s14101_s28 + $0x60] sm:$0xff] }
 0x80b   : >> { %10477 = vmatmul.msk.bf16.gmra.mxu3 %vm5804_vm15, %v10890_v54  ;;  %v10908_v54 = vld [vmem:[%s14101_s28 + $0x68] sm:$0xff] }
 0x80c   : >> { %10597 = vmatmul.msk.bf16.gmra.mxu0 %vm5804_vm15, %v10907_v13  ;;  %v8281_v47 = vadd.f32 %v14226_v21, %v8246_v0 }
 0x80d   : >> { %v7573_v34 = vpop.f32.mrf.mxu2 }
 0x80e   : >> { %v8313_v5 = vmax.f32 %v8281_v47, 0.0  ;;  %v7647_v38 = vadd.f32 %v7573_v34, %v7347_v39  ;;  %v7873_v37 = vpop.f32.mrf.mxu3  ;;  %v7275_v33 = vpop.f32.mrf.mxu1 }
 0x80f   : >> { %v7348_v31 = vadd.f32 %v7275_v33, %v14034_v7 }
 0x810   : >> { %v8345_v12 = vpack.c.bf16 %v8313_v5, %v8313_v5  ;;  %v7947_v1 = vadd.f32 %v7873_v37, %v7647_v38 }
 0x811   : >> { %v8175_v4 = vpop.f32.mrf.mxu0 }
 0x812   : >> { %8381 = vst.msk [vmem:[%s14232_s12 + $0xc] sm:$0xf] %vm8377_vm0, %v8345_v12  ;;  %v8247_v59 = vadd.f32 %v8173_v20, %v7947_v1 }
 0x814   : >> { %v8282_v9 = vadd.f32 %v14226_v21, %v8247_v59 }
 0x815   : >> { %v7575_v6 = vpop.f32.mrf.mxu2 }
 0x816   : >> { %v8314_v35 = vmax.f32 %v8282_v9, 0.0  ;;  %v7648_v23 = vadd.f32 %v7575_v6, %v7348_v31  ;;  %v7875_v27 = vpop.f32.mrf.mxu3  ;;  %v7278_v43 = vpop.f32.mrf.mxu1 }
 0x817   : >> { %v7349_v13 = vadd.f32 %v7278_v43, %v14039_v50  ;;  %v10857_v43 = vld [vmem:[%s13845_s29 + $0x70] sm:$0xff] }
 0x818   : >> { %v8346_v58 = vpack.c.bf16 %v8314_v35, %v8314_v35  ;;  %v7948_v16 = vadd.f32 %v7875_v27, %v7648_v23 }
 0x819   : >> { %v8178_v10 = vpop.f32.mrf.mxu0  ;;  %10270 = vmatmul.msk.bf16.gmra.mxu1 %vm5804_vm15, %v10856_v11  ;;  %v10909_v11 = vld [vmem:[%s14101_s28 + $0x70] sm:$0xff] }
 0x81a   : >> { %8382 = vst.msk [vmem:[%s14232_s12 + $0x10] sm:$0xf] %vm8377_vm0, %v8346_v58  ;;  %v8248_v20 = vadd.f32 %v8175_v4, %v7948_v16  ;;  %10358 = vmatmul.msk.bf16.gmra.mxu2 %vm5804_vm15, %v10874_v49  ;;  %v10875_v58 = vld [vmem:[%s14101_s28 + $0x60] sm:$0xff]  ;;  %v10892_v16 = vld [vmem:[%s14101_s28 + $0x68] sm:$0xff] }
 0x81b   : >> { %10478 = vmatmul.msk.bf16.gmra.mxu3 %vm5804_vm15, %v10891_v30 }
 0x81c   : >> { %10598 = vmatmul.msk.bf16.gmra.mxu0 %vm5804_vm15, %v10908_v54  ;;  %v8283_v7 = vadd.f32 %v14226_v21, %v8248_v20 }
 0x81d   : >> { %v7578_v0 = vpop.f32.mrf.mxu2 }
 0x81e   : >> { %v8315_v47 = vmax.f32 %v8283_v7, 0.0  ;;  %v7649_v39 = vadd.f32 %v7578_v0, %v7349_v13  ;;  %v7878_v34 = vpop.f32.mrf.mxu3  ;;  %v7280_v5 = vpop.f32.mrf.mxu1 }
 0x81f   : >> { %v7350_v50 = vadd.f32 %v7280_v5, %v14047_v61 }
 0x820   : >> { %v8347_v38 = vpack.c.bf16 %v8315_v47, %v8315_v47  ;;  %v7949_v37 = vadd.f32 %v7878_v34, %v7649_v39 }
 0x821   : >> { %v8180_v33 = vpop.f32.mrf.mxu0 }
 0x822   : >> { %8383 = vst.msk [vmem:[%s14232_s12 + $0x14] sm:$0xf] %vm8377_vm0, %v8347_v38  ;;  %v8249_v12 = vadd.f32 %v8178_v10, %v7949_v37 }
 0x824   : >> { %v8284_v1 = vadd.f32 %v14226_v21, %v8249_v12 }
 0x825   : >> { %v7580_v4 = vpop.f32.mrf.mxu2 }
 0x826   : >> { %v8316_v59 = vmax.f32 %v8284_v1, 0.0  ;;  %v7650_v9 = vadd.f32 %v7580_v4, %v7350_v50  ;;  %v7880_v31 = vpop.f32.mrf.mxu3  ;;  %v7283_v6 = vpop.f32.mrf.mxu1 }
 0x827   : >> { %v7351_v49 = vadd.f32 %v7283_v6, %v14052_v22  ;;  %v10893_v6 = vld [vmem:[%s14101_s28 + $0x70] sm:$0xff] }
 0x828   : >> { %v8348_v35 = vpack.c.bf16 %v8316_v59, %v8316_v59  ;;  %v7950_v23 = vadd.f32 %v7880_v31, %v7650_v9  ;;  %v10858_v9 = vld [vmem:[%s13845_s29 + $0x78] sm:$0xff]  ;;  %v10876_v31 = vld [vmem:[%s14101_s28 + $0x68] sm:$0xff] }
 0x829   : >> { %v8183_v27 = vpop.f32.mrf.mxu0  ;;  %10271 = vmatmul.msk.bf16.gmra.mxu1 %vm5804_vm15, %v10857_v43 }
 0x82a   : >> { %8384 = vst.msk [vmem:[%s14232_s12 + $0x18] sm:$0xf] %vm8377_vm0, %v8348_v35  ;;  %v8250_v10 = vadd.f32 %v8180_v33, %v7950_v23  ;;  %10359 = vmatmul.msk.bf16.gmra.mxu2 %vm5804_vm15, %v10875_v58  ;;  %v10910_v35 = vld [vmem:[%s14101_s28 + $0x78] sm:$0xff] }
 0x82b   : >> { %10479 = vmatmul.msk.bf16.gmra.mxu3 %vm5804_vm15, %v10892_v16 }
 0x82c   : >> { %10599 = vmatmul.msk.bf16.gmra.mxu0 %vm5804_vm15, %v10909_v11  ;;  %v8285_v61 = vadd.f32 %v14226_v21, %v8250_v10 }
 0x82d   : >> { %v7583_v30 = vpop.f32.mrf.mxu2 }
 0x82e   : >> { %v8317_v54 = vmax.f32 %v8285_v61, 0.0  ;;  %v7651_v20 = vadd.f32 %v7583_v30, %v7351_v49  ;;  %v7883_v7 = vpop.f32.mrf.mxu3  ;;  %v7285_v13 = vpop.f32.mrf.mxu1 }
 0x82f   : >> { %v7352_v22 = vadd.f32 %v7285_v13, %v14061_v26 }
 0x830   : >> { %v8349_v0 = vpack.c.bf16 %v8317_v54, %v8317_v54  ;;  %v7951_v47 = vadd.f32 %v7883_v7, %v7651_v20 }
 0x831   : >> { %v8185_v39 = vpop.f32.mrf.mxu0 }
 0x832   : >> { %8385 = vst.msk [vmem:[%s14232_s12 + $0x1c] sm:$0xf] %vm8377_vm0, %v8349_v0  ;;  %v8251_v34 = vadd.f32 %v8183_v27, %v7951_v47 }
 0x834   : >> { %v8286_v5 = vadd.f32 %v14226_v21, %v8251_v34 }
 0x835   : >> { %v7585_v38 = vpop.f32.mrf.mxu2 }
 0x836   : >> { %v8318_v37 = vmax.f32 %v8286_v5, 0.0  ;;  %v7652_v33 = vadd.f32 %v7585_v38, %v7352_v22  ;;  %v7885_v12 = vpop.f32.mrf.mxu3  ;;  %v7288_v1 = vpop.f32.mrf.mxu1  ;;  %v10859_v38 = vld [vmem:[%s13845_s29 + $0x80] sm:$0xff] }
 0x837   : >> { %v7353_v27 = vadd.f32 %v7288_v1, %v14066_v19 }
 0x838   : >> { %v8350_v50 = vpack.c.bf16 %v8318_v37, %v8318_v37  ;;  %v7952_v4 = vadd.f32 %v7885_v12, %v7652_v33  ;;  %v10877_v37 = vld [vmem:[%s14101_s28 + $0x70] sm:$0xff]  ;;  %v10894_v33 = vld [vmem:[%s14101_s28 + $0x78] sm:$0xff]  ;;  %v10911_v12 = vld [vmem:[%s14101_s28 + $0x80] sm:$0xff] }
 0x839   : >> { %v8188_v59 = vpop.f32.mrf.mxu0  ;;  %10272 = vmatmul.msk.bf16.gmra.mxu1 %vm5804_vm15, %v10858_v9 }
 0x83a   : >> { %8386 = vst.msk [vmem:[%s14232_s12 + $0x20] sm:$0xf] %vm8377_vm0, %v8350_v50  ;;  %v8252_v23 = vadd.f32 %v8185_v39, %v7952_v4  ;;  %10360 = vmatmul.msk.bf16.gmra.mxu2 %vm5804_vm15, %v10876_v31 }
 0x83b   : >> { %10480 = vmatmul.msk.bf16.gmra.mxu3 %vm5804_vm15, %v10893_v6 }
 0x83c   : >> { %10600 = vmatmul.msk.bf16.gmra.mxu0 %vm5804_vm15, %v10910_v35  ;;  %v8287_v26 = vadd.f32 %v14226_v21, %v8252_v23 }
 0x83d   : >> { %v7588_v43 = vpop.f32.mrf.mxu2 }
 0x83e   : >> { %v8319_v58 = vmax.f32 %v8287_v26, 0.0  ;;  %v7653_v16 = vadd.f32 %v7588_v43, %v7353_v27  ;;  %v7888_v11 = vpop.f32.mrf.mxu3  ;;  %v7290_v10 = vpop.f32.mrf.mxu1 }
 0x83f   : >> { %v7354_v19 = vadd.f32 %v7290_v10, %v14075_v36 }
 0x840   : >> { %v8351_v61 = vpack.c.bf16 %v8319_v58, %v8319_v58  ;;  %v7953_v49 = vadd.f32 %v7888_v11, %v7653_v16 }
 0x841   : >> { %v8190_v30 = vpop.f32.mrf.mxu0 }
 0x842   : >> { %8387 = vst.msk [vmem:[%s14232_s12 + $0x24] sm:$0xf] %vm8377_vm0, %v8351_v61  ;;  %v8253_v54 = vadd.f32 %v8188_v59, %v7953_v49 }
 0x844   : >> { %v8288_v20 = vadd.f32 %v14226_v21, %v8253_v54 }
 0x845   : >> { %v7590_v7 = vpop.f32.mrf.mxu2 }
 0x846   : >> { %v8320_v13 = vmax.f32 %v8288_v20, 0.0  ;;  %v7654_v0 = vadd.f32 %v7590_v7, %v7354_v19  ;;  %v7890_v47 = vpop.f32.mrf.mxu3  ;;  %v7293_v39 = vpop.f32.mrf.mxu1  ;;  %v10860_v20 = vld [vmem:[%s13845_s29 + $0x88] sm:$0xff]  ;;  %v10878_v19 = vld [vmem:[%s14101_s28 + $0x78] sm:$0xff]  ;;  %v10895_v7 = vld [vmem:[%s14101_s28 + $0x80] sm:$0xff] }
 0x847   : >> { %v7355_v50 = vadd.f32 %v7293_v39, %v14080_v51 }
 0x848   : >> { %v8352_v34 = vpack.c.bf16 %v8320_v13, %v8320_v13  ;;  %v7954_v5 = vadd.f32 %v7890_v47, %v7654_v0  ;;  %v10912_v13 = vld [vmem:[%s14101_s28 + $0x88] sm:$0xff] }
 0x849   : >> { %v8193_v22 = vpop.f32.mrf.mxu0  ;;  %10273 = vmatmul.msk.bf16.gmra.mxu1 %vm5804_vm15, %v10859_v38 }
 0x84a   : >> { %8388 = vst.msk [vmem:[%s14232_s12 + $0x28] sm:$0xf] %vm8377_vm0, %v8352_v34  ;;  %v8254_v1 = vadd.f32 %v8190_v30, %v7954_v5  ;;  %10361 = vmatmul.msk.bf16.gmra.mxu2 %vm5804_vm15, %v10877_v37 }
 0x84b   : >> { %10481 = vmatmul.msk.bf16.gmra.mxu3 %vm5804_vm15, %v10894_v33 }
 0x84c   : >> { %10601 = vmatmul.msk.bf16.gmra.mxu0 %vm5804_vm15, %v10911_v12  ;;  %v8289_v36 = vadd.f32 %v14226_v21, %v8254_v1 }
 0x84d   : >> { %v7593_v4 = vpop.f32.mrf.mxu2 }
 0x84e   : >> { %v8321_v59 = vmax.f32 %v8289_v36, 0.0  ;;  %v7655_v9 = vadd.f32 %v7593_v4, %v7355_v50  ;;  %v7893_v31 = vpop.f32.mrf.mxu3  ;;  %v7295_v6 = vpop.f32.mrf.mxu1 }
 0x84f   : >> { %v7356_v51 = vadd.f32 %v7295_v6, %v14091_v45 }
 0x850   : >> { %v8353_v35 = vpack.c.bf16 %v8321_v59, %v8321_v59  ;;  %v7955_v23 = vadd.f32 %v7893_v31, %v7655_v9 }
 0x851   : >> { %v8195_v26 = vpop.f32.mrf.mxu0 }
 0x852   : >> { %8389 = vst.msk [vmem:[%s14232_s12 + $0x2c] sm:$0xf] %vm8377_vm0, %v8353_v35  ;;  %v8255_v27 = vadd.f32 %v8193_v22, %v7955_v23 }
 0x854   : >> { %v8290_v43 = vadd.f32 %v14226_v21, %v8255_v27 }
 0x855   : >> { %v7595_v58 = vpop.f32.mrf.mxu2 }
 0x856   : >> { %v8322_v16 = vmax.f32 %v8290_v43, 0.0  ;;  %v7656_v11 = vadd.f32 %v7595_v58, %v7356_v51  ;;  %v7895_v10 = vpop.f32.mrf.mxu3  ;;  %v7298_v61 = vpop.f32.mrf.mxu1 }
 0x857   : >> { %v7357_v47 = vadd.f32 %v7298_v61, %v14097_v42 }
 0x858   : >> { %v8354_v49 = vpack.c.bf16 %v8322_v16, %v8322_v16  ;;  %v7956_v30 = vadd.f32 %v7895_v10, %v7656_v11 }
 0x859   : >> { %v8198_v54 = vpop.f32.mrf.mxu0  ;;  %10274 = vmatmul.msk.bf16.gmra.mxu1 %vm5804_vm15, %v10860_v20 }
 0x85a   : >> { %8390 = vst.msk [vmem:[%s14232_s12 + $0x30] sm:$0xf] %vm8377_vm0, %v8354_v49  ;;  %v8256_v0 = vadd.f32 %v8195_v26, %v7956_v30  ;;  %10362 = vmatmul.msk.bf16.gmra.mxu2 %vm5804_vm15, %v10878_v19 }
 0x85b   : >> { %10482 = vmatmul.msk.bf16.gmra.mxu3 %vm5804_vm15, %v10895_v7 }
 0x85c   : >> { %10602 = vmatmul.msk.bf16.gmra.mxu0 %vm5804_vm15, %v10912_v13  ;;  %v8291_v45 = vadd.f32 %v14226_v21, %v8256_v0 }
 0x85d   : >> { %v7598_v39 = vpop.f32.mrf.mxu2 }
 0x85e   : >> { %v8323_v34 = vmax.f32 %v8291_v45, 0.0  ;;  %v7657_v5 = vadd.f32 %v7598_v39, %v7357_v47  ;;  %v7898_v22 = vpop.f32.mrf.mxu3  ;;  %v7300_v38 = vpop.f32.mrf.mxu1 }
 0x85f   : >> { %v7358_v50 = vadd.f32 %v7300_v38, %v14108_v18 }
 0x860   : >> { %v8355_v37 = vpack.c.bf16 %v8323_v34, %v8323_v34  ;;  %v7957_v33 = vadd.f32 %v7898_v22, %v7657_v5 }
 0x861   : >> { %v8200_v12 = vpop.f32.mrf.mxu0 }
 0x862   : >> { %8391 = vst.msk [vmem:[%s14232_s12 + $0x34] sm:$0xf] %vm8377_vm0, %v8355_v37  ;;  %v8257_v1 = vadd.f32 %v8198_v54, %v7957_v33 }
 0x864   : >> { %v8292_v36 = vadd.f32 %v14226_v21, %v8257_v1 }
 0x865   : >> { %v7600_v4 = vpop.f32.mrf.mxu2 }
 0x866   : >> { %v8324_v59 = vmax.f32 %v8292_v36, 0.0  ;;  %v7658_v9 = vadd.f32 %v7600_v4, %v7358_v50  ;;  %v7900_v42 = vpop.f32.mrf.mxu3  ;;  %v7303_v31 = vpop.f32.mrf.mxu1 }
 0x867   : >> { %v7359_v43 = vadd.f32 %v7303_v31, %v14113_v14 }
 0x868   : >> { %v8356_v6 = vpack.c.bf16 %v8324_v59, %v8324_v59  ;;  %v7958_v35 = vadd.f32 %v7900_v42, %v7658_v9 }
 0x869   : >> { %v8203_v23 = vpop.f32.mrf.mxu0 }
 0x86a   : >> { %8392 = vst.msk [vmem:[%s14232_s12 + $0x38] sm:$0xf] %vm8377_vm0, %v8356_v6  ;;  %v8258_v26 = vadd.f32 %v8200_v12, %v7958_v35 }
 0x86c   : >> { %v8293_v27 = vadd.f32 %v14226_v21, %v8258_v26 }
 0x86d   : >> { %v7603_v51 = vpop.f32.mrf.mxu2 }
 0x86e   : >> { %v8325_v58 = vmax.f32 %v8293_v27, 0.0  ;;  %v7659_v16 = vadd.f32 %v7603_v51, %v7359_v43  ;;  %v7903_v18 = vpop.f32.mrf.mxu3  ;;  %v7305_v11 = vpop.f32.mrf.mxu1 }
 0x86f   : >> { %v7360_v20 = vadd.f32 %v7305_v11, %v14122_v41 }
 0x870   : >> { %v8357_v10 = vpack.c.bf16 %v8325_v58, %v8325_v58  ;;  %v7959_v61 = vadd.f32 %v7903_v18, %v7659_v16 }
 0x871   : >> { %v8205_v49 = vpop.f32.mrf.mxu0 }
 0x872   : >> { %8393 = vst.msk [vmem:[%s14232_s12 + $0x3c] sm:$0xf] %vm8377_vm0, %v8357_v10  ;;  %v8259_v30 = vadd.f32 %v8203_v23, %v7959_v61 }
 0x874   : >> { %v8294_v54 = vadd.f32 %v14226_v21, %v8259_v30 }
 0x875   : >> { %v7605_v19 = vpop.f32.mrf.mxu2 }
 0x876   : >> { %v8326_v7 = vmax.f32 %v8294_v54, 0.0  ;;  %v7660_v13 = vadd.f32 %v7605_v19, %v7360_v20  ;;  %v7905_v14 = vpop.f32.mrf.mxu3  ;;  %v7308_v0 = vpop.f32.mrf.mxu1 }
 0x877   : >> { %v7361_v22 = vadd.f32 %v7308_v0, %v14127_v53 }
 0x878   : >> { %v8358_v45 = vpack.c.bf16 %v8326_v7, %v8326_v7  ;;  %v7960_v47 = vadd.f32 %v7905_v14, %v7660_v13 }
 0x879   : >> { %v8208_v39 = vpop.f32.mrf.mxu0 }
 0x87a   : >> { %8394 = vst.msk [vmem:[%s14232_s12 + $0x40] sm:$0xf] %vm8377_vm0, %v8358_v45  ;;  %v8260_v34 = vadd.f32 %v8205_v49, %v7960_v47 }
 0x87c   : >> { %v8295_v5 = vadd.f32 %v14226_v21, %v8260_v34 }
 0x87d   : >> { %v7608_v38 = vpop.f32.mrf.mxu2 }
 0x87e   : >> { %v8327_v37 = vmax.f32 %v8295_v5, 0.0  ;;  %v7661_v33 = vadd.f32 %v7608_v38, %v7361_v22  ;;  %v7908_v41 = vpop.f32.mrf.mxu3  ;;  %v7310_v12 = vpop.f32.mrf.mxu1 }
 0x87f   : >> { %v7362_v9 = vadd.f32 %v7310_v12, %v14136_v32 }
 0x880   : >> { %v8359_v1 = vpack.c.bf16 %v8327_v37, %v8327_v37  ;;  %v7961_v36 = vadd.f32 %v7908_v41, %v7661_v33 }
 0x881   : >> { %v8210_v50 = vpop.f32.mrf.mxu0 }
 0x882   : >> { %8395 = vst.msk [vmem:[%s14232_s12 + $0x44] sm:$0xf] %vm8377_vm0, %v8359_v1  ;;  %v8261_v4 = vadd.f32 %v8208_v39, %v7961_v36 }
 0x884   : >> { %v8296_v59 = vadd.f32 %v14226_v21, %v8261_v4 }
 0x885   : >> { %v7610_v42 = vpop.f32.mrf.mxu2 }
 0x886   : >> { %v8328_v31 = vmax.f32 %v8296_v59, 0.0  ;;  %v7662_v6 = vadd.f32 %v7610_v42, %v7362_v9  ;;  %v7910_v53 = vpop.f32.mrf.mxu3  ;;  %v7313_v35 = vpop.f32.mrf.mxu1 }
 0x887   : >> { %v7363_v58 = vadd.f32 %v7313_v35, %v14141_v44 }
 0x888   : >> { %v8360_v23 = vpack.c.bf16 %v8328_v31, %v8328_v31  ;;  %v7962_v26 = vadd.f32 %v7910_v53, %v7662_v6 }
 0x889   : >> { %v8213_v27 = vpop.f32.mrf.mxu0 }
 0x88a   : >> { %8396 = vst.msk [vmem:[%s14232_s12 + $0x48] sm:$0xf] %vm8377_vm0, %v8360_v23  ;;  %v8262_v43 = vadd.f32 %v8210_v50, %v7962_v26 }
 0x88c   : >> { %v8297_v51 = vadd.f32 %v14226_v21, %v8262_v43 }
 0x88d   : >> { %v7613_v16 = vpop.f32.mrf.mxu2 }
 0x88e   : >> { %v8329_v18 = vmax.f32 %v8297_v51, 0.0  ;;  %v7663_v11 = vadd.f32 %v7613_v16, %v7363_v58  ;;  %v7913_v32 = vpop.f32.mrf.mxu3  ;;  %v7315_v10 = vpop.f32.mrf.mxu1 }
 0x88f   : >> { %v7364_v19 = vadd.f32 %v7315_v10, %v14150_v25 }
 0x890   : >> { %v8361_v61 = vpack.c.bf16 %v8329_v18, %v8329_v18  ;;  %v7963_v49 = vadd.f32 %v7913_v32, %v7663_v11 }
 0x891   : >> { %v8215_v30 = vpop.f32.mrf.mxu0 }
 0x892   : >> { %8397 = vst.msk [vmem:[%s14232_s12 + $0x4c] sm:$0xf] %vm8377_vm0, %v8361_v61  ;;  %v8263_v54 = vadd.f32 %v8213_v27, %v7963_v49 }
 0x894   : >> { %v8298_v20 = vadd.f32 %v14226_v21, %v8263_v54 }
 0x895   : >> { %v7615_v7 = vpop.f32.mrf.mxu2 }
 0x896   : >> { %v8330_v13 = vmax.f32 %v8298_v20, 0.0  ;;  %v7664_v14 = vadd.f32 %v7615_v7, %v7364_v19  ;;  %v7915_v44 = vpop.f32.mrf.mxu3  ;;  %v7318_v0 = vpop.f32.mrf.mxu1 }
 0x897   : >> { %v7365_v22 = vadd.f32 %v7318_v0, %v14155_v57 }
 0x898   : >> { %v8362_v45 = vpack.c.bf16 %v8330_v13, %v8330_v13  ;;  %v7964_v47 = vadd.f32 %v7915_v44, %v7664_v14 }
 0x899   : >> { %v8218_v39 = vpop.f32.mrf.mxu0 }
 0x89a   : >> { %8398 = vst.msk [vmem:[%s14232_s12 + $0x50] sm:$0xf] %vm8377_vm0, %v8362_v45  ;;  %v8264_v34 = vadd.f32 %v8215_v30, %v7964_v47 }
 0x89c   : >> { %v8299_v5 = vadd.f32 %v14226_v21, %v8264_v34 }
 0x89d   : >> { %v7618_v38 = vpop.f32.mrf.mxu2 }
 0x89e   : >> { %v8331_v37 = vmax.f32 %v8299_v5, 0.0  ;;  %v7665_v33 = vadd.f32 %v7618_v38, %v7365_v22  ;;  %v7918_v25 = vpop.f32.mrf.mxu3  ;;  %v7320_v41 = vpop.f32.mrf.mxu1 }
 0x89f   : >> { %v7366_v59 = vadd.f32 %v7320_v41, %v14164_v56 }
 0x8a0   : >> { %v8363_v12 = vpack.c.bf16 %v8331_v37, %v8331_v37  ;;  %v7965_v1 = vadd.f32 %v7918_v25, %v7665_v33 }
 0x8a1   : >> { %v8220_v36 = vpop.f32.mrf.mxu0 }
 0x8a2   : >> { %8399 = vst.msk [vmem:[%s14232_s12 + $0x54] sm:$0xf] %vm8377_vm0, %v8363_v12  ;;  %v8265_v50 = vadd.f32 %v8218_v39, %v7965_v1 }
 0x8a4   : >> { %v8300_v4 = vadd.f32 %v14226_v21, %v8265_v50 }
 0x8a5   : >> { %v7620_v9 = vpop.f32.mrf.mxu2 }
 0x8a6   : >> { %v8332_v42 = vmax.f32 %v8300_v4, 0.0  ;;  %v7666_v31 = vadd.f32 %v7620_v9, %v7366_v59  ;;  %v7920_v57 = vpop.f32.mrf.mxu3  ;;  %v7323_v6 = vpop.f32.mrf.mxu1 }
 0x8a7   : >> { %v7367_v43 = vadd.f32 %v7323_v6, %v14169_v60 }
 0x8a8   : >> { %v8364_v53 = vpack.c.bf16 %v8332_v42, %v8332_v42  ;;  %v7966_v35 = vadd.f32 %v7920_v57, %v7666_v31 }
 0x8a9   : >> { %v8223_v23 = vpop.f32.mrf.mxu0 }
 0x8aa   : >> { %8400 = vst.msk [vmem:[%s14232_s12 + $0x58] sm:$0xf] %vm8377_vm0, %v8364_v53  ;;  %v8266_v26 = vadd.f32 %v8220_v36, %v7966_v35 }
 0x8ac   : >> { %v8301_v27 = vadd.f32 %v14226_v21, %v8266_v26 }
 0x8ad   : >> { %v7623_v51 = vpop.f32.mrf.mxu2 }
 0x8ae   : >> { %v8333_v58 = vmax.f32 %v8301_v27, 0.0  ;;  %v7667_v16 = vadd.f32 %v7623_v51, %v7367_v43  ;;  %v7923_v56 = vpop.f32.mrf.mxu3  ;;  %v7325_v18 = vpop.f32.mrf.mxu1 }
 0x8af   : >> { %v7368_v30 = vadd.f32 %v7325_v18, %v14178_v40 }
 0x8b0   : >> { %v8365_v11 = vpack.c.bf16 %v8333_v58, %v8333_v58  ;;  %v7967_v32 = vadd.f32 %v7923_v56, %v7667_v16 }
 0x8b1   : >> { %v8225_v10 = vpop.f32.mrf.mxu0 }
 0x8b2   : >> { %8401 = vst.msk [vmem:[%s14232_s12 + $0x5c] sm:$0xf] %vm8377_vm0, %v8365_v11  ;;  %v8267_v61 = vadd.f32 %v8223_v23, %v7967_v32 }
 0x8b4   : >> { %v8302_v49 = vadd.f32 %v14226_v21, %v8267_v61 }
 0x8b5   : >> { %v7625_v54 = vpop.f32.mrf.mxu2 }
 0x8b6   : >> { %v8334_v20 = vmax.f32 %v8302_v49, 0.0  ;;  %v7668_v19 = vadd.f32 %v7625_v54, %v7368_v30  ;;  %v7925_v60 = vpop.f32.mrf.mxu3  ;;  %v7328_v7 = vpop.f32.mrf.mxu1 }
 0x8b7   : >> { %v7369_v47 = vadd.f32 %v7328_v7, %v14183_v48 }
 0x8b8   : >> { %v8366_v13 = vpack.c.bf16 %v8334_v20, %v8334_v20  ;;  %v7968_v14 = vadd.f32 %v7925_v60, %v7668_v19 }
 0x8b9   : >> { %v8228_v44 = vpop.f32.mrf.mxu0 }
 0x8ba   : >> { %8402 = vst.msk [vmem:[%s14232_s12 + $0x60] sm:$0xf] %vm8377_vm0, %v8366_v13  ;;  %v8268_v0 = vadd.f32 %v8225_v10, %v7968_v14 }
 0x8bc   : >> { %v8303_v45 = vadd.f32 %v14226_v21, %v8268_v0 }
 0x8bd   : >> { %v7628_v39 = vpop.f32.mrf.mxu2 }
 0x8be   : >> { %v8335_v34 = vmax.f32 %v8303_v45, 0.0  ;;  %v7669_v5 = vadd.f32 %v7628_v39, %v7369_v47  ;;  %v7928_v40 = vpop.f32.mrf.mxu3  ;;  %v7330_v22 = vpop.f32.mrf.mxu1 }
 0x8bf   : >> { %v7370_v12 = vadd.f32 %v7330_v22, %v14192_v62 }
 0x8c0   : >> { %v8367_v38 = vpack.c.bf16 %v8335_v34, %v8335_v34  ;;  %v7969_v37 = vadd.f32 %v7928_v40, %v7669_v5 }
 0x8c1   : >> { %v8230_v33 = vpop.f32.mrf.mxu0 }
 0x8c2   : >> { %8403 = vst.msk [vmem:[%s14232_s12 + $0x64] sm:$0xf] %vm8377_vm0, %v8367_v38  ;;  %v8269_v25 = vadd.f32 %v8228_v44, %v7969_v37 }
 0x8c4   : >> { %v8304_v41 = vadd.f32 %v14226_v21, %v8269_v25 }
 0x8c5   : >> { %v7630_v1 = vpop.f32.mrf.mxu2 }
 0x8c6   : >> { %v8336_v36 = vmax.f32 %v8304_v41, 0.0  ;;  %v7670_v50 = vadd.f32 %v7630_v1, %v7370_v12  ;;  %v7930_v48 = vpop.f32.mrf.mxu3  ;;  %v7333_v4 = vpop.f32.mrf.mxu1 }
 0x8c7   : >> { %v7371_v6 = vadd.f32 %v7333_v4, %v14197_v28 }
 0x8c8   : >> { %v8368_v59 = vpack.c.bf16 %v8336_v36, %v8336_v36  ;;  %v7970_v9 = vadd.f32 %v7930_v48, %v7670_v50 }
 0x8c9   : >> { %v8233_v31 = vpop.f32.mrf.mxu0 }
 0x8ca   : >> { %8404 = vst.msk [vmem:[%s14232_s12 + $0x68] sm:$0xf] %vm8377_vm0, %v8368_v59  ;;  %v8270_v42 = vadd.f32 %v8230_v33, %v7970_v9 }
 0x8cc   : >> { %v8305_v57 = vadd.f32 %v14226_v21, %v8270_v42 }
 0x8cd   : >> { %v7633_v53 = vpop.f32.mrf.mxu2 }
 0x8ce   : >> { %v8337_v35 = vmax.f32 %v8305_v57, 0.0  ;;  %v7671_v23 = vadd.f32 %v7633_v53, %v7371_v6  ;;  %v7933_v62 = vpop.f32.mrf.mxu3  ;;  %v7335_v26 = vpop.f32.mrf.mxu1 }
 0x8cf   : >> { %v7372_v16 = vadd.f32 %v7335_v26, %v14206_v55 }
 0x8d0   : >> { %v8369_v27 = vpack.c.bf16 %v8337_v35, %v8337_v35  ;;  %v7971_v43 = vadd.f32 %v7933_v62, %v7671_v23 }
 0x8d1   : >> { %v8235_v56 = vpop.f32.mrf.mxu0 }
 0x8d2   : >> { %8405 = vst.msk [vmem:[%s14232_s12 + $0x6c] sm:$0xf] %vm8377_vm0, %v8369_v27  ;;  %v8271_v51 = vadd.f32 %v8233_v31, %v7971_v43 }
 0x8d4   : >> { %v8306_v58 = vadd.f32 %v14226_v21, %v8271_v51 }
 0x8d5   : >> { %v7635_v18 = vpop.f32.mrf.mxu2 }
 0x8d6   : >> { %v8338_v11 = vmax.f32 %v8306_v58, 0.0  ;;  %v7672_v32 = vadd.f32 %v7635_v18, %v7372_v16  ;;  %v7935_v28 = vpop.f32.mrf.mxu3  ;;  %v7338_v10 = vpop.f32.mrf.mxu1 }
 0x8d7   : >> { %v7373_v20 = vadd.f32 %v7338_v10, %v14211_v29 }
 0x8d8   : >> { %v8370_v61 = vpack.c.bf16 %v8338_v11, %v8338_v11  ;;  %v7972_v49 = vadd.f32 %v7935_v28, %v7672_v32 }
 0x8d9   : >> { %v8238_v13 = vpop.f32.mrf.mxu0 }
 0x8da   : >> { %8406 = vst.msk [vmem:[%s14232_s12 + $0x70] sm:$0xf] %vm8377_vm0, %v8370_v61  ;;  %v8272_v30 = vadd.f32 %v8235_v56, %v7972_v49 }
 0x8dc   : >> { %v8307_v54 = vadd.f32 %v14226_v21, %v8272_v30 }
 0x8dd   : >> { %v7638_v19 = vpop.f32.mrf.mxu2 }
 0x8de   : >> { %v8339_v60 = vmax.f32 %v8307_v54, 0.0  ;;  %v7673_v7 = vadd.f32 %v7638_v19, %v7373_v20  ;;  %v7938_v55 = vpop.f32.mrf.mxu3  ;;  %v7340_v0 = vpop.f32.mrf.mxu1 }
 0x8df   : >> { %v7374_v39 = vadd.f32 %v7340_v0, %v14220_v46 }
 0x8e0   : >> { %v8371_v14 = vpack.c.bf16 %v8339_v60, %v8339_v60  ;;  %v7973_v44 = vadd.f32 %v7938_v55, %v7673_v7 }
 0x8e1   : >> { %v8240_v37 = vpop.f32.mrf.mxu0 }
 0x8e2   : >> { %8407 = vst.msk [vmem:[%s14232_s12 + $0x74] sm:$0xf] %vm8377_vm0, %v8371_v14  ;;  %v8273_v45 = vadd.f32 %v8238_v13, %v7973_v44 }
 0x8e4   : >> { %v8308_v47 = vadd.f32 %v14226_v21, %v8273_v45 }
 0x8e5   : >> { %v7640_v34 = vpop.f32.mrf.mxu2 }
 0x8e6   : >> { %v8340_v5 = vmax.f32 %v8308_v47, 0.0  ;;  %v7674_v29 = vadd.f32 %v7640_v34, %v7374_v39  ;;  %v7940_v40 = vpop.f32.mrf.mxu3 }
 0x8e8   : >> { %v8372_v22 = vpack.c.bf16 %v8340_v5, %v8340_v5  ;;  %v7974_v38 = vadd.f32 %v7940_v40, %v7674_v29 }
 0x8ea   : >> { %8408 = vst.msk [vmem:[%s14232_s12 + $0x78] sm:$0xf] %vm8377_vm0, %v8372_v22  ;;  %v8274_v33 = vadd.f32 %v8240_v37, %v7974_v38 }
 0x8ec   : >> { %v8309_v25 = vadd.f32 %v14226_v21, %v8274_v33 }
 0x8ee   : >> { %v8341_v41 = vmax.f32 %v8309_v25, 0.0 }
 0x8f0   : >> { %v8373_v12 = vpack.c.bf16 %v8341_v41, %v8341_v41 }
 0x8f2   : >> { %8409 = vst.msk [vmem:[%s14232_s12 + $0x7c] sm:$0xf] %vm8377_vm0, %v8373_v12 }
 0x8f3 PF: >> { %s1334_s30 = sadd.s32 1, %s11160_s30  }
 0x8f4   : >> { %p1331_p1 = scmp.ge.s32.totalorder %s1334_s30, 17  }
 0x8f6   : > { %1333 = sbr.rel (!%p1331_p1) target bundleno = 330 (0x14a), region = 154 }
 0x8fb PF: > { %s23_s13 = sadd.s32 1, %s11156_s13  }
 0x8fc   : > { %p20_p2 = scmp.ge.s32.totalorder %s23_s13, 4  }
 0x8fe   :  { %22 = sbr.rel (!%p20_p2) target bundleno = 4 (0x4), region = 165 }

</bundles_post_ra>
